<compile_context>
chip_gen: v7x
topology: tpu7x:2x2x1
jax: 0.10.0
libtpu: 0.0.40
codegen_flags: <defaults>
</compile_context>

<pallas_src>
import functools

import jax
import jax.numpy as jnp
from jax.experimental import pallas as pl
from jax.experimental.pallas import tpu as pltpu


_VMEM_LIMIT = 64 * 1024 * 1024


def _row_tile(rows, mult=8, cap=256):
    """Largest multiple-of-`mult` divisor of `rows` that is <= cap (else rows)."""
    best = rows
    t = mult
    while t <= min(cap, rows):
        if rows % t == 0:
            best = t
        t += mult
    return best


# ----------------------------------------------------------------------------
# Kernel 1: GroupLayerNorm + QKV projection + attention + out-proj + residual
# ----------------------------------------------------------------------------
def _block_attn_kernel(x_ref, g_ref, b_ref, wqkv_ref, wo_ref, bo_ref, o_ref,
                       merged_ref, *, groups, heads, dim_head, scale, causal,
                       eps, bcast_input):
    x = x_ref[0]                               # (N, Cx) f32
    n = x.shape[0]
    inner = groups * heads * dim_head
    heads_total = groups * heads
    d = wqkv_ref.shape[0] // groups
    c_out = wo_ref.shape[1]

    # --- GroupLayerNorm + dense QKV projection (accumulated over channel groups)
    qkv = jnp.zeros((n, 3 * inner), jnp.float32)
    if bcast_input:
        # First multistream block: every stream group sees the same (N, dim)
        # input, so normalize once and apply per-group gamma/beta only.
        mean = jnp.mean(x, axis=-1, keepdims=True)
        var = jnp.mean(jnp.square(x - mean), axis=-1, keepdims=True)
        xbase = (x - mean) * (1.0 / (jnp.sqrt(var) + eps))
    for g in range(groups):
        sl = slice(g * d, (g + 1) * d)
        if bcast_input:
            xg = xbase * g_ref[:, sl] + b_ref[:, sl]
        else:
            xg = x[:, sl]
            mean = jnp.mean(xg, axis=-1, keepdims=True)
            var = jnp.mean(jnp.square(xg - mean), axis=-1, keepdims=True)
            xg = (xg - mean) * (1.0 / (jnp.sqrt(var) + eps)) * g_ref[:, sl] + b_ref[:, sl]
        qkv = qkv + jnp.dot(xg.astype(jnp.bfloat16), wqkv_ref[sl, :],
                            preferred_element_type=jnp.float32)

    # --- Per-head attention; causal mask hoisted out of the head loop.
    if causal:
        row = jax.lax.broadcasted_iota(jnp.int32, (n, n), 0)
        col = jax.lax.broadcasted_iota(jnp.int32, (n, n), 1)
        causal_mask = col > row
    neg = -jnp.finfo(jnp.float32).max
    # TODO(synk): with production dim_head (>=64) batch all heads into one
    # leading-batch dot_general; at dim_head=8 the (N,H,dh) relayout is costly
    # and the MXU is K-starved either way, so lane-sliced heads are kept.
    for h in range(heads_total):
        hs = slice(h * dim_head, (h + 1) * dim_head)
        qh = qkv[:, hs].astype(jnp.bfloat16)
        kh = qkv[:, inner + h * dim_head:inner + (h + 1) * dim_head].astype(jnp.bfloat16)
        vh = qkv[:, 2 * inner + h * dim_head:2 * inner + (h + 1) * dim_head].astype(jnp.bfloat16)
        sim = jax.lax.dot_general(qh, kh, (((1,), (1,)), ((), ())),
                                  preferred_element_type=jnp.float32) * scale
        if causal:
            sim = jnp.where(causal_mask, neg, sim)
        sim = sim - jnp.max(sim, axis=-1, keepdims=True)
        p = jnp.exp(sim)
        attn = p * pl.reciprocal(jnp.sum(p, axis=-1, keepdims=True), approx=True)
        # Stash the head output; no lane-axis concatenation.
        merged_ref[:, hs] = jnp.dot(attn.astype(jnp.bfloat16), vh,
                                    preferred_element_type=jnp.float32)

    # --- Single K=inner output projection + bias.
    out = jnp.dot(merged_ref[...].astype(jnp.bfloat16), wo_ref[...],
                  preferred_element_type=jnp.float32) + bo_ref[...]

    # --- Residual (broadcast across stream groups for the first ms block).
    if bcast_input:
        dres = c_out // groups
        for g in range(groups):
            sl = slice(g * dres, (g + 1) * dres)
            o_ref[0, :, sl] = (out[:, sl] + x).astype(o_ref.dtype)
    else:
        o_ref[0] = (out + x).astype(o_ref.dtype)


def block_attn(x, p, *, groups, heads, dim_head, causal, bcast_input=False,
               eps=1e-5):
    """PreNorm(GroupLayerNorm)+Attention+residual.  x: (B, N, Cx) f32."""
    B, N, Cx = x.shape
    wqkv, wo, bo = p["wqkv"], p["wo"], p["bo"]
    Cw = wqkv.shape[0]
    C = wo.shape[1]
    inner = groups * heads * dim_head
    kernel = functools.partial(_block_attn_kernel, groups=groups, heads=heads,
                               dim_head=dim_head, scale=dim_head ** (-0.5),
                               causal=causal, eps=eps, bcast_input=bcast_input)
    # TODO(synk): add a KV-tile "arbitrary" grid axis with online softmax for
    # long sequences; whole-sequence blocks are fine at these sizes.
    return pl.pallas_call(
        kernel,
        out_shape=jax.ShapeDtypeStruct((B, N, C), jnp.float32),
        grid=(B,),
        in_specs=[
            pl.BlockSpec((1, N, Cx), lambda b: (b, 0, 0)),
            pl.BlockSpec((1, Cw), lambda b: (0, 0)),
            pl.BlockSpec((1, Cw), lambda b: (0, 0)),
            pl.BlockSpec((Cw, 3 * inner), lambda b: (0, 0)),
            pl.BlockSpec((inner, C), lambda b: (0, 0)),
            pl.BlockSpec((1, C), lambda b: (0, 0)),
        ],
        out_specs=pl.BlockSpec((1, N, C), lambda b: (b, 0, 0)),
        scratch_shapes=[pltpu.VMEM((N, inner), jnp.float32)],
        compiler_params=pltpu.CompilerParams(
            dimension_semantics=("parallel",), vmem_limit_bytes=_VMEM_LIMIT),
    )(x, p["norm1_g"].reshape(1, Cw), p["norm1_b"].reshape(1, Cw),
      wqkv, wo, bo.reshape(1, C))


# ----------------------------------------------------------------------------
# Kernel 2: GroupLayerNorm + grouped feed-forward (GELU) + residual
# ----------------------------------------------------------------------------
def _ln_ff_kernel(x_ref, g_ref, b_ref, w1_ref, b1_ref, w2_ref, b2_ref, o_ref,
                  *, groups, eps):
    x = x_ref[...]                             # (rt, C) f32
    c = x.shape[-1]
    d = c // groups
    for g in range(groups):
        sl = slice(g * d, (g + 1) * d)
        xg = x[:, sl]
        mean = jnp.mean(xg, axis=-1, keepdims=True)
        var = jnp.mean(jnp.square(xg - mean), axis=-1, keepdims=True)
        xn = (xg - mean) * (1.0 / (jnp.sqrt(var) + eps)) * g_ref[:, sl] + b_ref[:, sl]
        h = jnp.dot(xn.astype(jnp.bfloat16), w1_ref[g],
                    preferred_element_type=jnp.float32) + b1_ref[g]
        # TODO(synk): torch.nn.GELU() is the exact erf GELU; tanh approximation
        # is used (erf has no guaranteed Mosaic lowering).
        h = jax.nn.gelu(h, approximate=True)
        y = jnp.dot(h.astype(jnp.bfloat16), w2_ref[g],
                    preferred_element_type=jnp.float32) + b2_ref[g]
        # Direct per-group store (residual uses the pre-norm activation).
        o_ref[:, sl] = (y + xg).astype(o_ref.dtype)


def ln_ff(x, gamma, beta, w1, b1, w2, b2, *, groups, eps=1e-5):
    B, N, C = x.shape
    rows = B * N
    D = C // groups
    Hd = w1.shape[2]
    rt = _row_tile(rows, mult=8)
    kernel = functools.partial(_ln_ff_kernel, groups=groups, eps=eps)
    out = pl.pallas_call(
        kernel,
        out_shape=jax.ShapeDtypeStruct((rows, C), jnp.float32),
        grid=(rows // rt,),
        in_specs=[
            pl.BlockSpec((rt, C), lambda r: (r, 0)),
            pl.BlockSpec((1, C), lambda r: (0, 0)),
            pl.BlockSpec((1, C), lambda r: (0, 0)),
            pl.BlockSpec((groups, D, Hd), lambda r: (0, 0, 0)),
            pl.BlockSpec((groups, 1, Hd), lambda r: (0, 0, 0)),
            pl.BlockSpec((groups, Hd, D), lambda r: (0, 0, 0)),
            pl.BlockSpec((groups, 1, D), lambda r: (0, 0, 0)),
        ],
        out_specs=pl.BlockSpec((rt, C), lambda r: (r, 0)),
        compiler_params=pltpu.CompilerParams(
            dimension_semantics=("parallel",), vmem_limit_bytes=_VMEM_LIMIT),
    )(x.reshape(rows, C), gamma.reshape(1, C), beta.reshape(1, C),
      w1, b1.reshape(groups, 1, Hd), w2, b2.reshape(groups, 1, D))
    return out.reshape(B, N, C)


# ----------------------------------------------------------------------------
# Kernel 3: attention pooling over layer tokens (multistream only)
# ----------------------------------------------------------------------------
def _attn_pool_kernel(lt_ref, wkv_ref, qmat_ref, emat_ref, wo_ref, bo_ref,
                      o_ref, *, heads, dim_head, s_cat):
    inner = heads * dim_head
    rt = lt_ref.shape[1]
    sims, vals = [], []
    for j in range(s_cat):                     # s_cat is small and static
        ltj = lt_ref[j]                        # (rt, dim) f32
        kvj = jnp.dot(ltj.astype(jnp.bfloat16), wkv_ref[...],
                      preferred_element_type=jnp.float32)          # (rt, 2*inner)
        sims.append(jnp.dot(kvj[:, :inner].astype(jnp.bfloat16), qmat_ref[...],
                            preferred_element_type=jnp.float32))   # (rt, heads)
        vals.append(kvj[:, inner:])
    m = sims[0]
    for s in sims[1:]:
        m = jnp.maximum(m, s)
    ps = [jnp.exp(s - m) for s in sims]
    denom = ps[0]
    for p in ps[1:]:
        denom = denom + p
    inv = pl.reciprocal(denom, approx=True)                        # (rt, heads)
    ctx = jnp.zeros((rt, inner), jnp.float32)
    for j in range(s_cat):
        aj = jnp.dot((ps[j] * inv).astype(jnp.bfloat16), emat_ref[...],
                     preferred_element_type=jnp.float32)           # (rt, inner)
        ctx = ctx + aj * vals[j]
    out = jnp.dot(ctx.astype(jnp.bfloat16), wo_ref[...],
                  preferred_element_type=jnp.float32) + bo_ref[...]
    o_ref[...] = out.astype(o_ref.dtype)


def attn_pool(layer_tokens, q_vec, wkv, wo, bo, *, heads, dim_head):
    """layer_tokens: (s_cat, rows, dim) f32; q_vec: (inner,) already scaled."""
    s_cat, rows, dim = layer_tokens.shape
    inner = heads * dim_head
    rt = _row_tile(rows, mult=8)
    head_of = jnp.arange(inner, dtype=jnp.int32) // dim_head
    sel = (head_of[:, None] == jnp.arange(heads, dtype=jnp.int32)[None, :]
           ).astype(jnp.float32)                                   # (inner, heads)
    qmat = (q_vec[:, None] * sel).astype(jnp.bfloat16)             # (inner, heads)
    emat = sel.T.astype(jnp.bfloat16)                              # (heads, inner)
    kernel = functools.partial(_attn_pool_kernel, heads=heads,
                               dim_head=dim_head, s_cat=s_cat)
    return pl.pallas_call(
        kernel,
        out_shape=jax.ShapeDtypeStruct((rows, dim), jnp.float32),
        grid=(rows // rt,),
        in_specs=[
            pl.BlockSpec((s_cat, rt, dim), lambda r: (0, r, 0)),
            pl.BlockSpec((dim, 2 * inner), lambda r: (0, 0)),
            pl.BlockSpec((inner, heads), lambda r: (0, 0)),
            pl.BlockSpec((heads, inner), lambda r: (0, 0)),
            pl.BlockSpec((inner, dim), lambda r: (0, 0)),
            pl.BlockSpec((1, dim), lambda r: (0, 0)),
        ],
        out_specs=pl.BlockSpec((rt, dim), lambda r: (r, 0)),
        compiler_params=pltpu.CompilerParams(
            dimension_semantics=("parallel",), vmem_limit_bytes=_VMEM_LIMIT),
    )(layer_tokens, wkv, qmat, emat, wo, bo.reshape(1, dim))


# ----------------------------------------------------------------------------
# Kernel 4: final LayerNorm + logits projection
# ----------------------------------------------------------------------------
def _ln_linear_kernel(x_ref, g_ref, b_ref, w_ref, wb_ref, o_ref, *, eps):
    x = x_ref[...]                             # (rt, D) f32
    mean = jnp.mean(x, axis=-1, keepdims=True)
    var = jnp.mean(jnp.square(x - mean), axis=-1, keepdims=True)
    xn = (x - mean) * jax.lax.rsqrt(var + eps)
    xn = xn * g_ref[...] + b_ref[...]
    out = jnp.dot(xn.astype(jnp.bfloat16), w_ref[...],
                  preferred_element_type=jnp.float32) + wb_ref[...]
    o_ref[...] = out.astype(o_ref.dtype)


def ln_linear(x, gamma, beta, w, bias, eps=1e-5):
    B, N, D = x.shape
    rows = B * N
    V = w.shape[1]
    rt = _row_tile(rows, mult=8)
    # TODO(synk): for large vocab, additionally tile over 128-multiple vocab
    # columns with a K-reduction accumulator.
    out = pl.pallas_call(
        functools.partial(_ln_linear_kernel, eps=eps),
        out_shape=jax.ShapeDtypeStruct((rows, V), jnp.float32),
        grid=(rows // rt,),
        in_specs=[
            pl.BlockSpec((rt, D), lambda r: (r, 0)),
            pl.BlockSpec((1, D), lambda r: (0, 0)),
            pl.BlockSpec((1, D), lambda r: (0, 0)),
            pl.BlockSpec((D, V), lambda r: (0, 0)),
            pl.BlockSpec((1, V), lambda r: (0, 0)),
        ],
        out_specs=pl.BlockSpec((rt, V), lambda r: (r, 0)),
        compiler_params=pltpu.CompilerParams(
            dimension_semantics=("parallel",), vmem_limit_bytes=_VMEM_LIMIT),
    )(x.reshape(rows, D), gamma.reshape(1, D), beta.reshape(1, D),
      w, bias.reshape(1, V))
    return out.reshape(B, N, V)


# ----------------------------------------------------------------------------
# Module forward (thin JAX glue)
# ----------------------------------------------------------------------------
def transformer_block_fwd(x, p, *, heads, dim_head, groups, causal,
                          bcast_input=False):
    x = block_attn(x, p, groups=groups, heads=heads, dim_head=dim_head,
                   causal=causal, bcast_input=bcast_input)
    x = ln_ff(x, p["norm2_g"], p["norm2_b"], p["ff_w1"], p["ff_b1"],
              p["ff_w2"], p["ff_b2"], groups=groups)
    return x


def forward(params, tokens, cfg):
    # TODO(synk): optional key-padding `mask` branch not implemented -- forward
    # matches the reference default mask=None.
    dim, heads, dim_head = cfg["dim"], cfg["heads"], cfg["dim_head"]
    ns, causal = cfg["num_streams"], cfg["causal"]
    bsz, n = tokens.shape

    # Embedding lookup + positions (channels-last; gather stays in XLA).
    x = params["token_emb"][tokens] + params["pos_emb"][:n][None]

    x = transformer_block_fwd(x, params["pre_block"], heads=heads,
                              dim_head=dim_head, groups=1, causal=causal)
    layers_out = [x]

    # No jnp.tile: the first multistream block broadcasts the single-stream
    # input across groups inside the kernel (bcast_input=True).
    for idx, blk in enumerate(params["layers"]):
        bcast = (ns > 1) and (idx == 0)
        x = transformer_block_fwd(x, blk, heads=heads, dim_head=dim_head,
                                  groups=ns, causal=causal, bcast_input=bcast)
        layers_out.append(x)

    if ns > 1:
        # 'b (s d) n -> (b n) d s' + cat  ==  stack per-(layer,stream) tokens.
        slabs = []
        for t in layers_out:
            s_i = t.shape[2] // dim
            for j in range(s_i):
                slabs.append(t[:, :, j * dim:(j + 1) * dim].reshape(1, bsz * n, dim))
        layer_tokens = jnp.concatenate(slabs, axis=0)      # (s_cat, b*n, dim)

        pp = params["attn_pool"]
        # Query projection done once (same learned query for every row).
        q_vec = (params["query"] @ pp["wq"]) * (dim_head ** (-0.5))   # (inner,)
        x = attn_pool(layer_tokens, q_vec, pp["wkv"], pp["wo"], pp["bo"],
                      heads=heads, dim_head=dim_head)
        x = x.reshape(bsz, n, dim)

    x = transformer_block_fwd(x, params["post_block"], heads=heads,
                              dim_head=dim_head, groups=1, causal=causal)

    return ln_linear(x, params["ln_g"], params["ln_b"],
                     params["w_logits"], params["b_logits"])


# ----------------------------------------------------------------------------
# Deterministic parameter initialization (synthetic weights, pre-cast / fused)
# ----------------------------------------------------------------------------
def _nrm(key, shape, scale=0.02):
    return scale * jax.random.normal(key, shape, dtype=jnp.float32)


def init_block(key, dim, dim_head, heads, ff_mult, groups):
    k = jax.random.split(key, 8)
    C = dim * groups
    inner = dim_head * heads * groups
    hidden = dim * ff_mult
    return dict(
        norm1_g=jnp.ones((C,), jnp.float32),
        norm1_b=jnp.zeros((C,), jnp.float32),
        # wq | wk | wv pre-concatenated and pre-cast to bf16.
        wqkv=_nrm(k[0], (C, 3 * inner)).astype(jnp.bfloat16),
        wo=_nrm(k[1], (inner, C)).astype(jnp.bfloat16),
        bo=_nrm(k[2], (C,)),
        norm2_g=jnp.ones((C,), jnp.float32),
        norm2_b=jnp.zeros((C,), jnp.float32),
        ff_w1=_nrm(k[3], (groups, dim, hidden)).astype(jnp.bfloat16),
        ff_b1=_nrm(k[4], (groups, hidden)),
        ff_w2=_nrm(k[5], (groups, hidden, dim)).astype(jnp.bfloat16),
        ff_b2=_nrm(k[6], (groups, dim)),
    )


def init_pool(key, dim, dim_head, heads):
    k = jax.random.split(key, 4)
    inner = dim_head * heads
    return dict(
        wq=_nrm(k[0], (dim, inner)),                          # f32 (tiny, XLA)
        wkv=_nrm(k[1], (dim, 2 * inner)).astype(jnp.bfloat16),
        wo=_nrm(k[2], (inner, dim)).astype(jnp.bfloat16),
        bo=_nrm(k[3], (dim,)),
    )


def init_params(key, cfg):
    dim, depth = cfg["dim"], cfg["depth"]
    num_tokens, heads = cfg["num_tokens"], cfg["heads"]
    dim_head, ff_mult, ns = cfg["dim_head"], cfg["ff_mult"], cfg["num_streams"]
    keys = jax.random.split(key, depth + 8)
    params = dict(
        token_emb=jax.random.normal(keys[0], (num_tokens, dim), jnp.float32),
        pos_emb=jax.random.normal(keys[1], (cfg["max_seq_len"], dim), jnp.float32),
        pre_block=init_block(keys[2], dim, dim_head, heads, ff_mult, 1),
        post_block=init_block(keys[3], dim, dim_head, heads, ff_mult, 1),
        layers=[init_block(keys[4 + i], dim, dim_head, heads, ff_mult, ns)
                for i in range(depth)],
        ln_g=jnp.ones((dim,), jnp.float32),
        ln_b=jnp.zeros((dim,), jnp.float32),
        w_logits=_nrm(keys[4 + depth], (dim, num_tokens)).astype(jnp.bfloat16),
        b_logits=jnp.zeros((num_tokens,), jnp.float32),
    )
    if ns > 1:
        params["query"] = jax.random.normal(keys[5 + depth], (dim,), jnp.float32)
        params["attn_pool"] = init_pool(keys[6 + depth], dim, dim_head, heads)
    return params


# ----------------------------------------------------------------------------
if __name__ == "__main__":
    cfg = dict(dim=32, depth=2, num_tokens=64, max_seq_len=16, causal=False,
               dim_head=8, heads=4, ff_mult=2, num_streams=2)

    key = jax.random.PRNGKey(0)
    pkey, tkey = jax.random.split(key)
    params = init_params(pkey, cfg)

    batch, seq = 2, 8
    tokens = jax.random.randint(tkey, (batch, seq), 0, cfg["num_tokens"],
                                dtype=jnp.int32)

    fwd = jax.jit(functools.partial(forward, cfg=cfg))
    logits = fwd(params, tokens)
    jax.block_until_ready(logits)

    assert logits.shape == (batch, seq, cfg["num_tokens"])
    assert bool(jnp.all(jnp.isfinite(logits)))
    print("KERNEL_OK")
</pallas_src>

<mosaic_0001>
module attributes {stable_mosaic.version = 11 : i64} {
  func.func @_block_attn_kernel(%arg0: i32, %arg1: memref<1x8x32xf32, #tpu.memory_space<vmem>>, %arg2: memref<1x32xf32, #tpu.memory_space<vmem>>, %arg3: memref<1x32xf32, #tpu.memory_space<vmem>>, %arg4: memref<32x96xbf16, #tpu.memory_space<vmem>>, %arg5: memref<32x32xbf16, #tpu.memory_space<vmem>>, %arg6: memref<1x32xf32, #tpu.memory_space<vmem>>, %arg7: memref<1x8x32xf32, #tpu.memory_space<vmem>>, %arg8: memref<8x32xf32, #tpu.memory_space<vmem>>) attributes {dimension_semantics = [#tpu.dimension_semantics<parallel>], iteration_bounds = array<i64: 2>, scalar_prefetch = 0 : i64, scratch_operands = 1 : i64, tpu.core_type = #tpu.core_type<tc>, window_params = [{transform_indices = @transform_0, window_bounds = array<i64: 1, 8, 32>}, {pipeline_mode = #tpu.pipeline_mode<synchronous>, transform_indices = @transform_1, window_bounds = array<i64: 1, 32>}, {pipeline_mode = #tpu.pipeline_mode<synchronous>, transform_indices = @transform_2, window_bounds = array<i64: 1, 32>}, {pipeline_mode = #tpu.pipeline_mode<synchronous>, transform_indices = @transform_3, window_bounds = array<i64: 32, 96>}, {pipeline_mode = #tpu.pipeline_mode<synchronous>, transform_indices = @transform_4, window_bounds = array<i64: 32, 32>}, {pipeline_mode = #tpu.pipeline_mode<synchronous>, transform_indices = @transform_5, window_bounds = array<i64: 1, 32>}, {transform_indices = @transform_6, window_bounds = array<i64: 1, 8, 32>}]} {
    %c0 = arith.constant 0 : index
    %c0_0 = arith.constant 0 : index
    %c0_1 = arith.constant 0 : index
    %0 = vector.load %arg1[%c0, %c0_0, %c0_1] : memref<1x8x32xf32, #tpu.memory_space<vmem>>, vector<1x8x32xf32>
    %1 = vector.shape_cast %0 : vector<1x8x32xf32> to vector<8x32xf32>
    %cst = arith.constant 0.000000e+00 : f32
    %2 = vector.broadcast %cst : f32 to vector<8x96xf32>
    %cst_2 = arith.constant dense<0.000000e+00> : vector<8xf32>
    %3 = vector.multi_reduction <add>, %1, %cst_2 [1] : vector<8x32xf32> to vector<8xf32>
    %4 = vector.shape_cast %3 : vector<8xf32> to vector<8x1xf32>
    %cst_3 = arith.constant 3.200000e+01 : f32
    %5 = vector.broadcast %cst_3 : f32 to vector<8x1xf32>
    %6 = arith.divf %4, %5 : vector<8x1xf32>
    %7 = vector.broadcast %6 : vector<8x1xf32> to vector<8x32xf32>
    %8 = arith.subf %1, %7 : vector<8x32xf32>
    %9 = arith.mulf %8, %8 : vector<8x32xf32>
    %cst_4 = arith.constant dense<0.000000e+00> : vector<8xf32>
    %10 = vector.multi_reduction <add>, %9, %cst_4 [1] : vector<8x32xf32> to vector<8xf32>
    %11 = vector.shape_cast %10 : vector<8xf32> to vector<8x1xf32>
    %cst_5 = arith.constant 3.200000e+01 : f32
    %12 = vector.broadcast %cst_5 : f32 to vector<8x1xf32>
    %13 = arith.divf %11, %12 : vector<8x1xf32>
    %14 = vector.broadcast %6 : vector<8x1xf32> to vector<8x32xf32>
    %15 = arith.subf %1, %14 : vector<8x32xf32>
    %16 = math.sqrt %13 : vector<8x1xf32>
    %cst_6 = arith.constant 9.99999974E-6 : f32
    %17 = vector.broadcast %cst_6 : f32 to vector<8x1xf32>
    %18 = arith.addf %16, %17 : vector<8x1xf32>
    %cst_7 = arith.constant 1.000000e+00 : f32
    %19 = vector.broadcast %cst_7 : f32 to vector<8x1xf32>
    %20 = arith.divf %19, %18 : vector<8x1xf32>
    %21 = vector.broadcast %20 : vector<8x1xf32> to vector<8x32xf32>
    %22 = arith.mulf %15, %21 : vector<8x32xf32>
    %c0_8 = arith.constant 0 : index
    %c0_9 = arith.constant 0 : index
    %23 = vector.load %arg2[%c0_8, %c0_9] : memref<1x32xf32, #tpu.memory_space<vmem>>, vector<1x32xf32>
    %24 = vector.broadcast %23 : vector<1x32xf32> to vector<8x32xf32>
    %25 = arith.mulf %22, %24 : vector<8x32xf32>
    %c0_10 = arith.constant 0 : index
    %c0_11 = arith.constant 0 : index
    %26 = vector.load %arg3[%c0_10, %c0_11] : memref<1x32xf32, #tpu.memory_space<vmem>>, vector<1x32xf32>
    %27 = vector.broadcast %26 : vector<1x32xf32> to vector<8x32xf32>
    %28 = arith.addf %25, %27 : vector<8x32xf32>
    %29 = arith.truncf %28 : vector<8x32xf32> to vector<8x32xbf16>
    %c0_12 = arith.constant 0 : index
    %c0_13 = arith.constant 0 : index
    %30 = vector.load %arg4[%c0_12, %c0_13] : memref<32x96xbf16, #tpu.memory_space<vmem>>, vector<32x96xbf16>
    %cst_14 = arith.constant dense<0.000000e+00> : vector<8x96xf32>
    %31 = tpu.matmul %29, %30, %cst_14 {dimension_numbers = #tpu.dot_dimension_numbers<[1], [0], [0], [1], [0, 0, 1, 1], [], []>} : vector<8x32xbf16>, vector<32x96xbf16>, vector<8x96xf32> -> vector<8x96xf32>
    %32 = arith.addf %2, %31 : vector<8x96xf32>
    %33 = vector.extract_strided_slice %32 {offsets = [0, 0], sizes = [8, 8], strides = [1, 1]} : vector<8x96xf32> to vector<8x8xf32>
    %34 = arith.truncf %33 : vector<8x8xf32> to vector<8x8xbf16>
    %35 = vector.extract_strided_slice %32 {offsets = [0, 32], sizes = [8, 8], strides = [1, 1]} : vector<8x96xf32> to vector<8x8xf32>
    %36 = arith.truncf %35 : vector<8x8xf32> to vector<8x8xbf16>
    %37 = vector.extract_strided_slice %32 {offsets = [0, 64], sizes = [8, 8], strides = [1, 1]} : vector<8x96xf32> to vector<8x8xf32>
    %38 = arith.truncf %37 : vector<8x8xf32> to vector<8x8xbf16>
    %cst_15 = arith.constant dense<0.000000e+00> : vector<8x8xf32>
    %39 = tpu.matmul %34, %36, %cst_15 {dimension_numbers = #tpu.dot_dimension_numbers<[1], [1], [0], [0], [0, 0, 1, 0], [], []>} : vector<8x8xbf16>, vector<8x8xbf16>, vector<8x8xf32> -> vector<8x8xf32>
    %cst_16 = arith.constant 0.353553385 : f32
    %40 = vector.broadcast %cst_16 : f32 to vector<8x8xf32>
    %41 = arith.mulf %39, %40 : vector<8x8xf32>
    %cst_17 = arith.constant dense<0xFF800000> : vector<8xf32>
    %42 = vector.multi_reduction <maximumf>, %41, %cst_17 [1] : vector<8x8xf32> to vector<8xf32>
    %43 = vector.shape_cast %42 : vector<8xf32> to vector<8x1xf32>
    %44 = vector.broadcast %43 : vector<8x1xf32> to vector<8x8xf32>
    %45 = arith.subf %41, %44 : vector<8x8xf32>
    %46 = math.exp %45 : vector<8x8xf32>
    %cst_18 = arith.constant dense<0.000000e+00> : vector<8xf32>
    %47 = vector.multi_reduction <add>, %46, %cst_18 [1] : vector<8x8xf32> to vector<8xf32>
    %48 = vector.shape_cast %47 : vector<8xf32> to vector<8x1xf32>
    %49 = tpu.reciprocal %48 {approx = true} : vector<8x1xf32> -> vector<8x1xf32>
    %50 = vector.broadcast %49 : vector<8x1xf32> to vector<8x8xf32>
    %51 = arith.mulf %46, %50 : vector<8x8xf32>
    %52 = arith.truncf %51 : vector<8x8xf32> to vector<8x8xbf16>
    %cst_19 = arith.constant dense<0.000000e+00> : vector<8x8xf32>
    %53 = tpu.matmul %52, %38, %cst_19 {dimension_numbers = #tpu.dot_dimension_numbers<[1], [0], [0], [1], [0, 0, 1, 1], [], []>} : vector<8x8xbf16>, vector<8x8xbf16>, vector<8x8xf32> -> vector<8x8xf32>
    %c0_20 = arith.constant 0 : index
    %c0_21 = arith.constant 0 : index
    %54 = vector.load %arg8[%c0_20, %c0_21] : memref<8x32xf32, #tpu.memory_space<vmem>>, vector<8x8xf32>
    tpu.vector_store %arg8[%c0_20, %c0_21], %53 {strides = array<i32>} : memref<8x32xf32, #tpu.memory_space<vmem>>, vector<8x8xf32>,
    %55 = vector.extract_strided_slice %32 {offsets = [0, 8], sizes = [8, 8], strides = [1, 1]} : vector<8x96xf32> to vector<8x8xf32>
    %56 = arith.truncf %55 : vector<8x8xf32> to vector<8x8xbf16>
    %57 = vector.extract_strided_slice %32 {offsets = [0, 40], sizes = [8, 8], strides = [1, 1]} : vector<8x96xf32> to vector<8x8xf32>
    %58 = arith.truncf %57 : vector<8x8xf32> to vector<8x8xbf16>
    %59 = vector.extract_strided_slice %32 {offsets = [0, 72], sizes = [8, 8], strides = [1, 1]} : vector<8x96xf32> to vector<8x8xf32>
    %60 = arith.truncf %59 : vector<8x8xf32> to vector<8x8xbf16>
    %cst_22 = arith.constant dense<0.000000e+00> : vector<8x8xf32>
    %61 = tpu.matmul %56, %58, %cst_22 {dimension_numbers = #tpu.dot_dimension_numbers<[1], [1], [0], [0], [0, 0, 1, 0], [], []>} : vector<8x8xbf16>, vector<8x8xbf16>, vector<8x8xf32> -> vector<8x8xf32>
    %cst_23 = arith.constant 0.353553385 : f32
    %62 = vector.broadcast %cst_23 : f32 to vector<8x8xf32>
    %63 = arith.mulf %61, %62 : vector<8x8xf32>
    %cst_24 = arith.constant dense<0xFF800000> : vector<8xf32>
    %64 = vector.multi_reduction <maximumf>, %63, %cst_24 [1] : vector<8x8xf32> to vector<8xf32>
    %65 = vector.shape_cast %64 : vector<8xf32> to vector<8x1xf32>
    %66 = vector.broadcast %65 : vector<8x1xf32> to vector<8x8xf32>
    %67 = arith.subf %63, %66 : vector<8x8xf32>
    %68 = math.exp %67 : vector<8x8xf32>
    %cst_25 = arith.constant dense<0.000000e+00> : vector<8xf32>
    %69 = vector.multi_reduction <add>, %68, %cst_25 [1] : vector<8x8xf32> to vector<8xf32>
    %70 = vector.shape_cast %69 : vector<8xf32> to vector<8x1xf32>
    %71 = tpu.reciprocal %70 {approx = true} : vector<8x1xf32> -> vector<8x1xf32>
    %72 = vector.broadcast %71 : vector<8x1xf32> to vector<8x8xf32>
    %73 = arith.mulf %68, %72 : vector<8x8xf32>
    %74 = arith.truncf %73 : vector<8x8xf32> to vector<8x8xbf16>
    %cst_26 = arith.constant dense<0.000000e+00> : vector<8x8xf32>
    %75 = tpu.matmul %74, %60, %cst_26 {dimension_numbers = #tpu.dot_dimension_numbers<[1], [0], [0], [1], [0, 0, 1, 1], [], []>} : vector<8x8xbf16>, vector<8x8xbf16>, vector<8x8xf32> -> vector<8x8xf32>
    %c0_27 = arith.constant 0 : index
    %c8 = arith.constant 8 : index
    %76 = vector.load %arg8[%c0_27, %c8] : memref<8x32xf32, #tpu.memory_space<vmem>>, vector<8x8xf32>
    tpu.vector_store %arg8[%c0_27, %c8], %75 {strides = array<i32>} : memref<8x32xf32, #tpu.memory_space<vmem>>, vector<8x8xf32>,
    %77 = vector.extract_strided_slice %32 {offsets = [0, 16], sizes = [8, 8], strides = [1, 1]} : vector<8x96xf32> to vector<8x8xf32>
    %78 = arith.truncf %77 : vector<8x8xf32> to vector<8x8xbf16>
    %79 = vector.extract_strided_slice %32 {offsets = [0, 48], sizes = [8, 8], strides = [1, 1]} : vector<8x96xf32> to vector<8x8xf32>
    %80 = arith.truncf %79 : vector<8x8xf32> to vector<8x8xbf16>
    %81 = vector.extract_strided_slice %32 {offsets = [0, 80], sizes = [8, 8], strides = [1, 1]} : vector<8x96xf32> to vector<8x8xf32>
    %82 = arith.truncf %81 : vector<8x8xf32> to vector<8x8xbf16>
    %cst_28 = arith.constant dense<0.000000e+00> : vector<8x8xf32>
    %83 = tpu.matmul %78, %80, %cst_28 {dimension_numbers = #tpu.dot_dimension_numbers<[1], [1], [0], [0], [0, 0, 1, 0], [], []>} : vector<8x8xbf16>, vector<8x8xbf16>, vector<8x8xf32> -> vector<8x8xf32>
    %cst_29 = arith.constant 0.353553385 : f32
    %84 = vector.broadcast %cst_29 : f32 to vector<8x8xf32>
    %85 = arith.mulf %83, %84 : vector<8x8xf32>
    %cst_30 = arith.constant dense<0xFF800000> : vector<8xf32>
    %86 = vector.multi_reduction <maximumf>, %85, %cst_30 [1] : vector<8x8xf32> to vector<8xf32>
    %87 = vector.shape_cast %86 : vector<8xf32> to vector<8x1xf32>
    %88 = vector.broadcast %87 : vector<8x1xf32> to vector<8x8xf32>
    %89 = arith.subf %85, %88 : vector<8x8xf32>
    %90 = math.exp %89 : vector<8x8xf32>
    %cst_31 = arith.constant dense<0.000000e+00> : vector<8xf32>
    %91 = vector.multi_reduction <add>, %90, %cst_31 [1] : vector<8x8xf32> to vector<8xf32>
    %92 = vector.shape_cast %91 : vector<8xf32> to vector<8x1xf32>
    %93 = tpu.reciprocal %92 {approx = true} : vector<8x1xf32> -> vector<8x1xf32>
    %94 = vector.broadcast %93 : vector<8x1xf32> to vector<8x8xf32>
    %95 = arith.mulf %90, %94 : vector<8x8xf32>
    %96 = arith.truncf %95 : vector<8x8xf32> to vector<8x8xbf16>
    %cst_32 = arith.constant dense<0.000000e+00> : vector<8x8xf32>
    %97 = tpu.matmul %96, %82, %cst_32 {dimension_numbers = #tpu.dot_dimension_numbers<[1], [0], [0], [1], [0, 0, 1, 1], [], []>} : vector<8x8xbf16>, vector<8x8xbf16>, vector<8x8xf32> -> vector<8x8xf32>
    %c0_33 = arith.constant 0 : index
    %c16 = arith.constant 16 : index
    %98 = vector.load %arg8[%c0_33, %c16] : memref<8x32xf32, #tpu.memory_space<vmem>>, vector<8x8xf32>
    tpu.vector_store %arg8[%c0_33, %c16], %97 {strides = array<i32>} : memref<8x32xf32, #tpu.memory_space<vmem>>, vector<8x8xf32>,
    %99 = vector.extract_strided_slice %32 {offsets = [0, 24], sizes = [8, 8], strides = [1, 1]} : vector<8x96xf32> to vector<8x8xf32>
    %100 = arith.truncf %99 : vector<8x8xf32> to vector<8x8xbf16>
    %101 = vector.extract_strided_slice %32 {offsets = [0, 56], sizes = [8, 8], strides = [1, 1]} : vector<8x96xf32> to vector<8x8xf32>
    %102 = arith.truncf %101 : vector<8x8xf32> to vector<8x8xbf16>
    %103 = vector.extract_strided_slice %32 {offsets = [0, 88], sizes = [8, 8], strides = [1, 1]} : vector<8x96xf32> to vector<8x8xf32>
    %104 = arith.truncf %103 : vector<8x8xf32> to vector<8x8xbf16>
    %cst_34 = arith.constant dense<0.000000e+00> : vector<8x8xf32>
    %105 = tpu.matmul %100, %102, %cst_34 {dimension_numbers = #tpu.dot_dimension_numbers<[1], [1], [0], [0], [0, 0, 1, 0], [], []>} : vector<8x8xbf16>, vector<8x8xbf16>, vector<8x8xf32> -> vector<8x8xf32>
    %cst_35 = arith.constant 0.353553385 : f32
    %106 = vector.broadcast %cst_35 : f32 to vector<8x8xf32>
    %107 = arith.mulf %105, %106 : vector<8x8xf32>
    %cst_36 = arith.constant dense<0xFF800000> : vector<8xf32>
    %108 = vector.multi_reduction <maximumf>, %107, %cst_36 [1] : vector<8x8xf32> to vector<8xf32>
    %109 = vector.shape_cast %108 : vector<8xf32> to vector<8x1xf32>
    %110 = vector.broadcast %109 : vector<8x1xf32> to vector<8x8xf32>
    %111 = arith.subf %107, %110 : vector<8x8xf32>
    %112 = math.exp %111 : vector<8x8xf32>
    %cst_37 = arith.constant dense<0.000000e+00> : vector<8xf32>
    %113 = vector.multi_reduction <add>, %112, %cst_37 [1] : vector<8x8xf32> to vector<8xf32>
    %114 = vector.shape_cast %113 : vector<8xf32> to vector<8x1xf32>
    %115 = tpu.reciprocal %114 {approx = true} : vector<8x1xf32> -> vector<8x1xf32>
    %116 = vector.broadcast %115 : vector<8x1xf32> to vector<8x8xf32>
    %117 = arith.mulf %112, %116 : vector<8x8xf32>
    %118 = arith.truncf %117 : vector<8x8xf32> to vector<8x8xbf16>
    %cst_38 = arith.constant dense<0.000000e+00> : vector<8x8xf32>
    %119 = tpu.matmul %118, %104, %cst_38 {dimension_numbers = #tpu.dot_dimension_numbers<[1], [0], [0], [1], [0, 0, 1, 1], [], []>} : vector<8x8xbf16>, vector<8x8xbf16>, vector<8x8xf32> -> vector<8x8xf32>
    %c0_39 = arith.constant 0 : index
    %c24 = arith.constant 24 : index
    %120 = vector.load %arg8[%c0_39, %c24] : memref<8x32xf32, #tpu.memory_space<vmem>>, vector<8x8xf32>
    tpu.vector_store %arg8[%c0_39, %c24], %119 {strides = array<i32>} : memref<8x32xf32, #tpu.memory_space<vmem>>, vector<8x8xf32>,
    %c0_40 = arith.constant 0 : index
    %c0_41 = arith.constant 0 : index
    %121 = vector.load %arg8[%c0_40, %c0_41] : memref<8x32xf32, #tpu.memory_space<vmem>>, vector<8x32xf32>
    %122 = arith.truncf %121 : vector<8x32xf32> to vector<8x32xbf16>
    %c0_42 = arith.constant 0 : index
    %c0_43 = arith.constant 0 : index
    %123 = vector.load %arg5[%c0_42, %c0_43] : memref<32x32xbf16, #tpu.memory_space<vmem>>, vector<32x32xbf16>
    %cst_44 = arith.constant dense<0.000000e+00> : vector<8x32xf32>
    %124 = tpu.matmul %122, %123, %cst_44 {dimension_numbers = #tpu.dot_dimension_numbers<[1], [0], [0], [1], [0, 0, 1, 1], [], []>} : vector<8x32xbf16>, vector<32x32xbf16>, vector<8x32xf32> -> vector<8x32xf32>
    %c0_45 = arith.constant 0 : index
    %c0_46 = arith.constant 0 : index
    %125 = vector.load %arg6[%c0_45, %c0_46] : memref<1x32xf32, #tpu.memory_space<vmem>>, vector<1x32xf32>
    %126 = vector.broadcast %125 : vector<1x32xf32> to vector<8x32xf32>
    %127 = arith.addf %124, %126 : vector<8x32xf32>
    %128 = arith.addf %127, %1 : vector<8x32xf32>
    %c0_47 = arith.constant 0 : index
    %c0_48 = arith.constant 0 : index
    %c0_49 = arith.constant 0 : index
    %129 = vector.load %arg7[%c0_47, %c0_48, %c0_49] : memref<1x8x32xf32, #tpu.memory_space<vmem>>, vector<1x8x32xf32>
    %130 = vector.shape_cast %129 : vector<1x8x32xf32> to vector<8x32xf32>
    %131 = vector.shape_cast %128 : vector<8x32xf32> to vector<1x8x32xf32>
    tpu.vector_store %arg7[%c0_47, %c0_48, %c0_49], %131 {strides = array<i32>} : memref<1x8x32xf32, #tpu.memory_space<vmem>>, vector<1x8x32xf32>,
    return
  }
  func.func @transform_0(%arg0: i32) -> (i32, i32, i32) {
    %c0_i32 = arith.constant 0 : i32
    %c0_i32_0 = arith.constant 0 : i32
    %c0_i32_1 = arith.constant 0 : i32
    return %arg0, %c0_i32, %c0_i32_0 : i32, i32, i32
  }
  func.func @transform_1(%arg0: i32) -> (i32, i32) {
    %c0_i32 = arith.constant 0 : i32
    %c0_i32_0 = arith.constant 0 : i32
    %c0_i32_1 = arith.constant 0 : i32
    return %c0_i32, %c0_i32_0 : i32, i32
  }
  func.func @transform_2(%arg0: i32) -> (i32, i32) {
    %c0_i32 = arith.constant 0 : i32
    %c0_i32_0 = arith.constant 0 : i32
    %c0_i32_1 = arith.constant 0 : i32
    return %c0_i32, %c0_i32_0 : i32, i32
  }
  func.func @transform_3(%arg0: i32) -> (i32, i32) {
    %c0_i32 = arith.constant 0 : i32
    %c0_i32_0 = arith.constant 0 : i32
    %c0_i32_1 = arith.constant 0 : i32
    return %c0_i32, %c0_i32_0 : i32, i32
  }
  func.func @transform_4(%arg0: i32) -> (i32, i32) {
    %c0_i32 = arith.constant 0 : i32
    %c0_i32_0 = arith.constant 0 : i32
    %c0_i32_1 = arith.constant 0 : i32
    return %c0_i32, %c0_i32_0 : i32, i32
  }
  func.func @transform_5(%arg0: i32) -> (i32, i32) {
    %c0_i32 = arith.constant 0 : i32
    %c0_i32_0 = arith.constant 0 : i32
    %c0_i32_1 = arith.constant 0 : i32
    return %c0_i32, %c0_i32_0 : i32, i32
  }
  func.func @transform_6(%arg0: i32) -> (i32, i32, i32) {
    %c0_i32 = arith.constant 0 : i32
    %c0_i32_0 = arith.constant 0 : i32
    %c0_i32_1 = arith.constant 0 : i32
    return %arg0, %c0_i32, %c0_i32_0 : i32, i32, i32
  }
}

module attributes {stable_mosaic.version = 11 : i64} {
  func.func @_ln_ff_kernel(%arg0: i32, %arg1: memref<16x32xf32, #tpu.memory_space<vmem>>, %arg2: memref<1x32xf32, #tpu.memory_space<vmem>>, %arg3: memref<1x32xf32, #tpu.memory_space<vmem>>, %arg4: memref<1x32x64xbf16, #tpu.memory_space<vmem>>, %arg5: memref<1x1x64xf32, #tpu.memory_space<vmem>>, %arg6: memref<1x64x32xbf16, #tpu.memory_space<vmem>>, %arg7: memref<1x1x32xf32, #tpu.memory_space<vmem>>, %arg8: memref<16x32xf32, #tpu.memory_space<vmem>>) attributes {dimension_semantics = [#tpu.dimension_semantics<parallel>], iteration_bounds = array<i64: 1>, scalar_prefetch = 0 : i64, scratch_operands = 0 : i64, tpu.core_type = #tpu.core_type<tc>, window_params = [{transform_indices = @transform_0, window_bounds = array<i64: 16, 32>}, {pipeline_mode = #tpu.pipeline_mode<synchronous>, transform_indices = @transform_1, window_bounds = array<i64: 1, 32>}, {pipeline_mode = #tpu.pipeline_mode<synchronous>, transform_indices = @transform_2, window_bounds = array<i64: 1, 32>}, {pipeline_mode = #tpu.pipeline_mode<synchronous>, transform_indices = @transform_3, window_bounds = array<i64: 1, 32, 64>}, {pipeline_mode = #tpu.pipeline_mode<synchronous>, transform_indices = @transform_4, window_bounds = array<i64: 1, 1, 64>}, {pipeline_mode = #tpu.pipeline_mode<synchronous>, transform_indices = @transform_5, window_bounds = array<i64: 1, 64, 32>}, {pipeline_mode = #tpu.pipeline_mode<synchronous>, transform_indices = @transform_6, window_bounds = array<i64: 1, 1, 32>}, {transform_indices = @transform_7, window_bounds = array<i64: 16, 32>}]} {
    %c0 = arith.constant 0 : index
    %c0_0 = arith.constant 0 : index
    %0 = vector.load %arg1[%c0, %c0_0] : memref<16x32xf32, #tpu.memory_space<vmem>>, vector<16x32xf32>
    %cst = arith.constant dense<0.000000e+00> : vector<16xf32>
    %1 = vector.multi_reduction <add>, %0, %cst [1] : vector<16x32xf32> to vector<16xf32>
    %2 = vector.shape_cast %1 : vector<16xf32> to vector<16x1xf32>
    %cst_1 = arith.constant 3.200000e+01 : f32
    %3 = vector.broadcast %cst_1 : f32 to vector<16x1xf32>
    %4 = arith.divf %2, %3 : vector<16x1xf32>
    %5 = vector.broadcast %4 : vector<16x1xf32> to vector<16x32xf32>
    %6 = arith.subf %0, %5 : vector<16x32xf32>
    %7 = arith.mulf %6, %6 : vector<16x32xf32>
    %cst_2 = arith.constant dense<0.000000e+00> : vector<16xf32>
    %8 = vector.multi_reduction <add>, %7, %cst_2 [1] : vector<16x32xf32> to vector<16xf32>
    %9 = vector.shape_cast %8 : vector<16xf32> to vector<16x1xf32>
    %cst_3 = arith.constant 3.200000e+01 : f32
    %10 = vector.broadcast %cst_3 : f32 to vector<16x1xf32>
    %11 = arith.divf %9, %10 : vector<16x1xf32>
    %12 = vector.broadcast %4 : vector<16x1xf32> to vector<16x32xf32>
    %13 = arith.subf %0, %12 : vector<16x32xf32>
    %14 = math.sqrt %11 : vector<16x1xf32>
    %cst_4 = arith.constant 9.99999974E-6 : f32
    %15 = vector.broadcast %cst_4 : f32 to vector<16x1xf32>
    %16 = arith.addf %14, %15 : vector<16x1xf32>
    %cst_5 = arith.constant 1.000000e+00 : f32
    %17 = vector.broadcast %cst_5 : f32 to vector<16x1xf32>
    %18 = arith.divf %17, %16 : vector<16x1xf32>
    %19 = vector.broadcast %18 : vector<16x1xf32> to vector<16x32xf32>
    %20 = arith.mulf %13, %19 : vector<16x32xf32>
    %c0_6 = arith.constant 0 : index
    %c0_7 = arith.constant 0 : index
    %21 = vector.load %arg2[%c0_6, %c0_7] : memref<1x32xf32, #tpu.memory_space<vmem>>, vector<1x32xf32>
    %22 = vector.broadcast %21 : vector<1x32xf32> to vector<16x32xf32>
    %23 = arith.mulf %20, %22 : vector<16x32xf32>
    %c0_8 = arith.constant 0 : index
    %c0_9 = arith.constant 0 : index
    %24 = vector.load %arg3[%c0_8, %c0_9] : memref<1x32xf32, #tpu.memory_space<vmem>>, vector<1x32xf32>
    %25 = vector.broadcast %24 : vector<1x32xf32> to vector<16x32xf32>
    %26 = arith.addf %23, %25 : vector<16x32xf32>
    %27 = arith.truncf %26 : vector<16x32xf32> to vector<16x32xbf16>
    %c0_10 = arith.constant 0 : index
    %c0_11 = arith.constant 0 : index
    %c0_12 = arith.constant 0 : index
    %28 = vector.load %arg4[%c0_10, %c0_11, %c0_12] : memref<1x32x64xbf16, #tpu.memory_space<vmem>>, vector<1x32x64xbf16>
    %29 = vector.shape_cast %28 : vector<1x32x64xbf16> to vector<32x64xbf16>
    %cst_13 = arith.constant dense<0.000000e+00> : vector<16x64xf32>
    %30 = tpu.matmul %27, %29, %cst_13 {dimension_numbers = #tpu.dot_dimension_numbers<[1], [0], [0], [1], [0, 0, 1, 1], [], []>} : vector<16x32xbf16>, vector<32x64xbf16>, vector<16x64xf32> -> vector<16x64xf32>
    %c0_14 = arith.constant 0 : index
    %c0_15 = arith.constant 0 : index
    %c0_16 = arith.constant 0 : index
    %31 = vector.load %arg5[%c0_14, %c0_15, %c0_16] : memref<1x1x64xf32, #tpu.memory_space<vmem>>, vector<1x1x64xf32>
    %32 = vector.shape_cast %31 : vector<1x1x64xf32> to vector<1x64xf32>
    %33 = vector.broadcast %32 : vector<1x64xf32> to vector<16x64xf32>
    %34 = arith.addf %30, %33 : vector<16x64xf32>
    %35 = arith.mulf %34, %34 : vector<16x64xf32>
    %36 = arith.mulf %34, %35 : vector<16x64xf32>
    %cst_17 = arith.constant 4.471500e-02 : f32
    %37 = vector.broadcast %cst_17 : f32 to vector<16x64xf32>
    %38 = arith.mulf %37, %36 : vector<16x64xf32>
    %39 = arith.addf %34, %38 : vector<16x64xf32>
    %cst_18 = arith.constant 0.797884583 : f32
    %40 = vector.broadcast %cst_18 : f32 to vector<16x64xf32>
    %41 = arith.mulf %40, %39 : vector<16x64xf32>
    %42 = math.tanh %41 : vector<16x64xf32>
    %cst_19 = arith.constant 1.000000e+00 : f32
    %43 = vector.broadcast %cst_19 : f32 to vector<16x64xf32>
    %44 = arith.addf %43, %42 : vector<16x64xf32>
    %cst_20 = arith.constant 5.000000e-01 : f32
    %45 = vector.broadcast %cst_20 : f32 to vector<16x64xf32>
    %46 = arith.mulf %45, %44 : vector<16x64xf32>
    %47 = arith.mulf %34, %46 : vector<16x64xf32>
    %48 = arith.truncf %47 : vector<16x64xf32> to vector<16x64xbf16>
    %c0_21 = arith.constant 0 : index
    %c0_22 = arith.constant 0 : index
    %c0_23 = arith.constant 0 : index
    %49 = vector.load %arg6[%c0_21, %c0_22, %c0_23] : memref<1x64x32xbf16, #tpu.memory_space<vmem>>, vector<1x64x32xbf16>
    %50 = vector.shape_cast %49 : vector<1x64x32xbf16> to vector<64x32xbf16>
    %cst_24 = arith.constant dense<0.000000e+00> : vector<16x32xf32>
    %51 = tpu.matmul %48, %50, %cst_24 {dimension_numbers = #tpu.dot_dimension_numbers<[1], [0], [0], [1], [0, 0, 1, 1], [], []>} : vector<16x64xbf16>, vector<64x32xbf16>, vector<16x32xf32> -> vector<16x32xf32>
    %c0_25 = arith.constant 0 : index
    %c0_26 = arith.constant 0 : index
    %c0_27 = arith.constant 0 : index
    %52 = vector.load %arg7[%c0_25, %c0_26, %c0_27] : memref<1x1x32xf32, #tpu.memory_space<vmem>>, vector<1x1x32xf32>
    %53 = vector.shape_cast %52 : vector<1x1x32xf32> to vector<1x32xf32>
    %54 = vector.broadcast %53 : vector<1x32xf32> to vector<16x32xf32>
    %55 = arith.addf %51, %54 : vector<16x32xf32>
    %56 = arith.addf %55, %0 : vector<16x32xf32>
    %c0_28 = arith.constant 0 : index
    %c0_29 = arith.constant 0 : index
    %57 = vector.load %arg8[%c0_28, %c0_29] : memref<16x32xf32, #tpu.memory_space<vmem>>, vector<16x32xf32>
    tpu.vector_store %arg8[%c0_28, %c0_29], %56 {strides = array<i32>} : memref<16x32xf32, #tpu.memory_space<vmem>>, vector<16x32xf32>,
    return
  }
  func.func @transform_0(%arg0: i32) -> (i32, i32) {
    %c0_i32 = arith.constant 0 : i32
    %c0_i32_0 = arith.constant 0 : i32
    return %arg0, %c0_i32 : i32, i32
  }
  func.func @transform_1(%arg0: i32) -> (i32, i32) {
    %c0_i32 = arith.constant 0 : i32
    %c0_i32_0 = arith.constant 0 : i32
    %c0_i32_1 = arith.constant 0 : i32
    return %c0_i32, %c0_i32_0 : i32, i32
  }
  func.func @transform_2(%arg0: i32) -> (i32, i32) {
    %c0_i32 = arith.constant 0 : i32
    %c0_i32_0 = arith.constant 0 : i32
    %c0_i32_1 = arith.constant 0 : i32
    return %c0_i32, %c0_i32_0 : i32, i32
  }
  func.func @transform_3(%arg0: i32) -> (i32, i32, i32) {
    %c0_i32 = arith.constant 0 : i32
    %c0_i32_0 = arith.constant 0 : i32
    %c0_i32_1 = arith.constant 0 : i32
    %c0_i32_2 = arith.constant 0 : i32
    return %c0_i32, %c0_i32_0, %c0_i32_1 : i32, i32, i32
  }
  func.func @transform_4(%arg0: i32) -> (i32, i32, i32) {
    %c0_i32 = arith.constant 0 : i32
    %c0_i32_0 = arith.constant 0 : i32
    %c0_i32_1 = arith.constant 0 : i32
    %c0_i32_2 = arith.constant 0 : i32
    return %c0_i32, %c0_i32_0, %c0_i32_1 : i32, i32, i32
  }
  func.func @transform_5(%arg0: i32) -> (i32, i32, i32) {
    %c0_i32 = arith.constant 0 : i32
    %c0_i32_0 = arith.constant 0 : i32
    %c0_i32_1 = arith.constant 0 : i32
    %c0_i32_2 = arith.constant 0 : i32
    return %c0_i32, %c0_i32_0, %c0_i32_1 : i32, i32, i32
  }
  func.func @transform_6(%arg0: i32) -> (i32, i32, i32) {
    %c0_i32 = arith.constant 0 : i32
    %c0_i32_0 = arith.constant 0 : i32
    %c0_i32_1 = arith.constant 0 : i32
    %c0_i32_2 = arith.constant 0 : i32
    return %c0_i32, %c0_i32_0, %c0_i32_1 : i32, i32, i32
  }
  func.func @transform_7(%arg0: i32) -> (i32, i32) {
    %c0_i32 = arith.constant 0 : i32
    %c0_i32_0 = arith.constant 0 : i32
    return %arg0, %c0_i32 : i32, i32
  }
}

module attributes {stable_mosaic.version = 11 : i64} {
  func.func @_block_attn_kernel(%arg0: i32, %arg1: memref<1x8x32xf32, #tpu.memory_space<vmem>>, %arg2: memref<1x64xf32, #tpu.memory_space<vmem>>, %arg3: memref<1x64xf32, #tpu.memory_space<vmem>>, %arg4: memref<64x192xbf16, #tpu.memory_space<vmem>>, %arg5: memref<64x64xbf16, #tpu.memory_space<vmem>>, %arg6: memref<1x64xf32, #tpu.memory_space<vmem>>, %arg7: memref<1x8x64xf32, #tpu.memory_space<vmem>>, %arg8: memref<8x64xf32, #tpu.memory_space<vmem>>) attributes {dimension_semantics = [#tpu.dimension_semantics<parallel>], iteration_bounds = array<i64: 2>, scalar_prefetch = 0 : i64, scratch_operands = 1 : i64, tpu.core_type = #tpu.core_type<tc>, window_params = [{transform_indices = @transform_0, window_bounds = array<i64: 1, 8, 32>}, {pipeline_mode = #tpu.pipeline_mode<synchronous>, transform_indices = @transform_1, window_bounds = array<i64: 1, 64>}, {pipeline_mode = #tpu.pipeline_mode<synchronous>, transform_indices = @transform_2, window_bounds = array<i64: 1, 64>}, {pipeline_mode = #tpu.pipeline_mode<synchronous>, transform_indices = @transform_3, window_bounds = array<i64: 64, 192>}, {pipeline_mode = #tpu.pipeline_mode<synchronous>, transform_indices = @transform_4, window_bounds = array<i64: 64, 64>}, {pipeline_mode = #tpu.pipeline_mode<synchronous>, transform_indices = @transform_5, window_bounds = array<i64: 1, 64>}, {transform_indices = @transform_6, window_bounds = array<i64: 1, 8, 64>}]} {
    %c0 = arith.constant 0 : index
    %c0_0 = arith.constant 0 : index
    %c0_1 = arith.constant 0 : index
    %0 = vector.load %arg1[%c0, %c0_0, %c0_1] : memref<1x8x32xf32, #tpu.memory_space<vmem>>, vector<1x8x32xf32>
    %1 = vector.shape_cast %0 : vector<1x8x32xf32> to vector<8x32xf32>
    %cst = arith.constant 0.000000e+00 : f32
    %2 = vector.broadcast %cst : f32 to vector<8x192xf32>
    %cst_2 = arith.constant dense<0.000000e+00> : vector<8xf32>
    %3 = vector.multi_reduction <add>, %1, %cst_2 [1] : vector<8x32xf32> to vector<8xf32>
    %4 = vector.shape_cast %3 : vector<8xf32> to vector<8x1xf32>
    %cst_3 = arith.constant 3.200000e+01 : f32
    %5 = vector.broadcast %cst_3 : f32 to vector<8x1xf32>
    %6 = arith.divf %4, %5 : vector<8x1xf32>
    %7 = vector.broadcast %6 : vector<8x1xf32> to vector<8x32xf32>
    %8 = arith.subf %1, %7 : vector<8x32xf32>
    %9 = arith.mulf %8, %8 : vector<8x32xf32>
    %cst_4 = arith.constant dense<0.000000e+00> : vector<8xf32>
    %10 = vector.multi_reduction <add>, %9, %cst_4 [1] : vector<8x32xf32> to vector<8xf32>
    %11 = vector.shape_cast %10 : vector<8xf32> to vector<8x1xf32>
    %cst_5 = arith.constant 3.200000e+01 : f32
    %12 = vector.broadcast %cst_5 : f32 to vector<8x1xf32>
    %13 = arith.divf %11, %12 : vector<8x1xf32>
    %14 = vector.broadcast %6 : vector<8x1xf32> to vector<8x32xf32>
    %15 = arith.subf %1, %14 : vector<8x32xf32>
    %16 = math.sqrt %13 : vector<8x1xf32>
    %cst_6 = arith.constant 9.99999974E-6 : f32
    %17 = vector.broadcast %cst_6 : f32 to vector<8x1xf32>
    %18 = arith.addf %16, %17 : vector<8x1xf32>
    %cst_7 = arith.constant 1.000000e+00 : f32
    %19 = vector.broadcast %cst_7 : f32 to vector<8x1xf32>
    %20 = arith.divf %19, %18 : vector<8x1xf32>
    %21 = vector.broadcast %20 : vector<8x1xf32> to vector<8x32xf32>
    %22 = arith.mulf %15, %21 : vector<8x32xf32>
    %c0_8 = arith.constant 0 : index
    %c0_9 = arith.constant 0 : index
    %23 = vector.load %arg2[%c0_8, %c0_9] : memref<1x64xf32, #tpu.memory_space<vmem>>, vector<1x32xf32>
    %24 = vector.broadcast %23 : vector<1x32xf32> to vector<8x32xf32>
    %25 = arith.mulf %22, %24 : vector<8x32xf32>
    %c0_10 = arith.constant 0 : index
    %c0_11 = arith.constant 0 : index
    %26 = vector.load %arg3[%c0_10, %c0_11] : memref<1x64xf32, #tpu.memory_space<vmem>>, vector<1x32xf32>
    %27 = vector.broadcast %26 : vector<1x32xf32> to vector<8x32xf32>
    %28 = arith.addf %25, %27 : vector<8x32xf32>
    %29 = arith.truncf %28 : vector<8x32xf32> to vector<8x32xbf16>
    %c0_12 = arith.constant 0 : index
    %c0_13 = arith.constant 0 : index
    %30 = vector.load %arg4[%c0_12, %c0_13] : memref<64x192xbf16, #tpu.memory_space<vmem>>, vector<32x192xbf16>
    %cst_14 = arith.constant dense<0.000000e+00> : vector<8x192xf32>
    %31 = tpu.matmul %29, %30, %cst_14 {dimension_numbers = #tpu.dot_dimension_numbers<[1], [0], [0], [1], [0, 0, 1, 1], [], []>} : vector<8x32xbf16>, vector<32x192xbf16>, vector<8x192xf32> -> vector<8x192xf32>
    %32 = arith.addf %2, %31 : vector<8x192xf32>
    %c0_15 = arith.constant 0 : index
    %c32 = arith.constant 32 : index
    %33 = vector.load %arg2[%c0_15, %c32] : memref<1x64xf32, #tpu.memory_space<vmem>>, vector<1x32xf32>
    %34 = vector.broadcast %33 : vector<1x32xf32> to vector<8x32xf32>
    %35 = arith.mulf %22, %34 : vector<8x32xf32>
    %c0_16 = arith.constant 0 : index
    %c32_17 = arith.constant 32 : index
    %36 = vector.load %arg3[%c0_16, %c32_17] : memref<1x64xf32, #tpu.memory_space<vmem>>, vector<1x32xf32>
    %37 = vector.broadcast %36 : vector<1x32xf32> to vector<8x32xf32>
    %38 = arith.addf %35, %37 : vector<8x32xf32>
    %39 = arith.truncf %38 : vector<8x32xf32> to vector<8x32xbf16>
    %c32_18 = arith.constant 32 : index
    %c0_19 = arith.constant 0 : index
    %40 = vector.load %arg4[%c32_18, %c0_19] : memref<64x192xbf16, #tpu.memory_space<vmem>>, vector<32x192xbf16>
    %cst_20 = arith.constant dense<0.000000e+00> : vector<8x192xf32>
    %41 = tpu.matmul %39, %40, %cst_20 {dimension_numbers = #tpu.dot_dimension_numbers<[1], [0], [0], [1], [0, 0, 1, 1], [], []>} : vector<8x32xbf16>, vector<32x192xbf16>, vector<8x192xf32> -> vector<8x192xf32>
    %42 = arith.addf %32, %41 : vector<8x192xf32>
    %43 = vector.extract_strided_slice %42 {offsets = [0, 0], sizes = [8, 8], strides = [1, 1]} : vector<8x192xf32> to vector<8x8xf32>
    %44 = arith.truncf %43 : vector<8x8xf32> to vector<8x8xbf16>
    %45 = vector.extract_strided_slice %42 {offsets = [0, 64], sizes = [8, 8], strides = [1, 1]} : vector<8x192xf32> to vector<8x8xf32>
    %46 = arith.truncf %45 : vector<8x8xf32> to vector<8x8xbf16>
    %47 = vector.extract_strided_slice %42 {offsets = [0, 128], sizes = [8, 8], strides = [1, 1]} : vector<8x192xf32> to vector<8x8xf32>
    %48 = arith.truncf %47 : vector<8x8xf32> to vector<8x8xbf16>
    %cst_21 = arith.constant dense<0.000000e+00> : vector<8x8xf32>
    %49 = tpu.matmul %44, %46, %cst_21 {dimension_numbers = #tpu.dot_dimension_numbers<[1], [1], [0], [0], [0, 0, 1, 0], [], []>} : vector<8x8xbf16>, vector<8x8xbf16>, vector<8x8xf32> -> vector<8x8xf32>
    %cst_22 = arith.constant 0.353553385 : f32
    %50 = vector.broadcast %cst_22 : f32 to vector<8x8xf32>
    %51 = arith.mulf %49, %50 : vector<8x8xf32>
    %cst_23 = arith.constant dense<0xFF800000> : vector<8xf32>
    %52 = vector.multi_reduction <maximumf>, %51, %cst_23 [1] : vector<8x8xf32> to vector<8xf32>
    %53 = vector.shape_cast %52 : vector<8xf32> to vector<8x1xf32>
    %54 = vector.broadcast %53 : vector<8x1xf32> to vector<8x8xf32>
    %55 = arith.subf %51, %54 : vector<8x8xf32>
    %56 = math.exp %55 : vector<8x8xf32>
    %cst_24 = arith.constant dense<0.000000e+00> : vector<8xf32>
    %57 = vector.multi_reduction <add>, %56, %cst_24 [1] : vector<8x8xf32> to vector<8xf32>
    %58 = vector.shape_cast %57 : vector<8xf32> to vector<8x1xf32>
    %59 = tpu.reciprocal %58 {approx = true} : vector<8x1xf32> -> vector<8x1xf32>
    %60 = vector.broadcast %59 : vector<8x1xf32> to vector<8x8xf32>
    %61 = arith.mulf %56, %60 : vector<8x8xf32>
    %62 = arith.truncf %61 : vector<8x8xf32> to vector<8x8xbf16>
    %cst_25 = arith.constant dense<0.000000e+00> : vector<8x8xf32>
    %63 = tpu.matmul %62, %48, %cst_25 {dimension_numbers = #tpu.dot_dimension_numbers<[1], [0], [0], [1], [0, 0, 1, 1], [], []>} : vector<8x8xbf16>, vector<8x8xbf16>, vector<8x8xf32> -> vector<8x8xf32>
    %c0_26 = arith.constant 0 : index
    %c0_27 = arith.constant 0 : index
    %64 = vector.load %arg8[%c0_26, %c0_27] : memref<8x64xf32, #tpu.memory_space<vmem>>, vector<8x8xf32>
    tpu.vector_store %arg8[%c0_26, %c0_27], %63 {strides = array<i32>} : memref<8x64xf32, #tpu.memory_space<vmem>>, vector<8x8xf32>,
    %65 = vector.extract_strided_slice %42 {offsets = [0, 8], sizes = [8, 8], strides = [1, 1]} : vector<8x192xf32> to vector<8x8xf32>
    %66 = arith.truncf %65 : vector<8x8xf32> to vector<8x8xbf16>
    %67 = vector.extract_strided_slice %42 {offsets = [0, 72], sizes = [8, 8], strides = [1, 1]} : vector<8x192xf32> to vector<8x8xf32>
    %68 = arith.truncf %67 : vector<8x8xf32> to vector<8x8xbf16>
    %69 = vector.extract_strided_slice %42 {offsets = [0, 136], sizes = [8, 8], strides = [1, 1]} : vector<8x192xf32> to vector<8x8xf32>
    %70 = arith.truncf %69 : vector<8x8xf32> to vector<8x8xbf16>
    %cst_28 = arith.constant dense<0.000000e+00> : vector<8x8xf32>
    %71 = tpu.matmul %66, %68, %cst_28 {dimension_numbers = #tpu.dot_dimension_numbers<[1], [1], [0], [0], [0, 0, 1, 0], [], []>} : vector<8x8xbf16>, vector<8x8xbf16>, vector<8x8xf32> -> vector<8x8xf32>
    %cst_29 = arith.constant 0.353553385 : f32
    %72 = vector.broadcast %cst_29 : f32 to vector<8x8xf32>
    %73 = arith.mulf %71, %72 : vector<8x8xf32>
    %cst_30 = arith.constant dense<0xFF800000> : vector<8xf32>
    %74 = vector.multi_reduction <maximumf>, %73, %cst_30 [1] : vector<8x8xf32> to vector<8xf32>
    %75 = vector.shape_cast %74 : vector<8xf32> to vector<8x1xf32>
    %76 = vector.broadcast %75 : vector<8x1xf32> to vector<8x8xf32>
    %77 = arith.subf %73, %76 : vector<8x8xf32>
    %78 = math.exp %77 : vector<8x8xf32>
    %cst_31 = arith.constant dense<0.000000e+00> : vector<8xf32>
    %79 = vector.multi_reduction <add>, %78, %cst_31 [1] : vector<8x8xf32> to vector<8xf32>
    %80 = vector.shape_cast %79 : vector<8xf32> to vector<8x1xf32>
    %81 = tpu.reciprocal %80 {approx = true} : vector<8x1xf32> -> vector<8x1xf32>
    %82 = vector.broadcast %81 : vector<8x1xf32> to vector<8x8xf32>
    %83 = arith.mulf %78, %82 : vector<8x8xf32>
    %84 = arith.truncf %83 : vector<8x8xf32> to vector<8x8xbf16>
    %cst_32 = arith.constant dense<0.000000e+00> : vector<8x8xf32>
    %85 = tpu.matmul %84, %70, %cst_32 {dimension_numbers = #tpu.dot_dimension_numbers<[1], [0], [0], [1], [0, 0, 1, 1], [], []>} : vector<8x8xbf16>, vector<8x8xbf16>, vector<8x8xf32> -> vector<8x8xf32>
    %c0_33 = arith.constant 0 : index
    %c8 = arith.constant 8 : index
    %86 = vector.load %arg8[%c0_33, %c8] : memref<8x64xf32, #tpu.memory_space<vmem>>, vector<8x8xf32>
    tpu.vector_store %arg8[%c0_33, %c8], %85 {strides = array<i32>} : memref<8x64xf32, #tpu.memory_space<vmem>>, vector<8x8xf32>,
    %87 = vector.extract_strided_slice %42 {offsets = [0, 16], sizes = [8, 8], strides = [1, 1]} : vector<8x192xf32> to vector<8x8xf32>
    %88 = arith.truncf %87 : vector<8x8xf32> to vector<8x8xbf16>
    %89 = vector.extract_strided_slice %42 {offsets = [0, 80], sizes = [8, 8], strides = [1, 1]} : vector<8x192xf32> to vector<8x8xf32>
    %90 = arith.truncf %89 : vector<8x8xf32> to vector<8x8xbf16>
    %91 = vector.extract_strided_slice %42 {offsets = [0, 144], sizes = [8, 8], strides = [1, 1]} : vector<8x192xf32> to vector<8x8xf32>
    %92 = arith.truncf %91 : vector<8x8xf32> to vector<8x8xbf16>
    %cst_34 = arith.constant dense<0.000000e+00> : vector<8x8xf32>
    %93 = tpu.matmul %88, %90, %cst_34 {dimension_numbers = #tpu.dot_dimension_numbers<[1], [1], [0], [0], [0, 0, 1, 0], [], []>} : vector<8x8xbf16>, vector<8x8xbf16>, vector<8x8xf32> -> vector<8x8xf32>
    %cst_35 = arith.constant 0.353553385 : f32
    %94 = vector.broadcast %cst_35 : f32 to vector<8x8xf32>
    %95 = arith.mulf %93, %94 : vector<8x8xf32>
    %cst_36 = arith.constant dense<0xFF800000> : vector<8xf32>
    %96 = vector.multi_reduction <maximumf>, %95, %cst_36 [1] : vector<8x8xf32> to vector<8xf32>
    %97 = vector.shape_cast %96 : vector<8xf32> to vector<8x1xf32>
    %98 = vector.broadcast %97 : vector<8x1xf32> to vector<8x8xf32>
    %99 = arith.subf %95, %98 : vector<8x8xf32>
    %100 = math.exp %99 : vector<8x8xf32>
    %cst_37 = arith.constant dense<0.000000e+00> : vector<8xf32>
    %101 = vector.multi_reduction <add>, %100, %cst_37 [1] : vector<8x8xf32> to vector<8xf32>
    %102 = vector.shape_cast %101 : vector<8xf32> to vector<8x1xf32>
    %103 = tpu.reciprocal %102 {approx = true} : vector<8x1xf32> -> vector<8x1xf32>
    %104 = vector.broadcast %103 : vector<8x1xf32> to vector<8x8xf32>
    %105 = arith.mulf %100, %104 : vector<8x8xf32>
    %106 = arith.truncf %105 : vector<8x8xf32> to vector<8x8xbf16>
    %cst_38 = arith.constant dense<0.000000e+00> : vector<8x8xf32>
    %107 = tpu.matmul %106, %92, %cst_38 {dimension_numbers = #tpu.dot_dimension_numbers<[1], [0], [0], [1], [0, 0, 1, 1], [], []>} : vector<8x8xbf16>, vector<8x8xbf16>, vector<8x8xf32> -> vector<8x8xf32>
    %c0_39 = arith.constant 0 : index
    %c16 = arith.constant 16 : index
    %108 = vector.load %arg8[%c0_39, %c16] : memref<8x64xf32, #tpu.memory_space<vmem>>, vector<8x8xf32>
    tpu.vector_store %arg8[%c0_39, %c16], %107 {strides = array<i32>} : memref<8x64xf32, #tpu.memory_space<vmem>>, vector<8x8xf32>,
    %109 = vector.extract_strided_slice %42 {offsets = [0, 24], sizes = [8, 8], strides = [1, 1]} : vector<8x192xf32> to vector<8x8xf32>
    %110 = arith.truncf %109 : vector<8x8xf32> to vector<8x8xbf16>
    %111 = vector.extract_strided_slice %42 {offsets = [0, 88], sizes = [8, 8], strides = [1, 1]} : vector<8x192xf32> to vector<8x8xf32>
    %112 = arith.truncf %111 : vector<8x8xf32> to vector<8x8xbf16>
    %113 = vector.extract_strided_slice %42 {offsets = [0, 152], sizes = [8, 8], strides = [1, 1]} : vector<8x192xf32> to vector<8x8xf32>
    %114 = arith.truncf %113 : vector<8x8xf32> to vector<8x8xbf16>
    %cst_40 = arith.constant dense<0.000000e+00> : vector<8x8xf32>
    %115 = tpu.matmul %110, %112, %cst_40 {dimension_numbers = #tpu.dot_dimension_numbers<[1], [1], [0], [0], [0, 0, 1, 0], [], []>} : vector<8x8xbf16>, vector<8x8xbf16>, vector<8x8xf32> -> vector<8x8xf32>
    %cst_41 = arith.constant 0.353553385 : f32
    %116 = vector.broadcast %cst_41 : f32 to vector<8x8xf32>
    %117 = arith.mulf %115, %116 : vector<8x8xf32>
    %cst_42 = arith.constant dense<0xFF800000> : vector<8xf32>
    %118 = vector.multi_reduction <maximumf>, %117, %cst_42 [1] : vector<8x8xf32> to vector<8xf32>
    %119 = vector.shape_cast %118 : vector<8xf32> to vector<8x1xf32>
    %120 = vector.broadcast %119 : vector<8x1xf32> to vector<8x8xf32>
    %121 = arith.subf %117, %120 : vector<8x8xf32>
    %122 = math.exp %121 : vector<8x8xf32>
    %cst_43 = arith.constant dense<0.000000e+00> : vector<8xf32>
    %123 = vector.multi_reduction <add>, %122, %cst_43 [1] : vector<8x8xf32> to vector<8xf32>
    %124 = vector.shape_cast %123 : vector<8xf32> to vector<8x1xf32>
    %125 = tpu.reciprocal %124 {approx = true} : vector<8x1xf32> -> vector<8x1xf32>
    %126 = vector.broadcast %125 : vector<8x1xf32> to vector<8x8xf32>
    %127 = arith.mulf %122, %126 : vector<8x8xf32>
    %128 = arith.truncf %127 : vector<8x8xf32> to vector<8x8xbf16>
    %cst_44 = arith.constant dense<0.000000e+00> : vector<8x8xf32>
    %129 = tpu.matmul %128, %114, %cst_44 {dimension_numbers = #tpu.dot_dimension_numbers<[1], [0], [0], [1], [0, 0, 1, 1], [], []>} : vector<8x8xbf16>, vector<8x8xbf16>, vector<8x8xf32> -> vector<8x8xf32>
    %c0_45 = arith.constant 0 : index
    %c24 = arith.constant 24 : index
    %130 = vector.load %arg8[%c0_45, %c24] : memref<8x64xf32, #tpu.memory_space<vmem>>, vector<8x8xf32>
    tpu.vector_store %arg8[%c0_45, %c24], %129 {strides = array<i32>} : memref<8x64xf32, #tpu.memory_space<vmem>>, vector<8x8xf32>,
    %131 = vector.extract_strided_slice %42 {offsets = [0, 32], sizes = [8, 8], strides = [1, 1]} : vector<8x192xf32> to vector<8x8xf32>
    %132 = arith.truncf %131 : vector<8x8xf32> to vector<8x8xbf16>
    %133 = vector.extract_strided_slice %42 {offsets = [0, 96], sizes = [8, 8], strides = [1, 1]} : vector<8x192xf32> to vector<8x8xf32>
    %134 = arith.truncf %133 : vector<8x8xf32> to vector<8x8xbf16>
    %135 = vector.extract_strided_slice %42 {offsets = [0, 160], sizes = [8, 8], strides = [1, 1]} : vector<8x192xf32> to vector<8x8xf32>
    %136 = arith.truncf %135 : vector<8x8xf32> to vector<8x8xbf16>
    %cst_46 = arith.constant dense<0.000000e+00> : vector<8x8xf32>
    %137 = tpu.matmul %132, %134, %cst_46 {dimension_numbers = #tpu.dot_dimension_numbers<[1], [1], [0], [0], [0, 0, 1, 0], [], []>} : vector<8x8xbf16>, vector<8x8xbf16>, vector<8x8xf32> -> vector<8x8xf32>
    %cst_47 = arith.constant 0.353553385 : f32
    %138 = vector.broadcast %cst_47 : f32 to vector<8x8xf32>
    %139 = arith.mulf %137, %138 : vector<8x8xf32>
    %cst_48 = arith.constant dense<0xFF800000> : vector<8xf32>
    %140 = vector.multi_reduction <maximumf>, %139, %cst_48 [1] : vector<8x8xf32> to vector<8xf32>
    %141 = vector.shape_cast %140 : vector<8xf32> to vector<8x1xf32>
    %142 = vector.broadcast %141 : vector<8x1xf32> to vector<8x8xf32>
    %143 = arith.subf %139, %142 : vector<8x8xf32>
    %144 = math.exp %143 : vector<8x8xf32>
    %cst_49 = arith.constant dense<0.000000e+00> : vector<8xf32>
    %145 = vector.multi_reduction <add>, %144, %cst_49 [1] : vector<8x8xf32> to vector<8xf32>
    %146 = vector.shape_cast %145 : vector<8xf32> to vector<8x1xf32>
    %147 = tpu.reciprocal %146 {approx = true} : vector<8x1xf32> -> vector<8x1xf32>
    %148 = vector.broadcast %147 : vector<8x1xf32> to vector<8x8xf32>
    %149 = arith.mulf %144, %148 : vector<8x8xf32>
    %150 = arith.truncf %149 : vector<8x8xf32> to vector<8x8xbf16>
    %cst_50 = arith.constant dense<0.000000e+00> : vector<8x8xf32>
    %151 = tpu.matmul %150, %136, %cst_50 {dimension_numbers = #tpu.dot_dimension_numbers<[1], [0], [0], [1], [0, 0, 1, 1], [], []>} : vector<8x8xbf16>, vector<8x8xbf16>, vector<8x8xf32> -> vector<8x8xf32>
    %c0_51 = arith.constant 0 : index
    %c32_52 = arith.constant 32 : index
    %152 = vector.load %arg8[%c0_51, %c32_52] : memref<8x64xf32, #tpu.memory_space<vmem>>, vector<8x8xf32>
    tpu.vector_store %arg8[%c0_51, %c32_52], %151 {strides = array<i32>} : memref<8x64xf32, #tpu.memory_space<vmem>>, vector<8x8xf32>,
    %153 = vector.extract_strided_slice %42 {offsets = [0, 40], sizes = [8, 8], strides = [1, 1]} : vector<8x192xf32> to vector<8x8xf32>
    %154 = arith.truncf %153 : vector<8x8xf32> to vector<8x8xbf16>
    %155 = vector.extract_strided_slice %42 {offsets = [0, 104], sizes = [8, 8], strides = [1, 1]} : vector<8x192xf32> to vector<8x8xf32>
    %156 = arith.truncf %155 : vector<8x8xf32> to vector<8x8xbf16>
    %157 = vector.extract_strided_slice %42 {offsets = [0, 168], sizes = [8, 8], strides = [1, 1]} : vector<8x192xf32> to vector<8x8xf32>
    %158 = arith.truncf %157 : vector<8x8xf32> to vector<8x8xbf16>
    %cst_53 = arith.constant dense<0.000000e+00> : vector<8x8xf32>
    %159 = tpu.matmul %154, %156, %cst_53 {dimension_numbers = #tpu.dot_dimension_numbers<[1], [1], [0], [0], [0, 0, 1, 0], [], []>} : vector<8x8xbf16>, vector<8x8xbf16>, vector<8x8xf32> -> vector<8x8xf32>
    %cst_54 = arith.constant 0.353553385 : f32
    %160 = vector.broadcast %cst_54 : f32 to vector<8x8xf32>
    %161 = arith.mulf %159, %160 : vector<8x8xf32>
    %cst_55 = arith.constant dense<0xFF800000> : vector<8xf32>
    %162 = vector.multi_reduction <maximumf>, %161, %cst_55 [1] : vector<8x8xf32> to vector<8xf32>
    %163 = vector.shape_cast %162 : vector<8xf32> to vector<8x1xf32>
    %164 = vector.broadcast %163 : vector<8x1xf32> to vector<8x8xf32>
    %165 = arith.subf %161, %164 : vector<8x8xf32>
    %166 = math.exp %165 : vector<8x8xf32>
    %cst_56 = arith.constant dense<0.000000e+00> : vector<8xf32>
    %167 = vector.multi_reduction <add>, %166, %cst_56 [1] : vector<8x8xf32> to vector<8xf32>
    %168 = vector.shape_cast %167 : vector<8xf32> to vector<8x1xf32>
    %169 = tpu.reciprocal %168 {approx = true} : vector<8x1xf32> -> vector<8x1xf32>
    %170 = vector.broadcast %169 : vector<8x1xf32> to vector<8x8xf32>
    %171 = arith.mulf %166, %170 : vector<8x8xf32>
    %172 = arith.truncf %171 : vector<8x8xf32> to vector<8x8xbf16>
    %cst_57 = arith.constant dense<0.000000e+00> : vector<8x8xf32>
    %173 = tpu.matmul %172, %158, %cst_57 {dimension_numbers = #tpu.dot_dimension_numbers<[1], [0], [0], [1], [0, 0, 1, 1], [], []>} : vector<8x8xbf16>, vector<8x8xbf16>, vector<8x8xf32> -> vector<8x8xf32>
    %c0_58 = arith.constant 0 : index
    %c40 = arith.constant 40 : index
    %174 = vector.load %arg8[%c0_58, %c40] : memref<8x64xf32, #tpu.memory_space<vmem>>, vector<8x8xf32>
    tpu.vector_store %arg8[%c0_58, %c40], %173 {strides = array<i32>} : memref<8x64xf32, #tpu.memory_space<vmem>>, vector<8x8xf32>,
    %175 = vector.extract_strided_slice %42 {offsets = [0, 48], sizes = [8, 8], strides = [1, 1]} : vector<8x192xf32> to vector<8x8xf32>
    %176 = arith.truncf %175 : vector<8x8xf32> to vector<8x8xbf16>
    %177 = vector.extract_strided_slice %42 {offsets = [0, 112], sizes = [8, 8], strides = [1, 1]} : vector<8x192xf32> to vector<8x8xf32>
    %178 = arith.truncf %177 : vector<8x8xf32> to vector<8x8xbf16>
    %179 = vector.extract_strided_slice %42 {offsets = [0, 176], sizes = [8, 8], strides = [1, 1]} : vector<8x192xf32> to vector<8x8xf32>
    %180 = arith.truncf %179 : vector<8x8xf32> to vector<8x8xbf16>
    %cst_59 = arith.constant dense<0.000000e+00> : vector<8x8xf32>
    %181 = tpu.matmul %176, %178, %cst_59 {dimension_numbers = #tpu.dot_dimension_numbers<[1], [1], [0], [0], [0, 0, 1, 0], [], []>} : vector<8x8xbf16>, vector<8x8xbf16>, vector<8x8xf32> -> vector<8x8xf32>
    %cst_60 = arith.constant 0.353553385 : f32
    %182 = vector.broadcast %cst_60 : f32 to vector<8x8xf32>
    %183 = arith.mulf %181, %182 : vector<8x8xf32>
    %cst_61 = arith.constant dense<0xFF800000> : vector<8xf32>
    %184 = vector.multi_reduction <maximumf>, %183, %cst_61 [1] : vector<8x8xf32> to vector<8xf32>
    %185 = vector.shape_cast %184 : vector<8xf32> to vector<8x1xf32>
    %186 = vector.broadcast %185 : vector<8x1xf32> to vector<8x8xf32>
    %187 = arith.subf %183, %186 : vector<8x8xf32>
    %188 = math.exp %187 : vector<8x8xf32>
    %cst_62 = arith.constant dense<0.000000e+00> : vector<8xf32>
    %189 = vector.multi_reduction <add>, %188, %cst_62 [1] : vector<8x8xf32> to vector<8xf32>
    %190 = vector.shape_cast %189 : vector<8xf32> to vector<8x1xf32>
    %191 = tpu.reciprocal %190 {approx = true} : vector<8x1xf32> -> vector<8x1xf32>
    %192 = vector.broadcast %191 : vector<8x1xf32> to vector<8x8xf32>
    %193 = arith.mulf %188, %192 : vector<8x8xf32>
    %194 = arith.truncf %193 : vector<8x8xf32> to vector<8x8xbf16>
    %cst_63 = arith.constant dense<0.000000e+00> : vector<8x8xf32>
    %195 = tpu.matmul %194, %180, %cst_63 {dimension_numbers = #tpu.dot_dimension_numbers<[1], [0], [0], [1], [0, 0, 1, 1], [], []>} : vector<8x8xbf16>, vector<8x8xbf16>, vector<8x8xf32> -> vector<8x8xf32>
    %c0_64 = arith.constant 0 : index
    %c48 = arith.constant 48 : index
    %196 = vector.load %arg8[%c0_64, %c48] : memref<8x64xf32, #tpu.memory_space<vmem>>, vector<8x8xf32>
    tpu.vector_store %arg8[%c0_64, %c48], %195 {strides = array<i32>} : memref<8x64xf32, #tpu.memory_space<vmem>>, vector<8x8xf32>,
    %197 = vector.extract_strided_slice %42 {offsets = [0, 56], sizes = [8, 8], strides = [1, 1]} : vector<8x192xf32> to vector<8x8xf32>
    %198 = arith.truncf %197 : vector<8x8xf32> to vector<8x8xbf16>
    %199 = vector.extract_strided_slice %42 {offsets = [0, 120], sizes = [8, 8], strides = [1, 1]} : vector<8x192xf32> to vector<8x8xf32>
    %200 = arith.truncf %199 : vector<8x8xf32> to vector<8x8xbf16>
    %201 = vector.extract_strided_slice %42 {offsets = [0, 184], sizes = [8, 8], strides = [1, 1]} : vector<8x192xf32> to vector<8x8xf32>
    %202 = arith.truncf %201 : vector<8x8xf32> to vector<8x8xbf16>
    %cst_65 = arith.constant dense<0.000000e+00> : vector<8x8xf32>
    %203 = tpu.matmul %198, %200, %cst_65 {dimension_numbers = #tpu.dot_dimension_numbers<[1], [1], [0], [0], [0, 0, 1, 0], [], []>} : vector<8x8xbf16>, vector<8x8xbf16>, vector<8x8xf32> -> vector<8x8xf32>
    %cst_66 = arith.constant 0.353553385 : f32
    %204 = vector.broadcast %cst_66 : f32 to vector<8x8xf32>
    %205 = arith.mulf %203, %204 : vector<8x8xf32>
    %cst_67 = arith.constant dense<0xFF800000> : vector<8xf32>
    %206 = vector.multi_reduction <maximumf>, %205, %cst_67 [1] : vector<8x8xf32> to vector<8xf32>
    %207 = vector.shape_cast %206 : vector<8xf32> to vector<8x1xf32>
    %208 = vector.broadcast %207 : vector<8x1xf32> to vector<8x8xf32>
    %209 = arith.subf %205, %208 : vector<8x8xf32>
    %210 = math.exp %209 : vector<8x8xf32>
    %cst_68 = arith.constant dense<0.000000e+00> : vector<8xf32>
    %211 = vector.multi_reduction <add>, %210, %cst_68 [1] : vector<8x8xf32> to vector<8xf32>
    %212 = vector.shape_cast %211 : vector<8xf32> to vector<8x1xf32>
    %213 = tpu.reciprocal %212 {approx = true} : vector<8x1xf32> -> vector<8x1xf32>
    %214 = vector.broadcast %213 : vector<8x1xf32> to vector<8x8xf32>
    %215 = arith.mulf %210, %214 : vector<8x8xf32>
    %216 = arith.truncf %215 : vector<8x8xf32> to vector<8x8xbf16>
    %cst_69 = arith.constant dense<0.000000e+00> : vector<8x8xf32>
    %217 = tpu.matmul %216, %202, %cst_69 {dimension_numbers = #tpu.dot_dimension_numbers<[1], [0], [0], [1], [0, 0, 1, 1], [], []>} : vector<8x8xbf16>, vector<8x8xbf16>, vector<8x8xf32> -> vector<8x8xf32>
    %c0_70 = arith.constant 0 : index
    %c56 = arith.constant 56 : index
    %218 = vector.load %arg8[%c0_70, %c56] : memref<8x64xf32, #tpu.memory_space<vmem>>, vector<8x8xf32>
    tpu.vector_store %arg8[%c0_70, %c56], %217 {strides = array<i32>} : memref<8x64xf32, #tpu.memory_space<vmem>>, vector<8x8xf32>,
    %c0_71 = arith.constant 0 : index
    %c0_72 = arith.constant 0 : index
    %219 = vector.load %arg8[%c0_71, %c0_72] : memref<8x64xf32, #tpu.memory_space<vmem>>, vector<8x64xf32>
    %220 = arith.truncf %219 : vector<8x64xf32> to vector<8x64xbf16>
    %c0_73 = arith.constant 0 : index
    %c0_74 = arith.constant 0 : index
    %221 = vector.load %arg5[%c0_73, %c0_74] : memref<64x64xbf16, #tpu.memory_space<vmem>>, vector<64x64xbf16>
    %cst_75 = arith.constant dense<0.000000e+00> : vector<8x64xf32>
    %222 = tpu.matmul %220, %221, %cst_75 {dimension_numbers = #tpu.dot_dimension_numbers<[1], [0], [0], [1], [0, 0, 1, 1], [], []>} : vector<8x64xbf16>, vector<64x64xbf16>, vector<8x64xf32> -> vector<8x64xf32>
    %c0_76 = arith.constant 0 : index
    %c0_77 = arith.constant 0 : index
    %223 = vector.load %arg6[%c0_76, %c0_77] : memref<1x64xf32, #tpu.memory_space<vmem>>, vector<1x64xf32>
    %224 = vector.broadcast %223 : vector<1x64xf32> to vector<8x64xf32>
    %225 = arith.addf %222, %224 : vector<8x64xf32>
    %226 = vector.extract_strided_slice %225 {offsets = [0, 0], sizes = [8, 32], strides = [1, 1]} : vector<8x64xf32> to vector<8x32xf32>
    %227 = arith.addf %226, %1 : vector<8x32xf32>
    %c0_78 = arith.constant 0 : index
    %c0_79 = arith.constant 0 : index
    %c0_80 = arith.constant 0 : index
    %228 = vector.load %arg7[%c0_78, %c0_79, %c0_80] : memref<1x8x64xf32, #tpu.memory_space<vmem>>, vector<1x8x32xf32>
    %229 = vector.shape_cast %228 : vector<1x8x32xf32> to vector<8x32xf32>
    %230 = vector.shape_cast %227 : vector<8x32xf32> to vector<1x8x32xf32>
    tpu.vector_store %arg7[%c0_78, %c0_79, %c0_80], %230 {strides = array<i32>} : memref<1x8x64xf32, #tpu.memory_space<vmem>>, vector<1x8x32xf32>,
    %231 = vector.extract_strided_slice %225 {offsets = [0, 32], sizes = [8, 32], strides = [1, 1]} : vector<8x64xf32> to vector<8x32xf32>
    %232 = arith.addf %231, %1 : vector<8x32xf32>
    %c0_81 = arith.constant 0 : index
    %c0_82 = arith.constant 0 : index
    %c32_83 = arith.constant 32 : index
    %233 = vector.load %arg7[%c0_81, %c0_82, %c32_83] : memref<1x8x64xf32, #tpu.memory_space<vmem>>, vector<1x8x32xf32>
    %234 = vector.shape_cast %233 : vector<1x8x32xf32> to vector<8x32xf32>
    %235 = vector.shape_cast %232 : vector<8x32xf32> to vector<1x8x32xf32>
    tpu.vector_store %arg7[%c0_81, %c0_82, %c32_83], %235 {strides = array<i32>} : memref<1x8x64xf32, #tpu.memory_space<vmem>>, vector<1x8x32xf32>,
    return
  }
  func.func @transform_0(%arg0: i32) -> (i32, i32, i32) {
    %c0_i32 = arith.constant 0 : i32
    %c0_i32_0 = arith.constant 0 : i32
    %c0_i32_1 = arith.constant 0 : i32
    return %arg0, %c0_i32, %c0_i32_0 : i32, i32, i32
  }
  func.func @transform_1(%arg0: i32) -> (i32, i32) {
    %c0_i32 = arith.constant 0 : i32
    %c0_i32_0 = arith.constant 0 : i32
    %c0_i32_1 = arith.constant 0 : i32
    return %c0_i32, %c0_i32_0 : i32, i32
  }
  func.func @transform_2(%arg0: i32) -> (i32, i32) {
    %c0_i32 = arith.constant 0 : i32
    %c0_i32_0 = arith.constant 0 : i32
    %c0_i32_1 = arith.constant 0 : i32
    return %c0_i32, %c0_i32_0 : i32, i32
  }
  func.func @transform_3(%arg0: i32) -> (i32, i32) {
    %c0_i32 = arith.constant 0 : i32
    %c0_i32_0 = arith.constant 0 : i32
    %c0_i32_1 = arith.constant 0 : i32
    return %c0_i32, %c0_i32_0 : i32, i32
  }
  func.func @transform_4(%arg0: i32) -> (i32, i32) {
    %c0_i32 = arith.constant 0 : i32
    %c0_i32_0 = arith.constant 0 : i32
    %c0_i32_1 = arith.constant 0 : i32
    return %c0_i32, %c0_i32_0 : i32, i32
  }
  func.func @transform_5(%arg0: i32) -> (i32, i32) {
    %c0_i32 = arith.constant 0 : i32
    %c0_i32_0 = arith.constant 0 : i32
    %c0_i32_1 = arith.constant 0 : i32
    return %c0_i32, %c0_i32_0 : i32, i32
  }
  func.func @transform_6(%arg0: i32) -> (i32, i32, i32) {
    %c0_i32 = arith.constant 0 : i32
    %c0_i32_0 = arith.constant 0 : i32
    %c0_i32_1 = arith.constant 0 : i32
    return %arg0, %c0_i32, %c0_i32_0 : i32, i32, i32
  }
}

module attributes {stable_mosaic.version = 11 : i64} {
  func.func @_ln_ff_kernel(%arg0: i32, %arg1: memref<16x64xf32, #tpu.memory_space<vmem>>, %arg2: memref<1x64xf32, #tpu.memory_space<vmem>>, %arg3: memref<1x64xf32, #tpu.memory_space<vmem>>, %arg4: memref<2x32x64xbf16, #tpu.memory_space<vmem>>, %arg5: memref<2x1x64xf32, #tpu.memory_space<vmem>>, %arg6: memref<2x64x32xbf16, #tpu.memory_space<vmem>>, %arg7: memref<2x1x32xf32, #tpu.memory_space<vmem>>, %arg8: memref<16x64xf32, #tpu.memory_space<vmem>>) attributes {dimension_semantics = [#tpu.dimension_semantics<parallel>], iteration_bounds = array<i64: 1>, scalar_prefetch = 0 : i64, scratch_operands = 0 : i64, tpu.core_type = #tpu.core_type<tc>, window_params = [{transform_indices = @transform_0, window_bounds = array<i64: 16, 64>}, {pipeline_mode = #tpu.pipeline_mode<synchronous>, transform_indices = @transform_1, window_bounds = array<i64: 1, 64>}, {pipeline_mode = #tpu.pipeline_mode<synchronous>, transform_indices = @transform_2, window_bounds = array<i64: 1, 64>}, {pipeline_mode = #tpu.pipeline_mode<synchronous>, transform_indices = @transform_3, window_bounds = array<i64: 2, 32, 64>}, {pipeline_mode = #tpu.pipeline_mode<synchronous>, transform_indices = @transform_4, window_bounds = array<i64: 2, 1, 64>}, {pipeline_mode = #tpu.pipeline_mode<synchronous>, transform_indices = @transform_5, window_bounds = array<i64: 2, 64, 32>}, {pipeline_mode = #tpu.pipeline_mode<synchronous>, transform_indices = @transform_6, window_bounds = array<i64: 2, 1, 32>}, {transform_indices = @transform_7, window_bounds = array<i64: 16, 64>}]} {
    %c0 = arith.constant 0 : index
    %c0_0 = arith.constant 0 : index
    %0 = vector.load %arg1[%c0, %c0_0] : memref<16x64xf32, #tpu.memory_space<vmem>>, vector<16x64xf32>
    %1 = vector.extract_strided_slice %0 {offsets = [0, 0], sizes = [16, 32], strides = [1, 1]} : vector<16x64xf32> to vector<16x32xf32>
    %cst = arith.constant dense<0.000000e+00> : vector<16xf32>
    %2 = vector.multi_reduction <add>, %1, %cst [1] : vector<16x32xf32> to vector<16xf32>
    %3 = vector.shape_cast %2 : vector<16xf32> to vector<16x1xf32>
    %cst_1 = arith.constant 3.200000e+01 : f32
    %4 = vector.broadcast %cst_1 : f32 to vector<16x1xf32>
    %5 = arith.divf %3, %4 : vector<16x1xf32>
    %6 = vector.broadcast %5 : vector<16x1xf32> to vector<16x32xf32>
    %7 = arith.subf %1, %6 : vector<16x32xf32>
    %8 = arith.mulf %7, %7 : vector<16x32xf32>
    %cst_2 = arith.constant dense<0.000000e+00> : vector<16xf32>
    %9 = vector.multi_reduction <add>, %8, %cst_2 [1] : vector<16x32xf32> to vector<16xf32>
    %10 = vector.shape_cast %9 : vector<16xf32> to vector<16x1xf32>
    %cst_3 = arith.constant 3.200000e+01 : f32
    %11 = vector.broadcast %cst_3 : f32 to vector<16x1xf32>
    %12 = arith.divf %10, %11 : vector<16x1xf32>
    %13 = vector.broadcast %5 : vector<16x1xf32> to vector<16x32xf32>
    %14 = arith.subf %1, %13 : vector<16x32xf32>
    %15 = math.sqrt %12 : vector<16x1xf32>
    %cst_4 = arith.constant 9.99999974E-6 : f32
    %16 = vector.broadcast %cst_4 : f32 to vector<16x1xf32>
    %17 = arith.addf %15, %16 : vector<16x1xf32>
    %cst_5 = arith.constant 1.000000e+00 : f32
    %18 = vector.broadcast %cst_5 : f32 to vector<16x1xf32>
    %19 = arith.divf %18, %17 : vector<16x1xf32>
    %20 = vector.broadcast %19 : vector<16x1xf32> to vector<16x32xf32>
    %21 = arith.mulf %14, %20 : vector<16x32xf32>
    %c0_6 = arith.constant 0 : index
    %c0_7 = arith.constant 0 : index
    %22 = vector.load %arg2[%c0_6, %c0_7] : memref<1x64xf32, #tpu.memory_space<vmem>>, vector<1x32xf32>
    %23 = vector.broadcast %22 : vector<1x32xf32> to vector<16x32xf32>
    %24 = arith.mulf %21, %23 : vector<16x32xf32>
    %c0_8 = arith.constant 0 : index
    %c0_9 = arith.constant 0 : index
    %25 = vector.load %arg3[%c0_8, %c0_9] : memref<1x64xf32, #tpu.memory_space<vmem>>, vector<1x32xf32>
    %26 = vector.broadcast %25 : vector<1x32xf32> to vector<16x32xf32>
    %27 = arith.addf %24, %26 : vector<16x32xf32>
    %28 = arith.truncf %27 : vector<16x32xf32> to vector<16x32xbf16>
    %c0_10 = arith.constant 0 : index
    %c0_11 = arith.constant 0 : index
    %c0_12 = arith.constant 0 : index
    %29 = vector.load %arg4[%c0_10, %c0_11, %c0_12] : memref<2x32x64xbf16, #tpu.memory_space<vmem>>, vector<1x32x64xbf16>
    %30 = vector.shape_cast %29 : vector<1x32x64xbf16> to vector<32x64xbf16>
    %cst_13 = arith.constant dense<0.000000e+00> : vector<16x64xf32>
    %31 = tpu.matmul %28, %30, %cst_13 {dimension_numbers = #tpu.dot_dimension_numbers<[1], [0], [0], [1], [0, 0, 1, 1], [], []>} : vector<16x32xbf16>, vector<32x64xbf16>, vector<16x64xf32> -> vector<16x64xf32>
    %c0_14 = arith.constant 0 : index
    %c0_15 = arith.constant 0 : index
    %c0_16 = arith.constant 0 : index
    %32 = vector.load %arg5[%c0_14, %c0_15, %c0_16] : memref<2x1x64xf32, #tpu.memory_space<vmem>>, vector<1x1x64xf32>
    %33 = vector.shape_cast %32 : vector<1x1x64xf32> to vector<1x64xf32>
    %34 = vector.broadcast %33 : vector<1x64xf32> to vector<16x64xf32>
    %35 = arith.addf %31, %34 : vector<16x64xf32>
    %36 = arith.mulf %35, %35 : vector<16x64xf32>
    %37 = arith.mulf %35, %36 : vector<16x64xf32>
    %cst_17 = arith.constant 4.471500e-02 : f32
    %38 = vector.broadcast %cst_17 : f32 to vector<16x64xf32>
    %39 = arith.mulf %38, %37 : vector<16x64xf32>
    %40 = arith.addf %35, %39 : vector<16x64xf32>
    %cst_18 = arith.constant 0.797884583 : f32
    %41 = vector.broadcast %cst_18 : f32 to vector<16x64xf32>
    %42 = arith.mulf %41, %40 : vector<16x64xf32>
    %43 = math.tanh %42 : vector<16x64xf32>
    %cst_19 = arith.constant 1.000000e+00 : f32
    %44 = vector.broadcast %cst_19 : f32 to vector<16x64xf32>
    %45 = arith.addf %44, %43 : vector<16x64xf32>
    %cst_20 = arith.constant 5.000000e-01 : f32
    %46 = vector.broadcast %cst_20 : f32 to vector<16x64xf32>
    %47 = arith.mulf %46, %45 : vector<16x64xf32>
    %48 = arith.mulf %35, %47 : vector<16x64xf32>
    %49 = arith.truncf %48 : vector<16x64xf32> to vector<16x64xbf16>
    %c0_21 = arith.constant 0 : index
    %c0_22 = arith.constant 0 : index
    %c0_23 = arith.constant 0 : index
    %50 = vector.load %arg6[%c0_21, %c0_22, %c0_23] : memref<2x64x32xbf16, #tpu.memory_space<vmem>>, vector<1x64x32xbf16>
    %51 = vector.shape_cast %50 : vector<1x64x32xbf16> to vector<64x32xbf16>
    %cst_24 = arith.constant dense<0.000000e+00> : vector<16x32xf32>
    %52 = tpu.matmul %49, %51, %cst_24 {dimension_numbers = #tpu.dot_dimension_numbers<[1], [0], [0], [1], [0, 0, 1, 1], [], []>} : vector<16x64xbf16>, vector<64x32xbf16>, vector<16x32xf32> -> vector<16x32xf32>
    %c0_25 = arith.constant 0 : index
    %c0_26 = arith.constant 0 : index
    %c0_27 = arith.constant 0 : index
    %53 = vector.load %arg7[%c0_25, %c0_26, %c0_27] : memref<2x1x32xf32, #tpu.memory_space<vmem>>, vector<1x1x32xf32>
    %54 = vector.shape_cast %53 : vector<1x1x32xf32> to vector<1x32xf32>
    %55 = vector.broadcast %54 : vector<1x32xf32> to vector<16x32xf32>
    %56 = arith.addf %52, %55 : vector<16x32xf32>
    %57 = arith.addf %56, %1 : vector<16x32xf32>
    %c0_28 = arith.constant 0 : index
    %c0_29 = arith.constant 0 : index
    %58 = vector.load %arg8[%c0_28, %c0_29] : memref<16x64xf32, #tpu.memory_space<vmem>>, vector<16x32xf32>
    tpu.vector_store %arg8[%c0_28, %c0_29], %57 {strides = array<i32>} : memref<16x64xf32, #tpu.memory_space<vmem>>, vector<16x32xf32>,
    %59 = vector.extract_strided_slice %0 {offsets = [0, 32], sizes = [16, 32], strides = [1, 1]} : vector<16x64xf32> to vector<16x32xf32>
    %cst_30 = arith.constant dense<0.000000e+00> : vector<16xf32>
    %60 = vector.multi_reduction <add>, %59, %cst_30 [1] : vector<16x32xf32> to vector<16xf32>
    %61 = vector.shape_cast %60 : vector<16xf32> to vector<16x1xf32>
    %cst_31 = arith.constant 3.200000e+01 : f32
    %62 = vector.broadcast %cst_31 : f32 to vector<16x1xf32>
    %63 = arith.divf %61, %62 : vector<16x1xf32>
    %64 = vector.broadcast %63 : vector<16x1xf32> to vector<16x32xf32>
    %65 = arith.subf %59, %64 : vector<16x32xf32>
    %66 = arith.mulf %65, %65 : vector<16x32xf32>
    %cst_32 = arith.constant dense<0.000000e+00> : vector<16xf32>
    %67 = vector.multi_reduction <add>, %66, %cst_32 [1] : vector<16x32xf32> to vector<16xf32>
    %68 = vector.shape_cast %67 : vector<16xf32> to vector<16x1xf32>
    %cst_33 = arith.constant 3.200000e+01 : f32
    %69 = vector.broadcast %cst_33 : f32 to vector<16x1xf32>
    %70 = arith.divf %68, %69 : vector<16x1xf32>
    %71 = vector.broadcast %63 : vector<16x1xf32> to vector<16x32xf32>
    %72 = arith.subf %59, %71 : vector<16x32xf32>
    %73 = math.sqrt %70 : vector<16x1xf32>
    %cst_34 = arith.constant 9.99999974E-6 : f32
    %74 = vector.broadcast %cst_34 : f32 to vector<16x1xf32>
    %75 = arith.addf %73, %74 : vector<16x1xf32>
    %cst_35 = arith.constant 1.000000e+00 : f32
    %76 = vector.broadcast %cst_35 : f32 to vector<16x1xf32>
    %77 = arith.divf %76, %75 : vector<16x1xf32>
    %78 = vector.broadcast %77 : vector<16x1xf32> to vector<16x32xf32>
    %79 = arith.mulf %72, %78 : vector<16x32xf32>
    %c0_36 = arith.constant 0 : index
    %c32 = arith.constant 32 : index
    %80 = vector.load %arg2[%c0_36, %c32] : memref<1x64xf32, #tpu.memory_space<vmem>>, vector<1x32xf32>
    %81 = vector.broadcast %80 : vector<1x32xf32> to vector<16x32xf32>
    %82 = arith.mulf %79, %81 : vector<16x32xf32>
    %c0_37 = arith.constant 0 : index
    %c32_38 = arith.constant 32 : index
    %83 = vector.load %arg3[%c0_37, %c32_38] : memref<1x64xf32, #tpu.memory_space<vmem>>, vector<1x32xf32>
    %84 = vector.broadcast %83 : vector<1x32xf32> to vector<16x32xf32>
    %85 = arith.addf %82, %84 : vector<16x32xf32>
    %86 = arith.truncf %85 : vector<16x32xf32> to vector<16x32xbf16>
    %c1 = arith.constant 1 : index
    %c0_39 = arith.constant 0 : index
    %c0_40 = arith.constant 0 : index
    %87 = vector.load %arg4[%c1, %c0_39, %c0_40] : memref<2x32x64xbf16, #tpu.memory_space<vmem>>, vector<1x32x64xbf16>
    %88 = vector.shape_cast %87 : vector<1x32x64xbf16> to vector<32x64xbf16>
    %cst_41 = arith.constant dense<0.000000e+00> : vector<16x64xf32>
    %89 = tpu.matmul %86, %88, %cst_41 {dimension_numbers = #tpu.dot_dimension_numbers<[1], [0], [0], [1], [0, 0, 1, 1], [], []>} : vector<16x32xbf16>, vector<32x64xbf16>, vector<16x64xf32> -> vector<16x64xf32>
    %c1_42 = arith.constant 1 : index
    %c0_43 = arith.constant 0 : index
    %c0_44 = arith.constant 0 : index
    %90 = vector.load %arg5[%c1_42, %c0_43, %c0_44] : memref<2x1x64xf32, #tpu.memory_space<vmem>>, vector<1x1x64xf32>
    %91 = vector.shape_cast %90 : vector<1x1x64xf32> to vector<1x64xf32>
    %92 = vector.broadcast %91 : vector<1x64xf32> to vector<16x64xf32>
    %93 = arith.addf %89, %92 : vector<16x64xf32>
    %94 = arith.mulf %93, %93 : vector<16x64xf32>
    %95 = arith.mulf %93, %94 : vector<16x64xf32>
    %cst_45 = arith.constant 4.471500e-02 : f32
    %96 = vector.broadcast %cst_45 : f32 to vector<16x64xf32>
    %97 = arith.mulf %96, %95 : vector<16x64xf32>
    %98 = arith.addf %93, %97 : vector<16x64xf32>
    %cst_46 = arith.constant 0.797884583 : f32
    %99 = vector.broadcast %cst_46 : f32 to vector<16x64xf32>
    %100 = arith.mulf %99, %98 : vector<16x64xf32>
    %101 = math.tanh %100 : vector<16x64xf32>
    %cst_47 = arith.constant 1.000000e+00 : f32
    %102 = vector.broadcast %cst_47 : f32 to vector<16x64xf32>
    %103 = arith.addf %102, %101 : vector<16x64xf32>
    %cst_48 = arith.constant 5.000000e-01 : f32
    %104 = vector.broadcast %cst_48 : f32 to vector<16x64xf32>
    %105 = arith.mulf %104, %103 : vector<16x64xf32>
    %106 = arith.mulf %93, %105 : vector<16x64xf32>
    %107 = arith.truncf %106 : vector<16x64xf32> to vector<16x64xbf16>
    %c1_49 = arith.constant 1 : index
    %c0_50 = arith.constant 0 : index
    %c0_51 = arith.constant 0 : index
    %108 = vector.load %arg6[%c1_49, %c0_50, %c0_51] : memref<2x64x32xbf16, #tpu.memory_space<vmem>>, vector<1x64x32xbf16>
    %109 = vector.shape_cast %108 : vector<1x64x32xbf16> to vector<64x32xbf16>
    %cst_52 = arith.constant dense<0.000000e+00> : vector<16x32xf32>
    %110 = tpu.matmul %107, %109, %cst_52 {dimension_numbers = #tpu.dot_dimension_numbers<[1], [0], [0], [1], [0, 0, 1, 1], [], []>} : vector<16x64xbf16>, vector<64x32xbf16>, vector<16x32xf32> -> vector<16x32xf32>
    %c1_53 = arith.constant 1 : index
    %c0_54 = arith.constant 0 : index
    %c0_55 = arith.constant 0 : index
    %111 = vector.load %arg7[%c1_53, %c0_54, %c0_55] : memref<2x1x32xf32, #tpu.memory_space<vmem>>, vector<1x1x32xf32>
    %112 = vector.shape_cast %111 : vector<1x1x32xf32> to vector<1x32xf32>
    %113 = vector.broadcast %112 : vector<1x32xf32> to vector<16x32xf32>
    %114 = arith.addf %110, %113 : vector<16x32xf32>
    %115 = arith.addf %114, %59 : vector<16x32xf32>
    %c0_56 = arith.constant 0 : index
    %c32_57 = arith.constant 32 : index
    %116 = vector.load %arg8[%c0_56, %c32_57] : memref<16x64xf32, #tpu.memory_space<vmem>>, vector<16x32xf32>
    tpu.vector_store %arg8[%c0_56, %c32_57], %115 {strides = array<i32>} : memref<16x64xf32, #tpu.memory_space<vmem>>, vector<16x32xf32>,
    return
  }
  func.func @transform_0(%arg0: i32) -> (i32, i32) {
    %c0_i32 = arith.constant 0 : i32
    %c0_i32_0 = arith.constant 0 : i32
    return %arg0, %c0_i32 : i32, i32
  }
  func.func @transform_1(%arg0: i32) -> (i32, i32) {
    %c0_i32 = arith.constant 0 : i32
    %c0_i32_0 = arith.constant 0 : i32
    %c0_i32_1 = arith.constant 0 : i32
    return %c0_i32, %c0_i32_0 : i32, i32
  }
  func.func @transform_2(%arg0: i32) -> (i32, i32) {
    %c0_i32 = arith.constant 0 : i32
    %c0_i32_0 = arith.constant 0 : i32
    %c0_i32_1 = arith.constant 0 : i32
    return %c0_i32, %c0_i32_0 : i32, i32
  }
  func.func @transform_3(%arg0: i32) -> (i32, i32, i32) {
    %c0_i32 = arith.constant 0 : i32
    %c0_i32_0 = arith.constant 0 : i32
    %c0_i32_1 = arith.constant 0 : i32
    %c0_i32_2 = arith.constant 0 : i32
    return %c0_i32, %c0_i32_0, %c0_i32_1 : i32, i32, i32
  }
  func.func @transform_4(%arg0: i32) -> (i32, i32, i32) {
    %c0_i32 = arith.constant 0 : i32
    %c0_i32_0 = arith.constant 0 : i32
    %c0_i32_1 = arith.constant 0 : i32
    %c0_i32_2 = arith.constant 0 : i32
    return %c0_i32, %c0_i32_0, %c0_i32_1 : i32, i32, i32
  }
  func.func @transform_5(%arg0: i32) -> (i32, i32, i32) {
    %c0_i32 = arith.constant 0 : i32
    %c0_i32_0 = arith.constant 0 : i32
    %c0_i32_1 = arith.constant 0 : i32
    %c0_i32_2 = arith.constant 0 : i32
    return %c0_i32, %c0_i32_0, %c0_i32_1 : i32, i32, i32
  }
  func.func @transform_6(%arg0: i32) -> (i32, i32, i32) {
    %c0_i32 = arith.constant 0 : i32
    %c0_i32_0 = arith.constant 0 : i32
    %c0_i32_1 = arith.constant 0 : i32
    %c0_i32_2 = arith.constant 0 : i32
    return %c0_i32, %c0_i32_0, %c0_i32_1 : i32, i32, i32
  }
  func.func @transform_7(%arg0: i32) -> (i32, i32) {
    %c0_i32 = arith.constant 0 : i32
    %c0_i32_0 = arith.constant 0 : i32
    return %arg0, %c0_i32 : i32, i32
  }
}

module attributes {stable_mosaic.version = 11 : i64} {
  func.func @_ln_linear_kernel(%arg0: i32, %arg1: memref<16x32xf32, #tpu.memory_space<vmem>>, %arg2: memref<1x32xf32, #tpu.memory_space<vmem>>, %arg3: memref<1x32xf32, #tpu.memory_space<vmem>>, %arg4: memref<32x64xbf16, #tpu.memory_space<vmem>>, %arg5: memref<1x64xf32, #tpu.memory_space<vmem>>, %arg6: memref<16x64xf32, #tpu.memory_space<vmem>>) attributes {dimension_semantics = [#tpu.dimension_semantics<parallel>], iteration_bounds = array<i64: 1>, scalar_prefetch = 0 : i64, scratch_operands = 0 : i64, tpu.core_type = #tpu.core_type<tc>, window_params = [{transform_indices = @transform_0, window_bounds = array<i64: 16, 32>}, {pipeline_mode = #tpu.pipeline_mode<synchronous>, transform_indices = @transform_1, window_bounds = array<i64: 1, 32>}, {pipeline_mode = #tpu.pipeline_mode<synchronous>, transform_indices = @transform_2, window_bounds = array<i64: 1, 32>}, {pipeline_mode = #tpu.pipeline_mode<synchronous>, transform_indices = @transform_3, window_bounds = array<i64: 32, 64>}, {pipeline_mode = #tpu.pipeline_mode<synchronous>, transform_indices = @transform_4, window_bounds = array<i64: 1, 64>}, {transform_indices = @transform_5, window_bounds = array<i64: 16, 64>}]} {
    %c0 = arith.constant 0 : index
    %c0_0 = arith.constant 0 : index
    %0 = vector.load %arg1[%c0, %c0_0] : memref<16x32xf32, #tpu.memory_space<vmem>>, vector<16x32xf32>
    %cst = arith.constant dense<0.000000e+00> : vector<16xf32>
    %1 = vector.multi_reduction <add>, %0, %cst [1] : vector<16x32xf32> to vector<16xf32>
    %2 = vector.shape_cast %1 : vector<16xf32> to vector<16x1xf32>
    %cst_1 = arith.constant 3.200000e+01 : f32
    %3 = vector.broadcast %cst_1 : f32 to vector<16x1xf32>
    %4 = arith.divf %2, %3 : vector<16x1xf32>
    %5 = vector.broadcast %4 : vector<16x1xf32> to vector<16x32xf32>
    %6 = arith.subf %0, %5 : vector<16x32xf32>
    %7 = arith.mulf %6, %6 : vector<16x32xf32>
    %cst_2 = arith.constant dense<0.000000e+00> : vector<16xf32>
    %8 = vector.multi_reduction <add>, %7, %cst_2 [1] : vector<16x32xf32> to vector<16xf32>
    %9 = vector.shape_cast %8 : vector<16xf32> to vector<16x1xf32>
    %cst_3 = arith.constant 3.200000e+01 : f32
    %10 = vector.broadcast %cst_3 : f32 to vector<16x1xf32>
    %11 = arith.divf %9, %10 : vector<16x1xf32>
    %12 = vector.broadcast %4 : vector<16x1xf32> to vector<16x32xf32>
    %13 = arith.subf %0, %12 : vector<16x32xf32>
    %cst_4 = arith.constant 9.99999974E-6 : f32
    %14 = vector.broadcast %cst_4 : f32 to vector<16x1xf32>
    %15 = arith.addf %11, %14 : vector<16x1xf32>
    %16 = math.rsqrt %15 : vector<16x1xf32>
    %17 = vector.broadcast %16 : vector<16x1xf32> to vector<16x32xf32>
    %18 = arith.mulf %13, %17 : vector<16x32xf32>
    %c0_5 = arith.constant 0 : index
    %c0_6 = arith.constant 0 : index
    %19 = vector.load %arg2[%c0_5, %c0_6] : memref<1x32xf32, #tpu.memory_space<vmem>>, vector<1x32xf32>
    %20 = vector.broadcast %19 : vector<1x32xf32> to vector<16x32xf32>
    %21 = arith.mulf %18, %20 : vector<16x32xf32>
    %c0_7 = arith.constant 0 : index
    %c0_8 = arith.constant 0 : index
    %22 = vector.load %arg3[%c0_7, %c0_8] : memref<1x32xf32, #tpu.memory_space<vmem>>, vector<1x32xf32>
    %23 = vector.broadcast %22 : vector<1x32xf32> to vector<16x32xf32>
    %24 = arith.addf %21, %23 : vector<16x32xf32>
    %25 = arith.truncf %24 : vector<16x32xf32> to vector<16x32xbf16>
    %c0_9 = arith.constant 0 : index
    %c0_10 = arith.constant 0 : index
    %26 = vector.load %arg4[%c0_9, %c0_10] : memref<32x64xbf16, #tpu.memory_space<vmem>>, vector<32x64xbf16>
    %cst_11 = arith.constant dense<0.000000e+00> : vector<16x64xf32>
    %27 = tpu.matmul %25, %26, %cst_11 {dimension_numbers = #tpu.dot_dimension_numbers<[1], [0], [0], [1], [0, 0, 1, 1], [], []>} : vector<16x32xbf16>, vector<32x64xbf16>, vector<16x64xf32> -> vector<16x64xf32>
    %c0_12 = arith.constant 0 : index
    %c0_13 = arith.constant 0 : index
    %28 = vector.load %arg5[%c0_12, %c0_13] : memref<1x64xf32, #tpu.memory_space<vmem>>, vector<1x64xf32>
    %29 = vector.broadcast %28 : vector<1x64xf32> to vector<16x64xf32>
    %30 = arith.addf %27, %29 : vector<16x64xf32>
    %c0_14 = arith.constant 0 : index
    %c0_15 = arith.constant 0 : index
    %31 = vector.load %arg6[%c0_14, %c0_15] : memref<16x64xf32, #tpu.memory_space<vmem>>, vector<16x64xf32>
    tpu.vector_store %arg6[%c0_14, %c0_15], %30 {strides = array<i32>} : memref<16x64xf32, #tpu.memory_space<vmem>>, vector<16x64xf32>,
    return
  }
  func.func @transform_0(%arg0: i32) -> (i32, i32) {
    %c0_i32 = arith.constant 0 : i32
    %c0_i32_0 = arith.constant 0 : i32
    return %arg0, %c0_i32 : i32, i32
  }
  func.func @transform_1(%arg0: i32) -> (i32, i32) {
    %c0_i32 = arith.constant 0 : i32
    %c0_i32_0 = arith.constant 0 : i32
    %c0_i32_1 = arith.constant 0 : i32
    return %c0_i32, %c0_i32_0 : i32, i32
  }
  func.func @transform_2(%arg0: i32) -> (i32, i32) {
    %c0_i32 = arith.constant 0 : i32
    %c0_i32_0 = arith.constant 0 : i32
    %c0_i32_1 = arith.constant 0 : i32
    return %c0_i32, %c0_i32_0 : i32, i32
  }
  func.func @transform_3(%arg0: i32) -> (i32, i32) {
    %c0_i32 = arith.constant 0 : i32
    %c0_i32_0 = arith.constant 0 : i32
    %c0_i32_1 = arith.constant 0 : i32
    return %c0_i32, %c0_i32_0 : i32, i32
  }
  func.func @transform_4(%arg0: i32) -> (i32, i32) {
    %c0_i32 = arith.constant 0 : i32
    %c0_i32_0 = arith.constant 0 : i32
    %c0_i32_1 = arith.constant 0 : i32
    return %c0_i32, %c0_i32_0 : i32, i32
  }
  func.func @transform_5(%arg0: i32) -> (i32, i32) {
    %c0_i32 = arith.constant 0 : i32
    %c0_i32_0 = arith.constant 0 : i32
    return %arg0, %c0_i32 : i32, i32
  }
}

module attributes {stable_mosaic.version = 11 : i64} {
  func.func @_attn_pool_kernel(%arg0: i32, %arg1: memref<5x16x32xf32, #tpu.memory_space<vmem>>, %arg2: memref<32x64xbf16, #tpu.memory_space<vmem>>, %arg3: memref<32x4xbf16, #tpu.memory_space<vmem>>, %arg4: memref<4x32xbf16, #tpu.memory_space<vmem>>, %arg5: memref<32x32xbf16, #tpu.memory_space<vmem>>, %arg6: memref<1x32xf32, #tpu.memory_space<vmem>>, %arg7: memref<16x32xf32, #tpu.memory_space<vmem>>) attributes {dimension_semantics = [#tpu.dimension_semantics<parallel>], iteration_bounds = array<i64: 1>, scalar_prefetch = 0 : i64, scratch_operands = 0 : i64, tpu.core_type = #tpu.core_type<tc>, window_params = [{transform_indices = @transform_0, window_bounds = array<i64: 5, 16, 32>}, {pipeline_mode = #tpu.pipeline_mode<synchronous>, transform_indices = @transform_1, window_bounds = array<i64: 32, 64>}, {pipeline_mode = #tpu.pipeline_mode<synchronous>, transform_indices = @transform_2, window_bounds = array<i64: 32, 4>}, {pipeline_mode = #tpu.pipeline_mode<synchronous>, transform_indices = @transform_3, window_bounds = array<i64: 4, 32>}, {pipeline_mode = #tpu.pipeline_mode<synchronous>, transform_indices = @transform_4, window_bounds = array<i64: 32, 32>}, {pipeline_mode = #tpu.pipeline_mode<synchronous>, transform_indices = @transform_5, window_bounds = array<i64: 1, 32>}, {transform_indices = @transform_6, window_bounds = array<i64: 16, 32>}]} {
    %c0 = arith.constant 0 : index
    %c0_0 = arith.constant 0 : index
    %c0_1 = arith.constant 0 : index
    %0 = vector.load %arg1[%c0, %c0_0, %c0_1] : memref<5x16x32xf32, #tpu.memory_space<vmem>>, vector<1x16x32xf32>
    %1 = vector.shape_cast %0 : vector<1x16x32xf32> to vector<16x32xf32>
    %2 = arith.truncf %1 : vector<16x32xf32> to vector<16x32xbf16>
    %c0_2 = arith.constant 0 : index
    %c0_3 = arith.constant 0 : index
    %3 = vector.load %arg2[%c0_2, %c0_3] : memref<32x64xbf16, #tpu.memory_space<vmem>>, vector<32x64xbf16>
    %cst = arith.constant dense<0.000000e+00> : vector<16x64xf32>
    %4 = tpu.matmul %2, %3, %cst {dimension_numbers = #tpu.dot_dimension_numbers<[1], [0], [0], [1], [0, 0, 1, 1], [], []>} : vector<16x32xbf16>, vector<32x64xbf16>, vector<16x64xf32> -> vector<16x64xf32>
    %5 = vector.extract_strided_slice %4 {offsets = [0, 0], sizes = [16, 32], strides = [1, 1]} : vector<16x64xf32> to vector<16x32xf32>
    %6 = arith.truncf %5 : vector<16x32xf32> to vector<16x32xbf16>
    %c0_4 = arith.constant 0 : index
    %c0_5 = arith.constant 0 : index
    %7 = vector.load %arg3[%c0_4, %c0_5] : memref<32x4xbf16, #tpu.memory_space<vmem>>, vector<32x4xbf16>
    %cst_6 = arith.constant dense<0.000000e+00> : vector<16x4xf32>
    %8 = tpu.matmul %6, %7, %cst_6 {dimension_numbers = #tpu.dot_dimension_numbers<[1], [0], [0], [1], [0, 0, 1, 1], [], []>} : vector<16x32xbf16>, vector<32x4xbf16>, vector<16x4xf32> -> vector<16x4xf32>
    %9 = vector.extract_strided_slice %4 {offsets = [0, 32], sizes = [16, 32], strides = [1, 1]} : vector<16x64xf32> to vector<16x32xf32>
    %c1 = arith.constant 1 : index
    %c0_7 = arith.constant 0 : index
    %c0_8 = arith.constant 0 : index
    %10 = vector.load %arg1[%c1, %c0_7, %c0_8] : memref<5x16x32xf32, #tpu.memory_space<vmem>>, vector<1x16x32xf32>
    %11 = vector.shape_cast %10 : vector<1x16x32xf32> to vector<16x32xf32>
    %12 = arith.truncf %11 : vector<16x32xf32> to vector<16x32xbf16>
    %c0_9 = arith.constant 0 : index
    %c0_10 = arith.constant 0 : index
    %13 = vector.load %arg2[%c0_9, %c0_10] : memref<32x64xbf16, #tpu.memory_space<vmem>>, vector<32x64xbf16>
    %cst_11 = arith.constant dense<0.000000e+00> : vector<16x64xf32>
    %14 = tpu.matmul %12, %13, %cst_11 {dimension_numbers = #tpu.dot_dimension_numbers<[1], [0], [0], [1], [0, 0, 1, 1], [], []>} : vector<16x32xbf16>, vector<32x64xbf16>, vector<16x64xf32> -> vector<16x64xf32>
    %15 = vector.extract_strided_slice %14 {offsets = [0, 0], sizes = [16, 32], strides = [1, 1]} : vector<16x64xf32> to vector<16x32xf32>
    %16 = arith.truncf %15 : vector<16x32xf32> to vector<16x32xbf16>
    %c0_12 = arith.constant 0 : index
    %c0_13 = arith.constant 0 : index
    %17 = vector.load %arg3[%c0_12, %c0_13] : memref<32x4xbf16, #tpu.memory_space<vmem>>, vector<32x4xbf16>
    %cst_14 = arith.constant dense<0.000000e+00> : vector<16x4xf32>
    %18 = tpu.matmul %16, %17, %cst_14 {dimension_numbers = #tpu.dot_dimension_numbers<[1], [0], [0], [1], [0, 0, 1, 1], [], []>} : vector<16x32xbf16>, vector<32x4xbf16>, vector<16x4xf32> -> vector<16x4xf32>
    %19 = vector.extract_strided_slice %14 {offsets = [0, 32], sizes = [16, 32], strides = [1, 1]} : vector<16x64xf32> to vector<16x32xf32>
    %c2 = arith.constant 2 : index
    %c0_15 = arith.constant 0 : index
    %c0_16 = arith.constant 0 : index
    %20 = vector.load %arg1[%c2, %c0_15, %c0_16] : memref<5x16x32xf32, #tpu.memory_space<vmem>>, vector<1x16x32xf32>
    %21 = vector.shape_cast %20 : vector<1x16x32xf32> to vector<16x32xf32>
    %22 = arith.truncf %21 : vector<16x32xf32> to vector<16x32xbf16>
    %c0_17 = arith.constant 0 : index
    %c0_18 = arith.constant 0 : index
    %23 = vector.load %arg2[%c0_17, %c0_18] : memref<32x64xbf16, #tpu.memory_space<vmem>>, vector<32x64xbf16>
    %cst_19 = arith.constant dense<0.000000e+00> : vector<16x64xf32>
    %24 = tpu.matmul %22, %23, %cst_19 {dimension_numbers = #tpu.dot_dimension_numbers<[1], [0], [0], [1], [0, 0, 1, 1], [], []>} : vector<16x32xbf16>, vector<32x64xbf16>, vector<16x64xf32> -> vector<16x64xf32>
    %25 = vector.extract_strided_slice %24 {offsets = [0, 0], sizes = [16, 32], strides = [1, 1]} : vector<16x64xf32> to vector<16x32xf32>
    %26 = arith.truncf %25 : vector<16x32xf32> to vector<16x32xbf16>
    %c0_20 = arith.constant 0 : index
    %c0_21 = arith.constant 0 : index
    %27 = vector.load %arg3[%c0_20, %c0_21] : memref<32x4xbf16, #tpu.memory_space<vmem>>, vector<32x4xbf16>
    %cst_22 = arith.constant dense<0.000000e+00> : vector<16x4xf32>
    %28 = tpu.matmul %26, %27, %cst_22 {dimension_numbers = #tpu.dot_dimension_numbers<[1], [0], [0], [1], [0, 0, 1, 1], [], []>} : vector<16x32xbf16>, vector<32x4xbf16>, vector<16x4xf32> -> vector<16x4xf32>
    %29 = vector.extract_strided_slice %24 {offsets = [0, 32], sizes = [16, 32], strides = [1, 1]} : vector<16x64xf32> to vector<16x32xf32>
    %c3 = arith.constant 3 : index
    %c0_23 = arith.constant 0 : index
    %c0_24 = arith.constant 0 : index
    %30 = vector.load %arg1[%c3, %c0_23, %c0_24] : memref<5x16x32xf32, #tpu.memory_space<vmem>>, vector<1x16x32xf32>
    %31 = vector.shape_cast %30 : vector<1x16x32xf32> to vector<16x32xf32>
    %32 = arith.truncf %31 : vector<16x32xf32> to vector<16x32xbf16>
    %c0_25 = arith.constant 0 : index
    %c0_26 = arith.constant 0 : index
    %33 = vector.load %arg2[%c0_25, %c0_26] : memref<32x64xbf16, #tpu.memory_space<vmem>>, vector<32x64xbf16>
    %cst_27 = arith.constant dense<0.000000e+00> : vector<16x64xf32>
    %34 = tpu.matmul %32, %33, %cst_27 {dimension_numbers = #tpu.dot_dimension_numbers<[1], [0], [0], [1], [0, 0, 1, 1], [], []>} : vector<16x32xbf16>, vector<32x64xbf16>, vector<16x64xf32> -> vector<16x64xf32>
    %35 = vector.extract_strided_slice %34 {offsets = [0, 0], sizes = [16, 32], strides = [1, 1]} : vector<16x64xf32> to vector<16x32xf32>
    %36 = arith.truncf %35 : vector<16x32xf32> to vector<16x32xbf16>
    %c0_28 = arith.constant 0 : index
    %c0_29 = arith.constant 0 : index
    %37 = vector.load %arg3[%c0_28, %c0_29] : memref<32x4xbf16, #tpu.memory_space<vmem>>, vector<32x4xbf16>
    %cst_30 = arith.constant dense<0.000000e+00> : vector<16x4xf32>
    %38 = tpu.matmul %36, %37, %cst_30 {dimension_numbers = #tpu.dot_dimension_numbers<[1], [0], [0], [1], [0, 0, 1, 1], [], []>} : vector<16x32xbf16>, vector<32x4xbf16>, vector<16x4xf32> -> vector<16x4xf32>
    %39 = vector.extract_strided_slice %34 {offsets = [0, 32], sizes = [16, 32], strides = [1, 1]} : vector<16x64xf32> to vector<16x32xf32>
    %c4 = arith.constant 4 : index
    %c0_31 = arith.constant 0 : index
    %c0_32 = arith.constant 0 : index
    %40 = vector.load %arg1[%c4, %c0_31, %c0_32] : memref<5x16x32xf32, #tpu.memory_space<vmem>>, vector<1x16x32xf32>
    %41 = vector.shape_cast %40 : vector<1x16x32xf32> to vector<16x32xf32>
    %42 = arith.truncf %41 : vector<16x32xf32> to vector<16x32xbf16>
    %c0_33 = arith.constant 0 : index
    %c0_34 = arith.constant 0 : index
    %43 = vector.load %arg2[%c0_33, %c0_34] : memref<32x64xbf16, #tpu.memory_space<vmem>>, vector<32x64xbf16>
    %cst_35 = arith.constant dense<0.000000e+00> : vector<16x64xf32>
    %44 = tpu.matmul %42, %43, %cst_35 {dimension_numbers = #tpu.dot_dimension_numbers<[1], [0], [0], [1], [0, 0, 1, 1], [], []>} : vector<16x32xbf16>, vector<32x64xbf16>, vector<16x64xf32> -> vector<16x64xf32>
    %45 = vector.extract_strided_slice %44 {offsets = [0, 0], sizes = [16, 32], strides = [1, 1]} : vector<16x64xf32> to vector<16x32xf32>
    %46 = arith.truncf %45 : vector<16x32xf32> to vector<16x32xbf16>
    %c0_36 = arith.constant 0 : index
    %c0_37 = arith.constant 0 : index
    %47 = vector.load %arg3[%c0_36, %c0_37] : memref<32x4xbf16, #tpu.memory_space<vmem>>, vector<32x4xbf16>
    %cst_38 = arith.constant dense<0.000000e+00> : vector<16x4xf32>
    %48 = tpu.matmul %46, %47, %cst_38 {dimension_numbers = #tpu.dot_dimension_numbers<[1], [0], [0], [1], [0, 0, 1, 1], [], []>} : vector<16x32xbf16>, vector<32x4xbf16>, vector<16x4xf32> -> vector<16x4xf32>
    %49 = vector.extract_strided_slice %44 {offsets = [0, 32], sizes = [16, 32], strides = [1, 1]} : vector<16x64xf32> to vector<16x32xf32>
    %50 = arith.maximumf %8, %18 : vector<16x4xf32>
    %51 = arith.maximumf %50, %28 : vector<16x4xf32>
    %52 = arith.maximumf %51, %38 : vector<16x4xf32>
    %53 = arith.maximumf %52, %48 : vector<16x4xf32>
    %54 = arith.subf %8, %53 : vector<16x4xf32>
    %55 = math.exp %54 : vector<16x4xf32>
    %56 = arith.subf %18, %53 : vector<16x4xf32>
    %57 = math.exp %56 : vector<16x4xf32>
    %58 = arith.subf %28, %53 : vector<16x4xf32>
    %59 = math.exp %58 : vector<16x4xf32>
    %60 = arith.subf %38, %53 : vector<16x4xf32>
    %61 = math.exp %60 : vector<16x4xf32>
    %62 = arith.subf %48, %53 : vector<16x4xf32>
    %63 = math.exp %62 : vector<16x4xf32>
    %64 = arith.addf %55, %57 : vector<16x4xf32>
    %65 = arith.addf %64, %59 : vector<16x4xf32>
    %66 = arith.addf %65, %61 : vector<16x4xf32>
    %67 = arith.addf %66, %63 : vector<16x4xf32>
    %68 = tpu.reciprocal %67 {approx = true} : vector<16x4xf32> -> vector<16x4xf32>
    %cst_39 = arith.constant 0.000000e+00 : f32
    %69 = vector.broadcast %cst_39 : f32 to vector<16x32xf32>
    %70 = arith.mulf %55, %68 : vector<16x4xf32>
    %71 = arith.truncf %70 : vector<16x4xf32> to vector<16x4xbf16>
    %c0_40 = arith.constant 0 : index
    %c0_41 = arith.constant 0 : index
    %72 = vector.load %arg4[%c0_40, %c0_41] : memref<4x32xbf16, #tpu.memory_space<vmem>>, vector<4x32xbf16>
    %cst_42 = arith.constant dense<0.000000e+00> : vector<16x32xf32>
    %73 = tpu.matmul %71, %72, %cst_42 {dimension_numbers = #tpu.dot_dimension_numbers<[1], [0], [0], [1], [0, 0, 1, 1], [], []>} : vector<16x4xbf16>, vector<4x32xbf16>, vector<16x32xf32> -> vector<16x32xf32>
    %74 = arith.mulf %73, %9 : vector<16x32xf32>
    %75 = arith.addf %69, %74 : vector<16x32xf32>
    %76 = arith.mulf %57, %68 : vector<16x4xf32>
    %77 = arith.truncf %76 : vector<16x4xf32> to vector<16x4xbf16>
    %c0_43 = arith.constant 0 : index
    %c0_44 = arith.constant 0 : index
    %78 = vector.load %arg4[%c0_43, %c0_44] : memref<4x32xbf16, #tpu.memory_space<vmem>>, vector<4x32xbf16>
    %cst_45 = arith.constant dense<0.000000e+00> : vector<16x32xf32>
    %79 = tpu.matmul %77, %78, %cst_45 {dimension_numbers = #tpu.dot_dimension_numbers<[1], [0], [0], [1], [0, 0, 1, 1], [], []>} : vector<16x4xbf16>, vector<4x32xbf16>, vector<16x32xf32> -> vector<16x32xf32>
    %80 = arith.mulf %79, %19 : vector<16x32xf32>
    %81 = arith.addf %75, %80 : vector<16x32xf32>
    %82 = arith.mulf %59, %68 : vector<16x4xf32>
    %83 = arith.truncf %82 : vector<16x4xf32> to vector<16x4xbf16>
    %c0_46 = arith.constant 0 : index
    %c0_47 = arith.constant 0 : index
    %84 = vector.load %arg4[%c0_46, %c0_47] : memref<4x32xbf16, #tpu.memory_space<vmem>>, vector<4x32xbf16>
    %cst_48 = arith.constant dense<0.000000e+00> : vector<16x32xf32>
    %85 = tpu.matmul %83, %84, %cst_48 {dimension_numbers = #tpu.dot_dimension_numbers<[1], [0], [0], [1], [0, 0, 1, 1], [], []>} : vector<16x4xbf16>, vector<4x32xbf16>, vector<16x32xf32> -> vector<16x32xf32>
    %86 = arith.mulf %85, %29 : vector<16x32xf32>
    %87 = arith.addf %81, %86 : vector<16x32xf32>
    %88 = arith.mulf %61, %68 : vector<16x4xf32>
    %89 = arith.truncf %88 : vector<16x4xf32> to vector<16x4xbf16>
    %c0_49 = arith.constant 0 : index
    %c0_50 = arith.constant 0 : index
    %90 = vector.load %arg4[%c0_49, %c0_50] : memref<4x32xbf16, #tpu.memory_space<vmem>>, vector<4x32xbf16>
    %cst_51 = arith.constant dense<0.000000e+00> : vector<16x32xf32>
    %91 = tpu.matmul %89, %90, %cst_51 {dimension_numbers = #tpu.dot_dimension_numbers<[1], [0], [0], [1], [0, 0, 1, 1], [], []>} : vector<16x4xbf16>, vector<4x32xbf16>, vector<16x32xf32> -> vector<16x32xf32>
    %92 = arith.mulf %91, %39 : vector<16x32xf32>
    %93 = arith.addf %87, %92 : vector<16x32xf32>
    %94 = arith.mulf %63, %68 : vector<16x4xf32>
    %95 = arith.truncf %94 : vector<16x4xf32> to vector<16x4xbf16>
    %c0_52 = arith.constant 0 : index
    %c0_53 = arith.constant 0 : index
    %96 = vector.load %arg4[%c0_52, %c0_53] : memref<4x32xbf16, #tpu.memory_space<vmem>>, vector<4x32xbf16>
    %cst_54 = arith.constant dense<0.000000e+00> : vector<16x32xf32>
    %97 = tpu.matmul %95, %96, %cst_54 {dimension_numbers = #tpu.dot_dimension_numbers<[1], [0], [0], [1], [0, 0, 1, 1], [], []>} : vector<16x4xbf16>, vector<4x32xbf16>, vector<16x32xf32> -> vector<16x32xf32>
    %98 = arith.mulf %97, %49 : vector<16x32xf32>
    %99 = arith.addf %93, %98 : vector<16x32xf32>
    %100 = arith.truncf %99 : vector<16x32xf32> to vector<16x32xbf16>
    %c0_55 = arith.constant 0 : index
    %c0_56 = arith.constant 0 : index
    %101 = vector.load %arg5[%c0_55, %c0_56] : memref<32x32xbf16, #tpu.memory_space<vmem>>, vector<32x32xbf16>
    %cst_57 = arith.constant dense<0.000000e+00> : vector<16x32xf32>
    %102 = tpu.matmul %100, %101, %cst_57 {dimension_numbers = #tpu.dot_dimension_numbers<[1], [0], [0], [1], [0, 0, 1, 1], [], []>} : vector<16x32xbf16>, vector<32x32xbf16>, vector<16x32xf32> -> vector<16x32xf32>
    %c0_58 = arith.constant 0 : index
    %c0_59 = arith.constant 0 : index
    %103 = vector.load %arg6[%c0_58, %c0_59] : memref<1x32xf32, #tpu.memory_space<vmem>>, vector<1x32xf32>
    %104 = vector.broadcast %103 : vector<1x32xf32> to vector<16x32xf32>
    %105 = arith.addf %102, %104 : vector<16x32xf32>
    %c0_60 = arith.constant 0 : index
    %c0_61 = arith.constant 0 : index
    %106 = vector.load %arg7[%c0_60, %c0_61] : memref<16x32xf32, #tpu.memory_space<vmem>>, vector<16x32xf32>
    tpu.vector_store %arg7[%c0_60, %c0_61], %105 {strides = array<i32>} : memref<16x32xf32, #tpu.memory_space<vmem>>, vector<16x32xf32>,
    return
  }
  func.func @transform_0(%arg0: i32) -> (i32, i32, i32) {
    %c0_i32 = arith.constant 0 : i32
    %c0_i32_0 = arith.constant 0 : i32
    %c0_i32_1 = arith.constant 0 : i32
    return %c0_i32, %arg0, %c0_i32_0 : i32, i32, i32
  }
  func.func @transform_1(%arg0: i32) -> (i32, i32) {
    %c0_i32 = arith.constant 0 : i32
    %c0_i32_0 = arith.constant 0 : i32
    %c0_i32_1 = arith.constant 0 : i32
    return %c0_i32, %c0_i32_0 : i32, i32
  }
  func.func @transform_2(%arg0: i32) -> (i32, i32) {
    %c0_i32 = arith.constant 0 : i32
    %c0_i32_0 = arith.constant 0 : i32
    %c0_i32_1 = arith.constant 0 : i32
    return %c0_i32, %c0_i32_0 : i32, i32
  }
  func.func @transform_3(%arg0: i32) -> (i32, i32) {
    %c0_i32 = arith.constant 0 : i32
    %c0_i32_0 = arith.constant 0 : i32
    %c0_i32_1 = arith.constant 0 : i32
    return %c0_i32, %c0_i32_0 : i32, i32
  }
  func.func @transform_4(%arg0: i32) -> (i32, i32) {
    %c0_i32 = arith.constant 0 : i32
    %c0_i32_0 = arith.constant 0 : i32
    %c0_i32_1 = arith.constant 0 : i32
    return %c0_i32, %c0_i32_0 : i32, i32
  }
  func.func @transform_5(%arg0: i32) -> (i32, i32) {
    %c0_i32 = arith.constant 0 : i32
    %c0_i32_0 = arith.constant 0 : i32
    %c0_i32_1 = arith.constant 0 : i32
    return %c0_i32, %c0_i32_0 : i32, i32
  }
  func.func @transform_6(%arg0: i32) -> (i32, i32) {
    %c0_i32 = arith.constant 0 : i32
    %c0_i32_0 = arith.constant 0 : i32
    return %arg0, %c0_i32 : i32, i32
  }
}

module attributes {stable_mosaic.version = 11 : i64} {
  func.func @_block_attn_kernel(%arg0: i32, %arg1: memref<1x8x64xf32, #tpu.memory_space<vmem>>, %arg2: memref<1x64xf32, #tpu.memory_space<vmem>>, %arg3: memref<1x64xf32, #tpu.memory_space<vmem>>, %arg4: memref<64x192xbf16, #tpu.memory_space<vmem>>, %arg5: memref<64x64xbf16, #tpu.memory_space<vmem>>, %arg6: memref<1x64xf32, #tpu.memory_space<vmem>>, %arg7: memref<1x8x64xf32, #tpu.memory_space<vmem>>, %arg8: memref<8x64xf32, #tpu.memory_space<vmem>>) attributes {dimension_semantics = [#tpu.dimension_semantics<parallel>], iteration_bounds = array<i64: 2>, scalar_prefetch = 0 : i64, scratch_operands = 1 : i64, tpu.core_type = #tpu.core_type<tc>, window_params = [{transform_indices = @transform_0, window_bounds = array<i64: 1, 8, 64>}, {pipeline_mode = #tpu.pipeline_mode<synchronous>, transform_indices = @transform_1, window_bounds = array<i64: 1, 64>}, {pipeline_mode = #tpu.pipeline_mode<synchronous>, transform_indices = @transform_2, window_bounds = array<i64: 1, 64>}, {pipeline_mode = #tpu.pipeline_mode<synchronous>, transform_indices = @transform_3, window_bounds = array<i64: 64, 192>}, {pipeline_mode = #tpu.pipeline_mode<synchronous>, transform_indices = @transform_4, window_bounds = array<i64: 64, 64>}, {pipeline_mode = #tpu.pipeline_mode<synchronous>, transform_indices = @transform_5, window_bounds = array<i64: 1, 64>}, {transform_indices = @transform_6, window_bounds = array<i64: 1, 8, 64>}]} {
    %c0 = arith.constant 0 : index
    %c0_0 = arith.constant 0 : index
    %c0_1 = arith.constant 0 : index
    %0 = vector.load %arg1[%c0, %c0_0, %c0_1] : memref<1x8x64xf32, #tpu.memory_space<vmem>>, vector<1x8x64xf32>
    %1 = vector.shape_cast %0 : vector<1x8x64xf32> to vector<8x64xf32>
    %cst = arith.constant 0.000000e+00 : f32
    %2 = vector.broadcast %cst : f32 to vector<8x192xf32>
    %3 = vector.extract_strided_slice %1 {offsets = [0, 0], sizes = [8, 32], strides = [1, 1]} : vector<8x64xf32> to vector<8x32xf32>
    %cst_2 = arith.constant dense<0.000000e+00> : vector<8xf32>
    %4 = vector.multi_reduction <add>, %3, %cst_2 [1] : vector<8x32xf32> to vector<8xf32>
    %5 = vector.shape_cast %4 : vector<8xf32> to vector<8x1xf32>
    %cst_3 = arith.constant 3.200000e+01 : f32
    %6 = vector.broadcast %cst_3 : f32 to vector<8x1xf32>
    %7 = arith.divf %5, %6 : vector<8x1xf32>
    %8 = vector.broadcast %7 : vector<8x1xf32> to vector<8x32xf32>
    %9 = arith.subf %3, %8 : vector<8x32xf32>
    %10 = arith.mulf %9, %9 : vector<8x32xf32>
    %cst_4 = arith.constant dense<0.000000e+00> : vector<8xf32>
    %11 = vector.multi_reduction <add>, %10, %cst_4 [1] : vector<8x32xf32> to vector<8xf32>
    %12 = vector.shape_cast %11 : vector<8xf32> to vector<8x1xf32>
    %cst_5 = arith.constant 3.200000e+01 : f32
    %13 = vector.broadcast %cst_5 : f32 to vector<8x1xf32>
    %14 = arith.divf %12, %13 : vector<8x1xf32>
    %15 = vector.broadcast %7 : vector<8x1xf32> to vector<8x32xf32>
    %16 = arith.subf %3, %15 : vector<8x32xf32>
    %17 = math.sqrt %14 : vector<8x1xf32>
    %cst_6 = arith.constant 9.99999974E-6 : f32
    %18 = vector.broadcast %cst_6 : f32 to vector<8x1xf32>
    %19 = arith.addf %17, %18 : vector<8x1xf32>
    %cst_7 = arith.constant 1.000000e+00 : f32
    %20 = vector.broadcast %cst_7 : f32 to vector<8x1xf32>
    %21 = arith.divf %20, %19 : vector<8x1xf32>
    %22 = vector.broadcast %21 : vector<8x1xf32> to vector<8x32xf32>
    %23 = arith.mulf %16, %22 : vector<8x32xf32>
    %c0_8 = arith.constant 0 : index
    %c0_9 = arith.constant 0 : index
    %24 = vector.load %arg2[%c0_8, %c0_9] : memref<1x64xf32, #tpu.memory_space<vmem>>, vector<1x32xf32>
    %25 = vector.broadcast %24 : vector<1x32xf32> to vector<8x32xf32>
    %26 = arith.mulf %23, %25 : vector<8x32xf32>
    %c0_10 = arith.constant 0 : index
    %c0_11 = arith.constant 0 : index
    %27 = vector.load %arg3[%c0_10, %c0_11] : memref<1x64xf32, #tpu.memory_space<vmem>>, vector<1x32xf32>
    %28 = vector.broadcast %27 : vector<1x32xf32> to vector<8x32xf32>
    %29 = arith.addf %26, %28 : vector<8x32xf32>
    %30 = arith.truncf %29 : vector<8x32xf32> to vector<8x32xbf16>
    %c0_12 = arith.constant 0 : index
    %c0_13 = arith.constant 0 : index
    %31 = vector.load %arg4[%c0_12, %c0_13] : memref<64x192xbf16, #tpu.memory_space<vmem>>, vector<32x192xbf16>
    %cst_14 = arith.constant dense<0.000000e+00> : vector<8x192xf32>
    %32 = tpu.matmul %30, %31, %cst_14 {dimension_numbers = #tpu.dot_dimension_numbers<[1], [0], [0], [1], [0, 0, 1, 1], [], []>} : vector<8x32xbf16>, vector<32x192xbf16>, vector<8x192xf32> -> vector<8x192xf32>
    %33 = arith.addf %2, %32 : vector<8x192xf32>
    %34 = vector.extract_strided_slice %1 {offsets = [0, 32], sizes = [8, 32], strides = [1, 1]} : vector<8x64xf32> to vector<8x32xf32>
    %cst_15 = arith.constant dense<0.000000e+00> : vector<8xf32>
    %35 = vector.multi_reduction <add>, %34, %cst_15 [1] : vector<8x32xf32> to vector<8xf32>
    %36 = vector.shape_cast %35 : vector<8xf32> to vector<8x1xf32>
    %cst_16 = arith.constant 3.200000e+01 : f32
    %37 = vector.broadcast %cst_16 : f32 to vector<8x1xf32>
    %38 = arith.divf %36, %37 : vector<8x1xf32>
    %39 = vector.broadcast %38 : vector<8x1xf32> to vector<8x32xf32>
    %40 = arith.subf %34, %39 : vector<8x32xf32>
    %41 = arith.mulf %40, %40 : vector<8x32xf32>
    %cst_17 = arith.constant dense<0.000000e+00> : vector<8xf32>
    %42 = vector.multi_reduction <add>, %41, %cst_17 [1] : vector<8x32xf32> to vector<8xf32>
    %43 = vector.shape_cast %42 : vector<8xf32> to vector<8x1xf32>
    %cst_18 = arith.constant 3.200000e+01 : f32
    %44 = vector.broadcast %cst_18 : f32 to vector<8x1xf32>
    %45 = arith.divf %43, %44 : vector<8x1xf32>
    %46 = vector.broadcast %38 : vector<8x1xf32> to vector<8x32xf32>
    %47 = arith.subf %34, %46 : vector<8x32xf32>
    %48 = math.sqrt %45 : vector<8x1xf32>
    %cst_19 = arith.constant 9.99999974E-6 : f32
    %49 = vector.broadcast %cst_19 : f32 to vector<8x1xf32>
    %50 = arith.addf %48, %49 : vector<8x1xf32>
    %cst_20 = arith.constant 1.000000e+00 : f32
    %51 = vector.broadcast %cst_20 : f32 to vector<8x1xf32>
    %52 = arith.divf %51, %50 : vector<8x1xf32>
    %53 = vector.broadcast %52 : vector<8x1xf32> to vector<8x32xf32>
    %54 = arith.mulf %47, %53 : vector<8x32xf32>
    %c0_21 = arith.constant 0 : index
    %c32 = arith.constant 32 : index
    %55 = vector.load %arg2[%c0_21, %c32] : memref<1x64xf32, #tpu.memory_space<vmem>>, vector<1x32xf32>
    %56 = vector.broadcast %55 : vector<1x32xf32> to vector<8x32xf32>
    %57 = arith.mulf %54, %56 : vector<8x32xf32>
    %c0_22 = arith.constant 0 : index
    %c32_23 = arith.constant 32 : index
    %58 = vector.load %arg3[%c0_22, %c32_23] : memref<1x64xf32, #tpu.memory_space<vmem>>, vector<1x32xf32>
    %59 = vector.broadcast %58 : vector<1x32xf32> to vector<8x32xf32>
    %60 = arith.addf %57, %59 : vector<8x32xf32>
    %61 = arith.truncf %60 : vector<8x32xf32> to vector<8x32xbf16>
    %c32_24 = arith.constant 32 : index
    %c0_25 = arith.constant 0 : index
    %62 = vector.load %arg4[%c32_24, %c0_25] : memref<64x192xbf16, #tpu.memory_space<vmem>>, vector<32x192xbf16>
    %cst_26 = arith.constant dense<0.000000e+00> : vector<8x192xf32>
    %63 = tpu.matmul %61, %62, %cst_26 {dimension_numbers = #tpu.dot_dimension_numbers<[1], [0], [0], [1], [0, 0, 1, 1], [], []>} : vector<8x32xbf16>, vector<32x192xbf16>, vector<8x192xf32> -> vector<8x192xf32>
    %64 = arith.addf %33, %63 : vector<8x192xf32>
    %65 = vector.extract_strided_slice %64 {offsets = [0, 0], sizes = [8, 8], strides = [1, 1]} : vector<8x192xf32> to vector<8x8xf32>
    %66 = arith.truncf %65 : vector<8x8xf32> to vector<8x8xbf16>
    %67 = vector.extract_strided_slice %64 {offsets = [0, 64], sizes = [8, 8], strides = [1, 1]} : vector<8x192xf32> to vector<8x8xf32>
    %68 = arith.truncf %67 : vector<8x8xf32> to vector<8x8xbf16>
    %69 = vector.extract_strided_slice %64 {offsets = [0, 128], sizes = [8, 8], strides = [1, 1]} : vector<8x192xf32> to vector<8x8xf32>
    %70 = arith.truncf %69 : vector<8x8xf32> to vector<8x8xbf16>
    %cst_27 = arith.constant dense<0.000000e+00> : vector<8x8xf32>
    %71 = tpu.matmul %66, %68, %cst_27 {dimension_numbers = #tpu.dot_dimension_numbers<[1], [1], [0], [0], [0, 0, 1, 0], [], []>} : vector<8x8xbf16>, vector<8x8xbf16>, vector<8x8xf32> -> vector<8x8xf32>
    %cst_28 = arith.constant 0.353553385 : f32
    %72 = vector.broadcast %cst_28 : f32 to vector<8x8xf32>
    %73 = arith.mulf %71, %72 : vector<8x8xf32>
    %cst_29 = arith.constant dense<0xFF800000> : vector<8xf32>
    %74 = vector.multi_reduction <maximumf>, %73, %cst_29 [1] : vector<8x8xf32> to vector<8xf32>
    %75 = vector.shape_cast %74 : vector<8xf32> to vector<8x1xf32>
    %76 = vector.broadcast %75 : vector<8x1xf32> to vector<8x8xf32>
    %77 = arith.subf %73, %76 : vector<8x8xf32>
    %78 = math.exp %77 : vector<8x8xf32>
    %cst_30 = arith.constant dense<0.000000e+00> : vector<8xf32>
    %79 = vector.multi_reduction <add>, %78, %cst_30 [1] : vector<8x8xf32> to vector<8xf32>
    %80 = vector.shape_cast %79 : vector<8xf32> to vector<8x1xf32>
    %81 = tpu.reciprocal %80 {approx = true} : vector<8x1xf32> -> vector<8x1xf32>
    %82 = vector.broadcast %81 : vector<8x1xf32> to vector<8x8xf32>
    %83 = arith.mulf %78, %82 : vector<8x8xf32>
    %84 = arith.truncf %83 : vector<8x8xf32> to vector<8x8xbf16>
    %cst_31 = arith.constant dense<0.000000e+00> : vector<8x8xf32>
    %85 = tpu.matmul %84, %70, %cst_31 {dimension_numbers = #tpu.dot_dimension_numbers<[1], [0], [0], [1], [0, 0, 1, 1], [], []>} : vector<8x8xbf16>, vector<8x8xbf16>, vector<8x8xf32> -> vector<8x8xf32>
    %c0_32 = arith.constant 0 : index
    %c0_33 = arith.constant 0 : index
    %86 = vector.load %arg8[%c0_32, %c0_33] : memref<8x64xf32, #tpu.memory_space<vmem>>, vector<8x8xf32>
    tpu.vector_store %arg8[%c0_32, %c0_33], %85 {strides = array<i32>} : memref<8x64xf32, #tpu.memory_space<vmem>>, vector<8x8xf32>,
    %87 = vector.extract_strided_slice %64 {offsets = [0, 8], sizes = [8, 8], strides = [1, 1]} : vector<8x192xf32> to vector<8x8xf32>
    %88 = arith.truncf %87 : vector<8x8xf32> to vector<8x8xbf16>
    %89 = vector.extract_strided_slice %64 {offsets = [0, 72], sizes = [8, 8], strides = [1, 1]} : vector<8x192xf32> to vector<8x8xf32>
    %90 = arith.truncf %89 : vector<8x8xf32> to vector<8x8xbf16>
    %91 = vector.extract_strided_slice %64 {offsets = [0, 136], sizes = [8, 8], strides = [1, 1]} : vector<8x192xf32> to vector<8x8xf32>
    %92 = arith.truncf %91 : vector<8x8xf32> to vector<8x8xbf16>
    %cst_34 = arith.constant dense<0.000000e+00> : vector<8x8xf32>
    %93 = tpu.matmul %88, %90, %cst_34 {dimension_numbers = #tpu.dot_dimension_numbers<[1], [1], [0], [0], [0, 0, 1, 0], [], []>} : vector<8x8xbf16>, vector<8x8xbf16>, vector<8x8xf32> -> vector<8x8xf32>
    %cst_35 = arith.constant 0.353553385 : f32
    %94 = vector.broadcast %cst_35 : f32 to vector<8x8xf32>
    %95 = arith.mulf %93, %94 : vector<8x8xf32>
    %cst_36 = arith.constant dense<0xFF800000> : vector<8xf32>
    %96 = vector.multi_reduction <maximumf>, %95, %cst_36 [1] : vector<8x8xf32> to vector<8xf32>
    %97 = vector.shape_cast %96 : vector<8xf32> to vector<8x1xf32>
    %98 = vector.broadcast %97 : vector<8x1xf32> to vector<8x8xf32>
    %99 = arith.subf %95, %98 : vector<8x8xf32>
    %100 = math.exp %99 : vector<8x8xf32>
    %cst_37 = arith.constant dense<0.000000e+00> : vector<8xf32>
    %101 = vector.multi_reduction <add>, %100, %cst_37 [1] : vector<8x8xf32> to vector<8xf32>
    %102 = vector.shape_cast %101 : vector<8xf32> to vector<8x1xf32>
    %103 = tpu.reciprocal %102 {approx = true} : vector<8x1xf32> -> vector<8x1xf32>
    %104 = vector.broadcast %103 : vector<8x1xf32> to vector<8x8xf32>
    %105 = arith.mulf %100, %104 : vector<8x8xf32>
    %106 = arith.truncf %105 : vector<8x8xf32> to vector<8x8xbf16>
    %cst_38 = arith.constant dense<0.000000e+00> : vector<8x8xf32>
    %107 = tpu.matmul %106, %92, %cst_38 {dimension_numbers = #tpu.dot_dimension_numbers<[1], [0], [0], [1], [0, 0, 1, 1], [], []>} : vector<8x8xbf16>, vector<8x8xbf16>, vector<8x8xf32> -> vector<8x8xf32>
    %c0_39 = arith.constant 0 : index
    %c8 = arith.constant 8 : index
    %108 = vector.load %arg8[%c0_39, %c8] : memref<8x64xf32, #tpu.memory_space<vmem>>, vector<8x8xf32>
    tpu.vector_store %arg8[%c0_39, %c8], %107 {strides = array<i32>} : memref<8x64xf32, #tpu.memory_space<vmem>>, vector<8x8xf32>,
    %109 = vector.extract_strided_slice %64 {offsets = [0, 16], sizes = [8, 8], strides = [1, 1]} : vector<8x192xf32> to vector<8x8xf32>
    %110 = arith.truncf %109 : vector<8x8xf32> to vector<8x8xbf16>
    %111 = vector.extract_strided_slice %64 {offsets = [0, 80], sizes = [8, 8], strides = [1, 1]} : vector<8x192xf32> to vector<8x8xf32>
    %112 = arith.truncf %111 : vector<8x8xf32> to vector<8x8xbf16>
    %113 = vector.extract_strided_slice %64 {offsets = [0, 144], sizes = [8, 8], strides = [1, 1]} : vector<8x192xf32> to vector<8x8xf32>
    %114 = arith.truncf %113 : vector<8x8xf32> to vector<8x8xbf16>
    %cst_40 = arith.constant dense<0.000000e+00> : vector<8x8xf32>
    %115 = tpu.matmul %110, %112, %cst_40 {dimension_numbers = #tpu.dot_dimension_numbers<[1], [1], [0], [0], [0, 0, 1, 0], [], []>} : vector<8x8xbf16>, vector<8x8xbf16>, vector<8x8xf32> -> vector<8x8xf32>
    %cst_41 = arith.constant 0.353553385 : f32
    %116 = vector.broadcast %cst_41 : f32 to vector<8x8xf32>
    %117 = arith.mulf %115, %116 : vector<8x8xf32>
    %cst_42 = arith.constant dense<0xFF800000> : vector<8xf32>
    %118 = vector.multi_reduction <maximumf>, %117, %cst_42 [1] : vector<8x8xf32> to vector<8xf32>
    %119 = vector.shape_cast %118 : vector<8xf32> to vector<8x1xf32>
    %120 = vector.broadcast %119 : vector<8x1xf32> to vector<8x8xf32>
    %121 = arith.subf %117, %120 : vector<8x8xf32>
    %122 = math.exp %121 : vector<8x8xf32>
    %cst_43 = arith.constant dense<0.000000e+00> : vector<8xf32>
    %123 = vector.multi_reduction <add>, %122, %cst_43 [1] : vector<8x8xf32> to vector<8xf32>
    %124 = vector.shape_cast %123 : vector<8xf32> to vector<8x1xf32>
    %125 = tpu.reciprocal %124 {approx = true} : vector<8x1xf32> -> vector<8x1xf32>
    %126 = vector.broadcast %125 : vector<8x1xf32> to vector<8x8xf32>
    %127 = arith.mulf %122, %126 : vector<8x8xf32>
    %128 = arith.truncf %127 : vector<8x8xf32> to vector<8x8xbf16>
    %cst_44 = arith.constant dense<0.000000e+00> : vector<8x8xf32>
    %129 = tpu.matmul %128, %114, %cst_44 {dimension_numbers = #tpu.dot_dimension_numbers<[1], [0], [0], [1], [0, 0, 1, 1], [], []>} : vector<8x8xbf16>, vector<8x8xbf16>, vector<8x8xf32> -> vector<8x8xf32>
    %c0_45 = arith.constant 0 : index
    %c16 = arith.constant 16 : index
    %130 = vector.load %arg8[%c0_45, %c16] : memref<8x64xf32, #tpu.memory_space<vmem>>, vector<8x8xf32>
    tpu.vector_store %arg8[%c0_45, %c16], %129 {strides = array<i32>} : memref<8x64xf32, #tpu.memory_space<vmem>>, vector<8x8xf32>,
    %131 = vector.extract_strided_slice %64 {offsets = [0, 24], sizes = [8, 8], strides = [1, 1]} : vector<8x192xf32> to vector<8x8xf32>
    %132 = arith.truncf %131 : vector<8x8xf32> to vector<8x8xbf16>
    %133 = vector.extract_strided_slice %64 {offsets = [0, 88], sizes = [8, 8], strides = [1, 1]} : vector<8x192xf32> to vector<8x8xf32>
    %134 = arith.truncf %133 : vector<8x8xf32> to vector<8x8xbf16>
    %135 = vector.extract_strided_slice %64 {offsets = [0, 152], sizes = [8, 8], strides = [1, 1]} : vector<8x192xf32> to vector<8x8xf32>
    %136 = arith.truncf %135 : vector<8x8xf32> to vector<8x8xbf16>
    %cst_46 = arith.constant dense<0.000000e+00> : vector<8x8xf32>
    %137 = tpu.matmul %132, %134, %cst_46 {dimension_numbers = #tpu.dot_dimension_numbers<[1], [1], [0], [0], [0, 0, 1, 0], [], []>} : vector<8x8xbf16>, vector<8x8xbf16>, vector<8x8xf32> -> vector<8x8xf32>
    %cst_47 = arith.constant 0.353553385 : f32
    %138 = vector.broadcast %cst_47 : f32 to vector<8x8xf32>
    %139 = arith.mulf %137, %138 : vector<8x8xf32>
    %cst_48 = arith.constant dense<0xFF800000> : vector<8xf32>
    %140 = vector.multi_reduction <maximumf>, %139, %cst_48 [1] : vector<8x8xf32> to vector<8xf32>
    %141 = vector.shape_cast %140 : vector<8xf32> to vector<8x1xf32>
    %142 = vector.broadcast %141 : vector<8x1xf32> to vector<8x8xf32>
    %143 = arith.subf %139, %142 : vector<8x8xf32>
    %144 = math.exp %143 : vector<8x8xf32>
    %cst_49 = arith.constant dense<0.000000e+00> : vector<8xf32>
    %145 = vector.multi_reduction <add>, %144, %cst_49 [1] : vector<8x8xf32> to vector<8xf32>
    %146 = vector.shape_cast %145 : vector<8xf32> to vector<8x1xf32>
    %147 = tpu.reciprocal %146 {approx = true} : vector<8x1xf32> -> vector<8x1xf32>
    %148 = vector.broadcast %147 : vector<8x1xf32> to vector<8x8xf32>
    %149 = arith.mulf %144, %148 : vector<8x8xf32>
    %150 = arith.truncf %149 : vector<8x8xf32> to vector<8x8xbf16>
    %cst_50 = arith.constant dense<0.000000e+00> : vector<8x8xf32>
    %151 = tpu.matmul %150, %136, %cst_50 {dimension_numbers = #tpu.dot_dimension_numbers<[1], [0], [0], [1], [0, 0, 1, 1], [], []>} : vector<8x8xbf16>, vector<8x8xbf16>, vector<8x8xf32> -> vector<8x8xf32>
    %c0_51 = arith.constant 0 : index
    %c24 = arith.constant 24 : index
    %152 = vector.load %arg8[%c0_51, %c24] : memref<8x64xf32, #tpu.memory_space<vmem>>, vector<8x8xf32>
    tpu.vector_store %arg8[%c0_51, %c24], %151 {strides = array<i32>} : memref<8x64xf32, #tpu.memory_space<vmem>>, vector<8x8xf32>,
    %153 = vector.extract_strided_slice %64 {offsets = [0, 32], sizes = [8, 8], strides = [1, 1]} : vector<8x192xf32> to vector<8x8xf32>
    %154 = arith.truncf %153 : vector<8x8xf32> to vector<8x8xbf16>
    %155 = vector.extract_strided_slice %64 {offsets = [0, 96], sizes = [8, 8], strides = [1, 1]} : vector<8x192xf32> to vector<8x8xf32>
    %156 = arith.truncf %155 : vector<8x8xf32> to vector<8x8xbf16>
    %157 = vector.extract_strided_slice %64 {offsets = [0, 160], sizes = [8, 8], strides = [1, 1]} : vector<8x192xf32> to vector<8x8xf32>
    %158 = arith.truncf %157 : vector<8x8xf32> to vector<8x8xbf16>
    %cst_52 = arith.constant dense<0.000000e+00> : vector<8x8xf32>
    %159 = tpu.matmul %154, %156, %cst_52 {dimension_numbers = #tpu.dot_dimension_numbers<[1], [1], [0], [0], [0, 0, 1, 0], [], []>} : vector<8x8xbf16>, vector<8x8xbf16>, vector<8x8xf32> -> vector<8x8xf32>
    %cst_53 = arith.constant 0.353553385 : f32
    %160 = vector.broadcast %cst_53 : f32 to vector<8x8xf32>
    %161 = arith.mulf %159, %160 : vector<8x8xf32>
    %cst_54 = arith.constant dense<0xFF800000> : vector<8xf32>
    %162 = vector.multi_reduction <maximumf>, %161, %cst_54 [1] : vector<8x8xf32> to vector<8xf32>
    %163 = vector.shape_cast %162 : vector<8xf32> to vector<8x1xf32>
    %164 = vector.broadcast %163 : vector<8x1xf32> to vector<8x8xf32>
    %165 = arith.subf %161, %164 : vector<8x8xf32>
    %166 = math.exp %165 : vector<8x8xf32>
    %cst_55 = arith.constant dense<0.000000e+00> : vector<8xf32>
    %167 = vector.multi_reduction <add>, %166, %cst_55 [1] : vector<8x8xf32> to vector<8xf32>
    %168 = vector.shape_cast %167 : vector<8xf32> to vector<8x1xf32>
    %169 = tpu.reciprocal %168 {approx = true} : vector<8x1xf32> -> vector<8x1xf32>
    %170 = vector.broadcast %169 : vector<8x1xf32> to vector<8x8xf32>
    %171 = arith.mulf %166, %170 : vector<8x8xf32>
    %172 = arith.truncf %171 : vector<8x8xf32> to vector<8x8xbf16>
    %cst_56 = arith.constant dense<0.000000e+00> : vector<8x8xf32>
    %173 = tpu.matmul %172, %158, %cst_56 {dimension_numbers = #tpu.dot_dimension_numbers<[1], [0], [0], [1], [0, 0, 1, 1], [], []>} : vector<8x8xbf16>, vector<8x8xbf16>, vector<8x8xf32> -> vector<8x8xf32>
    %c0_57 = arith.constant 0 : index
    %c32_58 = arith.constant 32 : index
    %174 = vector.load %arg8[%c0_57, %c32_58] : memref<8x64xf32, #tpu.memory_space<vmem>>, vector<8x8xf32>
    tpu.vector_store %arg8[%c0_57, %c32_58], %173 {strides = array<i32>} : memref<8x64xf32, #tpu.memory_space<vmem>>, vector<8x8xf32>,
    %175 = vector.extract_strided_slice %64 {offsets = [0, 40], sizes = [8, 8], strides = [1, 1]} : vector<8x192xf32> to vector<8x8xf32>
    %176 = arith.truncf %175 : vector<8x8xf32> to vector<8x8xbf16>
    %177 = vector.extract_strided_slice %64 {offsets = [0, 104], sizes = [8, 8], strides = [1, 1]} : vector<8x192xf32> to vector<8x8xf32>
    %178 = arith.truncf %177 : vector<8x8xf32> to vector<8x8xbf16>
    %179 = vector.extract_strided_slice %64 {offsets = [0, 168], sizes = [8, 8], strides = [1, 1]} : vector<8x192xf32> to vector<8x8xf32>
    %180 = arith.truncf %179 : vector<8x8xf32> to vector<8x8xbf16>
    %cst_59 = arith.constant dense<0.000000e+00> : vector<8x8xf32>
    %181 = tpu.matmul %176, %178, %cst_59 {dimension_numbers = #tpu.dot_dimension_numbers<[1], [1], [0], [0], [0, 0, 1, 0], [], []>} : vector<8x8xbf16>, vector<8x8xbf16>, vector<8x8xf32> -> vector<8x8xf32>
    %cst_60 = arith.constant 0.353553385 : f32
    %182 = vector.broadcast %cst_60 : f32 to vector<8x8xf32>
    %183 = arith.mulf %181, %182 : vector<8x8xf32>
    %cst_61 = arith.constant dense<0xFF800000> : vector<8xf32>
    %184 = vector.multi_reduction <maximumf>, %183, %cst_61 [1] : vector<8x8xf32> to vector<8xf32>
    %185 = vector.shape_cast %184 : vector<8xf32> to vector<8x1xf32>
    %186 = vector.broadcast %185 : vector<8x1xf32> to vector<8x8xf32>
    %187 = arith.subf %183, %186 : vector<8x8xf32>
    %188 = math.exp %187 : vector<8x8xf32>
    %cst_62 = arith.constant dense<0.000000e+00> : vector<8xf32>
    %189 = vector.multi_reduction <add>, %188, %cst_62 [1] : vector<8x8xf32> to vector<8xf32>
    %190 = vector.shape_cast %189 : vector<8xf32> to vector<8x1xf32>
    %191 = tpu.reciprocal %190 {approx = true} : vector<8x1xf32> -> vector<8x1xf32>
    %192 = vector.broadcast %191 : vector<8x1xf32> to vector<8x8xf32>
    %193 = arith.mulf %188, %192 : vector<8x8xf32>
    %194 = arith.truncf %193 : vector<8x8xf32> to vector<8x8xbf16>
    %cst_63 = arith.constant dense<0.000000e+00> : vector<8x8xf32>
    %195 = tpu.matmul %194, %180, %cst_63 {dimension_numbers = #tpu.dot_dimension_numbers<[1], [0], [0], [1], [0, 0, 1, 1], [], []>} : vector<8x8xbf16>, vector<8x8xbf16>, vector<8x8xf32> -> vector<8x8xf32>
    %c0_64 = arith.constant 0 : index
    %c40 = arith.constant 40 : index
    %196 = vector.load %arg8[%c0_64, %c40] : memref<8x64xf32, #tpu.memory_space<vmem>>, vector<8x8xf32>
    tpu.vector_store %arg8[%c0_64, %c40], %195 {strides = array<i32>} : memref<8x64xf32, #tpu.memory_space<vmem>>, vector<8x8xf32>,
    %197 = vector.extract_strided_slice %64 {offsets = [0, 48], sizes = [8, 8], strides = [1, 1]} : vector<8x192xf32> to vector<8x8xf32>
    %198 = arith.truncf %197 : vector<8x8xf32> to vector<8x8xbf16>
    %199 = vector.extract_strided_slice %64 {offsets = [0, 112], sizes = [8, 8], strides = [1, 1]} : vector<8x192xf32> to vector<8x8xf32>
    %200 = arith.truncf %199 : vector<8x8xf32> to vector<8x8xbf16>
    %201 = vector.extract_strided_slice %64 {offsets = [0, 176], sizes = [8, 8], strides = [1, 1]} : vector<8x192xf32> to vector<8x8xf32>
    %202 = arith.truncf %201 : vector<8x8xf32> to vector<8x8xbf16>
    %cst_65 = arith.constant dense<0.000000e+00> : vector<8x8xf32>
    %203 = tpu.matmul %198, %200, %cst_65 {dimension_numbers = #tpu.dot_dimension_numbers<[1], [1], [0], [0], [0, 0, 1, 0], [], []>} : vector<8x8xbf16>, vector<8x8xbf16>, vector<8x8xf32> -> vector<8x8xf32>
    %cst_66 = arith.constant 0.353553385 : f32
    %204 = vector.broadcast %cst_66 : f32 to vector<8x8xf32>
    %205 = arith.mulf %203, %204 : vector<8x8xf32>
    %cst_67 = arith.constant dense<0xFF800000> : vector<8xf32>
    %206 = vector.multi_reduction <maximumf>, %205, %cst_67 [1] : vector<8x8xf32> to vector<8xf32>
    %207 = vector.shape_cast %206 : vector<8xf32> to vector<8x1xf32>
    %208 = vector.broadcast %207 : vector<8x1xf32> to vector<8x8xf32>
    %209 = arith.subf %205, %208 : vector<8x8xf32>
    %210 = math.exp %209 : vector<8x8xf32>
    %cst_68 = arith.constant dense<0.000000e+00> : vector<8xf32>
    %211 = vector.multi_reduction <add>, %210, %cst_68 [1] : vector<8x8xf32> to vector<8xf32>
    %212 = vector.shape_cast %211 : vector<8xf32> to vector<8x1xf32>
    %213 = tpu.reciprocal %212 {approx = true} : vector<8x1xf32> -> vector<8x1xf32>
    %214 = vector.broadcast %213 : vector<8x1xf32> to vector<8x8xf32>
    %215 = arith.mulf %210, %214 : vector<8x8xf32>
    %216 = arith.truncf %215 : vector<8x8xf32> to vector<8x8xbf16>
    %cst_69 = arith.constant dense<0.000000e+00> : vector<8x8xf32>
    %217 = tpu.matmul %216, %202, %cst_69 {dimension_numbers = #tpu.dot_dimension_numbers<[1], [0], [0], [1], [0, 0, 1, 1], [], []>} : vector<8x8xbf16>, vector<8x8xbf16>, vector<8x8xf32> -> vector<8x8xf32>
    %c0_70 = arith.constant 0 : index
    %c48 = arith.constant 48 : index
    %218 = vector.load %arg8[%c0_70, %c48] : memref<8x64xf32, #tpu.memory_space<vmem>>, vector<8x8xf32>
    tpu.vector_store %arg8[%c0_70, %c48], %217 {strides = array<i32>} : memref<8x64xf32, #tpu.memory_space<vmem>>, vector<8x8xf32>,
    %219 = vector.extract_strided_slice %64 {offsets = [0, 56], sizes = [8, 8], strides = [1, 1]} : vector<8x192xf32> to vector<8x8xf32>
    %220 = arith.truncf %219 : vector<8x8xf32> to vector<8x8xbf16>
    %221 = vector.extract_strided_slice %64 {offsets = [0, 120], sizes = [8, 8], strides = [1, 1]} : vector<8x192xf32> to vector<8x8xf32>
    %222 = arith.truncf %221 : vector<8x8xf32> to vector<8x8xbf16>
    %223 = vector.extract_strided_slice %64 {offsets = [0, 184], sizes = [8, 8], strides = [1, 1]} : vector<8x192xf32> to vector<8x8xf32>
    %224 = arith.truncf %223 : vector<8x8xf32> to vector<8x8xbf16>
    %cst_71 = arith.constant dense<0.000000e+00> : vector<8x8xf32>
    %225 = tpu.matmul %220, %222, %cst_71 {dimension_numbers = #tpu.dot_dimension_numbers<[1], [1], [0], [0], [0, 0, 1, 0], [], []>} : vector<8x8xbf16>, vector<8x8xbf16>, vector<8x8xf32> -> vector<8x8xf32>
    %cst_72 = arith.constant 0.353553385 : f32
    %226 = vector.broadcast %cst_72 : f32 to vector<8x8xf32>
    %227 = arith.mulf %225, %226 : vector<8x8xf32>
    %cst_73 = arith.constant dense<0xFF800000> : vector<8xf32>
    %228 = vector.multi_reduction <maximumf>, %227, %cst_73 [1] : vector<8x8xf32> to vector<8xf32>
    %229 = vector.shape_cast %228 : vector<8xf32> to vector<8x1xf32>
    %230 = vector.broadcast %229 : vector<8x1xf32> to vector<8x8xf32>
    %231 = arith.subf %227, %230 : vector<8x8xf32>
    %232 = math.exp %231 : vector<8x8xf32>
    %cst_74 = arith.constant dense<0.000000e+00> : vector<8xf32>
    %233 = vector.multi_reduction <add>, %232, %cst_74 [1] : vector<8x8xf32> to vector<8xf32>
    %234 = vector.shape_cast %233 : vector<8xf32> to vector<8x1xf32>
    %235 = tpu.reciprocal %234 {approx = true} : vector<8x1xf32> -> vector<8x1xf32>
    %236 = vector.broadcast %235 : vector<8x1xf32> to vector<8x8xf32>
    %237 = arith.mulf %232, %236 : vector<8x8xf32>
    %238 = arith.truncf %237 : vector<8x8xf32> to vector<8x8xbf16>
    %cst_75 = arith.constant dense<0.000000e+00> : vector<8x8xf32>
    %239 = tpu.matmul %238, %224, %cst_75 {dimension_numbers = #tpu.dot_dimension_numbers<[1], [0], [0], [1], [0, 0, 1, 1], [], []>} : vector<8x8xbf16>, vector<8x8xbf16>, vector<8x8xf32> -> vector<8x8xf32>
    %c0_76 = arith.constant 0 : index
    %c56 = arith.constant 56 : index
    %240 = vector.load %arg8[%c0_76, %c56] : memref<8x64xf32, #tpu.memory_space<vmem>>, vector<8x8xf32>
    tpu.vector_store %arg8[%c0_76, %c56], %239 {strides = array<i32>} : memref<8x64xf32, #tpu.memory_space<vmem>>, vector<8x8xf32>,
    %c0_77 = arith.constant 0 : index
    %c0_78 = arith.constant 0 : index
    %241 = vector.load %arg8[%c0_77, %c0_78] : memref<8x64xf32, #tpu.memory_space<vmem>>, vector<8x64xf32>
    %242 = arith.truncf %241 : vector<8x64xf32> to vector<8x64xbf16>
    %c0_79 = arith.constant 0 : index
    %c0_80 = arith.constant 0 : index
    %243 = vector.load %arg5[%c0_79, %c0_80] : memref<64x64xbf16, #tpu.memory_space<vmem>>, vector<64x64xbf16>
    %cst_81 = arith.constant dense<0.000000e+00> : vector<8x64xf32>
    %244 = tpu.matmul %242, %243, %cst_81 {dimension_numbers = #tpu.dot_dimension_numbers<[1], [0], [0], [1], [0, 0, 1, 1], [], []>} : vector<8x64xbf16>, vector<64x64xbf16>, vector<8x64xf32> -> vector<8x64xf32>
    %c0_82 = arith.constant 0 : index
    %c0_83 = arith.constant 0 : index
    %245 = vector.load %arg6[%c0_82, %c0_83] : memref<1x64xf32, #tpu.memory_space<vmem>>, vector<1x64xf32>
    %246 = vector.broadcast %245 : vector<1x64xf32> to vector<8x64xf32>
    %247 = arith.addf %244, %246 : vector<8x64xf32>
    %248 = arith.addf %247, %1 : vector<8x64xf32>
    %c0_84 = arith.constant 0 : index
    %c0_85 = arith.constant 0 : index
    %c0_86 = arith.constant 0 : index
    %249 = vector.load %arg7[%c0_84, %c0_85, %c0_86] : memref<1x8x64xf32, #tpu.memory_space<vmem>>, vector<1x8x64xf32>
    %250 = vector.shape_cast %249 : vector<1x8x64xf32> to vector<8x64xf32>
    %251 = vector.shape_cast %248 : vector<8x64xf32> to vector<1x8x64xf32>
    tpu.vector_store %arg7[%c0_84, %c0_85, %c0_86], %251 {strides = array<i32>} : memref<1x8x64xf32, #tpu.memory_space<vmem>>, vector<1x8x64xf32>,
    return
  }
  func.func @transform_0(%arg0: i32) -> (i32, i32, i32) {
    %c0_i32 = arith.constant 0 : i32
    %c0_i32_0 = arith.constant 0 : i32
    %c0_i32_1 = arith.constant 0 : i32
    return %arg0, %c0_i32, %c0_i32_0 : i32, i32, i32
  }
  func.func @transform_1(%arg0: i32) -> (i32, i32) {
    %c0_i32 = arith.constant 0 : i32
    %c0_i32_0 = arith.constant 0 : i32
    %c0_i32_1 = arith.constant 0 : i32
    return %c0_i32, %c0_i32_0 : i32, i32
  }
  func.func @transform_2(%arg0: i32) -> (i32, i32) {
    %c0_i32 = arith.constant 0 : i32
    %c0_i32_0 = arith.constant 0 : i32
    %c0_i32_1 = arith.constant 0 : i32
    return %c0_i32, %c0_i32_0 : i32, i32
  }
  func.func @transform_3(%arg0: i32) -> (i32, i32) {
    %c0_i32 = arith.constant 0 : i32
    %c0_i32_0 = arith.constant 0 : i32
    %c0_i32_1 = arith.constant 0 : i32
    return %c0_i32, %c0_i32_0 : i32, i32
  }
  func.func @transform_4(%arg0: i32) -> (i32, i32) {
    %c0_i32 = arith.constant 0 : i32
    %c0_i32_0 = arith.constant 0 : i32
    %c0_i32_1 = arith.constant 0 : i32
    return %c0_i32, %c0_i32_0 : i32, i32
  }
  func.func @transform_5(%arg0: i32) -> (i32, i32) {
    %c0_i32 = arith.constant 0 : i32
    %c0_i32_0 = arith.constant 0 : i32
    %c0_i32_1 = arith.constant 0 : i32
    return %c0_i32, %c0_i32_0 : i32, i32
  }
  func.func @transform_6(%arg0: i32) -> (i32, i32, i32) {
    %c0_i32 = arith.constant 0 : i32
    %c0_i32_0 = arith.constant 0 : i32
    %c0_i32_1 = arith.constant 0 : i32
    return %arg0, %c0_i32, %c0_i32_0 : i32, i32, i32
  }
}

</mosaic_0001>

<bundles_post_ra>
// kernel: forward.11
= control target key start
LH: loop header
LB: loop body
LE: loop exit
PB: predicated region body
PF: predicated region fallthrough
CT: control target
= control target key end

     0   :  { %12 = vsyncpa [#allocation3], 0  ;;  %s819_s0 = inlined_call_operand.hbm [shape: f32[16,32], index: 0, kind: input, shape index: {}]   ;;  %s820_s1 = inlined_call_operand.hbm [shape: f32[1,32], index: 1, kind: input, shape index: {}]   ;;  %s821_s2 = inlined_call_operand.hbm [shape: f32[1,32], index: 2, kind: input, shape index: {}]   ;;  %s822_s3 = inlined_call_operand.hbm [shape: bf16[1,32,64], index: 3, kind: input, shape index: {}]   ;;  %s823_s4 = inlined_call_operand.hbm [shape: f32[1,1,64], index: 4, kind: input, shape index: {}]   ;;  %s824_s5 = inlined_call_operand.hbm [shape: bf16[1,64,32], index: 5, kind: input, shape index: {}]   ;;  %s825_s6 = inlined_call_operand.hbm [shape: f32[1,1,32], index: 6, kind: input, shape index: {}]   ;;  %s826_s7 = inlined_call_operand.hbm [shape: f32[16,32], index: 7, kind: output, shape index: {}]  }
   0x1   :  { %13 = vsyncpa [#allocation6], 0 }
   0x2   :  { %14 = vsyncpa [#allocation9], 0 }
   0x3   :  { %15 = vsyncpa [#allocation12], 0 }
   0x4   :  { %16 = vsyncpa [#allocation4], 0  ;;  %s632_s24 = smov [#allocation5]   ;;  %s633_s26 = smov [#allocation8]  }
   0x5   :  { %s35_s25 = sshll.u32 %s632_s24, 4  ;;  %s54_s27 = sshll.u32 %s633_s26, 4  ;;  %s36_s25 = int_to_ptr.vmem [resolvable:$true] %s35_s25  ;;  %s686_s27 = int_to_ptr.vmem [resolvable:$true] %s54_s27 }
   0x6   :  { %s446_s30 = scalar_lea.hbm %s820_s1, 16 }
   0x7   :  { %p447_p0 = scmp.ne.s32.totalorder %s820_s1, %s446_s30  ;;  %p450_p1 = scmp.lt.u32.totalorder %s446_s30, %s820_s1 }
   0x9   :  { %p452_p2 = pnand %p450_p1, %p447_p0 }
   0xb   :  { %455 = shalt.err (!%p452_p2)
}
   0xc   :  { %s456_s12 = scalar_lea.vmem %s36_s25, 16  ;;  %s460_s13 = scalar_lea.vmem %s36_s25, 32 }
   0xd   :  { %p457_p3 = scmp.ne.s32.totalorder %s36_s25, %s456_s12  ;;  %p461_p4 = scmp.lt.s32.totalorder %s36_s25, %s36_s25 }
   0xe   :  { %p462_p5 = scmp.lt.s32.totalorder %s460_s13, %s456_s12 }
  0x10   :  { %p463_p6 = por %p462_p5, %p461_p4 }
  0x12   :  { %p464_p7 = pnand %p463_p6, %p457_p3 }
  0x14   :  { %467 = shalt.err (!%p464_p7)
}
  0x15   :  { %38 = dma.hbm_to_vmem [thread:$0]  %s820_s1, 16, %s36_s25, [#allocation6]  }
  0x16   :  { %s468_s18 = scalar_lea.hbm %s822_s3, 256 }
  0x17   :  { %p469_p8 = scmp.ne.s32.totalorder %s822_s3, %s468_s18  ;;  %p472_p9 = scmp.lt.u32.totalorder %s468_s18, %s822_s3 }
  0x19   :  { %p474_p10 = pnand %p472_p9, %p469_p8 }
  0x1b   :  { %477 = shalt.err (!%p474_p10)
}
  0x1c   :  { %s478_s23 = scalar_lea.vmem %s686_s27, 256  ;;  %p483_p12 = scmp.lt.s32.totalorder %s686_s27, %s686_s27 }
  0x1d   :  { %p479_p11 = scmp.ne.s32.totalorder %s686_s27, %s478_s23  ;;  %p484_p13 = scmp.lt.s32.totalorder %s478_s23, %s478_s23 }
  0x1f   :  { %p485_p0 = por %p484_p13, %p483_p12 }
  0x21   :  { %p486_p1 = pnand %p485_p0, %p479_p11 }
  0x23   :  { %489 = shalt.err (!%p486_p1)
}
  0x24   :  { %s634_s1 = smov 64   ;;  %s635_s24 = smov 4  }
  0x25   :  { %60 = dma.hbm_to_vmem [thread:$0]  %s822_s3, 256, %s686_s27, [#allocation9], %s634_s1, %s634_s1, %s635_s24  }
  0x26   :  { %s636_s28 = smov [#allocation11]   ;;  %s637_s30 = smov [#allocation2]  }
  0x27   :  { %s76_s29 = sshll.u32 %s636_s28, 4  ;;  %s22_s8 = sshll.u32 %s637_s30, 4  ;;  %s77_s29 = int_to_ptr.vmem [resolvable:$true] %s76_s29  ;;  %s717_s8 = int_to_ptr.vmem [resolvable:$true] %s22_s8 }
  0x28   :  { %s490_s11 = scalar_lea.hbm %s824_s5, 512 }
  0x29   :  { %p491_p2 = scmp.ne.s32.totalorder %s824_s5, %s490_s11  ;;  %p494_p3 = scmp.lt.u32.totalorder %s490_s11, %s824_s5 }
  0x2b   :  { %p496_p4 = pnand %p494_p3, %p491_p2 }
  0x2d   :  { %499 = shalt.err (!%p496_p4)
}
  0x2e   :  { %s500_s3 = scalar_lea.vmem %s77_s29, 512  ;;  %p505_p6 = scmp.lt.s32.totalorder %s77_s29, %s77_s29 }
  0x2f   :  { %p501_p5 = scmp.ne.s32.totalorder %s77_s29, %s500_s3  ;;  %p506_p7 = scmp.lt.s32.totalorder %s500_s3, %s500_s3 }
  0x31   :  { %p507_p8 = por %p506_p7, %p505_p6 }
  0x33   :  { %p508_p9 = pnand %p507_p8, %p501_p5 }
  0x35   :  { %511 = shalt.err (!%p508_p9)
}
  0x36   :  { %82 = dma.hbm_to_vmem [thread:$0]  %s824_s5, 512, %s77_s29, [#allocation12], %s634_s1, %s634_s1, %s635_s24  }
  0x37   :  { %s512_s19 = scalar_lea.hbm %s819_s0, 256 }
  0x38   :  { %p513_p10 = scmp.ne.s32.totalorder %s819_s0, %s512_s19  ;;  %p516_p11 = scmp.lt.u32.totalorder %s512_s19, %s819_s0 }
  0x3a   :  { %p518_p12 = pnand %p516_p11, %p513_p10 }
  0x3c   :  { %521 = shalt.err (!%p518_p12)
}
  0x3d   :  { %s522_s25 = scalar_lea.vmem %s717_s8, 256  ;;  %p527_p0 = scmp.lt.s32.totalorder %s717_s8, %s717_s8 }
  0x3e   :  { %p523_p13 = scmp.ne.s32.totalorder %s717_s8, %s522_s25  ;;  %p528_p1 = scmp.lt.s32.totalorder %s522_s25, %s522_s25 }
  0x40   :  { %p529_p2 = por %p528_p1, %p527_p0 }
  0x42   :  { %p530_p3 = pnand %p529_p2, %p523_p13 }
  0x44   :  { %533 = shalt.err (!%p530_p3)
}
  0x45   :  { %s638_s5 = smov 128   ;;  %s639_s1 = smov 8  }
  0x46   :  { %28 = dma.hbm_to_vmem [thread:$0]  %s819_s0, 256, %s717_s8, [#allocation3], %s638_s5, %s638_s5, %s639_s1  }
  0x47   :  { %s640_s28 = smov [#allocation7]   ;;  %s641_s30 = smov [#allocation10]  }
  0x48   :  { %s45_s29 = sshll.u32 %s640_s28, 4  ;;  %s67_s9 = sshll.u32 %s641_s30, 4  ;;  %s46_s29 = int_to_ptr.vmem [resolvable:$true] %s45_s29  ;;  %s68_s9 = int_to_ptr.vmem [resolvable:$true] %s67_s9 }
  0x49   :  { %s534_s12 = scalar_lea.hbm %s821_s2, 16 }
  0x4a   :  { %p535_p4 = scmp.ne.s32.totalorder %s821_s2, %s534_s12  ;;  %p538_p5 = scmp.lt.u32.totalorder %s534_s12, %s821_s2 }
  0x4c   :  { %p540_p6 = pnand %p538_p5, %p535_p4 }
  0x4e   :  { %543 = shalt.err (!%p540_p6)
}
  0x4f   :  { %s544_s0 = scalar_lea.vmem %s46_s29, 16  ;;  %s548_s8 = scalar_lea.vmem %s46_s29, 32 }
  0x50   :  { %p545_p7 = scmp.ne.s32.totalorder %s46_s29, %s544_s0  ;;  %p549_p8 = scmp.lt.s32.totalorder %s46_s29, %s46_s29 }
  0x51   :  { %p550_p9 = scmp.lt.s32.totalorder %s548_s8, %s544_s0 }
  0x53   :  { %p551_p10 = por %p550_p9, %p549_p8 }
  0x55   :  { %p552_p11 = pnand %p551_p10, %p545_p7 }
  0x57   :  { %555 = shalt.err (!%p552_p11)
}
  0x58   :  { %48 = dma.hbm_to_vmem [thread:$0]  %s821_s2, 16, %s46_s29, [#allocation6]  }
  0x59   :  { %s556_s19 = scalar_lea.hbm %s823_s4, 16 }
  0x5a   :  { %p557_p12 = scmp.ne.s32.totalorder %s823_s4, %s556_s19  ;;  %p560_p13 = scmp.lt.u32.totalorder %s556_s19, %s823_s4 }
  0x5c   :  { %p562_p0 = pnand %p560_p13, %p557_p12 }
  0x5e   :  { %565 = shalt.err (!%p562_p0)
}
  0x5f   :  { %s566_s25 = scalar_lea.vmem %s68_s9, 16  ;;  %s570_s24 = scalar_lea.vmem %s68_s9, 32 }
  0x60   :  { %p567_p1 = scmp.ne.s32.totalorder %s68_s9, %s566_s25  ;;  %p571_p2 = scmp.lt.s32.totalorder %s68_s9, %s68_s9 }
  0x61   :  { %p572_p3 = scmp.lt.s32.totalorder %s570_s24, %s566_s25 }
  0x63   :  { %p573_p4 = por %p572_p3, %p571_p2 }
  0x65   :  { %p574_p5 = pnand %p573_p4, %p567_p1 }
  0x67   :  { %577 = shalt.err (!%p574_p5)
}
  0x68   :  { %70 = dma.hbm_to_vmem [thread:$0]  %s823_s4, 16, %s68_s9, [#allocation9]  }
  0x69   :  { %s642_s28 = smov [#allocation13]   ;;  %s578_s11 = scalar_lea.hbm %s825_s6, 16 }
  0x6a   :  { %s89_s29 = sshll.u32 %s642_s28, 4  ;;  %p579_p6 = scmp.ne.s32.totalorder %s825_s6, %s578_s11  ;;  %s90_s29 = int_to_ptr.vmem [resolvable:$true] %s89_s29 }
  0x6b   :  { %p582_p7 = scmp.lt.u32.totalorder %s578_s11, %s825_s6 }
  0x6d   :  { %p584_p8 = pnand %p582_p7, %p579_p6 }
  0x6f   :  { %587 = shalt.err (!%p584_p8)
}
  0x70   :  { %s588_s3 = scalar_lea.vmem %s90_s29, 16  ;;  %s592_s4 = scalar_lea.vmem %s90_s29, 32 }
  0x71   :  { %p589_p9 = scmp.ne.s32.totalorder %s90_s29, %s588_s3  ;;  %p593_p10 = scmp.lt.s32.totalorder %s90_s29, %s90_s29 }
  0x72   :  { %p594_p11 = scmp.lt.s32.totalorder %s592_s4, %s588_s3 }
  0x74   :  { %p595_p12 = por %p594_p11, %p593_p10 }
  0x76   :  { %p596_p13 = pnand %p595_p12, %p589_p9 }
  0x78   :  { %599 = shalt.err (!%p596_p13)
}
  0x79   :  { %92 = dma.hbm_to_vmem [thread:$0]  %s825_s6, 16, %s90_s29, [#allocation12]  }
  0x7a   :  { %622 = dma.done.wait [#allocation3], 256  }
  0x7b   :  { %623 = vsyncadd [#allocation3], 4294967040 }
  0x7c   :  { %624 = dma.done.wait [#allocation6], 32  }
  0x7d   :  { %625 = vsyncadd [#allocation6], 4294967264 }
  0x7e   :  { %626 = dma.done.wait [#allocation9], 272  }
  0x7f   :  { %627 = vsyncadd [#allocation9], 4294967024 }
  0x80   :  { %628 = dma.done.wait [#allocation12], 528  }
  0x81   :  { %629 = vsyncadd [#allocation12], 4294966768  ;;  %vm117_vm0 = vcmask 261120   ;;  %v787_v0 = vld [vmem:[#allocation2] sm:$0xff]  ;;  %v789_v1 = vld [vmem:[#allocation2 + $0x8] sm:$0xff]  ;;  %v643_v15 = vmov 0.0  }
  0x82   :  { %v118_v2 = vsel %vm117_vm0, %v787_v0, 0.0  ;;  %v121_v3 = vsel %vm117_vm0, %v789_v1, 0.0  ;;  %v428_v14 = vld [vmem:[#allocation8] sm:$0xff]   ;;  %394 = vmatprep.subr.bf16.mxu0 %v643_v15  ;;  %vm644_vm1 = vmmov 0   ;;  %v429_v16 = vld [vmem:[#allocation8 + $0x8] sm:$0xff]   ;;  %402 = vmatprep.subr.bf16.mxu1 %v643_v15  ;;  %v430_v44 = vld [vmem:[#allocation11] sm:$0xff]  }
  0x83   :  { %119 = vadd.xlane.f32.xlu0 %v118_v2  ;;  %398 = vmatprep.mubr.msk.bf16.mxu0 %vm644_vm1, %v643_v15  ;;  %v374_v35 = vld [vmem:[#allocation5] ss:$0 sm:$0xff]  ;;  %v375_v39 = vld [vmem:[#allocation7] ss:$0 sm:$0xff]  ;;  %v432_v46 = vld [vmem:[#allocation11 + $0x10] sm:$0xff]   ;;  %vm305_vm6 = vcmask 523264  }
  0x84   :  { %395 = vmatpush3.bf16.msra.mxu0 %v428_v14  ;;  %410 = vmatprep.mubr.msk.bf16.mxu1 %vm644_vm1, %v643_v15  ;;  %v431_v45 = vld [vmem:[#allocation11 + $0x8] sm:$0xff]   ;;  %v433_v47 = vld [vmem:[#allocation11 + $0x18] sm:$0xff]   ;;  %s645_s6 = smov [#allocation14]  }
  0x85   :  { %396 = vmatprep.subr.bf16.mxu0 %v643_v15  ;;  %403 = vmatpush3.bf16.msra.mxu1 %v430_v44  ;;  %v376_v48 = vld [vmem:[#allocation10] ss:$0 sm:$0xff]  ;;  %s359_s8 = sshll.u32 %s645_s6, 4  ;;  %s360_s8 = int_to_ptr.vmem [resolvable:$true] %s359_s8 }
  0x86   :  { %404 = vmatprep.subr.bf16.mxu1 %v643_v15  ;;  %s600_s27 = scalar_lea.vmem %s360_s8, 256  ;;  %p605_p1 = scmp.lt.s32.totalorder %s360_s8, %s360_s8 }
  0x87   :  { %122 = vadd.xlane.f32.xlu0 %v121_v3  ;;  %p601_p0 = scmp.ne.s32.totalorder %s360_s8, %s600_s27  ;;  %p606_p2 = scmp.lt.s32.totalorder %s600_s27, %s600_s27 }
  0x88   :  { %397 = vmatpush3.bf16.msra.mxu0 %v429_v16 }
  0x89   :  { %405 = vmatpush3.bf16.msra.mxu1 %v431_v45  ;;  %p607_p3 = por %p606_p2, %p605_p1 }
  0x8a   :  { %406 = vmatprep.subr.bf16.mxu1 %v643_v15 }
  0x8b   :  { %p608_p4 = pnand %p607_p3, %p601_p0 }
  0x8d   :  { %407 = vmatpush3.bf16.msra.mxu1 %v432_v46 }
  0x8e   :  { %408 = vmatprep.subr.bf16.mxu1 %v643_v15 }
  0x91   :  { %409 = vmatpush3.bf16.msra.mxu1 %v433_v47 }
 0x110   :  { %v120_v4 = vpop.xlane.xlu0 %119 }
 0x111   :  { %v125_v5 = vmul.f32 0.03125, %v120_v4 }
 0x113   :  { %v127_v6 = vsub.f32 %v787_v0, %v125_v5 }
 0x114   :  { %v123_v7 = vpop.xlane.xlu0 %122 }
 0x115   :  { %v126_v8 = vmul.f32 0.03125, %v123_v7  ;;  %v129_v9 = vmul.f32 %v127_v6, %v127_v6 }
 0x117   :  { %v128_v10 = vsub.f32 %v789_v1, %v126_v8  ;;  %v131_v11 = vsel %vm117_vm0, %v129_v9, 0.0 }
 0x118   :  { %132 = vadd.xlane.f32.xlu1 %v131_v11 }
 0x119   :  { %v130_v12 = vmul.f32 %v128_v10, %v128_v10 }
 0x11b   :  { %v134_v13 = vsel %vm117_vm0, %v130_v12, 0.0  ;;  %v380_v12 = vld [vmem:[#allocation13] ss:$0 sm:$0xff] }
 0x11c   :  { %135 = vadd.xlane.f32.xlu1 %v134_v13 }
 0x1a5   :  { %v133_v17 = vpop.xlane.xlu1 %132 }
 0x1a6   :  { %v137_v18 = vmul.f32 0.03125, %v133_v17 }
 0x1a8   :  { %434 = vrsqrt.f32 %v137_v18  ;;  %vm141_vm2 = vcmp.eq.f32.partialorder %v137_v18, inf  ;;  %v144_v23 = vand.u32 2147483648, %v137_v18  ;;  %vm143_vm3 = vcmp.eq.f32.partialorder %v137_v18, 0.0 }
 0x1a9   :  { %v136_v19 = vpop.xlane.xlu1 %135 }
 0x1aa   :  { %v138_v20 = vmul.f32 0.03125, %v136_v19 }
 0x1ac   :  { %436 = vrsqrt.f32 %v138_v20  ;;  %vm148_vm4 = vcmp.eq.f32.partialorder %v138_v20, inf  ;;  %v151_v29 = vand.u32 2147483648, %v138_v20  ;;  %vm150_vm5 = vcmp.eq.f32.partialorder %v138_v20, 0.0 }
 0x1b2   :  { %v435_v21 = vpop.eup %434 }
 0x1b3   :  { %v140_v22 = vmul.f32 %v435_v21, %v137_v18 }
 0x1b5   :  { %v142_v24 = vsel %vm141_vm2, %v137_v18, %v140_v22 }
 0x1b6   :  { %v437_v25 = vpop.eup %436  ;;  %v145_v26 = vsel %vm143_vm3, %v144_v23, %v142_v24 }
 0x1b7   :  { %v153_v27 = vadd.f32 1e-05, %v145_v26  ;;  %v147_v28 = vmul.f32 %v437_v25, %v138_v20 }
 0x1b9   :  { %438 = vrcp.f32 %v153_v27  ;;  %v149_v30 = vsel %vm148_vm4, %v138_v20, %v147_v28 }
 0x1ba   :  { %v152_v31 = vsel %vm150_vm5, %v151_v29, %v149_v30 }
 0x1bb   :  { %v154_v32 = vadd.f32 1e-05, %v152_v31 }
 0x1bd   :  { %440 = vrcp.f32 %v154_v32 }
 0x1c3   :  { %v439_v33 = vpop.eup %438 }
 0x1c4   :  { %v159_v34 = vmul.f32 %v439_v33, %v127_v6 }
 0x1c6   :  { %v168_v38 = vmul.f32 %v374_v35, %v159_v34 }
 0x1c7   :  { %v441_v36 = vpop.eup %440 }
 0x1c8   :  { %v160_v37 = vmul.f32 %v441_v36, %v128_v10  ;;  %v177_v41 = vadd.f32 %v375_v39, %v168_v38 }
 0x1ca   :  { %v169_v40 = vmul.f32 %v374_v35, %v160_v37 }
 0x1cc   :  { %v178_v42 = vadd.f32 %v375_v39, %v169_v40 }
 0x1ce   :  { %v179_v43 = vpack.c.bf16 %v178_v42, %v177_v41 }
 0x1d0   :  { %399 = vmatmul.mubr.msk.bf16.vlgmr.msra.gmra.mrb[0].mxu0 %vm117_vm0, %v179_v43 }
 0x2a3   :  { %v240_v49 = vpop.f32.mrb[0].mxu0 }
 0x2a4   :  { %v241_v50 = vadd.f32 %v376_v48, %v240_v49  ;;  %v400_v51 = vpop.f32.mrb[1].mxu0 }
 0x2a5   :  { %v243_v52 = vpop.f32.mrb[2].mxu0 }
 0x2a6   :  { %v247_v53 = vmul.f32 %v241_v50, %v241_v50  ;;  %v244_v54 = vadd.f32 %v376_v48, %v243_v52  ;;  %v401_v55 = vpop.f32.mrb[3].mxu0 }
 0x2a8   :  { %v249_v56 = vmul.f32 %v247_v53, %v241_v50  ;;  %v248_v57 = vmul.f32 %v244_v54, %v244_v54 }
 0x2aa   :  { %v251_v58 = vmul.f32 0.044715, %v249_v56  ;;  %v250_v59 = vmul.f32 %v248_v57, %v244_v54 }
 0x2ac   :  { %v253_v60 = vadd.f32 %v251_v58, %v241_v50  ;;  %v252_v61 = vmul.f32 0.044715, %v250_v59 }
 0x2ae   :  { %v255_v62 = vmul.f32 0.7978846, %v253_v60  ;;  %v254_v63 = vadd.f32 %v252_v61, %v244_v54 }
 0x2b0   :  { %442 = vtanh.f32 %v255_v62  ;;  %v256_v2 = vmul.f32 0.7978846, %v254_v63 }
 0x2b2   :  { %444 = vtanh.f32 %v256_v2 }
 0x2ba   :  { %v443_v3 = vpop.eup %442 }
 0x2bb   :  { %v259_v4 = vadd.f32 1.0, %v443_v3 }
 0x2bc   :  { %v445_v5 = vpop.eup %444 }
 0x2bd   :  { %v261_v6 = vmul.f32 0.5, %v259_v4  ;;  %v260_v7 = vadd.f32 1.0, %v445_v5 }
 0x2bf   :  { %v262_v8 = vmul.f32 0.5, %v260_v7  ;;  %v263_v9 = vmul.f32 %v261_v6, %v241_v50 }
 0x2c1   :  { %v264_v10 = vmul.f32 %v262_v8, %v244_v54 }
 0x2c3   :  { %v265_v11 = vpack.c.bf16 %v264_v10, %v263_v9 }
 0x2c5   :  { %411 = vmatmul.mubr.msk.bf16.vlgmr.msra.gmra.mrb[0].mxu1 %vm305_vm6, %v265_v11 }
 0x398   :  { %v343_v13 = vpop.f32.mrb[0].mxu1 }
 0x399   :  { %v344_v14 = vadd.f32 %v380_v12, %v343_v13  ;;  %v412_v15 = vpop.f32.mrb[1].mxu1 }
 0x39a   :  { %v346_v16 = vpop.f32.mrb[2].mxu1 }
 0x39b   :  { %v350_v17 = vadd.f32 %v344_v14, %v787_v0  ;;  %v347_v18 = vadd.f32 %v380_v12, %v346_v16  ;;  %v413_v19 = vpop.f32.mrb[3].mxu1 }
 0x39d   :  { %352 = vst.msk [vmem:[#allocation14] sm:$0xff] %vm117_vm0, %v350_v17  ;;  %v351_v20 = vadd.f32 %v347_v18, %v789_v1 }
 0x39f   :  { %353 = vst.msk [vmem:[#allocation14 + $0x8] sm:$0xff] %vm117_vm0, %v351_v20 }
 0x3a0   :  { %611 = shalt.err (!%p608_p4)
}
 0x3a1   :  { %s612_s18 = scalar_lea.hbm %s826_s7, 256 }
 0x3a2   :  { %p613_p5 = scmp.ne.s32.totalorder %s826_s7, %s612_s18  ;;  %p616_p6 = scmp.lt.u32.totalorder %s612_s18, %s826_s7 }
 0x3a4   :  { %p618_p7 = pnand %p616_p6, %p613_p5 }
 0x3a6   :  { %621 = shalt.err (!%p618_p7)
}
 0x3a7   :  { %365 = dma.vmem_to_hbm [thread:$0]  %s360_s8, 256, %s826_s7, [#allocation4], %s638_s5, %s638_s5, %s639_s1  }
 0x3a8   :  { %630 = dma.done.wait [#allocation4], 256  }
 0x3a9   :  { %631 = vsyncadd [#allocation4], 4294967040 }
 0x3aa   :  { %369 = vsyncpa [#allocation3], 1 }
 0x3ab   :  { %370 = vsyncpa [#allocation6], 1 }
 0x3ac   :  { %371 = vsyncpa [#allocation9], 1 }
 0x3ad   :  { %372 = vsyncpa [#allocation12], 1 }
 0x3ae   :  { %373 = vsyncpa [#allocation4], 1 }

// kernel: forward.10
= control target key start
LH: loop header
LB: loop body
LE: loop exit
PB: predicated region body
PF: predicated region fallthrough
CT: control target
= control target key end

     0   :  { %11 = vsyncpa [#allocation4], 0  ;;  %s2065_s0 = inlined_call_operand.hbm [shape: f32[2,8,32], index: 0, kind: input, shape index: {}]   ;;  %s2066_s1 = inlined_call_operand.hbm [shape: f32[1,32], index: 1, kind: input, shape index: {}]   ;;  %s2067_s2 = inlined_call_operand.hbm [shape: f32[1,32], index: 2, kind: input, shape index: {}]   ;;  %s2068_s3 = inlined_call_operand.hbm [shape: bf16[32,96], index: 3, kind: input, shape index: {}]   ;;  %s2069_s4 = inlined_call_operand.hbm [shape: bf16[32,32], index: 4, kind: input, shape index: {}]   ;;  %s2070_s5 = inlined_call_operand.hbm [shape: f32[1,32], index: 5, kind: input, shape index: {}]   ;;  %s2071_s6 = inlined_call_operand.hbm [shape: f32[2,8,32], index: 6, kind: output, shape index: {}]  }
   0x1   :  { %13 = vsyncpa [#allocation4 + $0x1], 0 }
   0x2   :  { %14 = vsyncpa [#allocation7], 0 }
   0x3   :  { %15 = vsyncpa [#allocation10], 0 }
   0x4   :  { %16 = vsyncpa [#allocation13], 0 }
   0x5   :  { %17 = vsyncpa [#allocation5], 0 }
   0x6   :  { %19 = vsyncpa [#allocation5 + $0x1], 0  ;;  %s1676_s21 = smov 0   ;;  %s1678_s22 = smov 0  }
   0x7   :  { %s1680_s23 = smov 0   ;;  %s1682_s24 = smov 0  }
   0x8 LB: > { %s1616_s25 = smov [#allocation6]   ;;  %s1697_s27 = sadd.s32 4294967295, %s1614_s24   ;;  %s1614_s24 = sphi %s1682_s24, %s2096_s24   ;;  %s1610_s23 = sphi %s1680_s23, %s2095_s23   ;;  %s1606_s22 = sphi %s1678_s22, %s2094_s22   ;;  %s1602_s21 = sphi %s1676_s21, %s2093_s21  }
   0x9   : > { %s200_s26 = sshll.u32 %s1616_s25, 4  ;;  %p1103_p0 = scmp.ge.s32.totalorder %s1614_s24, 1  ;;  %s1702_s26 = int_to_ptr.vmem [resolvable:$true] %s200_s26 }
   0xa   : > { %p2072_p1 = scmp.eq.s32.totalorder %s1697_s27, 0  ;;  %p187_p2 = scmp.lt.s32.totalorder %s1614_s24, 3 }
   0xb   : > { %s1617_s29 = smov [#allocation9]   ;;  %s1618_s8 = smov [#allocation8]  }
   0xc   : > { %p1704_p3 = pnand %p1103_p0, %p187_p2  ;;  %s221_s30 = sshll.u32 %s1617_s29, 4  ;;  %s1711_s30 = int_to_ptr.vmem [resolvable:$true] %s221_s30 }
   0xd   : > { %s211_s9 = sshll.u32 %s1618_s8, 4  ;;  %s1366_s12 = scalar_lea.hbm %s2066_s1, 16  ;;  %s1719_s9 = int_to_ptr.vmem [resolvable:$true] %s211_s9 }
   0xe   : > { %s2075_s28 = scalar_select %p1704_p3, 1, 0 }
   0xf   : > { %p1251_p5 = pneg %p1704_p3  ;;  %p1367_p7 = scmp.ne.s32.totalorder %s2066_s1, %s1366_s12 }
  0x10   : > { %p1373_p11 = scmp.lt.u32.totalorder %s1366_s12, %s2066_s1 }
  0x11   : > { %p1715_p6 = pnand %p1251_p5, %p2072_p1 }
  0x13   : > { %p1729_p8 = pneg %p1715_p6 }
  0x15   : > { %p1369_p9 = pnand %p1729_p8, %p1367_p7 }
  0x17   : > { %p1370_p10 = pneg %p1369_p9 }
  0x19   : > { %p1375_p12 = pnand %p1373_p11, %p1370_p10 }
  0x1b   : > { %1378 = shalt.err (!%p1375_p12)
}
  0x1c   : > { %s1379_s18 = scalar_lea.vmem %s1702_s26, 16  ;;  %s1386_s19 = scalar_lea.vmem %s1702_s26, 32 }
  0x1d   : > { %p1380_p13 = scmp.ne.s32.totalorder %s1702_s26, %s1379_s18  ;;  %p1387_p5 = scmp.lt.s32.totalorder %s1702_s26, %s1702_s26 }
  0x1e   : > { %p1388_p7 = scmp.lt.s32.totalorder %s1386_s19, %s1379_s18 }
  0x1f   : > { %p1382_p0 = pnand %p1380_p13, %p1729_p8 }
  0x20   : > { %p1389_p9 = por %p1388_p7, %p1387_p5 }
  0x21   : > { %p1383_p2 = pneg %p1382_p0 }
  0x23   : > { %p1390_p4 = pnand %p1389_p9, %p1383_p2 }
  0x25   : > { %1393 = shalt.err (!%p1390_p4)
}
  0x26   : > { %1254 = dma.hbm_to_vmem [thread:$0]  (!%p1715_p6), %s2066_s1, 16, %s1702_s26, [#allocation7]  }
  0x27   : > { %s1394_s10 = scalar_lea.hbm %s2068_s3, 256 }
  0x28   : > { %p1395_p10 = scmp.ne.s32.totalorder %s2068_s3, %s1394_s10  ;;  %p1401_p4 = scmp.lt.u32.totalorder %s1394_s10, %s2068_s3 }
  0x2a   : > { %p1397_p11 = pnand %p1395_p10, %p1729_p8 }
  0x2c   : > { %p1398_p12 = pneg %p1397_p11 }
  0x2e   : > { %p1403_p13 = pnand %p1401_p4, %p1398_p12 }
  0x30   : > { %1406 = shalt.err (!%p1403_p13)
}
  0x31   : > { %s1407_s26 = scalar_lea.vmem %s1711_s30, 256  ;;  %p1415_p7 = scmp.lt.s32.totalorder %s1711_s30, %s1711_s30 }
  0x32   : > { %p1408_p0 = scmp.ne.s32.totalorder %s1711_s30, %s1407_s26  ;;  %p1416_p9 = scmp.lt.s32.totalorder %s1407_s26, %s1407_s26 }
  0x34   : > { %p1410_p2 = pnand %p1408_p0, %p1729_p8  ;;  %p1417_p10 = por %p1416_p9, %p1415_p7 }
  0x36   : > { %p1411_p5 = pneg %p1410_p2 }
  0x38   : > { %p1418_p11 = pnand %p1417_p10, %p1411_p5 }
  0x3a   : > { %1421 = shalt.err (!%p1418_p11)
}
  0x3b   : > { %s1619_s16 = smov 64   ;;  %s1620_s17 = smov 4  }
  0x3c   : > { %1260 = dma.hbm_to_vmem [thread:$0]  (!%p1715_p6), %s2068_s3, 256, %s1711_s30, [#allocation10], %s1619_s16, %s1619_s16, %s1620_s17  }
  0x3d   : > { %s1422_s29 = scalar_lea.hbm %s2067_s2, 16 }
  0x3e   : > { %p1423_p12 = scmp.ne.s32.totalorder %s2067_s2, %s1422_s29  ;;  %p1429_p0 = scmp.lt.u32.totalorder %s1422_s29, %s2067_s2 }
  0x40   : > { %p1425_p4 = pnand %p1423_p12, %p1729_p8 }
  0x42   : > { %p1426_p13 = pneg %p1425_p4 }
  0x44   : > { %p1431_p2 = pnand %p1429_p0, %p1426_p13 }
  0x46   : > { %1434 = shalt.err (!%p1431_p2)
}
  0x47   : > { %s1435_s30 = scalar_lea.vmem %s1719_s9, 16  ;;  %s1442_s13 = scalar_lea.vmem %s1719_s9, 32 }
  0x48   : > { %p1436_p5 = scmp.ne.s32.totalorder %s1719_s9, %s1435_s30  ;;  %p1443_p10 = scmp.lt.s32.totalorder %s1719_s9, %s1719_s9 }
  0x49   : > { %p1444_p11 = scmp.lt.s32.totalorder %s1442_s13, %s1435_s30 }
  0x4a   : > { %p1438_p7 = pnand %p1436_p5, %p1729_p8 }
  0x4b   : > { %p1445_p12 = por %p1444_p11, %p1443_p10 }
  0x4c   : > { %p1439_p9 = pneg %p1438_p7 }
  0x4e   : > { %p1446_p4 = pnand %p1445_p12, %p1439_p9 }
  0x50   : > { %1449 = shalt.err (!%p1446_p4)
}
  0x51   : > { %1257 = dma.hbm_to_vmem [thread:$0]  (!%p1715_p6), %s2067_s2, 16, %s1719_s9, [#allocation7]  }
  0x52   : > { %s1621_s18 = smov [#allocation11]   ;;  %s1622_s20 = smov [#allocation12]  }
  0x53   : > { %s234_s19 = sshll.u32 %s1621_s18, 4  ;;  %s248_s25 = sshll.u32 %s1622_s20, 4  ;;  %s235_s19 = int_to_ptr.vmem [resolvable:$true] %s234_s19  ;;  %s249_s25 = int_to_ptr.vmem [resolvable:$true] %s248_s25 }
  0x54   : > { %s1450_s10 = scalar_lea.hbm %s2069_s4, 256 }
  0x55   : > { %p1451_p13 = scmp.ne.s32.totalorder %s2069_s4, %s1450_s10  ;;  %p1457_p5 = scmp.lt.u32.totalorder %s1450_s10, %s2069_s4 }
  0x57   : > { %p1453_p0 = pnand %p1451_p13, %p1729_p8 }
  0x59   : > { %p1454_p2 = pneg %p1453_p0 }
  0x5b   : > { %p1459_p7 = pnand %p1457_p5, %p1454_p2 }
  0x5d   : > { %1462 = shalt.err (!%p1459_p7)
}
  0x5e   : > { %s1463_s9 = scalar_lea.vmem %s235_s19, 256  ;;  %p1471_p12 = scmp.lt.s32.totalorder %s235_s19, %s235_s19 }
  0x5f   : > { %p1464_p9 = scmp.ne.s32.totalorder %s235_s19, %s1463_s9  ;;  %p1472_p4 = scmp.lt.s32.totalorder %s1463_s9, %s1463_s9 }
  0x61   : > { %p1466_p10 = pnand %p1464_p9, %p1729_p8  ;;  %p1473_p1 = por %p1472_p4, %p1471_p12 }
  0x63   : > { %p1467_p11 = pneg %p1466_p10 }
  0x65   : > { %p1474_p3 = pnand %p1473_p1, %p1467_p11 }
  0x67   : > { %1477 = shalt.err (!%p1474_p3)
}
  0x68   : > { %1263 = dma.hbm_to_vmem [thread:$0]  (!%p1715_p6), %s2069_s4, 256, %s235_s19, [#allocation10], %s1619_s16, %s1619_s16, %s1620_s17  }
  0x69   : > { %s1478_s29 = scalar_lea.hbm %s2070_s5, 16 }
  0x6a   : > { %p1479_p1 = scmp.ne.s32.totalorder %s2070_s5, %s1478_s29  ;;  %p1485_p0 = scmp.lt.u32.totalorder %s1478_s29, %s2070_s5 }
  0x6c   : > { %p1481_p3 = pnand %p1479_p1, %p1729_p8 }
  0x6e   : > { %p1482_p13 = pneg %p1481_p3 }
  0x70   : > { %p1487_p2 = pnand %p1485_p0, %p1482_p13 }
  0x72   : > { %1490 = shalt.err (!%p1487_p2)
}
  0x73   : > { %s1491_s30 = scalar_lea.vmem %s249_s25, 16  ;;  %s1498_s16 = scalar_lea.vmem %s249_s25, 32 }
  0x74   : > { %p1492_p5 = scmp.ne.s32.totalorder %s249_s25, %s1491_s30  ;;  %p1499_p10 = scmp.lt.s32.totalorder %s249_s25, %s249_s25 }
  0x75   : > { %p1500_p11 = scmp.lt.s32.totalorder %s1498_s16, %s1491_s30 }
  0x76   : > { %p1494_p7 = pnand %p1492_p5, %p1729_p8 }
  0x77   : > { %p1501_p12 = por %p1500_p11, %p1499_p10 }
  0x78   : > { %p1495_p9 = pneg %p1494_p7 }
  0x7a   : > { %p1502_p4 = pnand %p1501_p12, %p1495_p9 }
  0x7c   : > { %1505 = shalt.err (!%p1502_p4)
}
  0x7d   : > { %1266 = dma.hbm_to_vmem [thread:$0]  (!%p1715_p6), %s2070_s5, 16, %s249_s25, [#allocation13]  }
  0x7e   : > { %s1102_s15 = sadd.s32 4294967294, %s1614_s24   ;;  %s1842_s7 = sadd.s32 1, %s1614_s24  }
  0x7f   : > { %s32_s13 = sadd.s32 1, %s1610_s23  ;;  %s29_s9 = ssub.s32 %s1614_s24, %s1842_s7 }
  0x80   : > { %p39_p8 = scmp.ne.s32.totalorder %s1610_s23, %s1606_s22  ;;  %p30_p1 = scmp.eq.s32.totalorder %s29_s9, 0 }
  0x81   : > { %p40_p3 = scmp.eq.s32.totalorder %s1614_s24, 0  ;;  %p45_p13 = scmp.ne.s32.totalorder %s1606_s22, %s1602_s21 }
  0x82   : > { %p174_p0 = scmp.eq.s32.totalorder %s1697_s27, 1  ;;  %p2078_p5 = scmp.eq.s32.totalorder %s1697_s27, 0 }
  0x83   : > { %s1854_s14 = scalar_select %p30_p1, %s1610_s23, %s32_s13  }
  0x84   : > { %p41_p2 = por %p40_p3, %p39_p8  ;;  %p1858_p7 = por %p2078_p5, %p45_p13 }
  0x85   : > { %p1862_p6 = por %p174_p0, %p39_p8  ;;  %p180_p9 = scmp.eq.s32.totalorder %s1102_s15, 1 }
  0x86   : > { %p1280_p10 = scmp.lt.s32.totalorder %s1614_s24, 2  ;;  %s259_s18 = sand.u32 1, %s1610_s23  }
  0x87   : > { %s2080_s25 = scalar_select %p1862_p6, 1, 0 }
  0x88   : > { %p1868_p11 = por %p180_p9, %p45_p13  ;;  %s1110_s29 = sshll.u32 %s259_s18, 3 }
  0x89   : > { %s1111_s8 = sshll.u32 %s1614_s24, 7  ;;  %s263_s30 = scalar_lea.vmem [#allocation3], %s1110_s29 }
  0x8a   : > { %s2081_s20 = scalar_select %p1868_p11, 1, 0 }
  0x8b   : > { %s1876_s12 = scalar_lea.hbm %s2065_s0, %s1111_s8  ;;  %s270_s16 = sshll.u32 %s263_s30, 4  ;;  %s1882_s16 = int_to_ptr.vmem [resolvable:$true] %s270_s16 }
  0x8c   : > { %p1878_p12 = pnand %p1280_p10, %p41_p2  ;;  %s260_s19 = scalar_lea.sflag [#allocation4], %s259_s18 }
  0x8d   : > { %s1506_s15 = scalar_lea.hbm %s1876_s12, 128  ;;  %s1511_s29 = scalar_lea.hbm %s2065_s0, 256 }
  0x8e   : > { %p1507_p4 = scmp.ne.s32.totalorder %s1876_s12, %s1506_s15  ;;  %p1508_p8 = pneg %p1878_p12 }
  0x8f   : > { %p1512_p13 = scmp.lt.u32.totalorder %s1876_s12, %s2065_s0  ;;  %p1513_p0 = scmp.lt.u32.totalorder %s1511_s29, %s1506_s15 }
  0x90   : > { %p1509_p1 = pnand %p1508_p8, %p1507_p4  ;;  %p1515_p5 = scmp.lt.u32.totalorder %s1506_s15, %s1876_s12 }
  0x91   : > { %p1514_p2 = por %p1513_p0, %p1512_p13 }
  0x92   : > { %p1510_p3 = pneg %p1509_p1 }
  0x93   : > { %p1516_p9 = por %p1515_p5, %p1514_p2 }
  0x95   : > { %p1517_p10 = pnand %p1516_p9, %p1510_p3 }
  0x97   : > { %1520 = shalt.err (!%p1517_p10)
}
  0x98   : > { %s1521_s18 = scalar_lea.vmem %s1882_s16, 128  ;;  %s1623_s11 = smov [#allocation3]  }
  0x99   : > { %p1522_p4 = scmp.ne.s32.totalorder %s1882_s16, %s1521_s18  ;;  %s1526_s30 = sshll.u32 %s1623_s11, 4  ;;  %s1527_s30 = int_to_ptr.vmem [resolvable:$false] %s1526_s30 }
  0x9a   : > { %s1528_s13 = scalar_lea.vmem %s1527_s30, 256  ;;  %p1529_p6 = scmp.lt.s32.totalorder %s1882_s16, %s1527_s30 }
  0x9b   : > { %p1524_p1 = pnand %p1522_p4, %p1508_p8  ;;  %p1530_p13 = scmp.lt.s32.totalorder %s1528_s13, %s1521_s18 }
  0x9d   : > { %p1525_p11 = pneg %p1524_p1  ;;  %p1531_p0 = por %p1530_p13, %p1529_p6 }
  0x9f   : > { %p1532_p2 = pnand %p1531_p0, %p1525_p11 }
  0xa1   : > { %1535 = shalt.err (!%p1532_p2)
}
  0xa2   : > { %1270 = dma.hbm_to_vmem [thread:$0]  (!%p1878_p12), %s1876_s12, 128, %s1882_s16, %s260_s19  }
  0xa3   : > { %p2083_p3 = scmp.ne.s32.totalorder %s2075_s28, 0 }
  0xa4   : > { %s1912_s15 = sand.u32 (!%p2083_p3), 1, %s1606_s22  }
  0xa5   : > { %279 = sbr.rel (%p2083_p3) target bundleno = 2008 (0x7d8), region = 44  ;;  %s1113_s9 = sshll.u32 (!%p2083_p3), %s1912_s15, 3 }
  0xa6   : > { %s282_s29 = scalar_lea.sflag (!%p2083_p3), [#allocation4], %s1912_s15  ;;  %s285_s8 = scalar_lea.vmem (!%p2083_p3), [#allocation3], %s1113_s9 }
  0xac   : > { %1581 = dma.done.wait (%p1858_p7), %s282_s29, 128  }
  0xad   : > { %1583 = vsyncadd (%p1858_p7), %s282_s29, 4294967168  ;;  %p2084_p6 = scmp.eq.s32.totalorder %s1697_s27, 0 }
  0xaf   : > { %1585 = dma.done.wait (%p2084_p6), [#allocation7], 32   ;;  %p2085_p11 = pmov %p2084_p6 }
  0xb0   : > { %p2086_p12 = pmov %p2084_p6 }
  0xb1   : > { %1587 = vsyncadd (%p2085_p11), [#allocation7], 4294967264 }
  0xb2   : > { %1589 = dma.done.wait (%p2086_p12), [#allocation10], 512   ;;  %p2087_p8 = pmov %p2084_p6 }
  0xb3   : > { %p2088_p5 = pmov %p2084_p6 }
  0xb4   : > { %1591 = vsyncadd (%p2087_p8), [#allocation10], 4294966784 }
  0xb5   : > { %1593 = dma.done.wait (%p2088_p5), [#allocation13], 16   ;;  %p2089_p9 = pmov %p2088_p5 }
  0xb6   : > { %vm336_vm0 = vcmask 261120   ;;  %v1934_v0 = vld [vmem:[%s285_s8] sm:$0xff]  ;;  %v1342_v7 = vld [vmem:[#allocation9] sm:$0xff]   ;;  %v1624_v8 = vmov 0.0   ;;  %vm1625_vm1 = vmmov 0   ;;  %s1626_s28 = smov 120  }
  0xb7   : > { %1595 = vsyncadd (%p2089_p9), [#allocation13], 4294967280  ;;  %v337_v1 = vsel %vm336_vm0, %v1934_v0, 0.0  ;;  %1163 = vmatprep.subr.bf16.mxu0 %v1624_v8  ;;  %1167 = vmatprep.mubr.msk.bf16.mxu0 %vm1625_vm1, %v1624_v8  ;;  %v1343_v9 = vld [vmem:[#allocation9 + $0x8] sm:$0xff]   ;;  %v1120_v19 = vld [vmem:[#allocation6] ss:$0 sm:$0xff] }
  0xb8   : > { %338 = vadd.xlane.f32.xlu0 %v337_v1  ;;  %1164 = vmatpush3.bf16.msra.mxu0 %v1342_v7  ;;  %v1121_v21 = vld [vmem:[#allocation8] ss:$0 sm:$0xff]  ;;  %s1627_s26 = smov 96   ;;  %s1628_s12 = smov 88   ;;  %vm439_vm4 = vcmask 64512   ;;  %vm504_vm5 = vcmask 1043456  }
  0xb9   : > { %1171 = vmatprep.subr.bf16.mxu1 %v1624_v8  ;;  %1165 = vmatprep.subr.bf16.mxu0 %v1624_v8  ;;  %s1629_s16 = smov 80   ;;  %s1630_s17 = smov 112   ;;  %vm664_vm6 = vcmask 130112   ;;  %vm781_vm7 = vcmask 195712   ;;  %vm898_vm8 = vcmask 261312  }
  0xba   : > { %1173 = vmatprep.mubr.msk.bf16.mxu1 %vm1625_vm1, %v1624_v8  ;;  %s1631_s19 = smov 72   ;;  %s1632_s10 = smov 104  }
  0xbb   : > { %s1633_s18 = smov 64   ;;  %s1634_s11 = smov 56  }
  0xbc   : > { %1166 = vmatpush3.bf16.msra.mxu0 %v1343_v9  ;;  %s1635_s30 = smov 48   ;;  %s1636_s13 = smov 40  }
  0xbd   : > { %1177 = vmatprep.subr.bf16.mxu0 %v1624_v8  ;;  %s1637_s29 = smov 8   ;;  %s1638_s8 = smov 16  }
  0xbe   : > { %p2090_p10 = scmp.ne.s32.totalorder %s2080_s25, 0 }
 0x145   : > { %v339_v2 = vpop.xlane.xlu0 %338 }
 0x146   : > { %v341_v3 = vmul.f32 0.03125, %v339_v2 }
 0x148   : > { %v342_v4 = vsub.f32 %v1934_v0, %v341_v3 }
 0x14a   : > { %v343_v5 = vmul.f32 %v342_v4, %v342_v4 }
 0x14c   : > { %v344_v6 = vsel %vm336_vm0, %v343_v5, 0.0 }
 0x14d   : > { %345 = vadd.xlane.f32.xlu0 %v344_v6 }
 0x1da   : > { %v346_v10 = vpop.xlane.xlu0 %345 }
 0x1db   : > { %v347_v11 = vmul.f32 0.03125, %v346_v10 }
 0x1dd   : > { %1346 = vrsqrt.f32 %v347_v11  ;;  %vm350_vm2 = vcmp.eq.f32.partialorder %v347_v11, inf  ;;  %v353_v14 = vand.u32 2147483648, %v347_v11  ;;  %vm352_vm3 = vcmp.eq.f32.partialorder %v347_v11, 0.0 }
 0x1e7   : > { %v1347_v12 = vpop.eup %1346 }
 0x1e8   : > { %v349_v13 = vmul.f32 %v1347_v12, %v347_v11 }
 0x1ea   : > { %v351_v15 = vsel %vm350_vm2, %v347_v11, %v349_v13 }
 0x1eb   : > { %v354_v16 = vsel %vm352_vm3, %v353_v14, %v351_v15 }
 0x1ec   : > { %v355_v17 = vadd.f32 1e-05, %v354_v16 }
 0x1ee   : > { %1348 = vrcp.f32 %v355_v17 }
 0x1f8   : > { %v1349_v18 = vpop.eup %1348 }
 0x1f9   : > { %v358_v20 = vmul.f32 %v1349_v18, %v342_v4 }
 0x1fb   : > { %v366_v22 = vmul.f32 %v1120_v19, %v358_v20 }
 0x1fd   : > { %v374_v23 = vadd.f32 %v1121_v21, %v366_v22 }
 0x1ff   : > { %v375_v24 = vpack.c.bf16 %v374_v23, %v374_v23 }
 0x201   : > { %1168 = vmatmul.mubr.msk.bf16.vlgmr.msra.gmra.mrb[0].mxu0 %vm336_vm0, %v375_v24 }
 0x202   : > { %1179 = vmatprep.mubr.msk.bf16.mxu0 %vm1625_vm1, %v1624_v8 }
 0x2d4   : > { %v429_v25 = vpop.f32.mrb[0].mxu0 }
 0x2d5   : > { %v1951_v26 = vpack.c.bf16 %v429_v25, %v429_v25  ;;  %v1169_v27 = vpop.f32.mrb[1].mxu0 }
 0x2d6   : > { %v432_v28 = vpop.f32.mrb[2].mxu0 }
 0x2d7   : > { %549 = vrot.lane.b32.xlu0 %v1951_v26, %s1626_s28  ;;  %437 = vrot.lane.b32.xlu1 %v1951_v26, %s1627_s26  ;;  %v1170_v29 = vpop.f32.mrb[3].mxu0  ;;  %s1639_s28 = smov 24   ;;  %s1138_s26 = sshll.u32 %s1697_s27, 7 }
 0x2d8   : > { %s971_s27 = scalar_lea.sflag [#allocation5], %s1912_s15 }
 0x2db   : > { %551 = vrot.lane.b32.xlu1 %v1951_v26, %s1628_s12  ;;  %s333_s12 = scalar_lea.vmem [#allocation14], %s1113_s9 }
 0x2df   : > { %668 = vrot.lane.b32.xlu1 %v1951_v26, %s1629_s16  ;;  %s984_s16 = sshll.u32 %s333_s12, 4  ;;  %s2022_s16 = int_to_ptr.vmem [resolvable:$true] %s984_s16 }
 0x2e0   : > { %s1536_s9 = scalar_lea.vmem %s2022_s16, 128 }
 0x2e1   : > { %p1537_p7 = scmp.ne.s32.totalorder %s2022_s16, %s1536_s9 }
 0x2e3   : > { %666 = vrot.lane.b32.xlu1 %v1951_v26, %s1630_s17  ;;  %p1538_p4 = pnand %p1537_p7, %p2090_p10 }
 0x2e5   : > { %p1539_p1 = pneg %p1538_p4 }
 0x2e7   : > { %785 = vrot.lane.b32.xlu1 %v1951_v26, %s1631_s19 }
 0x2eb   : > { %783 = vrot.lane.b32.xlu1 %v1951_v26, %s1632_s10  ;;  %s2020_s10 = scalar_lea.hbm %s2071_s6, %s1138_s26 }
 0x349   : > { %v438_v30 = vpop.permute.xlu1 %437  ;;  %v550_v35 = vpop.permute.xlu0 %549 }
 0x34a   : > { %v444_v31 = vsel %vm439_vm4, %v438_v30, 0 }
 0x34b   : > { %1172 = vmatpush3.bf16.xpose.msra.mxu1 %v444_v31 }
 0x34c   : > { %1183 = vmatprep.subr.bf16.mxu1 %v1624_v8 }
 0x34d   : > { %v552_v32 = vpop.permute.xlu1 %551 }
 0x34e   : > { %v557_v33 = vsel %vm439_vm4, %v552_v32, 0 }
 0x351   : > { %v669_v34 = vpop.permute.xlu1 %668 }
 0x352   : > { %1174 = vmatmul.mubr.msk.bf16.vlgmr.msra.gmra.mrb[0].mxu1 %vm439_vm4, %v1951_v26  ;;  %v674_v37 = vsel %vm439_vm4, %v669_v34, 0 }
 0x353   : > { %1184 = vmatpush3.bf16.xpose.msra.mxu1 %v557_v33  ;;  %1185 = vmatprep.mubr.msk.bf16.mxu1 %vm1625_vm1, %v1624_v8 }
 0x354   : > { %1195 = vmatprep.subr.bf16.mxu1 %v1624_v8 }
 0x355   : > { %v667_v36 = vpop.permute.xlu1 %666 }
 0x359   : > { %v786_v38 = vpop.permute.xlu1 %785 }
 0x35a   : > { %1186 = vmatmul.mubr.msk.bf16.vlgmr.msra.gmra.mrb[4].mxu1 %vm439_vm4, %v550_v35  ;;  %v791_v39 = vsel %vm439_vm4, %v786_v38, 0 }
 0x35b   : > { %1196 = vmatpush3.bf16.xpose.msra.mxu1 %v674_v37  ;;  %1197 = vmatprep.mubr.msk.bf16.mxu1 %vm1625_vm1, %v1624_v8 }
 0x35c   : > { %1207 = vmatprep.subr.bf16.mxu1 %v1624_v8 }
 0x35d   : > { %v784_v40 = vpop.permute.xlu1 %783 }
 0x362   : > { %1198 = vmatmul.mubr.msk.bf16.vlgmr.msra.gmra.mrb[8].mxu1 %vm439_vm4, %v667_v36 }
 0x363   : > { %1208 = vmatpush3.bf16.xpose.msra.mxu1 %v791_v39  ;;  %1209 = vmatprep.mubr.msk.bf16.mxu1 %vm1625_vm1, %v1624_v8 }
 0x364   : > { %1219 = vmatprep.subr.bf16.mxu1 %v1624_v8 }
 0x36a   : > { %1210 = vmatmul.mubr.msk.bf16.vlgmr.msra.gmra.mrb[12].mxu1 %vm439_vm4, %v784_v40 }
 0x36b   : > { %1223 = vmatprep.mubr.msk.bf16.mxu1 %vm1625_vm1, %v1624_v8 }
 0x425   : > { %v480_v41 = vpop.f32.mrb[0].mxu1 }
 0x426   : > { %v486_v42 = vmul.f32 0.35355338, %v480_v41  ;;  %v1175_v43 = vpop.f32.mrb[1].mxu1 }
 0x427   : > { %v483_v44 = vpop.f32.mrb[2].mxu1 }
 0x428   : > { %v1176_v45 = vpop.f32.mrb[3].mxu1  ;;  %v487_v46 = vsel %vm439_vm4, %v486_v42, -inf }
 0x429   : > { %488 = vmax.xlane.f32.xlu1 %v487_v46 }
 0x42d   : > { %v593_v47 = vpop.f32.mrb[4].mxu1 }
 0x42e   : > { %v599_v48 = vmul.f32 0.35355338, %v593_v47  ;;  %v1187_v49 = vpop.f32.mrb[5].mxu1 }
 0x42f   : > { %v596_v50 = vpop.f32.mrb[6].mxu1 }
 0x430   : > { %v1188_v51 = vpop.f32.mrb[7].mxu1  ;;  %v600_v52 = vsel %vm439_vm4, %v599_v48, -inf }
 0x431   : > { %601 = vmax.xlane.f32.xlu0 %v600_v52 }
 0x435   : > { %v710_v53 = vpop.f32.mrb[8].mxu1 }
 0x436   : > { %v716_v54 = vmul.f32 0.35355338, %v710_v53  ;;  %v1199_v55 = vpop.f32.mrb[9].mxu1 }
 0x437   : > { %v713_v56 = vpop.f32.mrb[10].mxu1  ;;  %v1344_v55 = vld [vmem:[#allocation11] sm:$0xff]  }
 0x438   : > { %v1200_v57 = vpop.f32.mrb[11].mxu1  ;;  %v717_v58 = vsel %vm439_vm4, %v716_v54, -inf  ;;  %1220 = vmatpush3.bf16.msra.mxu1 %v1344_v55  ;;  %v1345_v56 = vld [vmem:[#allocation11 + $0x8] sm:$0xff]  }
 0x439   : > { %718 = vmax.xlane.f32.xlu1 %v717_v58  ;;  %1221 = vmatprep.subr.bf16.mxu1 %v1624_v8 }
 0x43c   : > { %1222 = vmatpush3.bf16.msra.mxu1 %v1345_v56 }
 0x43d   : > { %v827_v59 = vpop.f32.mrb[12].mxu1 }
 0x43e   : > { %v833_v60 = vmul.f32 0.35355338, %v827_v59  ;;  %v1211_v61 = vpop.f32.mrb[13].mxu1 }
 0x43f   : > { %v830_v62 = vpop.f32.mrb[14].mxu1 }
 0x440   : > { %v1212_v63 = vpop.f32.mrb[15].mxu1  ;;  %v834_v1 = vsel %vm439_vm4, %v833_v60, -inf }
 0x441   : > { %835 = vmax.xlane.f32.xlu0 %v834_v1 }
 0x4b6   : > { %v489_v2 = vpop.xlane.xlu1 %488 }
 0x4b7   : > { %v490_v3 = vsub.f32 %v486_v42, %v489_v2 }
 0x4b9   : > { %v491_v4 = vmul.f32 1.442695, %v490_v3 }
 0x4bb   : > { %1350 = vpow2.f32 %v491_v4 }
 0x4be   : > { %v602_v5 = vpop.xlane.xlu0 %601 }
 0x4bf   : > { %v603_v6 = vsub.f32 %v599_v48, %v602_v5 }
 0x4c1   : > { %v604_v7 = vmul.f32 1.442695, %v603_v6  ;;  %v1133_v6 = vld [vmem:[#allocation12] ss:$0 sm:$0xff] }
 0x4c3   : > { %1352 = vpow2.f32 %v604_v7 }
 0x4c5   : > { %v1351_v9 = vpop.eup %1350 }
 0x4c6   : > { %v493_v10 = vsel %vm439_vm4, %v1351_v9, 0.0  ;;  %v719_v18 = vpop.xlane.xlu1 %718 }
 0x4c7   : > { %494 = vadd.xlane.f32.xlu1 %v493_v10  ;;  %v720_v19 = vsub.f32 %v716_v54, %v719_v18 }
 0x4c9   : > { %v721_v20 = vmul.f32 1.442695, %v720_v19 }
 0x4cd   : > { %v1353_v11 = vpop.eup %1352 }
 0x4ce   : > { %v836_v12 = vpop.xlane.xlu0 %835  ;;  %v606_v13 = vsel %vm439_vm4, %v1353_v11, 0.0 }
 0x4cf   : > { %v837_v14 = vsub.f32 %v833_v60, %v836_v12  ;;  %607 = vadd.xlane.f32.xlu0 %v606_v13 }
 0x4d1   : > { %v838_v15 = vmul.f32 1.442695, %v837_v14 }
 0x4d3   : > { %1354 = vpow2.f32 %v838_v15 }
 0x4d4   : > { %1356 = vpow2.f32 %v721_v20 }
 0x4d8   : > { %499 = vrot.lane.b32.xlu1 %v1951_v26, %s1633_s18  ;;  %s1640_s18 = smov [#allocation14]  }
 0x4dd   : > { %v1355_v16 = vpop.eup %1354 }
 0x4de   : > { %v840_v17 = vsel %vm439_vm4, %v1355_v16, 0.0  ;;  %v1357_v21 = vpop.eup %1356 }
 0x4df   : > { %841 = vadd.xlane.f32.xlu0 %v840_v17  ;;  %v723_v22 = vsel %vm439_vm4, %v1357_v21, 0.0 }
 0x4f5   : > { %612 = vrot.lane.b32.xlu0 %v1951_v26, %s1634_s11  ;;  %s1540_s11 = sshll.u32 %s1640_s18, 4  ;;  %s1541_s11 = int_to_ptr.vmem [resolvable:$false] %s1540_s11 }
 0x4f6   : > { %p1543_p13 = scmp.lt.s32.totalorder %s2022_s16, %s1541_s11 }
 0x4fc   : > { %724 = vadd.xlane.f32.xlu1 %v723_v22 }
 0x50d   : > { %729 = vrot.lane.b32.xlu1 %v1951_v26, %s1635_s30  ;;  %s1542_s30 = scalar_lea.vmem %s1541_s11, 256 }
 0x50e   : > { %p1544_p0 = scmp.lt.s32.totalorder %s1542_s30, %s1536_s9 }
 0x510   : > { %p1545_p2 = por %p1544_p0, %p1543_p13 }
 0x511   : > { %846 = vrot.lane.b32.xlu1 %v1951_v26, %s1636_s13 }
 0x512   : > { %p1546_p3 = pnand %p1545_p2, %p1539_p1 }
 0x554   : > { %v495_v23 = vpop.xlane.xlu1 %494 }
 0x555   : > { %1358 = vrcp.f32 %v495_v23 }
 0x558   : > { %v500_v24 = vpop.permute.xlu1 %499 }
 0x559   : > { %v506_v25 = vsel %vm504_vm5, %v500_v24, 0 }
 0x55a   : > { %1178 = vmatpush3.bf16.msra.mxu0 %v506_v25 }
 0x55b   : > { %1189 = vmatprep.subr.bf16.mxu0 %v1624_v8 }
 0x55c   : > { %v608_v28 = vpop.xlane.xlu0 %607 }
 0x55d   : > { %1360 = vrcp.f32 %v608_v28 }
 0x55f   : > { %v1359_v27 = vpop.eup %1358 }
 0x560   : > { %v497_v29 = vmul.f32 %v1359_v27, %v1351_v9 }
 0x562   : > { %v498_v30 = vpack.c.bf16 %v497_v29, %v497_v29 }
 0x564   : > { %1180 = vmatmul.mubr.msk.bf16.vlgmr.msra.gmra.mrb[4].mxu0 %vm439_vm4, %v498_v30 }
 0x565   : > { %1191 = vmatprep.mubr.msk.bf16.mxu0 %vm1625_vm1, %v1624_v8 }
 0x567   : > { %v1361_v26 = vpop.eup %1360 }
 0x568   : > { %v610_v32 = vmul.f32 %v1361_v26, %v1353_v11 }
 0x56a   : > { %v611_v35 = vpack.c.bf16 %v610_v32, %v610_v32 }
 0x56c   : > { %v842_v31 = vpop.xlane.xlu0 %841 }
 0x570   : > { %v613_v33 = vpop.permute.xlu0 %612 }
 0x571   : > { %v618_v34 = vsel %vm504_vm5, %v613_v33, 0 }
 0x572   : > { %1190 = vmatpush3.bf16.msra.mxu0 %v618_v34 }
 0x573   : > { %1201 = vmatprep.subr.bf16.mxu0 %v1624_v8 }
 0x575   : > { %1192 = vmatmul.mubr.msk.bf16.vlgmr.msra.gmra.mrb[8].mxu0 %vm439_vm4, %v611_v35 }
 0x576   : > { %1203 = vmatprep.mubr.msk.bf16.mxu0 %vm1625_vm1, %v1624_v8 }
 0x589   : > { %v725_v36 = vpop.xlane.xlu1 %724 }
 0x58a   : > { %1362 = vrcp.f32 %v725_v36 }
 0x58b   : > { %1364 = vrcp.f32 %v842_v31 }
 0x58d   : > { %v730_v37 = vpop.permute.xlu1 %729 }
 0x58e   : > { %v735_v38 = vsel %vm504_vm5, %v730_v37, 0 }
 0x58f   : > { %1202 = vmatpush3.bf16.msra.mxu0 %v735_v38 }
 0x590   : > { %1213 = vmatprep.subr.bf16.mxu0 %v1624_v8 }
 0x591   : > { %v847_v41 = vpop.permute.xlu1 %846 }
 0x592   : > { %v852_v44 = vsel %vm504_vm5, %v847_v41, 0 }
 0x594   : > { %v1363_v39 = vpop.eup %1362 }
 0x595   : > { %v727_v40 = vmul.f32 %v1363_v39, %v1357_v21  ;;  %v1365_v43 = vpop.eup %1364 }
 0x596   : > { %v844_v45 = vmul.f32 %v1365_v43, %v1355_v16 }
 0x597   : > { %v728_v42 = vpack.c.bf16 %v727_v40, %v727_v40 }
 0x598   : > { %v845_v46 = vpack.c.bf16 %v844_v45, %v844_v45 }
 0x599   : > { %1204 = vmatmul.mubr.msk.bf16.vlgmr.msra.gmra.mrb[12].mxu0 %vm439_vm4, %v728_v42 }
 0x59a   : > { %1214 = vmatpush3.bf16.msra.mxu0 %v852_v44  ;;  %1215 = vmatprep.mubr.msk.bf16.mxu0 %vm1625_vm1, %v1624_v8 }
 0x5a1   : > { %1216 = vmatmul.mubr.msk.bf16.vlgmr.msra.gmra.mrb[16].mxu0 %vm439_vm4, %v845_v46 }
 0x637   : > { %v542_v47 = vpop.f32.mrb[4].mxu0 }
 0x638   : > { %548 = vst.msk [vmem:[#allocation2] sm:$0xff] %vm439_vm4, %v542_v47  ;;  %v1181_v48 = vpop.f32.mrb[5].mxu0 }
 0x639   : > { %v545_v49 = vpop.f32.mrb[6].mxu0 }
 0x63a   : > { %v1182_v50 = vpop.f32.mrb[7].mxu0 }
 0x648   : > { %v654_v51 = vpop.f32.mrb[8].mxu0 }
 0x649   : > { %661 = vrot.lane.b32.xlu0 %v654_v51, %s1637_s29  ;;  %v1193_v52 = vpop.f32.mrb[9].mxu0 }
 0x64a   : > { %v657_v53 = vpop.f32.mrb[10].mxu0 }
 0x64b   : > { %v1194_v54 = vpop.f32.mrb[11].mxu0 }
 0x66c   : > { %v771_v57 = vpop.f32.mrb[12].mxu0 }
 0x66d   : > { %778 = vrot.lane.b32.xlu1 %v771_v57, %s1638_s8  ;;  %v1205_v58 = vpop.f32.mrb[13].mxu0 }
 0x66e   : > { %v774_v59 = vpop.f32.mrb[14].mxu0 }
 0x66f   : > { %v1206_v60 = vpop.f32.mrb[15].mxu0 }
 0x674   : > { %v888_v61 = vpop.f32.mrb[16].mxu0 }
 0x675   : > { %895 = vrot.lane.b32.xlu0 %v888_v61, %s1639_s28  ;;  %v1217_v62 = vpop.f32.mrb[17].mxu0 }
 0x676   : > { %v891_v63 = vpop.f32.mrb[18].mxu0 }
 0x677   : > { %v1218_v1 = vpop.f32.mrb[19].mxu0 }
 0x6bb   : > { %v662_v2 = vpop.permute.xlu0 %661 }
 0x6bc   : > { %665 = vst.msk [vmem:[#allocation2] sm:$0xff] %vm664_vm6, %v662_v2 }
 0x6df   : > { %v779_v8 = vpop.permute.xlu1 %778 }
 0x6e0   : > { %782 = vst.msk [vmem:[#allocation2] sm:$0xff] %vm781_vm7, %v779_v8 }
 0x6e7   : > { %v896_v3 = vpop.permute.xlu0 %895 }
 0x6e8   : > { %899 = vst.msk [vmem:[#allocation2] sm:$0xff] %vm898_vm8, %v896_v3 }
 0x6ef   : > { %v900_v4 = vld [vmem:[#allocation2] sm:$0xff] }
 0x6f0   : > { %v901_v5 = vpack.c.bf16 %v900_v4, %v900_v4 }
 0x6f2   : > { %1224 = vmatmul.mubr.msk.bf16.vlgmr.msra.gmra.mrb[16].mxu1 %vm336_vm0, %v901_v5 }
 0x7c5   : > { %v962_v7 = vpop.f32.mrb[16].mxu1 }
 0x7c6   : > { %v963_v9 = vadd.f32 %v1133_v6, %v962_v7  ;;  %v1225_v10 = vpop.f32.mrb[17].mxu1 }
 0x7c7   : > { %v965_v11 = vpop.f32.mrb[18].mxu1 }
 0x7c8   : > { %v968_v12 = vadd.f32 %v963_v9, %v1934_v0  ;;  %v1226_v13 = vpop.f32.mrb[19].mxu1 }
 0x7ca   : > { %969 = vst.msk [vmem:[%s333_s12] sm:$0xff] %vm336_vm0, %v968_v12 }
 0x7cb   : > { %1549 = shalt.err (!%p1546_p3)
}
 0x7cc   : > { %s1550_s15 = scalar_lea.hbm %s2020_s10, 128  ;;  %s1554_s8 = scalar_lea.hbm %s2071_s6, 256 }
 0x7cd   : > { %p1551_p6 = scmp.ne.s32.totalorder %s2020_s10, %s1550_s15  ;;  %p1555_p8 = scmp.lt.u32.totalorder %s2020_s10, %s2071_s6 }
 0x7ce   : > { %p1556_p5 = scmp.lt.u32.totalorder %s1554_s8, %s1550_s15  ;;  %p1558_p7 = scmp.lt.u32.totalorder %s1550_s15, %s2020_s10 }
 0x7cf   : > { %p1552_p11 = pnand %p1551_p6, %p2090_p10 }
 0x7d0   : > { %p1557_p9 = por %p1556_p5, %p1555_p8 }
 0x7d1   : > { %p1553_p12 = pneg %p1552_p11 }
 0x7d2   : > { %p1559_p4 = por %p1558_p7, %p1557_p9 }
 0x7d4   : > { %p1560_p1 = pnand %p1559_p4, %p1553_p12 }
 0x7d6   : > { %1563 = shalt.err (!%p1560_p1)
}
 0x7d7   : > { %1249 = dma.vmem_to_hbm [thread:$0]  (%p2090_p10), %s2022_s16, 128, %s2020_s10, %s971_s27  }
 0x7d8 PF: > { %s996_s12 = sand.u32 1, %s1602_s21   ;;  %p2091_p13 = scmp.ne.s32.totalorder %s2081_s20, 0 }
 0x7d9   : > { %p2092_p0 = scmp.ge.s32.totalorder %s1614_s24, 2  ;;  %s997_s17 = scalar_lea.sflag [#allocation5], %s996_s12 }
 0x7db   : > { %p1272_p2 = pnand %p2092_p0, %p2091_p13 }
 0x7dd   : > { %1597 = dma.done.wait (!%p1272_p2), %s997_s17, 128  }
 0x7de   : > { %1599 = vsyncadd (!%p1272_p2), %s997_s17, 4294967168  ;;  %p22_p3 = scmp.ge.s32.totalorder %s1842_s7, 4   ;;  %s2093_s21 = smov %s1606_s22 }
 0x7df   : > { %s2094_s22 = smov %s1610_s23  ;;  %s2095_s23 = smov %s1854_s14 }
 0x7e0   : > { %s2096_s24 = smov %s1842_s7  ;;  %24 = sbr.rel (!%p22_p3) target bundleno = 8 (0x8), region = 109 }
 0x7e7   :  { %1002 = vsyncpa [#allocation4], 1 }
 0x7e8   :  { %1004 = vsyncpa [#allocation4 + $0x1], 1 }
 0x7e9   :  { %1005 = vsyncpa [#allocation7], 1 }
 0x7ea   :  { %1006 = vsyncpa [#allocation10], 1 }
 0x7eb   :  { %1007 = vsyncpa [#allocation13], 1 }
 0x7ec   :  { %1008 = vsyncpa [#allocation5], 1 }
 0x7ed   :  { %1010 = vsyncpa [#allocation5 + $0x1], 1 }

// kernel: forward.13
= control target key start
LH: loop header
LB: loop body
LE: loop exit
PB: predicated region body
PF: predicated region fallthrough
CT: control target
= control target key end

     0   :  { %12 = vsyncpa [#allocation3], 0  ;;  %s1226_s0 = inlined_call_operand.hbm [shape: f32[16,64], index: 0, kind: input, shape index: {}]   ;;  %s1227_s1 = inlined_call_operand.hbm [shape: f32[1,64], index: 1, kind: input, shape index: {}]   ;;  %s1228_s2 = inlined_call_operand.hbm [shape: f32[1,64], index: 2, kind: input, shape index: {}]   ;;  %s1229_s3 = inlined_call_operand.hbm [shape: bf16[2,32,64], index: 3, kind: input, shape index: {}]   ;;  %s1230_s4 = inlined_call_operand.hbm [shape: f32[2,1,64], index: 4, kind: input, shape index: {}]   ;;  %s1231_s5 = inlined_call_operand.hbm [shape: bf16[2,64,32], index: 5, kind: input, shape index: {}]   ;;  %s1232_s6 = inlined_call_operand.hbm [shape: f32[2,1,32], index: 6, kind: input, shape index: {}]   ;;  %s1233_s7 = inlined_call_operand.hbm [shape: f32[16,64], index: 7, kind: output, shape index: {}]  }
   0x1   :  { %13 = vsyncpa [#allocation6], 0 }
   0x2   :  { %14 = vsyncpa [#allocation9], 0 }
   0x3   :  { %15 = vsyncpa [#allocation12], 0 }
   0x4   :  { %16 = vsyncpa [#allocation4], 0  ;;  %s964_s24 = smov [#allocation5]   ;;  %s965_s26 = smov [#allocation8]  }
   0x5   :  { %s35_s25 = sshll.u32 %s964_s24, 4  ;;  %s54_s27 = sshll.u32 %s965_s26, 4  ;;  %s36_s25 = int_to_ptr.vmem [resolvable:$true] %s35_s25  ;;  %s1022_s27 = int_to_ptr.vmem [resolvable:$true] %s54_s27 }
   0x6   :  { %s778_s30 = scalar_lea.hbm %s1227_s1, 16 }
   0x7   :  { %p779_p0 = scmp.ne.s32.totalorder %s1227_s1, %s778_s30  ;;  %p782_p1 = scmp.lt.u32.totalorder %s778_s30, %s1227_s1 }
   0x9   :  { %p784_p2 = pnand %p782_p1, %p779_p0 }
   0xb   :  { %787 = shalt.err (!%p784_p2)
}
   0xc   :  { %s788_s12 = scalar_lea.vmem %s36_s25, 16  ;;  %s792_s13 = scalar_lea.vmem %s36_s25, 32 }
   0xd   :  { %p789_p3 = scmp.ne.s32.totalorder %s36_s25, %s788_s12  ;;  %p793_p4 = scmp.lt.s32.totalorder %s36_s25, %s36_s25 }
   0xe   :  { %p794_p5 = scmp.lt.s32.totalorder %s792_s13, %s788_s12 }
  0x10   :  { %p795_p6 = por %p794_p5, %p793_p4 }
  0x12   :  { %p796_p7 = pnand %p795_p6, %p789_p3 }
  0x14   :  { %799 = shalt.err (!%p796_p7)
}
  0x15   :  { %38 = dma.hbm_to_vmem [thread:$0]  %s1227_s1, 16, %s36_s25, [#allocation6]  }
  0x16   :  { %s800_s18 = scalar_lea.hbm %s1229_s3, 512 }
  0x17   :  { %p801_p8 = scmp.ne.s32.totalorder %s1229_s3, %s800_s18  ;;  %p804_p9 = scmp.lt.u32.totalorder %s800_s18, %s1229_s3 }
  0x19   :  { %p806_p10 = pnand %p804_p9, %p801_p8 }
  0x1b   :  { %809 = shalt.err (!%p806_p10)
}
  0x1c   :  { %s810_s23 = scalar_lea.vmem %s1022_s27, 512  ;;  %p815_p12 = scmp.lt.s32.totalorder %s1022_s27, %s1022_s27 }
  0x1d   :  { %p811_p11 = scmp.ne.s32.totalorder %s1022_s27, %s810_s23  ;;  %p816_p13 = scmp.lt.s32.totalorder %s810_s23, %s810_s23 }
  0x1f   :  { %p817_p0 = por %p816_p13, %p815_p12 }
  0x21   :  { %p818_p1 = pnand %p817_p0, %p811_p11 }
  0x23   :  { %821 = shalt.err (!%p818_p1)
}
  0x24   :  { %s966_s1 = smov 64   ;;  %s967_s24 = smov 4  }
  0x25   :  { %60 = dma.hbm_to_vmem [thread:$0]  %s1229_s3, 512, %s1022_s27, [#allocation9], %s966_s1, %s966_s1, %s967_s24  }
  0x26   :  { %s968_s28 = smov [#allocation11]   ;;  %s969_s30 = smov [#allocation2]  }
  0x27   :  { %s78_s29 = sshll.u32 %s968_s28, 4  ;;  %s22_s8 = sshll.u32 %s969_s30, 4  ;;  %s79_s29 = int_to_ptr.vmem [resolvable:$true] %s78_s29  ;;  %s1053_s8 = int_to_ptr.vmem [resolvable:$true] %s22_s8 }
  0x28   :  { %s822_s11 = scalar_lea.hbm %s1231_s5, 1024 }
  0x29   :  { %p823_p2 = scmp.ne.s32.totalorder %s1231_s5, %s822_s11  ;;  %p826_p3 = scmp.lt.u32.totalorder %s822_s11, %s1231_s5 }
  0x2b   :  { %p828_p4 = pnand %p826_p3, %p823_p2 }
  0x2d   :  { %831 = shalt.err (!%p828_p4)
}
  0x2e   :  { %s832_s3 = scalar_lea.vmem %s79_s29, 1024  ;;  %p837_p6 = scmp.lt.s32.totalorder %s79_s29, %s79_s29 }
  0x2f   :  { %p833_p5 = scmp.ne.s32.totalorder %s79_s29, %s832_s3  ;;  %p838_p7 = scmp.lt.s32.totalorder %s832_s3, %s832_s3 }
  0x31   :  { %p839_p8 = por %p838_p7, %p837_p6 }
  0x33   :  { %p840_p9 = pnand %p839_p8, %p833_p5 }
  0x35   :  { %843 = shalt.err (!%p840_p9)
}
  0x36   :  { %84 = dma.hbm_to_vmem [thread:$0]  %s1231_s5, 1024, %s79_s29, [#allocation12], %s966_s1, %s966_s1, %s967_s24  }
  0x37   :  { %s844_s19 = scalar_lea.hbm %s1226_s0, 256 }
  0x38   :  { %p845_p10 = scmp.ne.s32.totalorder %s1226_s0, %s844_s19  ;;  %p848_p11 = scmp.lt.u32.totalorder %s844_s19, %s1226_s0 }
  0x3a   :  { %p850_p12 = pnand %p848_p11, %p845_p10 }
  0x3c   :  { %853 = shalt.err (!%p850_p12)
}
  0x3d   :  { %s854_s25 = scalar_lea.vmem %s1053_s8, 256  ;;  %p859_p0 = scmp.lt.s32.totalorder %s1053_s8, %s1053_s8 }
  0x3e   :  { %p855_p13 = scmp.ne.s32.totalorder %s1053_s8, %s854_s25  ;;  %p860_p1 = scmp.lt.s32.totalorder %s854_s25, %s854_s25 }
  0x40   :  { %p861_p2 = por %p860_p1, %p859_p0 }
  0x42   :  { %p862_p3 = pnand %p861_p2, %p855_p13 }
  0x44   :  { %865 = shalt.err (!%p862_p3)
}
  0x45   :  { %s970_s5 = smov 128   ;;  %s971_s1 = smov 8  }
  0x46   :  { %28 = dma.hbm_to_vmem [thread:$0]  %s1226_s0, 256, %s1053_s8, [#allocation3], %s970_s5, %s970_s5, %s971_s1  }
  0x47   :  { %s972_s28 = smov [#allocation7]   ;;  %s973_s30 = smov [#allocation10]  }
  0x48   :  { %s45_s29 = sshll.u32 %s972_s28, 4  ;;  %s66_s9 = sshll.u32 %s973_s30, 4  ;;  %s46_s29 = int_to_ptr.vmem [resolvable:$true] %s45_s29  ;;  %s1087_s9 = int_to_ptr.vmem [resolvable:$true] %s66_s9 }
  0x49   :  { %s866_s12 = scalar_lea.hbm %s1228_s2, 16 }
  0x4a   :  { %p867_p4 = scmp.ne.s32.totalorder %s1228_s2, %s866_s12  ;;  %p870_p5 = scmp.lt.u32.totalorder %s866_s12, %s1228_s2 }
  0x4c   :  { %p872_p6 = pnand %p870_p5, %p867_p4 }
  0x4e   :  { %875 = shalt.err (!%p872_p6)
}
  0x4f   :  { %s876_s0 = scalar_lea.vmem %s46_s29, 16  ;;  %s880_s8 = scalar_lea.vmem %s46_s29, 32 }
  0x50   :  { %p877_p7 = scmp.ne.s32.totalorder %s46_s29, %s876_s0  ;;  %p881_p8 = scmp.lt.s32.totalorder %s46_s29, %s46_s29 }
  0x51   :  { %p882_p9 = scmp.lt.s32.totalorder %s880_s8, %s876_s0 }
  0x53   :  { %p883_p10 = por %p882_p9, %p881_p8 }
  0x55   :  { %p884_p11 = pnand %p883_p10, %p877_p7 }
  0x57   :  { %887 = shalt.err (!%p884_p11)
}
  0x58   :  { %48 = dma.hbm_to_vmem [thread:$0]  %s1228_s2, 16, %s46_s29, [#allocation6]  }
  0x59   :  { %s888_s19 = scalar_lea.hbm %s1230_s4, 32 }
  0x5a   :  { %p889_p12 = scmp.ne.s32.totalorder %s1230_s4, %s888_s19  ;;  %p892_p13 = scmp.lt.u32.totalorder %s888_s19, %s1230_s4 }
  0x5c   :  { %p894_p0 = pnand %p892_p13, %p889_p12 }
  0x5e   :  { %897 = shalt.err (!%p894_p0)
}
  0x5f   :  { %s898_s25 = scalar_lea.vmem %s1087_s9, 32  ;;  %p903_p2 = scmp.lt.s32.totalorder %s1087_s9, %s1087_s9 }
  0x60   :  { %p899_p1 = scmp.ne.s32.totalorder %s1087_s9, %s898_s25  ;;  %p904_p3 = scmp.lt.s32.totalorder %s898_s25, %s898_s25 }
  0x62   :  { %p905_p4 = por %p904_p3, %p903_p2 }
  0x64   :  { %p906_p5 = pnand %p905_p4, %p899_p1 }
  0x66   :  { %909 = shalt.err (!%p906_p5)
}
  0x67   :  { %s974_s2 = smov 16   ;;  %s975_s24 = smov 1  }
  0x68   :  { %72 = dma.hbm_to_vmem [thread:$0]  %s1230_s4, 32, %s1087_s9, [#allocation9], %s974_s2, %s974_s2, %s975_s24  }
  0x69   :  { %s976_s29 = smov [#allocation13]   ;;  %s910_s12 = scalar_lea.hbm %s1232_s6, 32 }
  0x6a   :  { %s90_s30 = sshll.u32 %s976_s29, 4  ;;  %p911_p6 = scmp.ne.s32.totalorder %s1232_s6, %s910_s12  ;;  %s91_s30 = int_to_ptr.vmem [resolvable:$true] %s90_s30 }
  0x6b   :  { %p914_p7 = scmp.lt.u32.totalorder %s910_s12, %s1232_s6 }
  0x6d   :  { %p916_p8 = pnand %p914_p7, %p911_p6 }
  0x6f   :  { %919 = shalt.err (!%p916_p8)
}
  0x70   :  { %s920_s0 = scalar_lea.vmem %s91_s30, 32  ;;  %p925_p10 = scmp.lt.s32.totalorder %s91_s30, %s91_s30 }
  0x71   :  { %p921_p9 = scmp.ne.s32.totalorder %s91_s30, %s920_s0  ;;  %p926_p11 = scmp.lt.s32.totalorder %s920_s0, %s920_s0 }
  0x73   :  { %p927_p12 = por %p926_p11, %p925_p10 }
  0x75   :  { %p928_p13 = pnand %p927_p12, %p921_p9 }
  0x77   :  { %931 = shalt.err (!%p928_p13)
}
  0x78   :  { %96 = dma.hbm_to_vmem [thread:$0]  %s1232_s6, 32, %s91_s30, [#allocation12], %s974_s2, %s974_s2, %s975_s24  }
  0x79   :  { %954 = dma.done.wait [#allocation3], 256  }
  0x7a   :  { %955 = vsyncadd [#allocation3], 4294967040 }
  0x7b   :  { %956 = dma.done.wait [#allocation6], 32  }
  0x7c   :  { %957 = vsyncadd [#allocation6], 4294967264 }
  0x7d   :  { %958 = dma.done.wait [#allocation9], 544  }
  0x7e   :  { %959 = vsyncadd [#allocation9], 4294966752 }
  0x7f   :  { %960 = dma.done.wait [#allocation12], 1056  }
  0x80   :  { %961 = vsyncadd [#allocation12], 4294966240  ;;  %v1130_v0 = vld [vmem:[#allocation2] sm:$0xff]  ;;  %v1132_v1 = vld [vmem:[#allocation2 + $0x8] sm:$0xff]  ;;  %s977_s8 = smov 96   ;;  %vm121_vm0 = vcmask 261120  }
  0x81   :  { %360 = vrot.lane.b32.xlu0 %v1130_v0, %s977_s8  ;;  %v122_v16 = vsel %vm121_vm0, %v1130_v0, 0.0  ;;  %v125_v19 = vsel %vm121_vm0, %v1132_v1, 0.0  ;;  %v742_v20 = vld [vmem:[#allocation8 + $0x10] sm:$0xff]   ;;  %v978_v21 = vmov 0.0   ;;  %v743_v48 = vld [vmem:[#allocation8 + $0x18] sm:$0xff]   ;;  %vm979_vm5 = vmmov 0  }
  0x82   :  { %704 = vmatprep.subr.bf16.mxu0 %v978_v21  ;;  %684 = vmatprep.subr.bf16.mxu1 %v978_v21  ;;  %v656_v51 = vld [vmem:[#allocation5] ss:$0 sm:$0xff]  ;;  %v657_v55 = vld [vmem:[#allocation7] ss:$0 sm:$0xff]  ;;  %v744_v60 = vld [vmem:[#allocation8] sm:$0xff]   ;;  %vm309_vm10 = vcmask 523264  }
  0x83   :  { %705 = vmatpush3.bf16.msra.mxu0 %v742_v20  ;;  %708 = vmatprep.mubr.msk.bf16.mxu0 %vm979_vm5, %v978_v21  ;;  %v745_v61 = vld [vmem:[#allocation8 + $0x8] sm:$0xff]   ;;  %s980_s6 = smov 32   ;;  %vm621_vm11 = vcmask 523520   ;;  %s981_s27 = smov [#allocation14]  }
  0x84   :  { %706 = vmatprep.subr.bf16.mxu0 %v978_v21  ;;  %688 = vmatprep.mubr.msk.bf16.mxu1 %vm979_vm5, %v978_v21  ;;  %s629_s16 = sshll.u32 %s981_s27, 4  ;;  %s630_s16 = int_to_ptr.vmem [resolvable:$true] %s629_s16 }
  0x85   :  { %362 = vrot.lane.b32.xlu0 %v1132_v1, %s977_s8  ;;  %685 = vmatpush3.bf16.msra.mxu1 %v744_v60  ;;  %s932_s17 = scalar_lea.vmem %s630_s16, 256  ;;  %p937_p1 = scmp.lt.s32.totalorder %s630_s16, %s630_s16 }
  0x86   :  { %686 = vmatprep.subr.bf16.mxu1 %v978_v21  ;;  %p933_p0 = scmp.ne.s32.totalorder %s630_s16, %s932_s17  ;;  %p938_p2 = scmp.lt.s32.totalorder %s932_s17, %s932_s17 }
  0x87   :  { %707 = vmatpush3.bf16.msra.mxu0 %v743_v48 }
  0x88   :  { %712 = vmatprep.subr.bf16.mxu0 %v978_v21  ;;  %p939_p3 = por %p938_p2, %p937_p1 }
  0x89   :  { %687 = vmatpush3.bf16.msra.mxu1 %v745_v61 }
  0x8a   :  { %692 = vmatprep.subr.bf16.mxu1 %v978_v21  ;;  %p940_p4 = pnand %p939_p3, %p933_p0 }
  0xf3   :  { %v1138_v2 = vpop.permute.xlu0 %360 }
  0xf4   :  { %v366_v3 = vsel %vm121_vm0, %v1138_v2, 0.0 }
  0xf5   :  { %367 = vadd.xlane.f32.xlu1 %v366_v3 }
  0xf7   :  { %v1142_v4 = vpop.permute.xlu0 %362 }
  0xf8   :  { %v369_v5 = vsel %vm121_vm0, %v1142_v4, 0.0 }
  0xf9   :  { %370 = vadd.xlane.f32.xlu1 %v369_v5 }
 0x182   :  { %v368_v6 = vpop.xlane.xlu1 %367 }
 0x183   :  { %v372_v7 = vmul.f32 0.03125, %v368_v6 }
 0x185   :  { %v1147_v8 = vsub.f32 %v1130_v0, %v372_v7 }
 0x186   :  { %v371_v9 = vpop.xlane.xlu1 %370 }
 0x187   :  { %v373_v10 = vmul.f32 0.03125, %v371_v9  ;;  %v376_v11 = vmul.f32 %v1147_v8, %v1147_v8 }
 0x189   :  { %v1152_v12 = vsub.f32 %v1132_v1, %v373_v10  ;;  %380 = vrot.lane.b32.xlu0 %v376_v11, %s977_s8 }
 0x18b   :  { %v377_v13 = vmul.f32 %v1152_v12, %v1152_v12 }
 0x18d   :  { %382 = vrot.lane.b32.xlu1 %v377_v13, %s977_s8 }
 0x1fb   :  { %v381_v14 = vpop.permute.xlu0 %380 }
 0x1fc   :  { %v386_v15 = vsel %vm121_vm0, %v381_v14, 0.0 }
 0x1fd   :  { %387 = vadd.xlane.f32.xlu0 %v386_v15 }
 0x1ff   :  { %v383_v17 = vpop.permute.xlu1 %382 }
 0x200   :  { %v389_v18 = vsel %vm121_vm0, %v383_v17, 0.0 }
 0x201   :  { %390 = vadd.xlane.f32.xlu1 %v389_v18  ;;  %123 = vadd.xlane.f32.xlu0 %v122_v16 }
 0x205   :  { %126 = vadd.xlane.f32.xlu0 %v125_v19 }
 0x28a   :  { %v388_v22 = vpop.xlane.xlu0 %387 }
 0x28b   :  { %v392_v23 = vmul.f32 0.03125, %v388_v22 }
 0x28d   :  { %754 = vrsqrt.f32 %v392_v23  ;;  %vm396_vm1 = vcmp.eq.f32.partialorder %v392_v23, inf  ;;  %v399_v37 = vand.u32 2147483648, %v392_v23  ;;  %vm398_vm2 = vcmp.eq.f32.partialorder %v392_v23, 0.0 }
 0x28e   :  { %v391_v24 = vpop.xlane.xlu1 %390  ;;  %v124_v25 = vpop.xlane.xlu0 %123 }
 0x28f   :  { %v393_v26 = vmul.f32 0.03125, %v391_v24  ;;  %v129_v27 = vmul.f32 0.03125, %v124_v25 }
 0x291   :  { %756 = vrsqrt.f32 %v393_v26  ;;  %v1168_v28 = vsub.f32 %v1130_v0, %v129_v27  ;;  %vm403_vm3 = vcmp.eq.f32.partialorder %v393_v26, inf  ;;  %v406_v44 = vand.u32 2147483648, %v393_v26 }
 0x292   :  { %v127_v29 = vpop.xlane.xlu0 %126  ;;  %vm405_vm4 = vcmp.eq.f32.partialorder %v393_v26, 0.0 }
 0x293   :  { %v130_v30 = vmul.f32 0.03125, %v127_v29  ;;  %v133_v31 = vmul.f32 %v1168_v28, %v1168_v28 }
 0x295   :  { %v1173_v32 = vsub.f32 %v1132_v1, %v130_v30  ;;  %v135_v33 = vsel %vm121_vm0, %v133_v31, 0.0  ;;  %v746_v30 = vld [vmem:[#allocation11 + $0x20] sm:$0xff]   ;;  %v747_v31 = vld [vmem:[#allocation11 + $0x28] sm:$0xff]  }
 0x296   :  { %136 = vadd.xlane.f32.xlu1 %v135_v33  ;;  %v750_v33 = vld [vmem:[#allocation11] sm:$0xff]  }
 0x297   :  { %v755_v34 = vpop.eup %754  ;;  %v134_v35 = vmul.f32 %v1173_v32, %v1173_v32 }
 0x298   :  { %v395_v36 = vmul.f32 %v755_v34, %v392_v23  ;;  %v751_v34 = vld [vmem:[#allocation11 + $0x8] sm:$0xff]  }
 0x299   :  { %v138_v38 = vsel %vm121_vm0, %v134_v35, 0.0  ;;  %v752_v35 = vld [vmem:[#allocation11 + $0x10] sm:$0xff]  }
 0x29a   :  { %v397_v39 = vsel %vm396_vm1, %v392_v23, %v395_v36  ;;  %139 = vadd.xlane.f32.xlu1 %v138_v38  ;;  %v753_v36 = vld [vmem:[#allocation11 + $0x18] sm:$0xff]  }
 0x29b   :  { %v757_v40 = vpop.eup %756  ;;  %v400_v41 = vsel %vm398_vm2, %v399_v37, %v397_v39  ;;  %v658_v37 = vld [vmem:[#allocation10 + $0x1] ss:$0 sm:$0xff] }
 0x29c   :  { %v408_v42 = vadd.f32 1e-05, %v400_v41  ;;  %v402_v43 = vmul.f32 %v757_v40, %v393_v26 }
 0x29e   :  { %v404_v45 = vsel %vm403_vm3, %v393_v26, %v402_v43  ;;  %758 = vrcp.f32 %v408_v42 }
 0x29f   :  { %v407_v46 = vsel %vm405_vm4, %v406_v44, %v404_v45 }
 0x2a0   :  { %v409_v47 = vadd.f32 1e-05, %v407_v46 }
 0x2a2   :  { %760 = vrcp.f32 %v409_v47 }
 0x2a8   :  { %v759_v49 = vpop.eup %758 }
 0x2a9   :  { %v414_v50 = vmul.f32 %v759_v49, %v1147_v8 }
 0x2ab   :  { %v423_v54 = vmul.f32 %v656_v51, %v414_v50 }
 0x2ac   :  { %v761_v52 = vpop.eup %760 }
 0x2ad   :  { %v415_v53 = vmul.f32 %v761_v52, %v1152_v12  ;;  %v432_v57 = vadd.f32 %v657_v55, %v423_v54 }
 0x2af   :  { %v424_v56 = vmul.f32 %v656_v51, %v415_v53 }
 0x2b1   :  { %v433_v58 = vadd.f32 %v657_v55, %v424_v56 }
 0x2b3   :  { %v434_v59 = vpack.c.bf16 %v433_v58, %v432_v57 }
 0x2b5   :  { %449 = vrot.lane.b32.xlu0 %v434_v59, %s977_s8 }
 0x323   :  { %v137_v62 = vpop.xlane.xlu1 %136 }
 0x324   :  { %v141_v63 = vmul.f32 0.03125, %v137_v62  ;;  %v646_v62 = vld [vmem:[#allocation10] ss:$0 sm:$0xff] }
 0x326   :  { %762 = vrsqrt.f32 %v141_v63  ;;  %vm145_vm6 = vcmp.eq.f32.partialorder %v141_v63, inf  ;;  %v148_v8 = vand.u32 2147483648, %v141_v63  ;;  %vm147_vm7 = vcmp.eq.f32.partialorder %v141_v63, 0.0 }
 0x327   :  { %v450_v3 = vpop.permute.xlu0 %449  ;;  %v140_v5 = vpop.xlane.xlu1 %139 }
 0x328   :  { %709 = vmatmul.mubr.msk.bf16.vlgmr.msra.gmra.mrb[0].mxu0 %vm121_vm0, %v450_v3  ;;  %v142_v6 = vmul.f32 0.03125, %v140_v5 }
 0x329   :  { %720 = vmatprep.mubr.msk.bf16.mxu0 %vm979_vm5, %v978_v21  ;;  %713 = vmatpush3.bf16.msra.mxu0 %v746_v30  ;;  %v662_v30 = vld [vmem:[#allocation13 + $0x1] ss:$0 sm:$0xff] }
 0x32a   :  { %764 = vrsqrt.f32 %v142_v6  ;;  %vm152_vm8 = vcmp.eq.f32.partialorder %v142_v6, inf  ;;  %v155_v13 = vand.u32 2147483648, %v142_v6  ;;  %vm154_vm9 = vcmp.eq.f32.partialorder %v142_v6, 0.0  ;;  %714 = vmatprep.subr.bf16.mxu0 %v978_v21 }
 0x32d   :  { %715 = vmatpush3.bf16.msra.mxu0 %v747_v31 }
 0x32e   :  { %716 = vmatprep.subr.bf16.mxu0 %v978_v21 }
 0x330   :  { %v763_v7 = vpop.eup %762 }
 0x331   :  { %v144_v9 = vmul.f32 %v763_v7, %v141_v63 }
 0x333   :  { %v146_v10 = vsel %vm145_vm6, %v141_v63, %v144_v9 }
 0x334   :  { %v765_v11 = vpop.eup %764  ;;  %v149_v12 = vsel %vm147_vm7, %v148_v8, %v146_v10 }
 0x335   :  { %v157_v14 = vadd.f32 1e-05, %v149_v12  ;;  %v151_v15 = vmul.f32 %v765_v11, %v142_v6 }
 0x337   :  { %766 = vrcp.f32 %v157_v14  ;;  %v153_v16 = vsel %vm152_vm8, %v142_v6, %v151_v15 }
 0x338   :  { %v156_v17 = vsel %vm154_vm9, %v155_v13, %v153_v16 }
 0x339   :  { %v158_v18 = vadd.f32 1e-05, %v156_v17 }
 0x33b   :  { %768 = vrcp.f32 %v158_v18 }
 0x341   :  { %v767_v19 = vpop.eup %766 }
 0x342   :  { %v163_v20 = vmul.f32 %v767_v19, %v1168_v28  ;;  %v748_v28 = vld [vmem:[#allocation11 + $0x30] sm:$0xff]  }
 0x343   :  { %717 = vmatpush3.bf16.msra.mxu0 %v748_v28 }
 0x344   :  { %v172_v24 = vmul.f32 %v656_v51, %v163_v20  ;;  %718 = vmatprep.subr.bf16.mxu0 %v978_v21 }
 0x345   :  { %v769_v22 = vpop.eup %768 }
 0x346   :  { %v164_v23 = vmul.f32 %v769_v22, %v1173_v32  ;;  %v181_v26 = vadd.f32 %v657_v55, %v172_v24  ;;  %v749_v32 = vld [vmem:[#allocation11 + $0x38] sm:$0xff]  }
 0x347   :  { %719 = vmatpush3.bf16.msra.mxu0 %v749_v32 }
 0x348   :  { %v173_v25 = vmul.f32 %v656_v51, %v164_v23 }
 0x34a   :  { %v182_v27 = vadd.f32 %v657_v55, %v173_v25 }
 0x34c   :  { %v183_v29 = vpack.c.bf16 %v182_v27, %v181_v26 }
 0x34e   :  { %689 = vmatmul.mubr.msk.bf16.vlgmr.msra.gmra.mrb[0].mxu1 %vm121_vm0, %v183_v29 }
 0x34f   :  { %700 = vmatprep.mubr.msk.bf16.mxu1 %vm979_vm5, %v978_v21  ;;  %693 = vmatpush3.bf16.msra.mxu1 %v750_v33 }
 0x350   :  { %694 = vmatprep.subr.bf16.mxu1 %v978_v21 }
 0x353   :  { %695 = vmatpush3.bf16.msra.mxu1 %v751_v34 }
 0x354   :  { %696 = vmatprep.subr.bf16.mxu1 %v978_v21 }
 0x357   :  { %697 = vmatpush3.bf16.msra.mxu1 %v752_v35 }
 0x358   :  { %698 = vmatprep.subr.bf16.mxu1 %v978_v21 }
 0x35b   :  { %699 = vmatpush3.bf16.msra.mxu1 %v753_v36 }
 0x3fb   :  { %v500_v38 = vpop.f32.mrb[0].mxu0 }
 0x3fc   :  { %v501_v39 = vadd.f32 %v658_v37, %v500_v38  ;;  %v710_v40 = vpop.f32.mrb[1].mxu0  ;;  %v650_v38 = vld [vmem:[#allocation13] ss:$0 sm:$0xff] }
 0x3fd   :  { %v503_v41 = vpop.f32.mrb[2].mxu0 }
 0x3fe   :  { %v507_v42 = vmul.f32 %v501_v39, %v501_v39  ;;  %v504_v43 = vadd.f32 %v658_v37, %v503_v41  ;;  %v711_v44 = vpop.f32.mrb[3].mxu0 }
 0x400   :  { %v509_v45 = vmul.f32 %v507_v42, %v501_v39  ;;  %v508_v46 = vmul.f32 %v504_v43, %v504_v43 }
 0x402   :  { %v511_v47 = vmul.f32 0.044715, %v509_v45  ;;  %v510_v48 = vmul.f32 %v508_v46, %v504_v43 }
 0x404   :  { %v513_v49 = vadd.f32 %v511_v47, %v501_v39  ;;  %v512_v50 = vmul.f32 0.044715, %v510_v48 }
 0x406   :  { %v515_v51 = vmul.f32 0.7978846, %v513_v49  ;;  %v514_v52 = vadd.f32 %v512_v50, %v504_v43 }
 0x408   :  { %770 = vtanh.f32 %v515_v51  ;;  %v516_v21 = vmul.f32 0.7978846, %v514_v52 }
 0x40a   :  { %772 = vtanh.f32 %v516_v21 }
 0x412   :  { %v771_v53 = vpop.eup %770 }
 0x413   :  { %v519_v54 = vadd.f32 1.0, %v771_v53 }
 0x414   :  { %v773_v55 = vpop.eup %772 }
 0x415   :  { %v521_v56 = vmul.f32 0.5, %v519_v54  ;;  %v520_v57 = vadd.f32 1.0, %v773_v55 }
 0x417   :  { %v522_v58 = vmul.f32 0.5, %v520_v57  ;;  %v523_v59 = vmul.f32 %v521_v56, %v501_v39 }
 0x419   :  { %v524_v60 = vmul.f32 %v522_v58, %v504_v43 }
 0x41b   :  { %v525_v61 = vpack.c.bf16 %v524_v60, %v523_v59 }
 0x41d   :  { %721 = vmatmul.mubr.msk.bf16.vlgmr.msra.gmra.mrb[4].mxu0 %vm309_vm10, %v525_v61 }
 0x421   :  { %v244_v63 = vpop.f32.mrb[0].mxu1 }
 0x422   :  { %v245_v3 = vadd.f32 %v646_v62, %v244_v63  ;;  %v690_v5 = vpop.f32.mrb[1].mxu1 }
 0x423   :  { %v247_v6 = vpop.f32.mrb[2].mxu1 }
 0x424   :  { %v251_v7 = vmul.f32 %v245_v3, %v245_v3  ;;  %v248_v8 = vadd.f32 %v646_v62, %v247_v6  ;;  %v691_v9 = vpop.f32.mrb[3].mxu1 }
 0x426   :  { %v253_v10 = vmul.f32 %v251_v7, %v245_v3  ;;  %v252_v11 = vmul.f32 %v248_v8, %v248_v8 }
 0x428   :  { %v255_v12 = vmul.f32 0.044715, %v253_v10  ;;  %v254_v13 = vmul.f32 %v252_v11, %v248_v8 }
 0x42a   :  { %v257_v14 = vadd.f32 %v255_v12, %v245_v3  ;;  %v256_v15 = vmul.f32 0.044715, %v254_v13 }
 0x42c   :  { %v259_v16 = vmul.f32 0.7978846, %v257_v14  ;;  %v258_v17 = vadd.f32 %v256_v15, %v248_v8 }
 0x42e   :  { %774 = vtanh.f32 %v259_v16  ;;  %v260_v18 = vmul.f32 0.7978846, %v258_v17 }
 0x430   :  { %776 = vtanh.f32 %v260_v18 }
 0x438   :  { %v775_v19 = vpop.eup %774 }
 0x439   :  { %v263_v20 = vadd.f32 1.0, %v775_v19 }
 0x43a   :  { %v777_v22 = vpop.eup %776 }
 0x43b   :  { %v265_v23 = vmul.f32 0.5, %v263_v20  ;;  %v264_v24 = vadd.f32 1.0, %v777_v22 }
 0x43d   :  { %v266_v25 = vmul.f32 0.5, %v264_v24  ;;  %v267_v26 = vmul.f32 %v265_v23, %v245_v3 }
 0x43f   :  { %v268_v27 = vmul.f32 %v266_v25, %v248_v8 }
 0x441   :  { %v269_v29 = vpack.c.bf16 %v268_v27, %v267_v26 }
 0x443   :  { %701 = vmatmul.mubr.msk.bf16.vlgmr.msra.gmra.mrb[4].mxu1 %vm309_vm10, %v269_v29 }
 0x4f0   :  { %v604_v31 = vpop.f32.mrb[4].mxu0 }
 0x4f1   :  { %v605_v28 = vadd.f32 %v662_v30, %v604_v31  ;;  %v722_v32 = vpop.f32.mrb[5].mxu0 }
 0x4f2   :  { %v607_v33 = vpop.f32.mrb[6].mxu0 }
 0x4f3   :  { %v611_v34 = vadd.f32 %v605_v28, %v1138_v2  ;;  %v608_v35 = vadd.f32 %v662_v30, %v607_v33  ;;  %v723_v36 = vpop.f32.mrb[7].mxu0 }
 0x4f5   :  { %v612_v37 = vadd.f32 %v608_v35, %v1142_v4  ;;  %615 = vrot.lane.b32.xlu1 %v611_v34, %s980_s6 }
 0x4f7   :  { %617 = vrot.lane.b32.xlu0 %v612_v37, %s980_s6 }
 0x516   :  { %v347_v39 = vpop.f32.mrb[4].mxu1 }
 0x517   :  { %v348_v40 = vadd.f32 %v650_v38, %v347_v39  ;;  %v702_v41 = vpop.f32.mrb[5].mxu1 }
 0x518   :  { %v350_v42 = vpop.f32.mrb[6].mxu1 }
 0x519   :  { %v354_v43 = vadd.f32 %v348_v40, %v1130_v0  ;;  %v351_v44 = vadd.f32 %v650_v38, %v350_v42  ;;  %v703_v45 = vpop.f32.mrb[7].mxu1 }
 0x51b   :  { %356 = vst.msk [vmem:[#allocation14] sm:$0xff] %vm121_vm0, %v354_v43  ;;  %v355_v2 = vadd.f32 %v351_v44, %v1132_v1 }
 0x51d   :  { %357 = vst.msk [vmem:[#allocation14 + $0x8] sm:$0xff] %vm121_vm0, %v355_v2 }
 0x567   :  { %v616_v4 = vpop.permute.xlu1 %615 }
 0x568   :  { %622 = vst.msk [vmem:[#allocation14] sm:$0xff] %vm621_vm11, %v616_v4 }
 0x569   :  { %v618_v46 = vpop.permute.xlu0 %617 }
 0x56a   :  { %623 = vst.msk [vmem:[#allocation14 + $0x8] sm:$0xff] %vm621_vm11, %v618_v46 }
 0x56b   :  { %943 = shalt.err (!%p940_p4)
}
 0x56c   :  { %s944_s20 = scalar_lea.hbm %s1233_s7, 256 }
 0x56d   :  { %p945_p5 = scmp.ne.s32.totalorder %s1233_s7, %s944_s20  ;;  %p948_p6 = scmp.lt.u32.totalorder %s944_s20, %s1233_s7 }
 0x56f   :  { %p950_p7 = pnand %p948_p6, %p945_p5 }
 0x571   :  { %953 = shalt.err (!%p950_p7)
}
 0x572   :  { %635 = dma.vmem_to_hbm [thread:$0]  %s630_s16, 256, %s1233_s7, [#allocation4], %s970_s5, %s970_s5, %s971_s1  }
 0x573   :  { %962 = dma.done.wait [#allocation4], 256  }
 0x574   :  { %963 = vsyncadd [#allocation4], 4294967040 }
 0x575   :  { %639 = vsyncpa [#allocation3], 1 }
 0x576   :  { %640 = vsyncpa [#allocation6], 1 }
 0x577   :  { %641 = vsyncpa [#allocation9], 1 }
 0x578   :  { %642 = vsyncpa [#allocation12], 1 }
 0x579   :  { %643 = vsyncpa [#allocation4], 1 }

// kernel: forward.12
= control target key start
LH: loop header
LB: loop body
LE: loop exit
PB: predicated region body
PF: predicated region fallthrough
CT: control target
= control target key end

     0   :  { %11 = vsyncpa [#allocation4], 0  ;;  %s2853_s0 = inlined_call_operand.hbm [shape: f32[2,8,32], index: 0, kind: input, shape index: {}]   ;;  %s2854_s1 = inlined_call_operand.hbm [shape: f32[1,64], index: 1, kind: input, shape index: {}]   ;;  %s2855_s2 = inlined_call_operand.hbm [shape: f32[1,64], index: 2, kind: input, shape index: {}]   ;;  %s2856_s3 = inlined_call_operand.hbm [shape: bf16[64,192], index: 3, kind: input, shape index: {}]   ;;  %s2857_s4 = inlined_call_operand.hbm [shape: bf16[64,64], index: 4, kind: input, shape index: {}]   ;;  %s2858_s5 = inlined_call_operand.hbm [shape: f32[1,64], index: 5, kind: input, shape index: {}]   ;;  %s2859_s6 = inlined_call_operand.hbm [shape: f32[2,8,64], index: 6, kind: output, shape index: {}]  }
   0x1   :  { %13 = vsyncpa [#allocation4 + $0x1], 0 }
   0x2   :  { %14 = vsyncpa [#allocation7], 0 }
   0x3   :  { %15 = vsyncpa [#allocation10], 0 }
   0x4   :  { %16 = vsyncpa [#allocation13], 0 }
   0x5   :  { %17 = vsyncpa [#allocation5], 0 }
   0x6   :  { %19 = vsyncpa [#allocation5 + $0x1], 0  ;;  %s2368_s21 = smov 0   ;;  %s2370_s22 = smov 0  }
   0x7   :  { %s2372_s23 = smov 0   ;;  %s2374_s24 = smov 0  }
   0x8 LB: > { %s2304_s25 = smov [#allocation6]   ;;  %s2389_s27 = sadd.s32 4294967295, %s2302_s24   ;;  %s2302_s24 = sphi %s2374_s24, %s2886_s24   ;;  %s2298_s23 = sphi %s2372_s23, %s2885_s23   ;;  %s2294_s22 = sphi %s2370_s22, %s2884_s22   ;;  %s2290_s21 = sphi %s2368_s21, %s2883_s21  }
   0x9   : > { %s200_s26 = sshll.u32 %s2304_s25, 4  ;;  %p1681_p0 = scmp.ge.s32.totalorder %s2302_s24, 1  ;;  %s2394_s26 = int_to_ptr.vmem [resolvable:$true] %s200_s26 }
   0xa   : > { %p2860_p1 = scmp.eq.s32.totalorder %s2389_s27, 0  ;;  %p187_p2 = scmp.lt.s32.totalorder %s2302_s24, 3 }
   0xb   : > { %s2305_s29 = smov [#allocation9]   ;;  %s2306_s8 = smov [#allocation8]  }
   0xc   : > { %p2396_p3 = pnand %p1681_p0, %p187_p2  ;;  %s221_s30 = sshll.u32 %s2305_s29, 4  ;;  %s2403_s30 = int_to_ptr.vmem [resolvable:$true] %s221_s30 }
   0xd   : > { %s211_s9 = sshll.u32 %s2306_s8, 4  ;;  %s2054_s12 = scalar_lea.hbm %s2854_s1, 16  ;;  %s2411_s9 = int_to_ptr.vmem [resolvable:$true] %s211_s9 }
   0xe   : > { %s2864_s28 = scalar_select %p2396_p3, 1, 0 }
   0xf   : > { %p1907_p5 = pneg %p2396_p3  ;;  %p2055_p7 = scmp.ne.s32.totalorder %s2854_s1, %s2054_s12 }
  0x10   : > { %p2061_p11 = scmp.lt.u32.totalorder %s2054_s12, %s2854_s1 }
  0x11   : > { %p2407_p6 = pnand %p1907_p5, %p2860_p1 }
  0x13   : > { %p2421_p8 = pneg %p2407_p6 }
  0x15   : > { %p2057_p9 = pnand %p2421_p8, %p2055_p7 }
  0x17   : > { %p2058_p10 = pneg %p2057_p9 }
  0x19   : > { %p2063_p12 = pnand %p2061_p11, %p2058_p10 }
  0x1b   : > { %2066 = shalt.err (!%p2063_p12)
}
  0x1c   : > { %s2067_s18 = scalar_lea.vmem %s2394_s26, 16  ;;  %s2074_s19 = scalar_lea.vmem %s2394_s26, 32 }
  0x1d   : > { %p2068_p13 = scmp.ne.s32.totalorder %s2394_s26, %s2067_s18  ;;  %p2075_p5 = scmp.lt.s32.totalorder %s2394_s26, %s2394_s26 }
  0x1e   : > { %p2076_p7 = scmp.lt.s32.totalorder %s2074_s19, %s2067_s18 }
  0x1f   : > { %p2070_p0 = pnand %p2068_p13, %p2421_p8 }
  0x20   : > { %p2077_p9 = por %p2076_p7, %p2075_p5 }
  0x21   : > { %p2071_p2 = pneg %p2070_p0 }
  0x23   : > { %p2078_p4 = pnand %p2077_p9, %p2071_p2 }
  0x25   : > { %2081 = shalt.err (!%p2078_p4)
}
  0x26   : > { %1910 = dma.hbm_to_vmem [thread:$0]  (!%p2407_p6), %s2854_s1, 16, %s2394_s26, [#allocation7]  }
  0x27   : > { %s2082_s10 = scalar_lea.hbm %s2856_s3, 1024 }
  0x28   : > { %p2083_p10 = scmp.ne.s32.totalorder %s2856_s3, %s2082_s10  ;;  %p2089_p4 = scmp.lt.u32.totalorder %s2082_s10, %s2856_s3 }
  0x2a   : > { %p2085_p11 = pnand %p2083_p10, %p2421_p8 }
  0x2c   : > { %p2086_p12 = pneg %p2085_p11 }
  0x2e   : > { %p2091_p13 = pnand %p2089_p4, %p2086_p12 }
  0x30   : > { %2094 = shalt.err (!%p2091_p13)
}
  0x31   : > { %s2095_s26 = scalar_lea.vmem %s2403_s30, 1024  ;;  %p2103_p7 = scmp.lt.s32.totalorder %s2403_s30, %s2403_s30 }
  0x32   : > { %p2096_p0 = scmp.ne.s32.totalorder %s2403_s30, %s2095_s26  ;;  %p2104_p9 = scmp.lt.s32.totalorder %s2095_s26, %s2095_s26 }
  0x34   : > { %p2098_p2 = pnand %p2096_p0, %p2421_p8  ;;  %p2105_p10 = por %p2104_p9, %p2103_p7 }
  0x36   : > { %p2099_p5 = pneg %p2098_p2 }
  0x38   : > { %p2106_p11 = pnand %p2105_p10, %p2099_p5 }
  0x3a   : > { %2109 = shalt.err (!%p2106_p11)
}
  0x3b   : > { %s2307_s16 = smov 128   ;;  %s2308_s17 = smov 8  }
  0x3c   : > { %1916 = dma.hbm_to_vmem [thread:$0]  (!%p2407_p6), %s2856_s3, 1024, %s2403_s30, [#allocation10], %s2307_s16, %s2307_s16, %s2308_s17  }
  0x3d   : > { %s2110_s29 = scalar_lea.hbm %s2855_s2, 16 }
  0x3e   : > { %p2111_p12 = scmp.ne.s32.totalorder %s2855_s2, %s2110_s29  ;;  %p2117_p0 = scmp.lt.u32.totalorder %s2110_s29, %s2855_s2 }
  0x40   : > { %p2113_p4 = pnand %p2111_p12, %p2421_p8 }
  0x42   : > { %p2114_p13 = pneg %p2113_p4 }
  0x44   : > { %p2119_p2 = pnand %p2117_p0, %p2114_p13 }
  0x46   : > { %2122 = shalt.err (!%p2119_p2)
}
  0x47   : > { %s2123_s30 = scalar_lea.vmem %s2411_s9, 16  ;;  %s2130_s13 = scalar_lea.vmem %s2411_s9, 32 }
  0x48   : > { %p2124_p5 = scmp.ne.s32.totalorder %s2411_s9, %s2123_s30  ;;  %p2131_p10 = scmp.lt.s32.totalorder %s2411_s9, %s2411_s9 }
  0x49   : > { %p2132_p11 = scmp.lt.s32.totalorder %s2130_s13, %s2123_s30 }
  0x4a   : > { %p2126_p7 = pnand %p2124_p5, %p2421_p8 }
  0x4b   : > { %p2133_p12 = por %p2132_p11, %p2131_p10 }
  0x4c   : > { %p2127_p9 = pneg %p2126_p7 }
  0x4e   : > { %p2134_p4 = pnand %p2133_p12, %p2127_p9 }
  0x50   : > { %2137 = shalt.err (!%p2134_p4)
}
  0x51   : > { %1913 = dma.hbm_to_vmem [thread:$0]  (!%p2407_p6), %s2855_s2, 16, %s2411_s9, [#allocation7]  }
  0x52   : > { %s2309_s16 = smov [#allocation11]   ;;  %s2138_s20 = scalar_lea.hbm %s2857_s4, 512 }
  0x53   : > { %s234_s17 = sshll.u32 %s2309_s16, 4  ;;  %p2139_p13 = scmp.ne.s32.totalorder %s2857_s4, %s2138_s20  ;;  %s235_s17 = int_to_ptr.vmem [resolvable:$true] %s234_s17 }
  0x54   : > { %p2145_p5 = scmp.lt.u32.totalorder %s2138_s20, %s2857_s4 }
  0x55   : > { %p2141_p0 = pnand %p2139_p13, %p2421_p8 }
  0x57   : > { %p2142_p2 = pneg %p2141_p0 }
  0x59   : > { %p2147_p7 = pnand %p2145_p5, %p2142_p2 }
  0x5b   : > { %2150 = shalt.err (!%p2147_p7)
}
  0x5c   : > { %s2151_s9 = scalar_lea.vmem %s235_s17, 512  ;;  %p2159_p12 = scmp.lt.s32.totalorder %s235_s17, %s235_s17 }
  0x5d   : > { %p2152_p9 = scmp.ne.s32.totalorder %s235_s17, %s2151_s9  ;;  %p2160_p4 = scmp.lt.s32.totalorder %s2151_s9, %s2151_s9 }
  0x5f   : > { %p2154_p10 = pnand %p2152_p9, %p2421_p8  ;;  %p2161_p1 = por %p2160_p4, %p2159_p12 }
  0x61   : > { %p2155_p11 = pneg %p2154_p10 }
  0x63   : > { %p2162_p3 = pnand %p2161_p1, %p2155_p11 }
  0x65   : > { %2165 = shalt.err (!%p2162_p3)
}
  0x66   : > { %s2310_s11 = smov 64   ;;  %s2311_s12 = smov 4  }
  0x67   : > { %1919 = dma.hbm_to_vmem [thread:$0]  (!%p2407_p6), %s2857_s4, 512, %s235_s17, [#allocation10], %s2310_s11, %s2310_s11, %s2311_s12  }
  0x68   : > { %s2312_s14 = smov [#allocation12]   ;;  %s2166_s19 = scalar_lea.hbm %s2858_s5, 16 }
  0x69   : > { %s248_s26 = sshll.u32 %s2312_s14, 4  ;;  %p2167_p1 = scmp.ne.s32.totalorder %s2858_s5, %s2166_s19  ;;  %s249_s26 = int_to_ptr.vmem [resolvable:$true] %s248_s26 }
  0x6a   : > { %p2173_p0 = scmp.lt.u32.totalorder %s2166_s19, %s2858_s5 }
  0x6b   : > { %p2169_p3 = pnand %p2167_p1, %p2421_p8 }
  0x6d   : > { %p2170_p13 = pneg %p2169_p3 }
  0x6f   : > { %p2175_p2 = pnand %p2173_p0, %p2170_p13 }
  0x71   : > { %2178 = shalt.err (!%p2175_p2)
}
  0x72   : > { %s2179_s17 = scalar_lea.vmem %s249_s26, 16  ;;  %s2186_s10 = scalar_lea.vmem %s249_s26, 32 }
  0x73   : > { %p2180_p5 = scmp.ne.s32.totalorder %s249_s26, %s2179_s17  ;;  %p2187_p10 = scmp.lt.s32.totalorder %s249_s26, %s249_s26 }
  0x74   : > { %p2188_p11 = scmp.lt.s32.totalorder %s2186_s10, %s2179_s17 }
  0x75   : > { %p2182_p7 = pnand %p2180_p5, %p2421_p8 }
  0x76   : > { %p2189_p12 = por %p2188_p11, %p2187_p10 }
  0x77   : > { %p2183_p9 = pneg %p2182_p7 }
  0x79   : > { %p2190_p4 = pnand %p2189_p12, %p2183_p9 }
  0x7b   : > { %2193 = shalt.err (!%p2190_p4)
}
  0x7c   : > { %1922 = dma.hbm_to_vmem [thread:$0]  (!%p2407_p6), %s2858_s5, 16, %s249_s26, [#allocation13]  }
  0x7d   : > { %s1680_s15 = sadd.s32 4294967294, %s2302_s24   ;;  %s2528_s7 = sadd.s32 1, %s2302_s24  }
  0x7e   : > { %s32_s12 = sadd.s32 1, %s2298_s23  ;;  %s29_s30 = ssub.s32 %s2302_s24, %s2528_s7 }
  0x7f   : > { %p39_p8 = scmp.ne.s32.totalorder %s2298_s23, %s2294_s22  ;;  %p30_p1 = scmp.eq.s32.totalorder %s29_s30, 0 }
  0x80   : > { %p40_p3 = scmp.eq.s32.totalorder %s2302_s24, 0  ;;  %p45_p13 = scmp.ne.s32.totalorder %s2294_s22, %s2290_s21 }
  0x81   : > { %p174_p0 = scmp.eq.s32.totalorder %s2389_s27, 1  ;;  %p2867_p5 = scmp.eq.s32.totalorder %s2389_s27, 0 }
  0x82   : > { %s2540_s13 = scalar_select %p30_p1, %s2298_s23, %s32_s12  }
  0x83   : > { %p41_p2 = por %p40_p3, %p39_p8  ;;  %p2544_p7 = por %p2867_p5, %p45_p13 }
  0x84   : > { %p2548_p6 = por %p174_p0, %p39_p8  ;;  %p180_p9 = scmp.eq.s32.totalorder %s1680_s15, 1 }
  0x85   : > { %p1936_p10 = scmp.lt.s32.totalorder %s2302_s24, 2  ;;  %s259_s16 = sand.u32 1, %s2298_s23  }
  0x86   : > { %s2869_s26 = scalar_select %p2548_p6, 1, 0 }
  0x87   : > { %p2554_p11 = por %p180_p9, %p45_p13  ;;  %s1688_s19 = sshll.u32 %s259_s16, 3 }
  0x88   : > { %s1689_s20 = sshll.u32 %s2302_s24, 7  ;;  %s263_s17 = scalar_lea.vmem [#allocation3], %s1688_s19 }
  0x89   : > { %s2870_s18 = scalar_select %p2554_p11, 1, 0 }
  0x8a   : > { %s2562_s8 = scalar_lea.hbm %s2853_s0, %s1689_s20  ;;  %s270_s10 = sshll.u32 %s263_s17, 4  ;;  %s2568_s10 = int_to_ptr.vmem [resolvable:$true] %s270_s10 }
  0x8b   : > { %p2564_p12 = pnand %p1936_p10, %p41_p2  ;;  %s260_s11 = scalar_lea.sflag [#allocation4], %s259_s16 }
  0x8c   : > { %s2194_s15 = scalar_lea.hbm %s2562_s8, 128  ;;  %s2199_s19 = scalar_lea.hbm %s2853_s0, 256 }
  0x8d   : > { %p2195_p4 = scmp.ne.s32.totalorder %s2562_s8, %s2194_s15  ;;  %p2196_p8 = pneg %p2564_p12 }
  0x8e   : > { %p2200_p13 = scmp.lt.u32.totalorder %s2562_s8, %s2853_s0  ;;  %p2201_p0 = scmp.lt.u32.totalorder %s2199_s19, %s2194_s15 }
  0x8f   : > { %p2197_p1 = pnand %p2196_p8, %p2195_p4  ;;  %p2203_p5 = scmp.lt.u32.totalorder %s2194_s15, %s2562_s8 }
  0x90   : > { %p2202_p2 = por %p2201_p0, %p2200_p13 }
  0x91   : > { %p2198_p3 = pneg %p2197_p1 }
  0x92   : > { %p2204_p9 = por %p2203_p5, %p2202_p2 }
  0x94   : > { %p2205_p10 = pnand %p2204_p9, %p2198_p3 }
  0x96   : > { %2208 = shalt.err (!%p2205_p10)
}
  0x97   : > { %s2209_s16 = scalar_lea.vmem %s2568_s10, 128  ;;  %s2313_s29 = smov [#allocation3]  }
  0x98   : > { %p2210_p4 = scmp.ne.s32.totalorder %s2568_s10, %s2209_s16  ;;  %s2214_s17 = sshll.u32 %s2313_s29, 4  ;;  %s2215_s17 = int_to_ptr.vmem [resolvable:$false] %s2214_s17 }
  0x99   : > { %s2216_s12 = scalar_lea.vmem %s2215_s17, 256  ;;  %p2217_p6 = scmp.lt.s32.totalorder %s2568_s10, %s2215_s17 }
  0x9a   : > { %p2212_p1 = pnand %p2210_p4, %p2196_p8  ;;  %p2218_p13 = scmp.lt.s32.totalorder %s2216_s12, %s2209_s16 }
  0x9c   : > { %p2213_p11 = pneg %p2212_p1  ;;  %p2219_p0 = por %p2218_p13, %p2217_p6 }
  0x9e   : > { %p2220_p2 = pnand %p2219_p0, %p2213_p11 }
  0xa0   : > { %2223 = shalt.err (!%p2220_p2)
}
  0xa1   : > { %1926 = dma.hbm_to_vmem [thread:$0]  (!%p2564_p12), %s2562_s8, 128, %s2568_s10, %s260_s11  }
  0xa2   : > { %p2872_p3 = scmp.ne.s32.totalorder %s2864_s28, 0 }
  0xa3   : > { %s2598_s15 = sand.u32 (!%p2872_p3), 1, %s2294_s22  }
  0xa4   : > { %279 = sbr.rel (%p2872_p3) target bundleno = 2034 (0x7f2), region = 44  ;;  %s2863_s30 = sshll.u32 (!%p2872_p3), %s2598_s15, 3 }
  0xa5   : > { %s282_s19 = scalar_lea.sflag (!%p2872_p3), [#allocation4], %s2598_s15  ;;  %s285_s20 = scalar_lea.vmem (!%p2872_p3), [#allocation3], %s2863_s30 }
  0xab   : > { %2269 = dma.done.wait (%p2544_p7), %s282_s19, 128  }
  0xac   : > { %2271 = vsyncadd (%p2544_p7), %s282_s19, 4294967168  ;;  %p2873_p6 = scmp.eq.s32.totalorder %s2389_s27, 0 }
  0xae   : > { %2273 = dma.done.wait (%p2873_p6), [#allocation7], 32   ;;  %p2874_p11 = pmov %p2873_p6 }
  0xaf   : > { %p2875_p12 = pmov %p2873_p6 }
  0xb0   : > { %2275 = vsyncadd (%p2874_p11), [#allocation7], 4294967264 }
  0xb1   : > { %2277 = dma.done.wait (%p2875_p12), [#allocation10], 1536   ;;  %p2876_p8 = pmov %p2873_p6 }
  0xb2   : > { %p2877_p5 = pmov %p2873_p6 }
  0xb3   : > { %2279 = vsyncadd (%p2876_p8), [#allocation10], 4294965760 }
  0xb4   : > { %2281 = dma.done.wait (%p2877_p5), [#allocation13], 16   ;;  %p2878_p9 = pmov %p2877_p5 }
  0xb5   : > { %vm336_vm0 = vcmask 261120   ;;  %v2620_v0 = vld [vmem:[%s285_s20] sm:$0xff]  ;;  %v1698_v2 = vld [vmem:[#allocation6] ss:$0 sm:$0xff]  ;;  %s2314_s28 = smov 96   ;;  %v2315_v17 = vmov 0  }
  0xb6   : > { %2283 = vsyncadd (%p2878_p9), [#allocation13], 4294967280  ;;  %v337_v1 = vsel %vm336_vm0, %v2620_v0, 0.0  ;;  %380 = vrot.lane.b32.xlu1 %v1698_v2, %s2314_s28  ;;  %v1699_v3 = vld [vmem:[#allocation8] ss:$0 sm:$0xff]  ;;  %448 = vmatprep.mubr.bf16.mxu1 %v2315_v17  ;;  %v2316_v36 = vmov 0.0  }
  0xb7   : > { %338 = vadd.xlane.f32.xlu0 %v337_v1  ;;  %v2002_v9 = vld [vmem:[#allocation9 + $0x24] ss:$8 sps:$4 sm:$0xff]   ;;  %v2006_v11 = vld [vmem:[#allocation9 + $0x20] ss:$8 sps:$4 sm:$0xff]   ;;  %v2008_v13 = vld [vmem:[#allocation9 + $0x34] ss:$8 sps:$4 sm:$0xff]   ;;  %512 = vmatprep.mubr.bf16.mxu0 %v2315_v17 }
  0xb8   : > { %v2004_v10 = vld [vmem:[#allocation9 + $0x4] ss:$8 sps:$4 sm:$0xff]   ;;  %v2007_v12 = vld [vmem:[#allocation9] ss:$8 sps:$4 sm:$0xff]   ;;  %416 = vmatprep.subr.bf16.mxu1 %v2002_v9  ;;  %v2010_v14 = vld [vmem:[#allocation9 + $0x14] ss:$8 sps:$4 sm:$0xff]  }
  0xb9   : > { %480 = vmatprep.subr.bf16.mxu0 %v2004_v10  ;;  %417 = vmatpush1.bf16.msra.mxu1 %v2006_v11  ;;  %v2012_v15 = vld [vmem:[#allocation9 + $0x30] ss:$8 sps:$4 sm:$0xff]   ;;  %vm2317_vm3 = vmmov 0   ;;  %s2318_s14 = smov 56   ;;  %s2319_s8 = smov 64   ;;  %vm526_vm4 = vcmask 64512  }
  0xba   : > { %384 = vrot.lane.b32.xlu1 %v1699_v3, %s2314_s28  ;;  %481 = vmatpush1.bf16.msra.mxu0 %v2007_v12  ;;  %v2013_v16 = vld [vmem:[#allocation9 + $0x10] ss:$8 sps:$4 sm:$0xff]   ;;  %s2320_s10 = smov 120   ;;  %s2321_s9 = smov 32   ;;  %vm589_vm5 = vcmask 1043456   ;;  %vm750_vm6 = vcmask 130112  }
  0xbb   : > { %418 = vmatprep.subr.bf16.mxu1 %v2008_v13  ;;  %482 = vmatprep.subr.bf16.mxu0 %v2010_v14  ;;  %s2322_s11 = smov 48   ;;  %s2323_s25 = smov 24   ;;  %vm867_vm7 = vcmask 195712   ;;  %vm984_vm8 = vcmask 261312   ;;  %vm1101_vm9 = vcmask 326912   ;;  %vm1218_vm10 = vcmask 392512  }
  0xbc   : > { %s2324_s16 = smov 112   ;;  %s2325_s29 = smov 16   ;;  %vm1335_vm11 = vcmask 458112   ;;  %vm1452_vm12 = vcmask 523712   ;;  %vm1495_vm13 = vcmask 523264   ;;  %vm1546_vm14 = vcmask 523520  }
  0xbd   : > { %419 = vmatpush1.bf16.msra.mxu1 %v2012_v15  ;;  %s2326_s17 = smov 40   ;;  %s2327_s12 = smov 8  }
  0xbe   : > { %483 = vmatpush1.bf16.msra.mxu0 %v2013_v16  ;;  %1773 = vmatprep.subr.bf16.mxu1 %v2316_v36  ;;  %s2328_s19 = smov 104   ;;  %s2329_s20 = smov 88  }
  0xbf   : > { %1785 = vmatprep.subr.bf16.mxu0 %v2316_v36  ;;  %s2331_s30 = smov 72   ;;  %p2880_p10 = scmp.ne.s32.totalorder %s2869_s26, 0 }
 0x128   : > { %v381_v26 = vpop.permute.xlu1 %380 }
 0x12c   : > { %v385_v29 = vpop.permute.xlu1 %384 }
 0x144   : > { %v339_v4 = vpop.xlane.xlu0 %338 }
 0x145   : > { %v341_v5 = vmul.f32 0.03125, %v339_v4 }
 0x147   : > { %v342_v6 = vsub.f32 %v2620_v0, %v341_v5 }
 0x149   : > { %v343_v7 = vmul.f32 %v342_v6, %v342_v6 }
 0x14b   : > { %v344_v8 = vsel %vm336_vm0, %v343_v7, 0.0 }
 0x14c   : > { %345 = vadd.xlane.f32.xlu0 %v344_v8 }
 0x1d9   : > { %v346_v18 = vpop.xlane.xlu0 %345 }
 0x1da   : > { %v347_v19 = vmul.f32 0.03125, %v346_v18 }
 0x1dc   : > { %2018 = vrsqrt.f32 %v347_v19  ;;  %vm350_vm1 = vcmp.eq.f32.partialorder %v347_v19, inf  ;;  %v353_v22 = vand.u32 2147483648, %v347_v19  ;;  %vm352_vm2 = vcmp.eq.f32.partialorder %v347_v19, 0.0 }
 0x1e6   : > { %v2019_v20 = vpop.eup %2018 }
 0x1e7   : > { %v349_v21 = vmul.f32 %v2019_v20, %v347_v19 }
 0x1e9   : > { %v351_v23 = vsel %vm350_vm1, %v347_v19, %v349_v21 }
 0x1ea   : > { %v354_v24 = vsel %vm352_vm2, %v353_v22, %v351_v23 }
 0x1eb   : > { %v355_v25 = vadd.f32 1e-05, %v354_v24 }
 0x1ed   : > { %2020 = vrcp.f32 %v355_v25 }
 0x1f7   : > { %v2021_v27 = vpop.eup %2020 }
 0x1f8   : > { %v358_v28 = vmul.f32 %v2021_v27, %v342_v6 }
 0x1fa   : > { %v366_v30 = vmul.f32 %v1698_v2, %v358_v28  ;;  %v383_v31 = vmul.f32 %v381_v26, %v358_v28 }
 0x1fc   : > { %v374_v32 = vadd.f32 %v1699_v3, %v366_v30  ;;  %v387_v33 = vadd.f32 %v385_v29, %v383_v31 }
 0x1fe   : > { %v375_v34 = vpack.c.bf16 %v374_v32, %v374_v32  ;;  %v388_v35 = vpack.c.bf16 %v387_v33, %v387_v33 }
 0x200   : > { %1704 = vmatmul.mubr.msk.bf16.vlgmr.msra.gmra.mrb[0].mxu1 %vm336_vm0, %v388_v35  ;;  %1709 = vmatmul.mubr.msk.bf16.vlgmr.msra.gmra.mrb[0].mxu0 %vm336_vm0, %v375_v34 }
 0x201   : > { %1775 = vmatprep.mubr.msk.bf16.mxu1 %vm2317_vm3, %v2316_v36  ;;  %1787 = vmatprep.mubr.msk.bf16.mxu0 %vm2317_vm3, %v2316_v36 }
 0x2d3   : > { %v450_v37 = vpop.f32.mrb[0].mxu1  ;;  %v514_v38 = vpop.f32.mrb[0].mxu0 }
 0x2d4   : > { %v515_v39 = vadd.f32 %v514_v38, %v450_v37  ;;  %v452_v40 = vpop.f32.mrb[1].mxu1  ;;  %v516_v41 = vpop.f32.mrb[1].mxu0 }
 0x2d5   : > { %v517_v42 = vadd.f32 %v516_v41, %v452_v40  ;;  %v454_v43 = vpop.f32.mrb[2].mxu1  ;;  %v518_v44 = vpop.f32.mrb[2].mxu0 }
 0x2d6   : > { %v521_v45 = vpack.c.bf16 %v515_v39, %v515_v39  ;;  %v455_v46 = vpop.f32.mrb[3].mxu1  ;;  %v519_v47 = vpop.f32.mrb[3].mxu0 }
 0x2d7   : > { %v2654_v53 = vpack.c.bf16 %v517_v42, %v517_v42 }
 0x2d8   : > { %636 = vrot.lane.b32.xlu1 %v521_v45, %s2318_s14  ;;  %524 = vrot.lane.b32.xlu0 %v521_v45, %s2319_s8  ;;  %s2330_s8 = smov 80  }
 0x2d9   : > { %v591_v56 = vsel %vm589_vm5, %v2654_v53, 0 }
 0x2dc   : > { %634 = vrot.lane.b32.xlu1 %v521_v45, %s2320_s10  ;;  %988 = vrot.lane.b32.xlu0 %v521_v45, %s2321_s9 }
 0x2e0   : > { %754 = vrot.lane.b32.xlu1 %v521_v45, %s2322_s11  ;;  %1105 = vrot.lane.b32.xlu0 %v521_v45, %s2323_s25 }
 0x2e4   : > { %752 = vrot.lane.b32.xlu1 %v521_v45, %s2324_s16  ;;  %1222 = vrot.lane.b32.xlu0 %v521_v45, %s2325_s29 }
 0x2e8   : > { %871 = vrot.lane.b32.xlu1 %v521_v45, %s2326_s17  ;;  %1339 = vrot.lane.b32.xlu0 %v521_v45, %s2327_s12 }
 0x2ec   : > { %869 = vrot.lane.b32.xlu1 %v521_v45, %s2328_s19 }
 0x2f0   : > { %986 = vrot.lane.b32.xlu1 %v521_v45, %s2314_s28 }
 0x2f4   : > { %1103 = vrot.lane.b32.xlu1 %v521_v45, %s2329_s20 }
 0x2f8   : > { %1220 = vrot.lane.b32.xlu1 %v521_v45, %s2330_s8 }
 0x2fc   : > { %1337 = vrot.lane.b32.xlu1 %v521_v45, %s2331_s30 }
 0x34a   : > { %v637_v48 = vpop.permute.xlu1 %636  ;;  %v525_v49 = vpop.permute.xlu0 %524 }
 0x34b   : > { %v642_v50 = vsel %vm526_vm4, %v637_v48, 0  ;;  %v531_v51 = vsel %vm526_vm4, %v525_v49, 0 }
 0x34c   : > { %1774 = vmatpush3.bf16.xpose.msra.mxu1 %v531_v51  ;;  %1786 = vmatpush3.bf16.xpose.msra.mxu0 %v642_v50 }
 0x34d   : > { %1779 = vmatprep.subr.bf16.mxu1 %v2316_v36  ;;  %1797 = vmatprep.subr.bf16.mxu0 %v2316_v36 }
 0x34e   : > { %v635_v52 = vpop.permute.xlu1 %634  ;;  %v989_v60 = vpop.permute.xlu0 %988 }
 0x34f   : > { %v994_v62 = vsel %vm526_vm4, %v989_v60, 0 }
 0x352   : > { %v755_v54 = vpop.permute.xlu1 %754  ;;  %v1106_v63 = vpop.permute.xlu0 %1105 }
 0x353   : > { %v760_v55 = vsel %vm526_vm4, %v755_v54, 0  ;;  %1776 = vmatmul.mubr.msk.bf16.vlgmr.msra.gmra.mrb[4].mxu1 %vm526_vm4, %v521_v45  ;;  %1788 = vmatmul.mubr.msk.bf16.vlgmr.msra.gmra.mrb[4].mxu0 %vm526_vm4, %v635_v52  ;;  %v1111_v2 = vsel %vm526_vm4, %v1106_v63, 0 }
 0x354   : > { %1780 = vmatpush3.bf16.msra.mxu1 %v591_v56  ;;  %1798 = vmatpush3.bf16.xpose.msra.mxu0 %v760_v55 }
 0x355   : > { %1799 = vmatprep.mubr.msk.bf16.mxu0 %vm2317_vm3, %v2316_v36  ;;  %1809 = vmatprep.subr.bf16.mxu0 %v2316_v36 }
 0x356   : > { %v753_v57 = vpop.permute.xlu1 %752  ;;  %1781 = vmatprep.mubr.msk.bf16.mxu1 %vm2317_vm3, %v2316_v36  ;;  %1791 = vmatprep.subr.bf16.mxu1 %v2316_v36  ;;  %v1223_v3 = vpop.permute.xlu0 %1222 }
 0x357   : > { %v1228_v5 = vsel %vm526_vm4, %v1223_v3, 0 }
 0x35a   : > { %v872_v58 = vpop.permute.xlu1 %871  ;;  %v1340_v6 = vpop.permute.xlu0 %1339 }
 0x35b   : > { %v877_v59 = vsel %vm526_vm4, %v872_v58, 0  ;;  %1800 = vmatmul.mubr.msk.bf16.vlgmr.msra.gmra.mrb[8].mxu0 %vm526_vm4, %v753_v57  ;;  %v1345_v8 = vsel %vm526_vm4, %v1340_v6, 0 }
 0x35c   : > { %1810 = vmatpush3.bf16.xpose.msra.mxu0 %v877_v59  ;;  %1811 = vmatprep.mubr.msk.bf16.mxu0 %vm2317_vm3, %v2316_v36 }
 0x35d   : > { %1821 = vmatprep.subr.bf16.mxu0 %v2316_v36 }
 0x35e   : > { %v870_v61 = vpop.permute.xlu1 %869 }
 0x362   : > { %v987_v1 = vpop.permute.xlu1 %986 }
 0x363   : > { %1812 = vmatmul.mubr.msk.bf16.vlgmr.msra.gmra.mrb[12].mxu0 %vm526_vm4, %v870_v61 }
 0x364   : > { %1822 = vmatpush3.bf16.xpose.msra.mxu0 %v994_v62  ;;  %1823 = vmatprep.mubr.msk.bf16.mxu0 %vm2317_vm3, %v2316_v36 }
 0x365   : > { %1833 = vmatprep.subr.bf16.mxu0 %v2316_v36 }
 0x366   : > { %v1104_v4 = vpop.permute.xlu1 %1103 }
 0x36a   : > { %v1221_v7 = vpop.permute.xlu1 %1220 }
 0x36b   : > { %1824 = vmatmul.mubr.msk.bf16.vlgmr.msra.gmra.mrb[16].mxu0 %vm526_vm4, %v987_v1 }
 0x36c   : > { %1834 = vmatpush3.bf16.xpose.msra.mxu0 %v1111_v2  ;;  %1835 = vmatprep.mubr.msk.bf16.mxu0 %vm2317_vm3, %v2316_v36 }
 0x36d   : > { %1845 = vmatprep.subr.bf16.mxu0 %v2316_v36 }
 0x36e   : > { %v1338_v9 = vpop.permute.xlu1 %1337 }
 0x373   : > { %1836 = vmatmul.mubr.msk.bf16.vlgmr.msra.gmra.mrb[20].mxu0 %vm526_vm4, %v1104_v4 }
 0x374   : > { %1846 = vmatpush3.bf16.xpose.msra.mxu0 %v1228_v5  ;;  %1847 = vmatprep.mubr.msk.bf16.mxu0 %vm2317_vm3, %v2316_v36 }
 0x375   : > { %1857 = vmatprep.subr.bf16.mxu0 %v2316_v36 }
 0x37b   : > { %1848 = vmatmul.mubr.msk.bf16.vlgmr.msra.gmra.mrb[24].mxu0 %vm526_vm4, %v1221_v7 }
 0x37c   : > { %1858 = vmatpush3.bf16.xpose.msra.mxu0 %v1345_v8  ;;  %1859 = vmatprep.mubr.msk.bf16.mxu0 %vm2317_vm3, %v2316_v36 }
 0x37d   : > { %1869 = vmatprep.subr.bf16.mxu0 %v2316_v36 }
 0x383   : > { %1860 = vmatmul.mubr.msk.bf16.vlgmr.msra.gmra.mrb[28].mxu0 %vm526_vm4, %v1338_v9 }
 0x384   : > { %1877 = vmatprep.mubr.msk.bf16.mxu0 %vm2317_vm3, %v2316_v36 }
 0x426   : > { %v567_v10 = vpop.f32.mrb[4].mxu1  ;;  %v678_v11 = vpop.f32.mrb[4].mxu0 }
 0x427   : > { %v573_v12 = vmul.f32 0.35355338, %v567_v10  ;;  %v684_v13 = vmul.f32 0.35355338, %v678_v11  ;;  %v1777_v14 = vpop.f32.mrb[5].mxu1  ;;  %v1789_v15 = vpop.f32.mrb[5].mxu0 }
 0x428   : > { %v570_v16 = vpop.f32.mrb[6].mxu1  ;;  %v681_v17 = vpop.f32.mrb[6].mxu0 }
 0x429   : > { %v1778_v18 = vpop.f32.mrb[7].mxu1  ;;  %v1790_v19 = vpop.f32.mrb[7].mxu0  ;;  %v685_v20 = vsel %vm526_vm4, %v684_v13, -inf  ;;  %v574_v21 = vsel %vm526_vm4, %v573_v12, -inf }
 0x42a   : > { %686 = vmax.xlane.f32.xlu1 %v685_v20  ;;  %575 = vmax.xlane.f32.xlu0 %v574_v21 }
 0x42e   : > { %v796_v22 = vpop.f32.mrb[8].mxu0 }
 0x42f   : > { %v802_v23 = vmul.f32 0.35355338, %v796_v22  ;;  %v1801_v24 = vpop.f32.mrb[9].mxu0 }
 0x430   : > { %v799_v25 = vpop.f32.mrb[10].mxu0 }
 0x431   : > { %v1802_v26 = vpop.f32.mrb[11].mxu0  ;;  %v803_v27 = vsel %vm526_vm4, %v802_v23, -inf }
 0x432   : > { %804 = vmax.xlane.f32.xlu0 %v803_v27 }
 0x436   : > { %v913_v28 = vpop.f32.mrb[12].mxu0 }
 0x437   : > { %v919_v29 = vmul.f32 0.35355338, %v913_v28  ;;  %v1813_v30 = vpop.f32.mrb[13].mxu0 }
 0x438   : > { %v916_v31 = vpop.f32.mrb[14].mxu0 }
 0x439   : > { %v1814_v32 = vpop.f32.mrb[15].mxu0  ;;  %v920_v33 = vsel %vm526_vm4, %v919_v29, -inf }
 0x43a   : > { %921 = vmax.xlane.f32.xlu0 %v920_v33 }
 0x43e   : > { %v1030_v34 = vpop.f32.mrb[16].mxu0 }
 0x43f   : > { %v1036_v35 = vmul.f32 0.35355338, %v1030_v34  ;;  %v1825_v37 = vpop.f32.mrb[17].mxu0 }
 0x440   : > { %v1033_v38 = vpop.f32.mrb[18].mxu0 }
 0x441   : > { %v1826_v39 = vpop.f32.mrb[19].mxu0  ;;  %v1037_v40 = vsel %vm526_vm4, %v1036_v35, -inf }
 0x442   : > { %1038 = vmax.xlane.f32.xlu1 %v1037_v40 }
 0x446   : > { %v1147_v41 = vpop.f32.mrb[20].mxu0 }
 0x447   : > { %v1153_v42 = vmul.f32 0.35355338, %v1147_v41  ;;  %v1837_v43 = vpop.f32.mrb[21].mxu0 }
 0x448   : > { %v1150_v44 = vpop.f32.mrb[22].mxu0 }
 0x449   : > { %v1838_v45 = vpop.f32.mrb[23].mxu0  ;;  %v1154_v46 = vsel %vm526_vm4, %v1153_v42, -inf }
 0x44a   : > { %1155 = vmax.xlane.f32.xlu0 %v1154_v46 }
 0x44e   : > { %v1264_v47 = vpop.f32.mrb[24].mxu0 }
 0x44f   : > { %v1270_v48 = vmul.f32 0.35355338, %v1264_v47  ;;  %v1849_v49 = vpop.f32.mrb[25].mxu0 }
 0x450   : > { %v1267_v50 = vpop.f32.mrb[26].mxu0 }
 0x451   : > { %v1850_v51 = vpop.f32.mrb[27].mxu0  ;;  %v1271_v52 = vsel %vm526_vm4, %v1270_v48, -inf }
 0x452   : > { %1272 = vmax.xlane.f32.xlu1 %v1271_v52 }
 0x456   : > { %v1381_v54 = vpop.f32.mrb[28].mxu0 }
 0x457   : > { %v1387_v55 = vmul.f32 0.35355338, %v1381_v54  ;;  %v1861_v56 = vpop.f32.mrb[29].mxu0 }
 0x458   : > { %v1384_v57 = vpop.f32.mrb[30].mxu0 }
 0x459   : > { %v1862_v58 = vpop.f32.mrb[31].mxu0  ;;  %v1388_v59 = vsel %vm526_vm4, %v1387_v55, -inf }
 0x45a   : > { %1389 = vmax.xlane.f32.xlu0 %v1388_v59 }
 0x463   : > { %815 = vrot.lane.b32.xlu1 %v2654_v53, %s2324_s16 }
 0x470   : > { %698 = vrot.lane.b32.xlu0 %v2654_v53, %s2320_s10 }
 0x4b7   : > { %v687_v60 = vpop.xlane.xlu1 %686  ;;  %v576_v61 = vpop.xlane.xlu0 %575 }
 0x4b8   : > { %v688_v62 = vsub.f32 %v684_v13, %v687_v60  ;;  %v577_v63 = vsub.f32 %v573_v12, %v576_v61 }
 0x4ba   : > { %v689_v1 = vmul.f32 1.442695, %v688_v62  ;;  %v578_v2 = vmul.f32 1.442695, %v577_v63 }
 0x4bc   : > { %2022 = vpow2.f32 %v689_v1 }
 0x4bd   : > { %2024 = vpow2.f32 %v578_v2 }
 0x4bf   : > { %v805_v3 = vpop.xlane.xlu0 %804 }
 0x4c0   : > { %v806_v4 = vsub.f32 %v802_v23, %v805_v3 }
 0x4c2   : > { %v807_v5 = vmul.f32 1.442695, %v806_v4 }
 0x4c4   : > { %2026 = vpow2.f32 %v807_v5 }
 0x4c6   : > { %v2707_v6 = vpop.eup %2022 }
 0x4c7   : > { %v2025_v7 = vpop.eup %2024  ;;  %v922_v8 = vpop.xlane.xlu0 %921  ;;  %v691_v9 = vsel %vm526_vm4, %v2707_v6, 0.0 }
 0x4c8   : > { %v923_v10 = vsub.f32 %v919_v29, %v922_v8  ;;  %692 = vadd.xlane.f32.xlu0 %v691_v9  ;;  %v580_v11 = vsel %vm526_vm4, %v2025_v7, 0.0 }
 0x4c9   : > { %581 = vadd.xlane.f32.xlu1 %v580_v11 }
 0x4ca   : > { %v924_v12 = vmul.f32 1.442695, %v923_v10 }
 0x4cc   : > { %2028 = vpow2.f32 %v924_v12 }
 0x4ce   : > { %v2712_v13 = vpop.eup %2026 }
 0x4cf   : > { %v809_v14 = vsel %vm526_vm4, %v2712_v13, 0.0  ;;  %v1039_v17 = vpop.xlane.xlu1 %1038 }
 0x4d0   : > { %810 = vadd.xlane.f32.xlu1 %v809_v14  ;;  %v1040_v18 = vsub.f32 %v1036_v35, %v1039_v17 }
 0x4d2   : > { %v1041_v20 = vmul.f32 1.442695, %v1040_v18 }
 0x4d4   : > { %2030 = vpow2.f32 %v1041_v20 }
 0x4d6   : > { %v2716_v15 = vpop.eup %2028 }
 0x4d7   : > { %v926_v16 = vsel %vm526_vm4, %v2716_v15, 0.0  ;;  %v1156_v19 = vpop.xlane.xlu0 %1155 }
 0x4d8   : > { %927 = vadd.xlane.f32.xlu0 %v926_v16  ;;  %v1157_v21 = vsub.f32 %v1153_v42, %v1156_v19 }
 0x4da   : > { %v1158_v25 = vmul.f32 1.442695, %v1157_v21 }
 0x4dc   : > { %2032 = vpow2.f32 %v1158_v25 }
 0x4de   : > { %v2724_v29 = vpop.eup %2030 }
 0x4df   : > { %v1273_v22 = vpop.xlane.xlu1 %1272  ;;  %v1043_v30 = vsel %vm526_vm4, %v2724_v29, 0.0 }
 0x4e0   : > { %v1274_v24 = vsub.f32 %v1270_v48, %v1273_v22 }
 0x4e1   : > { %932 = vrot.lane.b32.xlu1 %v2654_v53, %s2328_s19 }
 0x4e2   : > { %v1275_v27 = vmul.f32 1.442695, %v1274_v24 }
 0x4e3   : > { %v816_v38 = vpop.permute.xlu1 %815 }
 0x4e4   : > { %2034 = vpow2.f32 %v1275_v27  ;;  %v821_v51 = vsel %vm589_vm5, %v816_v38, 0 }
 0x4e6   : > { %v2728_v31 = vpop.eup %2032 }
 0x4e7   : > { %v1390_v23 = vpop.xlane.xlu0 %1389  ;;  %v1160_v33 = vsel %vm526_vm4, %v2728_v31, 0.0 }
 0x4e8   : > { %v1391_v26 = vsub.f32 %v1387_v55, %v1390_v23 }
 0x4ea   : > { %v1392_v28 = vmul.f32 1.442695, %v1391_v26 }
 0x4eb   : > { %v699_v39 = vpop.permute.xlu0 %698 }
 0x4ec   : > { %2036 = vpow2.f32 %v1392_v28  ;;  %v704_v47 = vsel %vm589_vm5, %v699_v39, 0 }
 0x4ee   : > { %1049 = vrot.lane.b32.xlu0 %v2654_v53, %s2314_s28  ;;  %v2730_v32 = vpop.eup %2034  ;;  %s2879_s28 = sshll.u32 %s2598_s15, 3 }
 0x4ef   : > { %v1277_v35 = vsel %vm526_vm4, %v2730_v32, 0.0 }
 0x4f6   : > { %v2734_v34 = vpop.eup %2036 }
 0x4f7   : > { %v1394_v37 = vsel %vm526_vm4, %v2734_v34, 0.0 }
 0x505   : > { %1044 = vadd.xlane.f32.xlu1 %v1043_v30 }
 0x509   : > { %1161 = vadd.xlane.f32.xlu1 %v1160_v33 }
 0x50d   : > { %1278 = vadd.xlane.f32.xlu0 %v1277_v35  ;;  %1395 = vadd.xlane.f32.xlu1 %v1394_v37 }
 0x51e   : > { %1166 = vrot.lane.b32.xlu1 %v2654_v53, %s2329_s20 }
 0x523   : > { %1283 = vrot.lane.b32.xlu0 %v2654_v53, %s2330_s8 }
 0x527   : > { %1400 = vrot.lane.b32.xlu0 %v2654_v53, %s2331_s30  ;;  %s1733_s30 = sshll.u32 %s2389_s27, 7  ;;  %s1549_s27 = scalar_lea.sflag [#allocation5], %s2598_s15 }
 0x555   : > { %v693_v41 = vpop.xlane.xlu0 %692 }
 0x556   : > { %v582_v40 = vpop.xlane.xlu1 %581 }
 0x557   : > { %2038 = vrcp.f32 %v582_v40 }
 0x558   : > { %2040 = vrcp.f32 %v693_v41 }
 0x55d   : > { %v811_v42 = vpop.xlane.xlu1 %810 }
 0x55e   : > { %2042 = vrcp.f32 %v811_v42  ;;  %v2014_v42 = vld [vmem:[#allocation11] sm:$0xff]  }
 0x55f   : > { %1870 = vmatpush3.bf16.msra.mxu0 %v2014_v42 }
 0x560   : > { %1871 = vmatprep.subr.bf16.mxu0 %v2316_v36 }
 0x561   : > { %v2039_v43 = vpop.eup %2038  ;;  %v933_v54 = vpop.permute.xlu1 %932 }
 0x562   : > { %v584_v44 = vmul.f32 %v2039_v43, %v2025_v7  ;;  %v2041_v46 = vpop.eup %2040  ;;  %v938_v57 = vsel %vm589_vm5, %v933_v54, 0  ;;  %v2015_v43 = vld [vmem:[#allocation11 + $0x8] sm:$0xff]  }
 0x563   : > { %v695_v53 = vmul.f32 %v2041_v46, %v2707_v6  ;;  %1872 = vmatpush3.bf16.msra.mxu0 %v2015_v43 }
 0x564   : > { %v585_v45 = vpack.c.bf16 %v584_v44, %v584_v44  ;;  %1873 = vmatprep.subr.bf16.mxu0 %v2316_v36 }
 0x565   : > { %v928_v48 = vpop.xlane.xlu0 %927  ;;  %v696_v49 = vpack.c.bf16 %v695_v53, %v695_v53  ;;  %v2016_v53 = vld [vmem:[#allocation11 + $0x10] sm:$0xff]  }
 0x566   : > { %1782 = vmatmul.mubr.msk.bf16.vlgmr.msra.gmra.mrb[8].mxu1 %vm526_vm4, %v585_v45  ;;  %2044 = vrcp.f32 %v928_v48  ;;  %v2017_v48 = vld [vmem:[#allocation11 + $0x18] sm:$0xff]  }
 0x567   : > { %1792 = vmatpush3.bf16.msra.mxu1 %v704_v47  ;;  %1793 = vmatprep.mubr.msk.bf16.mxu1 %vm2317_vm3, %v2316_v36 }
 0x568   : > { %1803 = vmatprep.subr.bf16.mxu1 %v2316_v36  ;;  %v2043_v50 = vpop.eup %2042  ;;  %1874 = vmatpush3.bf16.msra.mxu0 %v2016_v53 }
 0x569   : > { %v813_v52 = vmul.f32 %v2043_v50, %v2712_v13  ;;  %v1050_v59 = vpop.permute.xlu0 %1049  ;;  %1875 = vmatprep.subr.bf16.mxu0 %v2316_v36 }
 0x56a   : > { %v1055_v61 = vsel %vm589_vm5, %v1050_v59, 0 }
 0x56b   : > { %v814_v55 = vpack.c.bf16 %v813_v52, %v813_v52 }
 0x56c   : > { %1876 = vmatpush3.bf16.msra.mxu0 %v2017_v48 }
 0x56e   : > { %1794 = vmatmul.mubr.msk.bf16.vlgmr.msra.gmra.mrb[12].mxu1 %vm526_vm4, %v696_v49 }
 0x56f   : > { %1804 = vmatpush3.bf16.msra.mxu1 %v821_v51  ;;  %1805 = vmatprep.mubr.msk.bf16.mxu1 %vm2317_vm3, %v2316_v36 }
 0x570   : > { %1815 = vmatprep.subr.bf16.mxu1 %v2316_v36  ;;  %v2045_v56 = vpop.eup %2044 }
 0x571   : > { %v930_v58 = vmul.f32 %v2045_v56, %v2716_v15 }
 0x573   : > { %v931_v60 = vpack.c.bf16 %v930_v58, %v930_v58 }
 0x576   : > { %1806 = vmatmul.mubr.msk.bf16.vlgmr.msra.gmra.mrb[16].mxu1 %vm526_vm4, %v814_v55 }
 0x577   : > { %1816 = vmatpush3.bf16.msra.mxu1 %v938_v57  ;;  %1817 = vmatprep.mubr.msk.bf16.mxu1 %vm2317_vm3, %v2316_v36 }
 0x578   : > { %1827 = vmatprep.subr.bf16.mxu1 %v2316_v36 }
 0x57e   : > { %1818 = vmatmul.mubr.msk.bf16.vlgmr.msra.gmra.mrb[20].mxu1 %vm526_vm4, %v931_v60 }
 0x57f   : > { %1828 = vmatpush3.bf16.msra.mxu1 %v1055_v61  ;;  %1829 = vmatprep.mubr.msk.bf16.mxu1 %vm2317_vm3, %v2316_v36 }
 0x580   : > { %1839 = vmatprep.subr.bf16.mxu1 %v2316_v36 }
 0x592   : > { %v1045_v62 = vpop.xlane.xlu1 %1044 }
 0x593   : > { %2046 = vrcp.f32 %v1045_v62 }
 0x596   : > { %v1162_v63 = vpop.xlane.xlu1 %1161 }
 0x597   : > { %2048 = vrcp.f32 %v1162_v63 }
 0x59a   : > { %v1396_v1 = vpop.xlane.xlu1 %1395  ;;  %v1279_v2 = vpop.xlane.xlu0 %1278 }
 0x59b   : > { %2050 = vrcp.f32 %v1279_v2 }
 0x59c   : > { %2052 = vrcp.f32 %v1396_v1 }
 0x59d   : > { %v2047_v3 = vpop.eup %2046 }
 0x59e   : > { %v1047_v4 = vmul.f32 %v2047_v3, %v2724_v29  ;;  %v1167_v5 = vpop.permute.xlu1 %1166  ;;  %v1284_v10 = vpop.permute.xlu0 %1283  ;;  %v1726_v3 = vld [vmem:[#allocation12] ss:$0 sm:$0xff] }
 0x59f   : > { %v1172_v8 = vsel %vm589_vm5, %v1167_v5, 0  ;;  %v1289_v13 = vsel %vm589_vm5, %v1284_v10, 0 }
 0x5a0   : > { %v1048_v6 = vpack.c.bf16 %v1047_v4, %v1047_v4 }
 0x5a1   : > { %v2049_v7 = vpop.eup %2048 }
 0x5a2   : > { %1830 = vmatmul.mubr.msk.bf16.vlgmr.msra.gmra.mrb[24].mxu1 %vm526_vm4, %v1048_v6  ;;  %v1164_v9 = vmul.f32 %v2049_v7, %v2728_v31  ;;  %v1401_v15 = vpop.permute.xlu0 %1400 }
 0x5a3   : > { %1840 = vmatpush3.bf16.msra.mxu1 %v1172_v8  ;;  %1841 = vmatprep.mubr.msk.bf16.mxu1 %vm2317_vm3, %v2316_v36  ;;  %v1406_v18 = vsel %vm589_vm5, %v1401_v15, 0 }
 0x5a4   : > { %1851 = vmatprep.subr.bf16.mxu1 %v2316_v36  ;;  %v1165_v11 = vpack.c.bf16 %v1164_v9, %v1164_v9 }
 0x5a5   : > { %v2051_v12 = vpop.eup %2050 }
 0x5a6   : > { %v1281_v14 = vmul.f32 %v2051_v12, %v2730_v32  ;;  %v2053_v17 = vpop.eup %2052 }
 0x5a7   : > { %v1398_v19 = vmul.f32 %v2053_v17, %v2734_v34 }
 0x5a8   : > { %v1282_v16 = vpack.c.bf16 %v1281_v14, %v1281_v14 }
 0x5a9   : > { %v1399_v20 = vpack.c.bf16 %v1398_v19, %v1398_v19 }
 0x5aa   : > { %1842 = vmatmul.mubr.msk.bf16.vlgmr.msra.gmra.mrb[28].mxu1 %vm526_vm4, %v1165_v11 }
 0x5ab   : > { %1852 = vmatpush3.bf16.msra.mxu1 %v1289_v13  ;;  %1853 = vmatprep.mubr.msk.bf16.mxu1 %vm2317_vm3, %v2316_v36 }
 0x5ac   : > { %1863 = vmatprep.subr.bf16.mxu1 %v2316_v36 }
 0x5b2   : > { %1854 = vmatmul.mubr.msk.bf16.vlgmr.msra.gmra.mrb[32].mxu1 %vm526_vm4, %v1282_v16 }
 0x5b3   : > { %1864 = vmatpush3.bf16.msra.mxu1 %v1406_v18  ;;  %1865 = vmatprep.mubr.msk.bf16.mxu1 %vm2317_vm3, %v2316_v36 }
 0x5ba   : > { %1866 = vmatmul.mubr.msk.bf16.vlgmr.msra.gmra.mrb[36].mxu1 %vm526_vm4, %v1399_v20 }
 0x639   : > { %v627_v21 = vpop.f32.mrb[8].mxu1 }
 0x63a   : > { %633 = vst.msk [vmem:[#allocation2] sm:$0xff] %vm526_vm4, %v627_v21  ;;  %v1783_v22 = vpop.f32.mrb[9].mxu1 }
 0x63b   : > { %v630_v23 = vpop.f32.mrb[10].mxu1 }
 0x63c   : > { %v1784_v24 = vpop.f32.mrb[11].mxu1 }
 0x641   : > { %v740_v25 = vpop.f32.mrb[12].mxu1 }
 0x642   : > { %747 = vrot.lane.b32.xlu1 %v740_v25, %s2327_s12  ;;  %v1795_v26 = vpop.f32.mrb[13].mxu1 }
 0x643   : > { %v743_v27 = vpop.f32.mrb[14].mxu1 }
 0x644   : > { %v1796_v28 = vpop.f32.mrb[15].mxu1 }
 0x649   : > { %v857_v29 = vpop.f32.mrb[16].mxu1 }
 0x64a   : > { %864 = vrot.lane.b32.xlu0 %v857_v29, %s2325_s29  ;;  %v1807_v30 = vpop.f32.mrb[17].mxu1  ;;  %s2332_s29 = smov [#allocation14]  }
 0x64b   : > { %v860_v31 = vpop.f32.mrb[18].mxu1 }
 0x64c   : > { %v1808_v32 = vpop.f32.mrb[19].mxu1 }
 0x651   : > { %v974_v33 = vpop.f32.mrb[20].mxu1 }
 0x652   : > { %981 = vrot.lane.b32.xlu1 %v974_v33, %s2323_s25  ;;  %v1819_v34 = vpop.f32.mrb[21].mxu1  ;;  %s2808_s25 = scalar_lea.hbm %s2859_s6, %s1733_s30 }
 0x653   : > { %v977_v35 = vpop.f32.mrb[22].mxu1 }
 0x654   : > { %v1820_v37 = vpop.f32.mrb[23].mxu1 }
 0x675   : > { %v1091_v38 = vpop.f32.mrb[24].mxu1 }
 0x676   : > { %1098 = vrot.lane.b32.xlu0 %v1091_v38, %s2321_s9  ;;  %v1831_v39 = vpop.f32.mrb[25].mxu1 }
 0x677   : > { %v1094_v40 = vpop.f32.mrb[26].mxu1 }
 0x678   : > { %v1832_v41 = vpop.f32.mrb[27].mxu1 }
 0x67d   : > { %v1208_v44 = vpop.f32.mrb[28].mxu1 }
 0x67e   : > { %1215 = vrot.lane.b32.xlu1 %v1208_v44, %s2326_s17  ;;  %v1843_v45 = vpop.f32.mrb[29].mxu1  ;;  %s2228_s17 = sshll.u32 %s2332_s29, 4  ;;  %s2229_s17 = int_to_ptr.vmem [resolvable:$false] %s2228_s17 }
 0x67f   : > { %v1211_v46 = vpop.f32.mrb[30].mxu1  ;;  %s2230_s12 = scalar_lea.vmem %s2229_s17, 256 }
 0x680   : > { %v1844_v47 = vpop.f32.mrb[31].mxu1 }
 0x685   : > { %v1325_v49 = vpop.f32.mrb[32].mxu1 }
 0x686   : > { %1332 = vrot.lane.b32.xlu0 %v1325_v49, %s2322_s11  ;;  %v1855_v50 = vpop.f32.mrb[33].mxu1 }
 0x687   : > { %v1328_v51 = vpop.f32.mrb[34].mxu1 }
 0x688   : > { %v1856_v52 = vpop.f32.mrb[35].mxu1 }
 0x68a   : > { %1542 = vrot.lane.b32.xlu0 %v2620_v0, %s2321_s9 }
 0x68d   : > { %v1442_v54 = vpop.f32.mrb[36].mxu1 }
 0x68e   : > { %1449 = vrot.lane.b32.xlu1 %v1442_v54, %s2318_s14  ;;  %v1867_v55 = vpop.f32.mrb[37].mxu1  ;;  %s333_s14 = scalar_lea.vmem [#allocation14], %s2879_s28 }
 0x68f   : > { %v1445_v56 = vpop.f32.mrb[38].mxu1  ;;  %s1562_s10 = sshll.u32 %s333_s14, 4  ;;  %s2810_s10 = int_to_ptr.vmem [resolvable:$true] %s1562_s10 }
 0x690   : > { %v1868_v57 = vpop.f32.mrb[39].mxu1  ;;  %s2224_s16 = scalar_lea.vmem %s2810_s10, 128  ;;  %p2231_p13 = scmp.lt.s32.totalorder %s2810_s10, %s2229_s17 }
 0x691   : > { %p2225_p7 = scmp.ne.s32.totalorder %s2810_s10, %s2224_s16  ;;  %p2232_p0 = scmp.lt.s32.totalorder %s2230_s12, %s2224_s16 }
 0x693   : > { %p2226_p4 = pnand %p2225_p7, %p2880_p10  ;;  %p2233_p2 = por %p2232_p0, %p2231_p13 }
 0x695   : > { %p2227_p1 = pneg %p2226_p4 }
 0x697   : > { %p2234_p3 = pnand %p2233_p2, %p2227_p1 }
 0x6b4   : > { %v748_v58 = vpop.permute.xlu1 %747 }
 0x6b5   : > { %751 = vst.msk [vmem:[#allocation2] sm:$0xff] %vm750_vm6, %v748_v58 }
 0x6bc   : > { %v865_v36 = vpop.permute.xlu0 %864 }
 0x6bd   : > { %868 = vst.msk [vmem:[#allocation2] sm:$0xff] %vm867_vm7, %v865_v36 }
 0x6c4   : > { %v982_v59 = vpop.permute.xlu1 %981 }
 0x6c5   : > { %985 = vst.msk [vmem:[#allocation2] sm:$0xff] %vm984_vm8, %v982_v59 }
 0x6e8   : > { %v1099_v60 = vpop.permute.xlu0 %1098 }
 0x6e9   : > { %1102 = vst.msk [vmem:[#allocation2] sm:$0xff] %vm1101_vm9, %v1099_v60 }
 0x6f0   : > { %v1216_v61 = vpop.permute.xlu1 %1215 }
 0x6f1   : > { %1219 = vst.msk [vmem:[#allocation2] sm:$0xff] %vm1218_vm10, %v1216_v61 }
 0x6f8   : > { %v1333_v62 = vpop.permute.xlu0 %1332 }
 0x6f9   : > { %1336 = vst.msk [vmem:[#allocation2] sm:$0xff] %vm1335_vm11, %v1333_v62 }
 0x6fc   : > { %v1543_v5 = vpop.permute.xlu0 %1542 }
 0x700   : > { %v1450_v63 = vpop.permute.xlu1 %1449 }
 0x701   : > { %1453 = vst.msk [vmem:[#allocation2] sm:$0xff] %vm1452_vm12, %v1450_v63 }
 0x708   : > { %v1454_v1 = vld [vmem:[#allocation2] sm:$0xff] }
 0x709   : > { %v1455_v2 = vpack.c.bf16 %v1454_v1, %v1454_v1 }
 0x70b   : > { %1878 = vmatmul.mubr.msk.bf16.vlgmr.msra.gmra.mrb[32].mxu0 %vm1495_vm13, %v1455_v2 }
 0x7de   : > { %v1533_v4 = vpop.f32.mrb[32].mxu0 }
 0x7df   : > { %v1534_v6 = vadd.f32 %v1726_v3, %v1533_v4  ;;  %v1879_v7 = vpop.f32.mrb[33].mxu0 }
 0x7e0   : > { %v1536_v8 = vpop.f32.mrb[34].mxu0 }
 0x7e1   : > { %v1539_v9 = vadd.f32 %v1534_v6, %v2620_v0  ;;  %v1545_v10 = vadd.f32 %v1543_v5, %v1534_v6  ;;  %v1880_v11 = vpop.f32.mrb[35].mxu0 }
 0x7e3   : > { %1540 = vst.msk [vmem:[%s333_s14] sm:$0xff] %vm336_vm0, %v1539_v9 }
 0x7e4   : > { %1547 = vst.msk [vmem:[%s333_s14] sm:$0xff] %vm1546_vm14, %v1545_v10 }
 0x7e5   : > { %2237 = shalt.err (!%p2234_p3)
}
 0x7e6   : > { %s2238_s15 = scalar_lea.hbm %s2808_s25, 128  ;;  %s2242_s8 = scalar_lea.hbm %s2859_s6, 256 }
 0x7e7   : > { %p2239_p6 = scmp.ne.s32.totalorder %s2808_s25, %s2238_s15  ;;  %p2243_p8 = scmp.lt.u32.totalorder %s2808_s25, %s2859_s6 }
 0x7e8   : > { %p2244_p5 = scmp.lt.u32.totalorder %s2242_s8, %s2238_s15  ;;  %p2246_p7 = scmp.lt.u32.totalorder %s2238_s15, %s2808_s25 }
 0x7e9   : > { %p2240_p11 = pnand %p2239_p6, %p2880_p10 }
 0x7ea   : > { %p2245_p9 = por %p2244_p5, %p2243_p8 }
 0x7eb   : > { %p2241_p12 = pneg %p2240_p11 }
 0x7ec   : > { %p2247_p4 = por %p2246_p7, %p2245_p9 }
 0x7ee   : > { %p2248_p1 = pnand %p2247_p4, %p2241_p12 }
 0x7f0   : > { %2251 = shalt.err (!%p2248_p1)
}
 0x7f1   : > { %1905 = dma.vmem_to_hbm [thread:$0]  (%p2880_p10), %s2810_s10, 128, %s2808_s25, %s1549_s27  }
 0x7f2 PF: > { %s1574_s14 = sand.u32 1, %s2290_s21   ;;  %p2881_p13 = scmp.ne.s32.totalorder %s2870_s18, 0 }
 0x7f3   : > { %p2882_p0 = scmp.ge.s32.totalorder %s2302_s24, 2  ;;  %s1575_s9 = scalar_lea.sflag [#allocation5], %s1574_s14 }
 0x7f5   : > { %p1928_p2 = pnand %p2882_p0, %p2881_p13 }
 0x7f7   : > { %2285 = dma.done.wait (!%p1928_p2), %s1575_s9, 128  }
 0x7f8   : > { %2287 = vsyncadd (!%p1928_p2), %s1575_s9, 4294967168  ;;  %p22_p3 = scmp.ge.s32.totalorder %s2528_s7, 4   ;;  %s2883_s21 = smov %s2294_s22 }
 0x7f9   : > { %s2884_s22 = smov %s2298_s23  ;;  %s2885_s23 = smov %s2540_s13 }
 0x7fa   : > { %s2886_s24 = smov %s2528_s7  ;;  %24 = sbr.rel (!%p22_p3) target bundleno = 8 (0x8), region = 109 }
 0x801   :  { %1580 = vsyncpa [#allocation4], 1 }
 0x802   :  { %1582 = vsyncpa [#allocation4 + $0x1], 1 }
 0x803   :  { %1583 = vsyncpa [#allocation7], 1 }
 0x804   :  { %1584 = vsyncpa [#allocation10], 1 }
 0x805   :  { %1585 = vsyncpa [#allocation13], 1 }
 0x806   :  { %1586 = vsyncpa [#allocation5], 1 }
 0x807   :  { %1588 = vsyncpa [#allocation5 + $0x1], 1 }

// kernel: forward.19
= control target key start
LH: loop header
LB: loop body
LE: loop exit
PB: predicated region body
PF: predicated region fallthrough
CT: control target
= control target key end

     0   :  { %10 = vsyncpa [#allocation3], 0  ;;  %s529_s0 = inlined_call_operand.hbm [shape: f32[16,32], index: 0, kind: input, shape index: {}]   ;;  %s530_s1 = inlined_call_operand.hbm [shape: f32[1,32], index: 1, kind: input, shape index: {}]   ;;  %s531_s2 = inlined_call_operand.hbm [shape: f32[1,32], index: 2, kind: input, shape index: {}]   ;;  %s532_s3 = inlined_call_operand.hbm [shape: bf16[32,64], index: 3, kind: input, shape index: {}]   ;;  %s533_s4 = inlined_call_operand.hbm [shape: f32[1,64], index: 4, kind: input, shape index: {}]   ;;  %s534_s5 = inlined_call_operand.hbm [shape: f32[16,64], index: 5, kind: output, shape index: {}]  }
   0x1   :  { %11 = vsyncpa [#allocation6], 0 }
   0x2   :  { %12 = vsyncpa [#allocation9], 0 }
   0x3   :  { %13 = vsyncpa [#allocation4], 0  ;;  %s397_s18 = smov [#allocation5]   ;;  %s398_s20 = smov [#allocation8]  }
   0x4   :  { %s32_s19 = sshll.u32 %s397_s18, 4  ;;  %s51_s21 = sshll.u32 %s398_s20, 4  ;;  %s33_s19 = int_to_ptr.vmem [resolvable:$true] %s32_s19  ;;  %s439_s21 = int_to_ptr.vmem [resolvable:$true] %s51_s21 }
   0x5   :  { %s257_s24 = scalar_lea.hbm %s530_s1, 16 }
   0x6   :  { %p258_p0 = scmp.ne.s32.totalorder %s530_s1, %s257_s24  ;;  %p261_p1 = scmp.lt.u32.totalorder %s257_s24, %s530_s1 }
   0x8   :  { %p263_p2 = pnand %p261_p1, %p258_p0 }
   0xa   :  { %266 = shalt.err (!%p263_p2)
}
   0xb   :  { %s267_s29 = scalar_lea.vmem %s33_s19, 16  ;;  %s271_s30 = scalar_lea.vmem %s33_s19, 32 }
   0xc   :  { %p268_p3 = scmp.ne.s32.totalorder %s33_s19, %s267_s29  ;;  %p272_p4 = scmp.lt.s32.totalorder %s33_s19, %s33_s19 }
   0xd   :  { %p273_p5 = scmp.lt.s32.totalorder %s271_s30, %s267_s29 }
   0xf   :  { %p274_p6 = por %p273_p5, %p272_p4 }
  0x11   :  { %p275_p7 = pnand %p274_p6, %p268_p3 }
  0x13   :  { %278 = shalt.err (!%p275_p7)
}
  0x14   :  { %35 = dma.hbm_to_vmem [thread:$0]  %s530_s1, 16, %s33_s19, [#allocation6]  }
  0x15   :  { %s279_s10 = scalar_lea.hbm %s532_s3, 256 }
  0x16   :  { %p280_p8 = scmp.ne.s32.totalorder %s532_s3, %s279_s10  ;;  %p283_p9 = scmp.lt.u32.totalorder %s279_s10, %s532_s3 }
  0x18   :  { %p285_p10 = pnand %p283_p9, %p280_p8 }
  0x1a   :  { %288 = shalt.err (!%p285_p10)
}
  0x1b   :  { %s289_s15 = scalar_lea.vmem %s439_s21, 256  ;;  %p294_p12 = scmp.lt.s32.totalorder %s439_s21, %s439_s21 }
  0x1c   :  { %p290_p11 = scmp.ne.s32.totalorder %s439_s21, %s289_s15  ;;  %p295_p13 = scmp.lt.s32.totalorder %s289_s15, %s289_s15 }
  0x1e   :  { %p296_p0 = por %p295_p13, %p294_p12 }
  0x20   :  { %p297_p1 = pnand %p296_p0, %p290_p11 }
  0x22   :  { %300 = shalt.err (!%p297_p1)
}
  0x23   :  { %s399_s1 = smov 64   ;;  %s400_s16 = smov 4  }
  0x24   :  { %57 = dma.hbm_to_vmem [thread:$0]  %s532_s3, 256, %s439_s21, [#allocation9], %s399_s1, %s399_s1, %s400_s16  }
  0x25   :  { %s401_s19 = smov [#allocation2]   ;;  %s301_s24 = scalar_lea.hbm %s529_s0, 256 }
  0x26   :  { %s19_s20 = sshll.u32 %s401_s19, 4  ;;  %p302_p2 = scmp.ne.s32.totalorder %s529_s0, %s301_s24  ;;  %s20_s20 = int_to_ptr.vmem [resolvable:$true] %s19_s20 }
  0x27   :  { %p305_p3 = scmp.lt.u32.totalorder %s301_s24, %s529_s0 }
  0x29   :  { %p307_p4 = pnand %p305_p3, %p302_p2 }
  0x2b   :  { %310 = shalt.err (!%p307_p4)
}
  0x2c   :  { %s311_s29 = scalar_lea.vmem %s20_s20, 256  ;;  %p316_p6 = scmp.lt.s32.totalorder %s20_s20, %s20_s20 }
  0x2d   :  { %p312_p5 = scmp.ne.s32.totalorder %s20_s20, %s311_s29  ;;  %p317_p7 = scmp.lt.s32.totalorder %s311_s29, %s311_s29 }
  0x2f   :  { %p318_p8 = por %p317_p7, %p316_p6 }
  0x31   :  { %p319_p9 = pnand %p318_p8, %p312_p5 }
  0x33   :  { %322 = shalt.err (!%p319_p9)
}
  0x34   :  { %s402_s3 = smov 128   ;;  %s403_s21 = smov 8  }
  0x35   :  { %25 = dma.hbm_to_vmem [thread:$0]  %s529_s0, 256, %s20_s20, [#allocation3], %s402_s3, %s402_s3, %s403_s21  }
  0x36   :  { %s404_s7 = smov [#allocation7]   ;;  %s405_s9 = smov [#allocation10]  }
  0x37   :  { %s42_s8 = sshll.u32 %s404_s7, 4  ;;  %s64_s10 = sshll.u32 %s405_s9, 4  ;;  %s43_s8 = int_to_ptr.vmem [resolvable:$true] %s42_s8  ;;  %s65_s10 = int_to_ptr.vmem [resolvable:$true] %s64_s10 }
  0x38   :  { %s323_s13 = scalar_lea.hbm %s531_s2, 16 }
  0x39   :  { %p324_p10 = scmp.ne.s32.totalorder %s531_s2, %s323_s13  ;;  %p327_p11 = scmp.lt.u32.totalorder %s323_s13, %s531_s2 }
  0x3b   :  { %p329_p12 = pnand %p327_p11, %p324_p10 }
  0x3d   :  { %332 = shalt.err (!%p329_p12)
}
  0x3e   :  { %s333_s0 = scalar_lea.vmem %s43_s8, 16  ;;  %s337_s17 = scalar_lea.vmem %s43_s8, 32 }
  0x3f   :  { %p334_p13 = scmp.ne.s32.totalorder %s43_s8, %s333_s0  ;;  %p338_p0 = scmp.lt.s32.totalorder %s43_s8, %s43_s8 }
  0x40   :  { %p339_p1 = scmp.lt.s32.totalorder %s337_s17, %s333_s0 }
  0x42   :  { %p340_p2 = por %p339_p1, %p338_p0 }
  0x44   :  { %p341_p3 = pnand %p340_p2, %p334_p13 }
  0x46   :  { %344 = shalt.err (!%p341_p3)
}
  0x47   :  { %45 = dma.hbm_to_vmem [thread:$0]  %s531_s2, 16, %s43_s8, [#allocation6]  }
  0x48   :  { %s345_s23 = scalar_lea.hbm %s533_s4, 16 }
  0x49   :  { %p346_p4 = scmp.ne.s32.totalorder %s533_s4, %s345_s23  ;;  %p349_p5 = scmp.lt.u32.totalorder %s345_s23, %s533_s4 }
  0x4b   :  { %p351_p6 = pnand %p349_p5, %p346_p4 }
  0x4d   :  { %354 = shalt.err (!%p351_p6)
}
  0x4e   :  { %s355_s28 = scalar_lea.vmem %s65_s10, 16  ;;  %s359_s29 = scalar_lea.vmem %s65_s10, 32 }
  0x4f   :  { %p356_p7 = scmp.ne.s32.totalorder %s65_s10, %s355_s28  ;;  %p360_p8 = scmp.lt.s32.totalorder %s65_s10, %s65_s10 }
  0x50   :  { %p361_p9 = scmp.lt.s32.totalorder %s359_s29, %s355_s28 }
  0x52   :  { %p362_p10 = por %p361_p9, %p360_p8 }
  0x54   :  { %p363_p11 = pnand %p362_p10, %p356_p7 }
  0x56   :  { %366 = shalt.err (!%p363_p11)
}
  0x57   :  { %67 = dma.hbm_to_vmem [thread:$0]  %s533_s4, 16, %s65_s10, [#allocation9]  }
  0x58   :  { %389 = dma.done.wait [#allocation3], 256  }
  0x59   :  { %390 = vsyncadd [#allocation3], 4294967040 }
  0x5a   :  { %391 = dma.done.wait [#allocation6], 32  }
  0x5b   :  { %392 = vsyncadd [#allocation6], 4294967264 }
  0x5c   :  { %393 = dma.done.wait [#allocation9], 272  }
  0x5d   :  { %394 = vsyncadd [#allocation9], 4294967024  ;;  %vm86_vm0 = vcmask 261120   ;;  %v84_v0 = vld [vmem:[#allocation2] sm:$0xff]  ;;  %v85_v1 = vld [vmem:[#allocation2 + $0x8] sm:$0xff]  ;;  %v406_v15 = vmov 0.0  }
  0x5e   :  { %v87_v2 = vsel %vm86_vm0, %v84_v0, 0.0  ;;  %v90_v3 = vsel %vm86_vm0, %v85_v1, 0.0  ;;  %v251_v14 = vld [vmem:[#allocation8] sm:$0xff]   ;;  %231 = vmatprep.subr.bf16.mxu0 %v406_v15  ;;  %v252_v16 = vld [vmem:[#allocation8 + $0x8] sm:$0xff]   ;;  %vm407_vm1 = vmmov 0   ;;  %vm200_vm2 = vcmask 523264  }
  0x5f   :  { %88 = vadd.xlane.f32.xlu0 %v87_v2  ;;  %232 = vmatpush3.bf16.msra.mxu0 %v251_v14  ;;  %v222_v25 = vld [vmem:[#allocation5] ss:$0 sm:$0xff]  ;;  %v223_v29 = vld [vmem:[#allocation7] ss:$0 sm:$0xff]  ;;  %v224_v34 = vld [vmem:[#allocation10] ss:$0 sm:$0xff] }
  0x60   :  { %235 = vmatprep.mubr.msk.bf16.mxu0 %vm407_vm1, %v406_v15  ;;  %233 = vmatprep.subr.bf16.mxu0 %v406_v15  ;;  %s408_s4 = smov [#allocation11]  }
  0x61   :  { %s208_s6 = sshll.u32 %s408_s4, 4  ;;  %s209_s6 = int_to_ptr.vmem [resolvable:$true] %s208_s6 }
  0x62   :  { %s367_s7 = scalar_lea.vmem %s209_s6, 256  ;;  %p372_p13 = scmp.lt.s32.totalorder %s209_s6, %s209_s6 }
  0x63   :  { %91 = vadd.xlane.f32.xlu0 %v90_v3  ;;  %234 = vmatpush3.bf16.msra.mxu0 %v252_v16  ;;  %p368_p12 = scmp.ne.s32.totalorder %s209_s6, %s367_s7  ;;  %p373_p0 = scmp.lt.s32.totalorder %s367_s7, %s367_s7 }
  0x65   :  { %p374_p1 = por %p373_p0, %p372_p13 }
  0x67   :  { %p375_p2 = pnand %p374_p1, %p368_p12 }
  0xec   :  { %v89_v4 = vpop.xlane.xlu0 %88 }
  0xed   :  { %v94_v5 = vmul.f32 0.03125, %v89_v4 }
  0xef   :  { %v96_v6 = vsub.f32 %v84_v0, %v94_v5 }
  0xf0   :  { %v92_v7 = vpop.xlane.xlu0 %91 }
  0xf1   :  { %v95_v8 = vmul.f32 0.03125, %v92_v7  ;;  %v98_v9 = vmul.f32 %v96_v6, %v96_v6 }
  0xf3   :  { %v97_v10 = vsub.f32 %v85_v1, %v95_v8  ;;  %v100_v11 = vsel %vm86_vm0, %v98_v9, 0.0 }
  0xf4   :  { %101 = vadd.xlane.f32.xlu1 %v100_v11 }
  0xf5   :  { %v99_v12 = vmul.f32 %v97_v10, %v97_v10 }
  0xf7   :  { %v103_v13 = vsel %vm86_vm0, %v99_v12, 0.0 }
  0xf8   :  { %104 = vadd.xlane.f32.xlu1 %v103_v13 }
 0x181   :  { %v102_v17 = vpop.xlane.xlu1 %101 }
 0x182   :  { %v106_v18 = vmul.f32 0.03125, %v102_v17 }
 0x184   :  { %v108_v19 = vadd.f32 1e-05, %v106_v18 }
 0x185   :  { %v105_v20 = vpop.xlane.xlu1 %104 }
 0x186   :  { %253 = vrsqrt.f32 %v108_v19  ;;  %v107_v21 = vmul.f32 0.03125, %v105_v20 }
 0x188   :  { %v109_v22 = vadd.f32 1e-05, %v107_v21 }
 0x18a   :  { %255 = vrsqrt.f32 %v109_v22 }
 0x190   :  { %v254_v23 = vpop.eup %253 }
 0x191   :  { %v112_v24 = vmul.f32 %v254_v23, %v96_v6 }
 0x193   :  { %v121_v28 = vmul.f32 %v222_v25, %v112_v24 }
 0x194   :  { %v256_v26 = vpop.eup %255 }
 0x195   :  { %v113_v27 = vmul.f32 %v256_v26, %v97_v10  ;;  %v130_v31 = vadd.f32 %v223_v29, %v121_v28 }
 0x197   :  { %v122_v30 = vmul.f32 %v222_v25, %v113_v27 }
 0x199   :  { %v131_v32 = vadd.f32 %v223_v29, %v122_v30 }
 0x19b   :  { %v132_v33 = vpack.c.bf16 %v131_v32, %v130_v31 }
 0x19d   :  { %236 = vmatmul.mubr.msk.bf16.vlgmr.msra.gmra.mrb[0].mxu0 %vm86_vm0, %v132_v33 }
 0x270   :  { %v193_v35 = vpop.f32.mrb[0].mxu0 }
 0x271   :  { %v194_v36 = vadd.f32 %v224_v34, %v193_v35  ;;  %v237_v37 = vpop.f32.mrb[1].mxu0 }
 0x272   :  { %v196_v38 = vpop.f32.mrb[2].mxu0 }
 0x273   :  { %v197_v39 = vadd.f32 %v224_v34, %v196_v38  ;;  %v238_v40 = vpop.f32.mrb[3].mxu0  ;;  %201 = vst.msk [vmem:[#allocation11] sm:$0xff] %vm200_vm2, %v194_v36 }
 0x275   :  { %202 = vst.msk [vmem:[#allocation11 + $0x8] sm:$0xff] %vm200_vm2, %v197_v39 }
 0x276   :  { %378 = shalt.err (!%p375_p2)
}
 0x277   :  { %s379_s10 = scalar_lea.hbm %s534_s5, 256 }
 0x278   :  { %p380_p3 = scmp.ne.s32.totalorder %s534_s5, %s379_s10  ;;  %p383_p4 = scmp.lt.u32.totalorder %s379_s10, %s534_s5 }
 0x27a   :  { %p385_p5 = pnand %p383_p4, %p380_p3 }
 0x27c   :  { %388 = shalt.err (!%p385_p5)
}
 0x27d   :  { %214 = dma.vmem_to_hbm [thread:$0]  %s209_s6, 256, %s534_s5, [#allocation4], %s402_s3, %s402_s3, %s403_s21  }
 0x27e   :  { %395 = dma.done.wait [#allocation4], 256  }
 0x27f   :  { %396 = vsyncadd [#allocation4], 4294967040 }
 0x280   :  { %218 = vsyncpa [#allocation3], 1 }
 0x281   :  { %219 = vsyncpa [#allocation6], 1 }
 0x282   :  { %220 = vsyncpa [#allocation9], 1 }
 0x283   :  { %221 = vsyncpa [#allocation4], 1 }

// kernel: forward.16
= control target key start
LH: loop header
LB: loop body
LE: loop exit
PB: predicated region body
PF: predicated region fallthrough
CT: control target
= control target key end

     0   :  { %11 = vsyncpa [#allocation3], 0  ;;  %s1680_s0 = inlined_call_operand.hbm [shape: f32[5,16,32], index: 0, kind: input, shape index: {}]   ;;  %s1681_s1 = inlined_call_operand.hbm [shape: bf16[32,64], index: 1, kind: input, shape index: {}]   ;;  %s1682_s2 = inlined_call_operand.hbm [shape: bf16[32,4], index: 2, kind: input, shape index: {}]   ;;  %s1683_s3 = inlined_call_operand.hbm [shape: bf16[4,32], index: 3, kind: input, shape index: {}]   ;;  %s1684_s4 = inlined_call_operand.hbm [shape: bf16[32,32], index: 4, kind: input, shape index: {}]   ;;  %s1685_s5 = inlined_call_operand.hbm [shape: f32[1,32], index: 5, kind: input, shape index: {}]   ;;  %s1686_s6 = inlined_call_operand.hbm [shape: f32[16,32], index: 6, kind: output, shape index: {}]  }
   0x1   :  { %12 = vsyncpa [#allocation6], 0 }
   0x2   :  { %13 = vsyncpa [#allocation9], 0 }
   0x3   :  { %14 = vsyncpa [#allocation12], 0 }
   0x4   :  { %15 = vsyncpa [#allocation4], 0  ;;  %s1431_s21 = smov [#allocation5]   ;;  %s1267_s25 = scalar_lea.hbm %s1681_s1, 256 }
   0x5   :  { %s33_s22 = sshll.u32 %s1431_s21, 4  ;;  %p1268_p0 = scmp.ne.s32.totalorder %s1681_s1, %s1267_s25  ;;  %s34_s22 = int_to_ptr.vmem [resolvable:$true] %s33_s22 }
   0x6   :  { %p1271_p1 = scmp.lt.u32.totalorder %s1267_s25, %s1681_s1 }
   0x8   :  { %p1273_p2 = pnand %p1271_p1, %p1268_p0 }
   0xa   :  { %1276 = shalt.err (!%p1273_p2)
}
   0xb   :  { %s1277_s30 = scalar_lea.vmem %s34_s22, 256  ;;  %p1282_p4 = scmp.lt.s32.totalorder %s34_s22, %s34_s22 }
   0xc   :  { %p1278_p3 = scmp.ne.s32.totalorder %s34_s22, %s1277_s30  ;;  %p1283_p5 = scmp.lt.s32.totalorder %s1277_s30, %s1277_s30 }
   0xe   :  { %p1284_p6 = por %p1283_p5, %p1282_p4 }
  0x10   :  { %p1285_p7 = pnand %p1284_p6, %p1278_p3 }
  0x12   :  { %1288 = shalt.err (!%p1285_p7)
}
  0x13   :  { %s1432_s7 = smov 64   ;;  %s1433_s8 = smov 4  }
  0x14   :  { %39 = dma.hbm_to_vmem [thread:$0]  %s1681_s1, 256, %s34_s22, [#allocation6], %s1432_s7, %s1432_s7, %s1433_s8  }
  0x15   :  { %s1434_s11 = smov [#allocation8]   ;;  %s1435_s13 = smov [#allocation2]  }
  0x16   :  { %s58_s12 = sshll.u32 %s1434_s11, 4  ;;  %s21_s14 = sshll.u32 %s1435_s13, 4  ;;  %s59_s12 = int_to_ptr.vmem [resolvable:$true] %s58_s12  ;;  %s22_s14 = int_to_ptr.vmem [resolvable:$true] %s21_s14 }
  0x17   :  { %s1289_s17 = scalar_lea.hbm %s1683_s3, 32 }
  0x18   :  { %p1290_p8 = scmp.ne.s32.totalorder %s1683_s3, %s1289_s17  ;;  %p1293_p9 = scmp.lt.u32.totalorder %s1289_s17, %s1683_s3 }
  0x1a   :  { %p1295_p10 = pnand %p1293_p9, %p1290_p8 }
  0x1c   :  { %1298 = shalt.err (!%p1295_p10)
}
  0x1d   :  { %s1299_s1 = scalar_lea.vmem %s59_s12, 32  ;;  %p1304_p12 = scmp.lt.s32.totalorder %s59_s12, %s59_s12 }
  0x1e   :  { %p1300_p11 = scmp.ne.s32.totalorder %s59_s12, %s1299_s1  ;;  %p1305_p13 = scmp.lt.s32.totalorder %s1299_s1, %s1299_s1 }
  0x20   :  { %p1306_p0 = por %p1305_p13, %p1304_p12 }
  0x22   :  { %p1307_p1 = pnand %p1306_p0, %p1300_p11 }
  0x24   :  { %1310 = shalt.err (!%p1307_p1)
}
  0x25   :  { %61 = dma.hbm_to_vmem [thread:$0]  %s1683_s3, 32, %s59_s12, [#allocation9]  }
  0x26   :  { %s1311_s26 = scalar_lea.hbm %s1680_s0, 1280 }
  0x27   :  { %p1312_p2 = scmp.ne.s32.totalorder %s1680_s0, %s1311_s26  ;;  %p1315_p3 = scmp.lt.u32.totalorder %s1311_s26, %s1680_s0 }
  0x29   :  { %p1317_p4 = pnand %p1315_p3, %p1312_p2 }
  0x2b   :  { %1320 = shalt.err (!%p1317_p4)
}
  0x2c   :  { %s1321_s9 = scalar_lea.vmem %s22_s14, 1280  ;;  %p1326_p6 = scmp.lt.s32.totalorder %s22_s14, %s22_s14 }
  0x2d   :  { %p1322_p5 = scmp.ne.s32.totalorder %s22_s14, %s1321_s9  ;;  %p1327_p7 = scmp.lt.s32.totalorder %s1321_s9, %s1321_s9 }
  0x2f   :  { %p1328_p8 = por %p1327_p7, %p1326_p6 }
  0x31   :  { %p1329_p9 = pnand %p1328_p8, %p1322_p5 }
  0x33   :  { %1332 = shalt.err (!%p1329_p9)
}
  0x34   :  { %s1436_s3 = smov 128   ;;  %s1437_s10 = smov 8  }
  0x35   :  { %27 = dma.hbm_to_vmem [thread:$0]  %s1680_s0, 1280, %s22_s14, [#allocation3], %s1436_s3, %s1436_s3, %s1437_s10  }
  0x36   :  { %s1438_s13 = smov [#allocation7]   ;;  %s1439_s16 = smov [#allocation10]  }
  0x37   :  { %s45_s15 = sshll.u32 %s1438_s13, 4  ;;  %s67_s17 = sshll.u32 %s1439_s16, 4  ;;  %s46_s15 = int_to_ptr.vmem [resolvable:$true] %s45_s15  ;;  %s68_s17 = int_to_ptr.vmem [resolvable:$true] %s67_s17 }
  0x38   :  { %s1333_s20 = scalar_lea.hbm %s1682_s2, 256 }
  0x39   :  { %p1334_p10 = scmp.ne.s32.totalorder %s1682_s2, %s1333_s20  ;;  %p1337_p11 = scmp.lt.u32.totalorder %s1333_s20, %s1682_s2 }
  0x3b   :  { %p1339_p12 = pnand %p1337_p11, %p1334_p10 }
  0x3d   :  { %1342 = shalt.err (!%p1339_p12)
}
  0x3e   :  { %s1343_s0 = scalar_lea.vmem %s46_s15, 256  ;;  %p1348_p0 = scmp.lt.s32.totalorder %s46_s15, %s46_s15 }
  0x3f   :  { %p1344_p13 = scmp.ne.s32.totalorder %s46_s15, %s1343_s0  ;;  %p1349_p1 = scmp.lt.s32.totalorder %s1343_s0, %s1343_s0 }
  0x41   :  { %p1350_p2 = por %p1349_p1, %p1348_p0 }
  0x43   :  { %p1351_p3 = pnand %p1350_p2, %p1344_p13 }
  0x45   :  { %1354 = shalt.err (!%p1351_p3)
}
  0x46   :  { %51 = dma.hbm_to_vmem [thread:$0]  %s1682_s2, 256, %s46_s15, [#allocation6], %s1432_s7, %s1432_s7, %s1433_s8  }
  0x47   :  { %s1355_s27 = scalar_lea.hbm %s1684_s4, 256 }
  0x48   :  { %p1356_p4 = scmp.ne.s32.totalorder %s1684_s4, %s1355_s27  ;;  %p1359_p5 = scmp.lt.u32.totalorder %s1355_s27, %s1684_s4 }
  0x4a   :  { %p1361_p6 = pnand %p1359_p5, %p1356_p4 }
  0x4c   :  { %1364 = shalt.err (!%p1361_p6)
}
  0x4d   :  { %s1365_s11 = scalar_lea.vmem %s68_s17, 256  ;;  %p1370_p8 = scmp.lt.s32.totalorder %s68_s17, %s68_s17 }
  0x4e   :  { %p1366_p7 = scmp.ne.s32.totalorder %s68_s17, %s1365_s11  ;;  %p1371_p9 = scmp.lt.s32.totalorder %s1365_s11, %s1365_s11 }
  0x50   :  { %p1372_p10 = por %p1371_p9, %p1370_p8 }
  0x52   :  { %p1373_p11 = pnand %p1372_p10, %p1366_p7 }
  0x54   :  { %1376 = shalt.err (!%p1373_p11)
}
  0x55   :  { %73 = dma.hbm_to_vmem [thread:$0]  %s1684_s4, 256, %s68_s17, [#allocation9], %s1432_s7, %s1432_s7, %s1433_s8  }
  0x56   :  { %s1440_s13 = smov [#allocation11]   ;;  %s1377_s19 = scalar_lea.hbm %s1685_s5, 16 }
  0x57   :  { %s80_s15 = sshll.u32 %s1440_s13, 4  ;;  %p1378_p12 = scmp.ne.s32.totalorder %s1685_s5, %s1377_s19  ;;  %s81_s15 = int_to_ptr.vmem [resolvable:$true] %s80_s15 }
  0x58   :  { %p1381_p13 = scmp.lt.u32.totalorder %s1377_s19, %s1685_s5 }
  0x5a   :  { %p1383_p0 = pnand %p1381_p13, %p1378_p12 }
  0x5c   :  { %1386 = shalt.err (!%p1383_p0)
}
  0x5d   :  { %s1387_s23 = scalar_lea.vmem %s81_s15, 16  ;;  %s1391_s4 = scalar_lea.vmem %s81_s15, 32 }
  0x5e   :  { %p1388_p1 = scmp.ne.s32.totalorder %s81_s15, %s1387_s23  ;;  %p1392_p2 = scmp.lt.s32.totalorder %s81_s15, %s81_s15 }
  0x5f   :  { %p1393_p3 = scmp.lt.s32.totalorder %s1391_s4, %s1387_s23 }
  0x61   :  { %p1394_p4 = por %p1393_p3, %p1392_p2 }
  0x63   :  { %p1395_p5 = pnand %p1394_p4, %p1388_p1 }
  0x65   :  { %1398 = shalt.err (!%p1395_p5)
}
  0x66   :  { %83 = dma.hbm_to_vmem [thread:$0]  %s1685_s5, 16, %s81_s15, [#allocation12]  }
  0x67   :  { %1421 = dma.done.wait [#allocation3], 1280  }
  0x68   :  { %1422 = vsyncadd [#allocation3], 4294966016 }
  0x69   :  { %1423 = dma.done.wait [#allocation6], 512  }
  0x6a   :  { %1424 = vsyncadd [#allocation6], 4294966784 }
  0x6b   :  { %1425 = dma.done.wait [#allocation9], 288  }
  0x6c   :  { %1426 = vsyncadd [#allocation9], 4294967008 }
  0x6d   :  { %1427 = dma.done.wait [#allocation12], 16  }
  0x6e   :  { %1428 = vsyncadd [#allocation12], 4294967280  ;;  %v1441_v0 = vmov 0.0   ;;  %vm1442_vm0 = vmmov 0   ;;  %v1237_v1 = vld [vmem:[#allocation5] sm:$0xff]   ;;  %v1238_v2 = vld [vmem:[#allocation5 + $0x8] sm:$0xff]  }
  0x6f   :  { %1105 = vmatprep.subr.bf16.mxu0 %v1441_v0  ;;  %1109 = vmatprep.mubr.msk.bf16.mxu0 %vm1442_vm0, %v1441_v0  ;;  %v103_v3 = vld [vmem:[#allocation2] sm:$0xff]  ;;  %v104_v4 = vld [vmem:[#allocation2 + $0x8] sm:$0xff]  ;;  %vm122_vm1 = vcmask 261120   ;;  %v229_v7 = vld [vmem:[#allocation2 + $0x10] sm:$0xff]  ;;  %s1443_s5 = smov 96   ;;  %vm656_vm2 = vcmask 1041408  }
  0x70   :  { %1113 = vmatprep.subr.bf16.mxu1 %v1441_v0  ;;  %1117 = vmatprep.mubr.msk.bf16.mxu1 %vm1442_vm0, %v1441_v0  ;;  %v105_v5 = vpack.c.bf16 %v104_v4, %v103_v3  ;;  %v1571_v6 = vld [vmem:[#allocation7] sm:$0xff]   ;;  %v230_v8 = vld [vmem:[#allocation2 + $0x18] sm:$0xff]  ;;  %v323_v11 = vld [vmem:[#allocation2 + $0x28] sm:$0xff]  ;;  %vm652_vm3 = vcmask 31744   ;;  %s1444_s17 = smov [#allocation13]  }
  0x71   :  { %1106 = vmatpush3.bf16.msra.mxu0 %v1237_v1  ;;  %1114 = vmatpush3.bf16.msra.mxu1 %v1571_v6  ;;  %v231_v9 = vpack.c.bf16 %v230_v8, %v229_v7  ;;  %v322_v10 = vld [vmem:[#allocation2 + $0x20] sm:$0xff]  ;;  %v415_v13 = vld [vmem:[#allocation2 + $0x30] sm:$0xff]  ;;  %v416_v14 = vld [vmem:[#allocation2 + $0x38] sm:$0xff]  ;;  %s1024_s0 = sshll.u32 %s1444_s17, 4  ;;  %s1025_s0 = int_to_ptr.vmem [resolvable:$true] %s1024_s0 }
  0x72   :  { %1107 = vmatprep.subr.bf16.mxu0 %v1441_v0  ;;  %1115 = vmatprep.subr.bf16.mxu1 %v1441_v0  ;;  %v324_v12 = vpack.c.bf16 %v323_v11, %v322_v10  ;;  %v417_v15 = vpack.c.bf16 %v416_v14, %v415_v13  ;;  %v508_v16 = vld [vmem:[#allocation2 + $0x40] sm:$0xff]  ;;  %v509_v17 = vld [vmem:[#allocation2 + $0x48] sm:$0xff]  ;;  %v651_v45 = vld [vmem:[#allocation8] sm:$0x3]  ;;  %s1399_s14 = scalar_lea.vmem %s1025_s0, 256  ;;  %p1404_p7 = scmp.lt.s32.totalorder %s1025_s0, %s1025_s0 }
  0x73   :  { %v510_v18 = vpack.c.bf16 %v509_v17, %v508_v16  ;;  %v1240_v19 = vld [vmem:[#allocation7 + $0x8] sm:$0xff]   ;;  %v1637_v46 = vsel %vm656_vm2, %v651_v45, 0  ;;  %p1400_p6 = scmp.ne.s32.totalorder %s1025_s0, %s1399_s14  ;;  %p1405_p8 = scmp.lt.s32.totalorder %s1399_s14, %s1399_s14 }
  0x75   :  { %1108 = vmatpush3.bf16.msra.mxu0 %v1238_v2  ;;  %1116 = vmatpush3.bf16.msra.mxu1 %v1240_v19  ;;  %p1406_p9 = por %p1405_p8, %p1404_p7 }
  0x76   :  { %1121 = vmatprep.subr.bf16.mxu0 %v1441_v0  ;;  %1129 = vmatprep.subr.bf16.mxu1 %v1441_v0 }
  0x77   :  { %p1407_p10 = pnand %p1406_p9, %p1400_p6 }
  0x78   :  { %1110 = vmatmul.mubr.msk.bf16.vlgmr.msra.gmra.mrb[0].mxu0 %vm122_vm1, %v105_v5 }
  0x79   :  { %1122 = vmatpush3.bf16.msra.mxu0 %v1237_v1  ;;  %1125 = vmatprep.mubr.msk.bf16.mxu0 %vm1442_vm0, %v1441_v0 }
  0x7a   :  { %1123 = vmatprep.subr.bf16.mxu0 %v1441_v0 }
  0x7d   :  { %1124 = vmatpush3.bf16.msra.mxu0 %v1238_v2 }
  0x7e   :  { %1137 = vmatprep.subr.bf16.mxu0 %v1441_v0 }
  0x80   :  { %1126 = vmatmul.mubr.msk.bf16.vlgmr.msra.gmra.mrb[4].mxu0 %vm122_vm1, %v231_v9 }
  0x81   :  { %1138 = vmatpush3.bf16.msra.mxu0 %v1237_v1  ;;  %1141 = vmatprep.mubr.msk.bf16.mxu0 %vm1442_vm0, %v1441_v0 }
  0x82   :  { %1139 = vmatprep.subr.bf16.mxu0 %v1441_v0 }
  0x85   :  { %1140 = vmatpush3.bf16.msra.mxu0 %v1238_v2 }
  0x86   :  { %1153 = vmatprep.subr.bf16.mxu0 %v1441_v0 }
  0x88   :  { %1142 = vmatmul.mubr.msk.bf16.vlgmr.msra.gmra.mrb[8].mxu0 %vm122_vm1, %v324_v12 }
  0x89   :  { %1154 = vmatpush3.bf16.msra.mxu0 %v1237_v1  ;;  %1157 = vmatprep.mubr.msk.bf16.mxu0 %vm1442_vm0, %v1441_v0 }
  0x8a   :  { %1155 = vmatprep.subr.bf16.mxu0 %v1441_v0 }
  0x8d   :  { %1156 = vmatpush3.bf16.msra.mxu0 %v1238_v2 }
  0x8e   :  { %1169 = vmatprep.subr.bf16.mxu0 %v1441_v0 }
  0x90   :  { %1158 = vmatmul.mubr.msk.bf16.vlgmr.msra.gmra.mrb[12].mxu0 %vm122_vm1, %v417_v15 }
  0x91   :  { %1170 = vmatpush3.bf16.msra.mxu0 %v1237_v1  ;;  %1173 = vmatprep.mubr.msk.bf16.mxu0 %vm1442_vm0, %v1441_v0 }
  0x92   :  { %1171 = vmatprep.subr.bf16.mxu0 %v1441_v0 }
  0x95   :  { %1172 = vmatpush3.bf16.msra.mxu0 %v1238_v2 }
  0x96   :  { %1185 = vmatprep.subr.bf16.mxu0 %v1441_v0 }
  0x98   :  { %1174 = vmatmul.mubr.msk.bf16.vlgmr.msra.gmra.mrb[16].mxu0 %vm122_vm1, %v510_v18 }
  0x99   :  { %1187 = vmatprep.mubr.msk.bf16.mxu0 %vm1442_vm0, %v1441_v0  ;;  %1186 = vmatpush3.bf16.msra.mxu0 %v1637_v46 }
  0x9a   :  { %1197 = vmatprep.subr.bf16.mxu0 %v1441_v0 }
 0x14b   :  { %v160_v20 = vpop.f32.mrb[0].mxu0 }
 0x14c   :  { %703 = vrot.lane.b32.xlu0 %v160_v20, %s1443_s5  ;;  %v1111_v21 = vpop.f32.mrb[1].mxu0 }
 0x14d   :  { %v163_v22 = vpop.f32.mrb[2].mxu0 }
 0x14e   :  { %v167_v23 = vpack.c.bf16 %v163_v22, %v160_v20  ;;  %v1112_v24 = vpop.f32.mrb[3].mxu0 }
 0x150   :  { %705 = vrot.lane.b32.xlu0 %v163_v22, %s1443_s5  ;;  %1118 = vmatmul.mubr.msk.bf16.vlgmr.msra.gmra.mrb[0].mxu1 %vm122_vm1, %v167_v23 }
 0x151   :  { %1130 = vmatpush3.bf16.msra.mxu1 %v1571_v6  ;;  %1133 = vmatprep.mubr.msk.bf16.mxu1 %vm1442_vm0, %v1441_v0 }
 0x152   :  { %1131 = vmatprep.subr.bf16.mxu1 %v1441_v0 }
 0x153   :  { %v269_v25 = vpop.f32.mrb[4].mxu0 }
 0x154   :  { %762 = vrot.lane.b32.xlu1 %v269_v25, %s1443_s5  ;;  %v1127_v26 = vpop.f32.mrb[5].mxu0 }
 0x155   :  { %v272_v27 = vpop.f32.mrb[6].mxu0  ;;  %1132 = vmatpush3.bf16.msra.mxu1 %v1240_v19 }
 0x156   :  { %v276_v28 = vpack.c.bf16 %v272_v27, %v269_v25  ;;  %v1128_v29 = vpop.f32.mrb[7].mxu0  ;;  %1145 = vmatprep.subr.bf16.mxu1 %v1441_v0 }
 0x158   :  { %764 = vrot.lane.b32.xlu1 %v272_v27, %s1443_s5  ;;  %1134 = vmatmul.mubr.msk.bf16.vlgmr.msra.gmra.mrb[4].mxu1 %vm122_vm1, %v276_v28 }
 0x159   :  { %1146 = vmatpush3.bf16.msra.mxu1 %v1571_v6  ;;  %1149 = vmatprep.mubr.msk.bf16.mxu1 %vm1442_vm0, %v1441_v0 }
 0x15a   :  { %1147 = vmatprep.subr.bf16.mxu1 %v1441_v0 }
 0x15b   :  { %v362_v30 = vpop.f32.mrb[8].mxu0 }
 0x15c   :  { %v1143_v31 = vpop.f32.mrb[9].mxu0  ;;  %821 = vrot.lane.b32.xlu0 %v362_v30, %s1443_s5 }
 0x15d   :  { %1148 = vmatpush3.bf16.msra.mxu1 %v1240_v19  ;;  %v365_v32 = vpop.f32.mrb[10].mxu0 }
 0x15e   :  { %v369_v33 = vpack.c.bf16 %v365_v32, %v362_v30  ;;  %823 = vrot.lane.b32.xlu1 %v365_v32, %s1443_s5  ;;  %v1144_v34 = vpop.f32.mrb[11].mxu0  ;;  %1161 = vmatprep.subr.bf16.mxu1 %v1441_v0 }
 0x160   :  { %1150 = vmatmul.mubr.msk.bf16.vlgmr.msra.gmra.mrb[8].mxu1 %vm122_vm1, %v369_v33 }
 0x161   :  { %1162 = vmatpush3.bf16.msra.mxu1 %v1571_v6  ;;  %1165 = vmatprep.mubr.msk.bf16.mxu1 %vm1442_vm0, %v1441_v0 }
 0x162   :  { %1163 = vmatprep.subr.bf16.mxu1 %v1441_v0 }
 0x163   :  { %v455_v35 = vpop.f32.mrb[12].mxu0 }
 0x164   :  { %v1159_v36 = vpop.f32.mrb[13].mxu0  ;;  %880 = vrot.lane.b32.xlu0 %v455_v35, %s1443_s5 }
 0x165   :  { %1164 = vmatpush3.bf16.msra.mxu1 %v1240_v19  ;;  %v458_v37 = vpop.f32.mrb[14].mxu0 }
 0x166   :  { %v462_v38 = vpack.c.bf16 %v458_v37, %v455_v35  ;;  %882 = vrot.lane.b32.xlu1 %v458_v37, %s1443_s5  ;;  %v1160_v39 = vpop.f32.mrb[15].mxu0  ;;  %1177 = vmatprep.subr.bf16.mxu1 %v1441_v0 }
 0x168   :  { %1166 = vmatmul.mubr.msk.bf16.vlgmr.msra.gmra.mrb[12].mxu1 %vm122_vm1, %v462_v38 }
 0x169   :  { %1178 = vmatpush3.bf16.msra.mxu1 %v1571_v6  ;;  %1181 = vmatprep.mubr.msk.bf16.mxu1 %vm1442_vm0, %v1441_v0 }
 0x16a   :  { %1179 = vmatprep.subr.bf16.mxu1 %v1441_v0 }
 0x16b   :  { %v548_v40 = vpop.f32.mrb[16].mxu0 }
 0x16c   :  { %v1175_v41 = vpop.f32.mrb[17].mxu0  ;;  %939 = vrot.lane.b32.xlu0 %v548_v40, %s1443_s5 }
 0x16d   :  { %1180 = vmatpush3.bf16.msra.mxu1 %v1240_v19  ;;  %v551_v42 = vpop.f32.mrb[18].mxu0 }
 0x16e   :  { %v555_v43 = vpack.c.bf16 %v551_v42, %v548_v40  ;;  %941 = vrot.lane.b32.xlu1 %v551_v42, %s1443_s5  ;;  %v1176_v44 = vpop.f32.mrb[19].mxu0  ;;  %1191 = vmatprep.subr.bf16.mxu1 %v1441_v0 }
 0x170   :  { %1182 = vmatmul.mubr.msk.bf16.vlgmr.msra.gmra.mrb[16].mxu1 %vm122_vm1, %v555_v43 }
 0x171   :  { %1193 = vmatprep.mubr.msk.bf16.mxu1 %vm1442_vm0, %v1441_v0  ;;  %1192 = vmatpush3.bf16.msra.mxu1 %v1637_v46 }
 0x172   :  { %1203 = vmatprep.subr.bf16.mxu1 %v1441_v0 }
 0x223   :  { %v221_v47 = vpop.f32.mrb[0].mxu1 }
 0x224   :  { %v1119_v48 = vpop.f32.mrb[1].mxu1 }
 0x225   :  { %v224_v49 = vpop.f32.mrb[2].mxu1 }
 0x226   :  { %v1120_v50 = vpop.f32.mrb[3].mxu1 }
 0x22b   :  { %v314_v51 = vpop.f32.mrb[4].mxu1 }
 0x22c   :  { %v600_v52 = vmax.f32 %v221_v47, %v314_v51  ;;  %v1135_v53 = vpop.f32.mrb[5].mxu1 }
 0x22d   :  { %v317_v54 = vpop.f32.mrb[6].mxu1 }
 0x22e   :  { %v601_v55 = vmax.f32 %v224_v49, %v317_v54  ;;  %v1136_v56 = vpop.f32.mrb[7].mxu1 }
 0x233   :  { %v407_v57 = vpop.f32.mrb[8].mxu1 }
 0x234   :  { %v602_v58 = vmax.f32 %v600_v52, %v407_v57  ;;  %v1151_v59 = vpop.f32.mrb[9].mxu1 }
 0x235   :  { %v410_v60 = vpop.f32.mrb[10].mxu1 }
 0x236   :  { %v603_v61 = vmax.f32 %v601_v55, %v410_v60  ;;  %v1152_v62 = vpop.f32.mrb[11].mxu1 }
 0x23b   :  { %v500_v63 = vpop.f32.mrb[12].mxu1 }
 0x23c   :  { %v604_v1 = vmax.f32 %v602_v58, %v500_v63  ;;  %v1167_v2 = vpop.f32.mrb[13].mxu1 }
 0x23d   :  { %v503_v3 = vpop.f32.mrb[14].mxu1 }
 0x23e   :  { %v605_v4 = vmax.f32 %v603_v61, %v503_v3  ;;  %v1168_v5 = vpop.f32.mrb[15].mxu1 }
 0x23f   :  { %v1241_v5 = vld [vmem:[#allocation10] sm:$0xff]  }
 0x243   :  { %v593_v6 = vpop.f32.mrb[16].mxu1 }
 0x244   :  { %v606_v7 = vmax.f32 %v604_v1, %v593_v6  ;;  %v1183_v8 = vpop.f32.mrb[17].mxu1 }
 0x245   :  { %v596_v9 = vpop.f32.mrb[18].mxu1  ;;  %v763_v8 = vpop.permute.xlu1 %762 }
 0x246   :  { %v608_v10 = vsub.f32 %v221_v47, %v606_v7  ;;  %v614_v11 = vsub.f32 %v314_v51, %v606_v7  ;;  %v620_v12 = vsub.f32 %v407_v57, %v606_v7  ;;  %v626_v13 = vsub.f32 %v500_v63, %v606_v7  ;;  %v1184_v14 = vpop.f32.mrb[19].mxu1 }
 0x247   :  { %v632_v15 = vsub.f32 %v593_v6, %v606_v7  ;;  %v607_v16 = vmax.f32 %v605_v4, %v596_v9  ;;  %v1242_v6 = vld [vmem:[#allocation10 + $0x8] sm:$0xff]   ;;  %v704_v7 = vpop.permute.xlu0 %703 }
 0x248   :  { %v610_v17 = vmul.f32 1.442695, %v608_v10  ;;  %v616_v18 = vmul.f32 1.442695, %v614_v11  ;;  %v622_v19 = vmul.f32 1.442695, %v620_v12 }
 0x249   :  { %v628_v20 = vmul.f32 1.442695, %v626_v13  ;;  %v609_v21 = vsub.f32 %v224_v49, %v607_v16  ;;  %v615_v22 = vsub.f32 %v317_v54, %v607_v16  ;;  %v621_v23 = vsub.f32 %v410_v60, %v607_v16  ;;  %v765_v10 = vpop.permute.xlu1 %764 }
 0x24a   :  { %1243 = vpow2.f32 %v610_v17  ;;  %v627_v24 = vsub.f32 %v503_v3, %v607_v16  ;;  %v633_v25 = vsub.f32 %v596_v9, %v607_v16  ;;  %v634_v28 = vmul.f32 1.442695, %v632_v15 }
 0x24b   :  { %1245 = vpow2.f32 %v616_v18  ;;  %v612_v26 = vmul.f32 1.442695, %v609_v21  ;;  %v618_v27 = vmul.f32 1.442695, %v615_v22  ;;  %v624_v29 = vmul.f32 1.442695, %v621_v23  ;;  %v706_v9 = vpop.permute.xlu0 %705 }
 0x24c   :  { %1247 = vpow2.f32 %v622_v19  ;;  %v630_v30 = vmul.f32 1.442695, %v627_v24  ;;  %v636_v31 = vmul.f32 1.442695, %v633_v25 }
 0x24d   :  { %1249 = vpow2.f32 %v628_v20  ;;  %v824_v24 = vpop.permute.xlu1 %823 }
 0x24e   :  { %1251 = vpow2.f32 %v612_v26 }
 0x24f   :  { %1253 = vpow2.f32 %v618_v27  ;;  %v822_v11 = vpop.permute.xlu0 %821 }
 0x250   :  { %1255 = vpow2.f32 %v634_v28 }
 0x251   :  { %1257 = vpow2.f32 %v624_v29 }
 0x252   :  { %1259 = vpow2.f32 %v630_v30 }
 0x253   :  { %1261 = vpow2.f32 %v636_v31  ;;  %v881_v25 = vpop.permute.xlu0 %880 }
 0x254   :  { %v1244_v32 = vpop.eup %1243 }
 0x255   :  { %v1246_v33 = vpop.eup %1245 }
 0x256   :  { %v638_v34 = vadd.f32 %v1246_v33, %v1244_v32  ;;  %v1248_v35 = vpop.eup %1247 }
 0x257   :  { %v1250_v36 = vpop.eup %1249 }
 0x258   :  { %v640_v37 = vadd.f32 %v1248_v35, %v638_v34  ;;  %v1252_v38 = vpop.eup %1251 }
 0x259   :  { %v1254_v39 = vpop.eup %1253 }
 0x25a   :  { %v642_v40 = vadd.f32 %v1250_v36, %v640_v37  ;;  %v1256_v41 = vpop.eup %1255  ;;  %v639_v42 = vadd.f32 %v1254_v39, %v1252_v38 }
 0x25b   :  { %v1258_v43 = vpop.eup %1257 }
 0x25c   :  { %v644_v44 = vadd.f32 %v1256_v41, %v642_v40  ;;  %v641_v45 = vadd.f32 %v1258_v43, %v639_v42  ;;  %v1260_v47 = vpop.eup %1259 }
 0x25d   :  { %v1262_v49 = vpop.eup %1261 }
 0x25e   :  { %1263 = vrcp.f32 %v644_v44  ;;  %v643_v48 = vadd.f32 %v1260_v47, %v641_v45 }
 0x260   :  { %v645_v50 = vadd.f32 %v1262_v49, %v643_v48 }
 0x262   :  { %1265 = vrcp.f32 %v645_v50 }
 0x268   :  { %v1264_v51 = vpop.eup %1263 }
 0x269   :  { %v890_v52 = vmul.f32 %v1264_v51, %v1256_v41  ;;  %v648_v53 = vmul.f32 %v1264_v51, %v1244_v32  ;;  %v713_v54 = vmul.f32 %v1264_v51, %v1246_v33  ;;  %v772_v55 = vmul.f32 %v1264_v51, %v1248_v35 }
 0x26a   :  { %v831_v56 = vmul.f32 %v1264_v51, %v1250_v36 }
 0x26c   :  { %v1266_v57 = vpop.eup %1265 }
 0x26d   :  { %v891_v58 = vmul.f32 %v1266_v57, %v1262_v49  ;;  %v649_v59 = vmul.f32 %v1266_v57, %v1252_v38  ;;  %v714_v60 = vmul.f32 %v1266_v57, %v1254_v39  ;;  %v773_v61 = vmul.f32 %v1266_v57, %v1258_v43  ;;  %v883_v38 = vpop.permute.xlu1 %882  ;;  %v940_v43 = vpop.permute.xlu0 %939 }
 0x26e   :  { %v832_v62 = vmul.f32 %v1266_v57, %v1260_v47 }
 0x26f   :  { %v650_v63 = vpack.c.bf16 %v649_v59, %v648_v53  ;;  %v715_v1 = vpack.c.bf16 %v714_v60, %v713_v54  ;;  %v774_v2 = vpack.c.bf16 %v773_v61, %v772_v55  ;;  %v892_v3 = vpack.c.bf16 %v891_v58, %v890_v52  ;;  %v1058_v55 = vld [vmem:[#allocation11] ss:$0 sm:$0xff] }
 0x270   :  { %v833_v4 = vpack.c.bf16 %v832_v62, %v831_v56 }
 0x271   :  { %1188 = vmatmul.mubr.msk.bf16.vlgmr.msra.gmra.mrb[20].mxu0 %vm652_vm3, %v650_v63  ;;  %1194 = vmatmul.mubr.msk.bf16.vlgmr.msra.gmra.mrb[20].mxu1 %vm652_vm3, %v715_v1  ;;  %v942_v48 = vpop.permute.xlu1 %941 }
 0x272   :  { %1198 = vmatpush3.bf16.msra.mxu0 %v1637_v46  ;;  %1204 = vmatpush3.bf16.msra.mxu1 %v1637_v46 }
 0x273   :  { %1199 = vmatprep.mubr.msk.bf16.mxu0 %vm1442_vm0, %v1441_v0  ;;  %1205 = vmatprep.mubr.msk.bf16.mxu1 %vm1442_vm0, %v1441_v0 }
 0x274   :  { %1209 = vmatprep.subr.bf16.mxu0 %v1441_v0  ;;  %1215 = vmatprep.subr.bf16.mxu1 %v1441_v0 }
 0x279   :  { %1200 = vmatmul.mubr.msk.bf16.vlgmr.msra.gmra.mrb[24].mxu0 %vm652_vm3, %v774_v2  ;;  %1206 = vmatmul.mubr.msk.bf16.vlgmr.msra.gmra.mrb[24].mxu1 %vm652_vm3, %v833_v4 }
 0x27a   :  { %1210 = vmatpush3.bf16.msra.mxu0 %v1637_v46  ;;  %1211 = vmatprep.mubr.msk.bf16.mxu0 %vm1442_vm0, %v1441_v0 }
 0x27b   :  { %1219 = vmatprep.mubr.msk.bf16.mxu1 %vm1442_vm0, %v1441_v0  ;;  %1216 = vmatpush3.bf16.msra.mxu1 %v1241_v5 }
 0x27c   :  { %1217 = vmatprep.subr.bf16.mxu1 %v1441_v0 }
 0x27f   :  { %1218 = vmatpush3.bf16.msra.mxu1 %v1242_v6 }
 0x281   :  { %1212 = vmatmul.mubr.msk.bf16.vlgmr.msra.gmra.mrb[28].mxu0 %vm652_vm3, %v892_v3 }
 0x344   :  { %v694_v46 = vpop.f32.mrb[20].mxu0  ;;  %v753_v12 = vpop.f32.mrb[20].mxu1 }
 0x345   :  { %v709_v13 = vmul.f32 %v704_v7, %v694_v46  ;;  %v768_v14 = vmul.f32 %v763_v8, %v753_v12  ;;  %v1189_v15 = vpop.f32.mrb[21].mxu0  ;;  %v1195_v16 = vpop.f32.mrb[21].mxu1 }
 0x346   :  { %v697_v17 = vpop.f32.mrb[22].mxu0  ;;  %v756_v18 = vpop.f32.mrb[22].mxu1 }
 0x347   :  { %v770_v19 = vadd.f32 %v768_v14, %v709_v13  ;;  %v710_v20 = vmul.f32 %v706_v9, %v697_v17  ;;  %v769_v21 = vmul.f32 %v765_v10, %v756_v18  ;;  %v1190_v22 = vpop.f32.mrb[23].mxu0  ;;  %v1196_v0 = vpop.f32.mrb[23].mxu1 }
 0x349   :  { %v771_v23 = vadd.f32 %v769_v21, %v710_v20 }
 0x34c   :  { %v812_v26 = vpop.f32.mrb[24].mxu0  ;;  %v871_v27 = vpop.f32.mrb[24].mxu1 }
 0x34d   :  { %v827_v28 = vmul.f32 %v822_v11, %v812_v26  ;;  %v1201_v29 = vpop.f32.mrb[25].mxu0  ;;  %v1207_v30 = vpop.f32.mrb[25].mxu1  ;;  %v886_v34 = vmul.f32 %v881_v25, %v871_v27 }
 0x34e   :  { %v815_v31 = vpop.f32.mrb[26].mxu0  ;;  %v874_v32 = vpop.f32.mrb[26].mxu1 }
 0x34f   :  { %v829_v33 = vadd.f32 %v827_v28, %v770_v19  ;;  %v828_v35 = vmul.f32 %v824_v24, %v815_v31  ;;  %v1202_v36 = vpop.f32.mrb[27].mxu0  ;;  %v1208_v37 = vpop.f32.mrb[27].mxu1  ;;  %v887_v41 = vmul.f32 %v883_v38, %v874_v32 }
 0x351   :  { %v888_v39 = vadd.f32 %v886_v34, %v829_v33  ;;  %v830_v40 = vadd.f32 %v828_v35, %v771_v23 }
 0x353   :  { %v889_v42 = vadd.f32 %v887_v41, %v830_v40 }
 0x354   :  { %v930_v44 = vpop.f32.mrb[28].mxu0 }
 0x355   :  { %v945_v45 = vmul.f32 %v940_v43, %v930_v44  ;;  %v1213_v47 = vpop.f32.mrb[29].mxu0 }
 0x356   :  { %v933_v49 = vpop.f32.mrb[30].mxu0 }
 0x357   :  { %v947_v50 = vadd.f32 %v945_v45, %v888_v39  ;;  %v946_v51 = vmul.f32 %v942_v48, %v933_v49  ;;  %v1214_v52 = vpop.f32.mrb[31].mxu0 }
 0x359   :  { %v948_v53 = vadd.f32 %v946_v51, %v889_v42 }
 0x35b   :  { %v949_v54 = vpack.c.bf16 %v948_v53, %v947_v50 }
 0x35d   :  { %1220 = vmatmul.mubr.msk.bf16.vlgmr.msra.gmra.mrb[28].mxu1 %vm122_vm1, %v949_v54 }
 0x430   :  { %v1010_v56 = vpop.f32.mrb[28].mxu1 }
 0x431   :  { %v1011_v57 = vadd.f32 %v1058_v55, %v1010_v56  ;;  %v1221_v58 = vpop.f32.mrb[29].mxu1 }
 0x432   :  { %v1013_v59 = vpop.f32.mrb[30].mxu1 }
 0x433   :  { %1017 = vst.msk [vmem:[#allocation13] sm:$0xff] %vm122_vm1, %v1011_v57  ;;  %v1014_v60 = vadd.f32 %v1058_v55, %v1013_v59  ;;  %v1222_v61 = vpop.f32.mrb[31].mxu1 }
 0x435   :  { %1018 = vst.msk [vmem:[#allocation13 + $0x8] sm:$0xff] %vm122_vm1, %v1014_v60 }
 0x436   :  { %1410 = shalt.err (!%p1407_p10)
}
 0x437   :  { %s1411_s26 = scalar_lea.hbm %s1686_s6, 256 }
 0x438   :  { %p1412_p11 = scmp.ne.s32.totalorder %s1686_s6, %s1411_s26  ;;  %p1415_p12 = scmp.lt.u32.totalorder %s1411_s26, %s1686_s6 }
 0x43a   :  { %p1417_p13 = pnand %p1415_p12, %p1412_p11 }
 0x43c   :  { %1420 = shalt.err (!%p1417_p13)
}
 0x43d   :  { %1030 = dma.vmem_to_hbm [thread:$0]  %s1025_s0, 256, %s1686_s6, [#allocation4], %s1436_s3, %s1436_s3, %s1437_s10  }
 0x43e   :  { %1429 = dma.done.wait [#allocation4], 256  }
 0x43f   :  { %1430 = vsyncadd [#allocation4], 4294967040 }
 0x440   :  { %1034 = vsyncpa [#allocation3], 1 }
 0x441   :  { %1035 = vsyncpa [#allocation6], 1 }
 0x442   :  { %1036 = vsyncpa [#allocation9], 1 }
 0x443   :  { %1037 = vsyncpa [#allocation12], 1 }
 0x444   :  { %1038 = vsyncpa [#allocation4], 1 }

// kernel: forward.14
= control target key start
LH: loop header
LB: loop body
LE: loop exit
PB: predicated region body
PF: predicated region fallthrough
CT: control target
= control target key end

     0   :  { %11 = vsyncpa [#allocation4], 0  ;;  %s2878_s0 = inlined_call_operand.hbm [shape: f32[2,8,64], index: 0, kind: input, shape index: {}]   ;;  %s2879_s1 = inlined_call_operand.hbm [shape: f32[1,64], index: 1, kind: input, shape index: {}]   ;;  %s2880_s2 = inlined_call_operand.hbm [shape: f32[1,64], index: 2, kind: input, shape index: {}]   ;;  %s2881_s3 = inlined_call_operand.hbm [shape: bf16[64,192], index: 3, kind: input, shape index: {}]   ;;  %s2882_s4 = inlined_call_operand.hbm [shape: bf16[64,64], index: 4, kind: input, shape index: {}]   ;;  %s2883_s5 = inlined_call_operand.hbm [shape: f32[1,64], index: 5, kind: input, shape index: {}]   ;;  %s2884_s6 = inlined_call_operand.hbm [shape: f32[2,8,64], index: 6, kind: output, shape index: {}]  }
   0x1   :  { %13 = vsyncpa [#allocation4 + $0x1], 0 }
   0x2   :  { %14 = vsyncpa [#allocation7], 0 }
   0x3   :  { %15 = vsyncpa [#allocation10], 0 }
   0x4   :  { %16 = vsyncpa [#allocation13], 0 }
   0x5   :  { %17 = vsyncpa [#allocation5], 0 }
   0x6   :  { %19 = vsyncpa [#allocation5 + $0x1], 0  ;;  %s2391_s21 = smov 0   ;;  %s2393_s22 = smov 0  }
   0x7   :  { %s2395_s23 = smov 0   ;;  %s2397_s24 = smov 0  }
   0x8 LB: > { %s2327_s25 = smov [#allocation6]   ;;  %s2412_s27 = sadd.s32 4294967295, %s2325_s24   ;;  %s2325_s24 = sphi %s2397_s24, %s2911_s24   ;;  %s2321_s23 = sphi %s2395_s23, %s2910_s23   ;;  %s2317_s22 = sphi %s2393_s22, %s2909_s22   ;;  %s2313_s21 = sphi %s2391_s21, %s2908_s21  }
   0x9   : > { %s200_s26 = sshll.u32 %s2327_s25, 4  ;;  %p1700_p0 = scmp.ge.s32.totalorder %s2325_s24, 1  ;;  %s2417_s26 = int_to_ptr.vmem [resolvable:$true] %s200_s26 }
   0xa   : > { %p2885_p1 = scmp.eq.s32.totalorder %s2412_s27, 0  ;;  %p187_p2 = scmp.lt.s32.totalorder %s2325_s24, 3 }
   0xb   : > { %s2328_s29 = smov [#allocation9]   ;;  %s2329_s8 = smov [#allocation8]  }
   0xc   : > { %p2419_p3 = pnand %p1700_p0, %p187_p2  ;;  %s221_s30 = sshll.u32 %s2328_s29, 4  ;;  %s2426_s30 = int_to_ptr.vmem [resolvable:$true] %s221_s30 }
   0xd   : > { %s211_s9 = sshll.u32 %s2329_s8, 4  ;;  %s2077_s12 = scalar_lea.hbm %s2879_s1, 16  ;;  %s2434_s9 = int_to_ptr.vmem [resolvable:$true] %s211_s9 }
   0xe   : > { %s2889_s28 = scalar_select %p2419_p3, 1, 0 }
   0xf   : > { %p1926_p5 = pneg %p2419_p3  ;;  %p2078_p7 = scmp.ne.s32.totalorder %s2879_s1, %s2077_s12 }
  0x10   : > { %p2084_p11 = scmp.lt.u32.totalorder %s2077_s12, %s2879_s1 }
  0x11   : > { %p2430_p6 = pnand %p1926_p5, %p2885_p1 }
  0x13   : > { %p2444_p8 = pneg %p2430_p6 }
  0x15   : > { %p2080_p9 = pnand %p2444_p8, %p2078_p7 }
  0x17   : > { %p2081_p10 = pneg %p2080_p9 }
  0x19   : > { %p2086_p12 = pnand %p2084_p11, %p2081_p10 }
  0x1b   : > { %2089 = shalt.err (!%p2086_p12)
}
  0x1c   : > { %s2090_s18 = scalar_lea.vmem %s2417_s26, 16  ;;  %s2097_s19 = scalar_lea.vmem %s2417_s26, 32 }
  0x1d   : > { %p2091_p13 = scmp.ne.s32.totalorder %s2417_s26, %s2090_s18  ;;  %p2098_p5 = scmp.lt.s32.totalorder %s2417_s26, %s2417_s26 }
  0x1e   : > { %p2099_p7 = scmp.lt.s32.totalorder %s2097_s19, %s2090_s18 }
  0x1f   : > { %p2093_p0 = pnand %p2091_p13, %p2444_p8 }
  0x20   : > { %p2100_p9 = por %p2099_p7, %p2098_p5 }
  0x21   : > { %p2094_p2 = pneg %p2093_p0 }
  0x23   : > { %p2101_p4 = pnand %p2100_p9, %p2094_p2 }
  0x25   : > { %2104 = shalt.err (!%p2101_p4)
}
  0x26   : > { %1929 = dma.hbm_to_vmem [thread:$0]  (!%p2430_p6), %s2879_s1, 16, %s2417_s26, [#allocation7]  }
  0x27   : > { %s2105_s10 = scalar_lea.hbm %s2881_s3, 1024 }
  0x28   : > { %p2106_p10 = scmp.ne.s32.totalorder %s2881_s3, %s2105_s10  ;;  %p2112_p4 = scmp.lt.u32.totalorder %s2105_s10, %s2881_s3 }
  0x2a   : > { %p2108_p11 = pnand %p2106_p10, %p2444_p8 }
  0x2c   : > { %p2109_p12 = pneg %p2108_p11 }
  0x2e   : > { %p2114_p13 = pnand %p2112_p4, %p2109_p12 }
  0x30   : > { %2117 = shalt.err (!%p2114_p13)
}
  0x31   : > { %s2118_s26 = scalar_lea.vmem %s2426_s30, 1024  ;;  %p2126_p7 = scmp.lt.s32.totalorder %s2426_s30, %s2426_s30 }
  0x32   : > { %p2119_p0 = scmp.ne.s32.totalorder %s2426_s30, %s2118_s26  ;;  %p2127_p9 = scmp.lt.s32.totalorder %s2118_s26, %s2118_s26 }
  0x34   : > { %p2121_p2 = pnand %p2119_p0, %p2444_p8  ;;  %p2128_p10 = por %p2127_p9, %p2126_p7 }
  0x36   : > { %p2122_p5 = pneg %p2121_p2 }
  0x38   : > { %p2129_p11 = pnand %p2128_p10, %p2122_p5 }
  0x3a   : > { %2132 = shalt.err (!%p2129_p11)
}
  0x3b   : > { %s2330_s16 = smov 128   ;;  %s2331_s17 = smov 8  }
  0x3c   : > { %1935 = dma.hbm_to_vmem [thread:$0]  (!%p2430_p6), %s2881_s3, 1024, %s2426_s30, [#allocation10], %s2330_s16, %s2330_s16, %s2331_s17  }
  0x3d   : > { %s2133_s29 = scalar_lea.hbm %s2880_s2, 16 }
  0x3e   : > { %p2134_p12 = scmp.ne.s32.totalorder %s2880_s2, %s2133_s29  ;;  %p2140_p0 = scmp.lt.u32.totalorder %s2133_s29, %s2880_s2 }
  0x40   : > { %p2136_p4 = pnand %p2134_p12, %p2444_p8 }
  0x42   : > { %p2137_p13 = pneg %p2136_p4 }
  0x44   : > { %p2142_p2 = pnand %p2140_p0, %p2137_p13 }
  0x46   : > { %2145 = shalt.err (!%p2142_p2)
}
  0x47   : > { %s2146_s30 = scalar_lea.vmem %s2434_s9, 16  ;;  %s2153_s13 = scalar_lea.vmem %s2434_s9, 32 }
  0x48   : > { %p2147_p5 = scmp.ne.s32.totalorder %s2434_s9, %s2146_s30  ;;  %p2154_p10 = scmp.lt.s32.totalorder %s2434_s9, %s2434_s9 }
  0x49   : > { %p2155_p11 = scmp.lt.s32.totalorder %s2153_s13, %s2146_s30 }
  0x4a   : > { %p2149_p7 = pnand %p2147_p5, %p2444_p8 }
  0x4b   : > { %p2156_p12 = por %p2155_p11, %p2154_p10 }
  0x4c   : > { %p2150_p9 = pneg %p2149_p7 }
  0x4e   : > { %p2157_p4 = pnand %p2156_p12, %p2150_p9 }
  0x50   : > { %2160 = shalt.err (!%p2157_p4)
}
  0x51   : > { %1932 = dma.hbm_to_vmem [thread:$0]  (!%p2430_p6), %s2880_s2, 16, %s2434_s9, [#allocation7]  }
  0x52   : > { %s2332_s16 = smov [#allocation11]   ;;  %s2161_s20 = scalar_lea.hbm %s2882_s4, 512 }
  0x53   : > { %s234_s17 = sshll.u32 %s2332_s16, 4  ;;  %p2162_p13 = scmp.ne.s32.totalorder %s2882_s4, %s2161_s20  ;;  %s235_s17 = int_to_ptr.vmem [resolvable:$true] %s234_s17 }
  0x54   : > { %p2168_p5 = scmp.lt.u32.totalorder %s2161_s20, %s2882_s4 }
  0x55   : > { %p2164_p0 = pnand %p2162_p13, %p2444_p8 }
  0x57   : > { %p2165_p2 = pneg %p2164_p0 }
  0x59   : > { %p2170_p7 = pnand %p2168_p5, %p2165_p2 }
  0x5b   : > { %2173 = shalt.err (!%p2170_p7)
}
  0x5c   : > { %s2174_s9 = scalar_lea.vmem %s235_s17, 512  ;;  %p2182_p12 = scmp.lt.s32.totalorder %s235_s17, %s235_s17 }
  0x5d   : > { %p2175_p9 = scmp.ne.s32.totalorder %s235_s17, %s2174_s9  ;;  %p2183_p4 = scmp.lt.s32.totalorder %s2174_s9, %s2174_s9 }
  0x5f   : > { %p2177_p10 = pnand %p2175_p9, %p2444_p8  ;;  %p2184_p1 = por %p2183_p4, %p2182_p12 }
  0x61   : > { %p2178_p11 = pneg %p2177_p10 }
  0x63   : > { %p2185_p3 = pnand %p2184_p1, %p2178_p11 }
  0x65   : > { %2188 = shalt.err (!%p2185_p3)
}
  0x66   : > { %s2333_s11 = smov 64   ;;  %s2334_s12 = smov 4  }
  0x67   : > { %1938 = dma.hbm_to_vmem [thread:$0]  (!%p2430_p6), %s2882_s4, 512, %s235_s17, [#allocation10], %s2333_s11, %s2333_s11, %s2334_s12  }
  0x68   : > { %s2335_s14 = smov [#allocation12]   ;;  %s2189_s19 = scalar_lea.hbm %s2883_s5, 16 }
  0x69   : > { %s248_s26 = sshll.u32 %s2335_s14, 4  ;;  %p2190_p1 = scmp.ne.s32.totalorder %s2883_s5, %s2189_s19  ;;  %s249_s26 = int_to_ptr.vmem [resolvable:$true] %s248_s26 }
  0x6a   : > { %p2196_p0 = scmp.lt.u32.totalorder %s2189_s19, %s2883_s5 }
  0x6b   : > { %p2192_p3 = pnand %p2190_p1, %p2444_p8 }
  0x6d   : > { %p2193_p13 = pneg %p2192_p3 }
  0x6f   : > { %p2198_p2 = pnand %p2196_p0, %p2193_p13 }
  0x71   : > { %2201 = shalt.err (!%p2198_p2)
}
  0x72   : > { %s2202_s17 = scalar_lea.vmem %s249_s26, 16  ;;  %s2209_s10 = scalar_lea.vmem %s249_s26, 32 }
  0x73   : > { %p2203_p5 = scmp.ne.s32.totalorder %s249_s26, %s2202_s17  ;;  %p2210_p10 = scmp.lt.s32.totalorder %s249_s26, %s249_s26 }
  0x74   : > { %p2211_p11 = scmp.lt.s32.totalorder %s2209_s10, %s2202_s17 }
  0x75   : > { %p2205_p7 = pnand %p2203_p5, %p2444_p8 }
  0x76   : > { %p2212_p12 = por %p2211_p11, %p2210_p10 }
  0x77   : > { %p2206_p9 = pneg %p2205_p7 }
  0x79   : > { %p2213_p4 = pnand %p2212_p12, %p2206_p9 }
  0x7b   : > { %2216 = shalt.err (!%p2213_p4)
}
  0x7c   : > { %1941 = dma.hbm_to_vmem [thread:$0]  (!%p2430_p6), %s2883_s5, 16, %s249_s26, [#allocation13]  }
  0x7d   : > { %s1699_s15 = sadd.s32 4294967294, %s2325_s24   ;;  %s2551_s7 = sadd.s32 1, %s2325_s24  }
  0x7e   : > { %s32_s12 = sadd.s32 1, %s2321_s23  ;;  %s29_s30 = ssub.s32 %s2325_s24, %s2551_s7 }
  0x7f   : > { %p39_p8 = scmp.ne.s32.totalorder %s2321_s23, %s2317_s22  ;;  %p30_p1 = scmp.eq.s32.totalorder %s29_s30, 0 }
  0x80   : > { %p40_p3 = scmp.eq.s32.totalorder %s2325_s24, 0  ;;  %p45_p13 = scmp.ne.s32.totalorder %s2317_s22, %s2313_s21 }
  0x81   : > { %p174_p0 = scmp.eq.s32.totalorder %s2412_s27, 1  ;;  %p2892_p5 = scmp.eq.s32.totalorder %s2412_s27, 0 }
  0x82   : > { %s2563_s13 = scalar_select %p30_p1, %s2321_s23, %s32_s12  }
  0x83   : > { %p41_p2 = por %p40_p3, %p39_p8  ;;  %p2567_p7 = por %p2892_p5, %p45_p13 }
  0x84   : > { %p2571_p6 = por %p174_p0, %p39_p8  ;;  %p180_p9 = scmp.eq.s32.totalorder %s1699_s15, 1 }
  0x85   : > { %p1955_p10 = scmp.lt.s32.totalorder %s2325_s24, 2  ;;  %s259_s16 = sand.u32 1, %s2321_s23  }
  0x86   : > { %s2894_s26 = scalar_select %p2571_p6, 1, 0 }
  0x87   : > { %p2577_p11 = por %p180_p9, %p45_p13  ;;  %s1707_s19 = sshll.u32 %s259_s16, 3 }
  0x88   : > { %s1708_s20 = sshll.u32 %s2325_s24, 7  ;;  %s263_s17 = scalar_lea.vmem [#allocation3], %s1707_s19 }
  0x89   : > { %s2895_s18 = scalar_select %p2577_p11, 1, 0 }
  0x8a   : > { %s2585_s8 = scalar_lea.hbm %s2878_s0, %s1708_s20  ;;  %s270_s10 = sshll.u32 %s263_s17, 4  ;;  %s2591_s10 = int_to_ptr.vmem [resolvable:$true] %s270_s10 }
  0x8b   : > { %p2587_p12 = pnand %p1955_p10, %p41_p2  ;;  %s260_s11 = scalar_lea.sflag [#allocation4], %s259_s16 }
  0x8c   : > { %s2217_s15 = scalar_lea.hbm %s2585_s8, 128  ;;  %s2222_s19 = scalar_lea.hbm %s2878_s0, 256 }
  0x8d   : > { %p2218_p4 = scmp.ne.s32.totalorder %s2585_s8, %s2217_s15  ;;  %p2219_p8 = pneg %p2587_p12 }
  0x8e   : > { %p2223_p13 = scmp.lt.u32.totalorder %s2585_s8, %s2878_s0  ;;  %p2224_p0 = scmp.lt.u32.totalorder %s2222_s19, %s2217_s15 }
  0x8f   : > { %p2220_p1 = pnand %p2219_p8, %p2218_p4  ;;  %p2226_p5 = scmp.lt.u32.totalorder %s2217_s15, %s2585_s8 }
  0x90   : > { %p2225_p2 = por %p2224_p0, %p2223_p13 }
  0x91   : > { %p2221_p3 = pneg %p2220_p1 }
  0x92   : > { %p2227_p9 = por %p2226_p5, %p2225_p2 }
  0x94   : > { %p2228_p10 = pnand %p2227_p9, %p2221_p3 }
  0x96   : > { %2231 = shalt.err (!%p2228_p10)
}
  0x97   : > { %s2232_s16 = scalar_lea.vmem %s2591_s10, 128  ;;  %s2336_s29 = smov [#allocation3]  }
  0x98   : > { %p2233_p4 = scmp.ne.s32.totalorder %s2591_s10, %s2232_s16  ;;  %s2237_s17 = sshll.u32 %s2336_s29, 4  ;;  %s2238_s17 = int_to_ptr.vmem [resolvable:$false] %s2237_s17 }
  0x99   : > { %s2239_s12 = scalar_lea.vmem %s2238_s17, 256  ;;  %p2240_p6 = scmp.lt.s32.totalorder %s2591_s10, %s2238_s17 }
  0x9a   : > { %p2235_p1 = pnand %p2233_p4, %p2219_p8  ;;  %p2241_p13 = scmp.lt.s32.totalorder %s2239_s12, %s2232_s16 }
  0x9c   : > { %p2236_p11 = pneg %p2235_p1  ;;  %p2242_p0 = por %p2241_p13, %p2240_p6 }
  0x9e   : > { %p2243_p2 = pnand %p2242_p0, %p2236_p11 }
  0xa0   : > { %2246 = shalt.err (!%p2243_p2)
}
  0xa1   : > { %1945 = dma.hbm_to_vmem [thread:$0]  (!%p2587_p12), %s2585_s8, 128, %s2591_s10, %s260_s11  }
  0xa2   : > { %p2897_p3 = scmp.ne.s32.totalorder %s2889_s28, 0 }
  0xa3   : > { %s2621_s15 = sand.u32 (!%p2897_p3), 1, %s2317_s22  }
  0xa4   : > { %279 = sbr.rel (%p2897_p3) target bundleno = 2378 (0x94a), region = 44  ;;  %s2888_s30 = sshll.u32 (!%p2897_p3), %s2621_s15, 3 }
  0xa5   : > { %s282_s19 = scalar_lea.sflag (!%p2897_p3), [#allocation4], %s2621_s15  ;;  %s285_s20 = scalar_lea.vmem (!%p2897_p3), [#allocation3], %s2888_s30 }
  0xab   : > { %2292 = dma.done.wait (%p2567_p7), %s282_s19, 128  }
  0xac   : > { %2294 = vsyncadd (%p2567_p7), %s282_s19, 4294967168  ;;  %p2898_p6 = scmp.eq.s32.totalorder %s2412_s27, 0 }
  0xae   : > { %2296 = dma.done.wait (%p2898_p6), [#allocation7], 32   ;;  %p2899_p11 = pmov %p2898_p6 }
  0xaf   : > { %p2900_p12 = pmov %p2898_p6 }
  0xb0   : > { %2298 = vsyncadd (%p2899_p11), [#allocation7], 4294967264 }
  0xb1   : > { %2300 = dma.done.wait (%p2900_p12), [#allocation10], 1536   ;;  %p2901_p8 = pmov %p2898_p6 }
  0xb2   : > { %p2902_p5 = pmov %p2898_p6 }
  0xb3   : > { %2302 = vsyncadd (%p2901_p8), [#allocation10], 4294965760 }
  0xb4   : > { %2304 = dma.done.wait (%p2902_p5), [#allocation13], 16   ;;  %p2903_p9 = pmov %p2902_p5 }
  0xb5   : > { %v2643_v0 = vld [vmem:[%s285_s20] sm:$0xff]  ;;  %s2337_s28 = smov 96   ;;  %vm336_vm0 = vcmask 261120   ;;  %v2023_v16 = vld [vmem:[#allocation9] ss:$8 sps:$4 sm:$0xff]   ;;  %v2338_v18 = vmov 0  }
  0xb6   : > { %2306 = vsyncadd (%p2903_p9), [#allocation13], 4294967280  ;;  %381 = vrot.lane.b32.xlu0 %v2643_v0, %s2337_s28  ;;  %v337_v7 = vsel %vm336_vm0, %v2643_v0, 0.0  ;;  %v2021_v15 = vld [vmem:[#allocation9 + $0x4] ss:$8 sps:$4 sm:$0xff]   ;;  %538 = vmatprep.mubr.bf16.mxu0 %v2338_v18  ;;  %v2339_v57 = vmov 0.0  }
  0xb7   : > { %v2024_v17 = vld [vmem:[#allocation9 + $0x14] ss:$8 sps:$4 sm:$0xff]   ;;  %506 = vmatprep.subr.bf16.mxu0 %v2021_v15  ;;  %v2026_v19 = vld [vmem:[#allocation9 + $0x10] ss:$8 sps:$4 sm:$0xff]   ;;  %474 = vmatprep.mubr.bf16.mxu1 %v2338_v18  ;;  %v2027_v20 = vld [vmem:[#allocation9 + $0x24] ss:$8 sps:$4 sm:$0xff]  }
  0xb8   : > { %507 = vmatpush1.bf16.msra.mxu0 %v2023_v16  ;;  %v2029_v21 = vld [vmem:[#allocation9 + $0x20] ss:$8 sps:$4 sm:$0xff]   ;;  %v2030_v22 = vld [vmem:[#allocation9 + $0x34] ss:$8 sps:$4 sm:$0xff]   ;;  %442 = vmatprep.subr.bf16.mxu1 %v2027_v20  ;;  %v2032_v23 = vld [vmem:[#allocation9 + $0x30] ss:$8 sps:$4 sm:$0xff]  }
  0xb9   : > { %508 = vmatprep.subr.bf16.mxu0 %v2024_v17  ;;  %443 = vmatpush1.bf16.msra.mxu1 %v2029_v21  ;;  %v1717_v33 = vld [vmem:[#allocation6] ss:$0 sm:$0xff]  ;;  %v1718_v35 = vld [vmem:[#allocation8] ss:$0 sm:$0xff]  ;;  %vm2340_vm5 = vmmov 0   ;;  %s2341_s14 = smov 56  }
  0xba   : > { %444 = vmatprep.subr.bf16.mxu1 %v2030_v22  ;;  %s2342_s8 = smov 64   ;;  %s2343_s10 = smov 120   ;;  %vm552_vm6 = vcmask 64512   ;;  %vm615_vm7 = vcmask 1043456   ;;  %vm776_vm8 = vcmask 130112   ;;  %vm893_vm9 = vcmask 195712  }
  0xbb   : > { %s2344_s9 = smov 48   ;;  %s2345_s11 = smov 112   ;;  %vm1010_vm10 = vcmask 261312   ;;  %vm1127_vm11 = vcmask 326912   ;;  %vm1244_vm12 = vcmask 392512   ;;  %vm1361_vm13 = vcmask 458112  }
  0xbc   : > { %509 = vmatpush1.bf16.msra.mxu0 %v2026_v19  ;;  %s2346_s25 = smov 40   ;;  %s2347_s16 = smov 104   ;;  %vm1478_vm14 = vcmask 523712   ;;  %vm1521_vm15 = vcmask 523264  }
  0xbd   : > { %445 = vmatpush1.bf16.msra.mxu1 %v2032_v23  ;;  %1804 = vmatprep.subr.bf16.mxu0 %v2339_v57  ;;  %s2348_s29 = smov 32   ;;  %s2349_s17 = smov 24  }
  0xbe   : > { %1792 = vmatprep.subr.bf16.mxu1 %v2339_v57  ;;  %s2350_s12 = smov 88   ;;  %s2351_s19 = smov 16  }
  0xbf   : > { %s2352_s20 = smov 80   ;;  %s2354_s30 = smov 72  }
  0xc0   : > { %p2905_p10 = scmp.ne.s32.totalorder %s2894_s26, 0 }
 0x128   : > { %v382_v1 = vpop.permute.xlu0 %381 }
 0x129   : > { %v384_v2 = vsel %vm336_vm0, %v382_v1, 0.0 }
 0x12a   : > { %385 = vadd.xlane.f32.xlu0 %v384_v2 }
 0x1b7   : > { %v386_v3 = vpop.xlane.xlu0 %385 }
 0x1b8   : > { %v387_v4 = vmul.f32 0.03125, %v386_v3 }
 0x1ba   : > { %v388_v5 = vsub.f32 %v2643_v0, %v387_v4 }
 0x1bc   : > { %v389_v6 = vmul.f32 %v388_v5, %v388_v5 }
 0x1be   : > { %391 = vrot.lane.b32.xlu1 %v389_v6, %s2337_s28 }
 0x1e2   : > { %338 = vadd.xlane.f32.xlu1 %v337_v7 }
 0x230   : > { %v392_v8 = vpop.permute.xlu1 %391 }
 0x231   : > { %v394_v9 = vsel %vm336_vm0, %v392_v8, 0.0 }
 0x232   : > { %395 = vadd.xlane.f32.xlu0 %v394_v9 }
 0x26f   : > { %v339_v10 = vpop.xlane.xlu1 %338 }
 0x270   : > { %v341_v11 = vmul.f32 0.03125, %v339_v10 }
 0x272   : > { %v342_v12 = vsub.f32 %v2643_v0, %v341_v11 }
 0x274   : > { %v343_v13 = vmul.f32 %v342_v12, %v342_v12 }
 0x276   : > { %v344_v14 = vsel %vm336_vm0, %v343_v13, 0.0 }
 0x277   : > { %345 = vadd.xlane.f32.xlu0 %v344_v14 }
 0x2bf   : > { %v396_v24 = vpop.xlane.xlu0 %395 }
 0x2c0   : > { %v397_v25 = vmul.f32 0.03125, %v396_v24 }
 0x2c2   : > { %2037 = vrsqrt.f32 %v397_v25  ;;  %vm400_vm1 = vcmp.eq.f32.partialorder %v397_v25, inf  ;;  %v403_v28 = vand.u32 2147483648, %v397_v25  ;;  %vm402_vm2 = vcmp.eq.f32.partialorder %v397_v25, 0.0 }
 0x2cc   : > { %v2038_v26 = vpop.eup %2037 }
 0x2cd   : > { %v399_v27 = vmul.f32 %v2038_v26, %v397_v25 }
 0x2cf   : > { %v401_v29 = vsel %vm400_vm1, %v397_v25, %v399_v27 }
 0x2d0   : > { %v404_v30 = vsel %vm402_vm2, %v403_v28, %v401_v29 }
 0x2d1   : > { %v405_v31 = vadd.f32 1e-05, %v404_v30 }
 0x2d3   : > { %2039 = vrcp.f32 %v405_v31 }
 0x2dd   : > { %v2040_v32 = vpop.eup %2039 }
 0x2de   : > { %v408_v34 = vmul.f32 %v2040_v32, %v388_v5 }
 0x2e0   : > { %v409_v36 = vmul.f32 %v1717_v33, %v408_v34 }
 0x2e2   : > { %v410_v37 = vadd.f32 %v1718_v35, %v409_v36 }
 0x2e4   : > { %v411_v38 = vpack.c.bf16 %v410_v37, %v410_v37 }
 0x2e6   : > { %417 = vrot.lane.b32.xlu1 %v411_v38, %s2337_s28 }
 0x304   : > { %v346_v39 = vpop.xlane.xlu0 %345 }
 0x305   : > { %v347_v40 = vmul.f32 0.03125, %v346_v39 }
 0x307   : > { %2041 = vrsqrt.f32 %v347_v40  ;;  %vm350_vm3 = vcmp.eq.f32.partialorder %v347_v40, inf  ;;  %v353_v42 = vand.u32 2147483648, %v347_v40  ;;  %vm352_vm4 = vcmp.eq.f32.partialorder %v347_v40, 0.0 }
 0x311   : > { %v2042_v41 = vpop.eup %2041 }
 0x312   : > { %v349_v43 = vmul.f32 %v2042_v41, %v347_v40 }
 0x314   : > { %v351_v44 = vsel %vm350_vm3, %v347_v40, %v349_v43 }
 0x315   : > { %v354_v45 = vsel %vm352_vm4, %v353_v42, %v351_v44 }
 0x316   : > { %v355_v46 = vadd.f32 1e-05, %v354_v45 }
 0x318   : > { %2043 = vrcp.f32 %v355_v46 }
 0x322   : > { %v2044_v47 = vpop.eup %2043 }
 0x323   : > { %v358_v48 = vmul.f32 %v2044_v47, %v342_v12 }
 0x325   : > { %v366_v49 = vmul.f32 %v1717_v33, %v358_v48 }
 0x327   : > { %v374_v50 = vadd.f32 %v1718_v35, %v366_v49 }
 0x329   : > { %v375_v51 = vpack.c.bf16 %v374_v50, %v374_v50 }
 0x32b   : > { %1728 = vmatmul.mubr.msk.bf16.vlgmr.msra.gmra.mrb[0].mxu0 %vm336_vm0, %v375_v51 }
 0x32c   : > { %1806 = vmatprep.mubr.msk.bf16.mxu0 %vm2340_vm5, %v2339_v57 }
 0x358   : > { %v418_v52 = vpop.permute.xlu1 %417 }
 0x359   : > { %1723 = vmatmul.mubr.msk.bf16.vlgmr.msra.gmra.mrb[0].mxu1 %vm336_vm0, %v418_v52 }
 0x35a   : > { %1794 = vmatprep.mubr.msk.bf16.mxu1 %vm2340_vm5, %v2339_v57 }
 0x3fe   : > { %v540_v53 = vpop.f32.mrb[0].mxu0 }
 0x3ff   : > { %v542_v54 = vpop.f32.mrb[1].mxu0 }
 0x400   : > { %v544_v55 = vpop.f32.mrb[2].mxu0 }
 0x401   : > { %v545_v56 = vpop.f32.mrb[3].mxu0 }
 0x42c   : > { %v476_v58 = vpop.f32.mrb[0].mxu1 }
 0x42d   : > { %v541_v59 = vadd.f32 %v540_v53, %v476_v58  ;;  %v478_v60 = vpop.f32.mrb[1].mxu1 }
 0x42e   : > { %v543_v61 = vadd.f32 %v542_v54, %v478_v60  ;;  %v480_v62 = vpop.f32.mrb[2].mxu1 }
 0x42f   : > { %v547_v63 = vpack.c.bf16 %v541_v59, %v541_v59  ;;  %v481_v1 = vpop.f32.mrb[3].mxu1 }
 0x430   : > { %v2682_v6 = vpack.c.bf16 %v543_v61, %v543_v61 }
 0x431   : > { %662 = vrot.lane.b32.xlu1 %v547_v63, %s2341_s14  ;;  %550 = vrot.lane.b32.xlu0 %v547_v63, %s2342_s8  ;;  %s2353_s8 = smov 8  }
 0x432   : > { %v617_v10 = vsel %vm615_vm7, %v2682_v6, 0 }
 0x435   : > { %660 = vrot.lane.b32.xlu1 %v547_v63, %s2343_s10  ;;  %780 = vrot.lane.b32.xlu0 %v547_v63, %s2344_s9 }
 0x439   : > { %778 = vrot.lane.b32.xlu1 %v547_v63, %s2345_s11  ;;  %897 = vrot.lane.b32.xlu0 %v547_v63, %s2346_s25 }
 0x43d   : > { %895 = vrot.lane.b32.xlu1 %v547_v63, %s2347_s16  ;;  %1014 = vrot.lane.b32.xlu0 %v547_v63, %s2348_s29 }
 0x441   : > { %1012 = vrot.lane.b32.xlu1 %v547_v63, %s2337_s28  ;;  %1131 = vrot.lane.b32.xlu0 %v547_v63, %s2349_s17 }
 0x445   : > { %1129 = vrot.lane.b32.xlu1 %v547_v63, %s2350_s12  ;;  %1248 = vrot.lane.b32.xlu0 %v547_v63, %s2351_s19 }
 0x449   : > { %1246 = vrot.lane.b32.xlu1 %v547_v63, %s2352_s20  ;;  %1365 = vrot.lane.b32.xlu0 %v547_v63, %s2353_s8 }
 0x44d   : > { %1363 = vrot.lane.b32.xlu1 %v547_v63, %s2354_s30 }
 0x4a3   : > { %v663_v2 = vpop.permute.xlu1 %662  ;;  %v551_v3 = vpop.permute.xlu0 %550 }
 0x4a4   : > { %v668_v4 = vsel %vm552_vm6, %v663_v2, 0  ;;  %v557_v5 = vsel %vm552_vm6, %v551_v3, 0 }
 0x4a5   : > { %1793 = vmatpush3.bf16.xpose.msra.mxu1 %v557_v5  ;;  %1805 = vmatpush3.bf16.xpose.msra.mxu0 %v668_v4 }
 0x4a6   : > { %1798 = vmatprep.subr.bf16.mxu1 %v2339_v57  ;;  %1816 = vmatprep.subr.bf16.mxu0 %v2339_v57 }
 0x4a7   : > { %v781_v7 = vpop.permute.xlu0 %780  ;;  %v661_v8 = vpop.permute.xlu1 %660 }
 0x4a8   : > { %v786_v9 = vsel %vm552_vm6, %v781_v7, 0 }
 0x4ab   : > { %v898_v11 = vpop.permute.xlu0 %897  ;;  %v779_v12 = vpop.permute.xlu1 %778 }
 0x4ac   : > { %1795 = vmatmul.mubr.msk.bf16.vlgmr.msra.gmra.mrb[4].mxu1 %vm552_vm6, %v547_v63  ;;  %1807 = vmatmul.mubr.msk.bf16.vlgmr.msra.gmra.mrb[4].mxu0 %vm552_vm6, %v661_v8  ;;  %v903_v13 = vsel %vm552_vm6, %v898_v11, 0 }
 0x4ad   : > { %1799 = vmatpush3.bf16.msra.mxu1 %v617_v10  ;;  %1817 = vmatpush3.bf16.xpose.msra.mxu0 %v786_v9 }
 0x4ae   : > { %1818 = vmatprep.mubr.msk.bf16.mxu0 %vm2340_vm5, %v2339_v57  ;;  %1828 = vmatprep.subr.bf16.mxu0 %v2339_v57 }
 0x4af   : > { %1800 = vmatprep.mubr.msk.bf16.mxu1 %vm2340_vm5, %v2339_v57  ;;  %1810 = vmatprep.subr.bf16.mxu1 %v2339_v57  ;;  %v1015_v14 = vpop.permute.xlu0 %1014  ;;  %v896_v15 = vpop.permute.xlu1 %895 }
 0x4b0   : > { %v1020_v16 = vsel %vm552_vm6, %v1015_v14, 0 }
 0x4b3   : > { %v1132_v17 = vpop.permute.xlu0 %1131  ;;  %v1013_v18 = vpop.permute.xlu1 %1012 }
 0x4b4   : > { %1819 = vmatmul.mubr.msk.bf16.vlgmr.msra.gmra.mrb[8].mxu0 %vm552_vm6, %v779_v12  ;;  %v1137_v19 = vsel %vm552_vm6, %v1132_v17, 0 }
 0x4b5   : > { %1829 = vmatpush3.bf16.xpose.msra.mxu0 %v903_v13  ;;  %1830 = vmatprep.mubr.msk.bf16.mxu0 %vm2340_vm5, %v2339_v57 }
 0x4b6   : > { %1840 = vmatprep.subr.bf16.mxu0 %v2339_v57 }
 0x4b7   : > { %v1249_v20 = vpop.permute.xlu0 %1248  ;;  %v1130_v21 = vpop.permute.xlu1 %1129 }
 0x4b8   : > { %v1254_v22 = vsel %vm552_vm6, %v1249_v20, 0 }
 0x4bb   : > { %v1366_v23 = vpop.permute.xlu0 %1365  ;;  %v1247_v24 = vpop.permute.xlu1 %1246 }
 0x4bc   : > { %1831 = vmatmul.mubr.msk.bf16.vlgmr.msra.gmra.mrb[12].mxu0 %vm552_vm6, %v896_v15  ;;  %v1371_v25 = vsel %vm552_vm6, %v1366_v23, 0 }
 0x4bd   : > { %1841 = vmatpush3.bf16.xpose.msra.mxu0 %v1020_v16  ;;  %1842 = vmatprep.mubr.msk.bf16.mxu0 %vm2340_vm5, %v2339_v57 }
 0x4be   : > { %1852 = vmatprep.subr.bf16.mxu0 %v2339_v57 }
 0x4bf   : > { %v1364_v26 = vpop.permute.xlu1 %1363 }
 0x4c4   : > { %1843 = vmatmul.mubr.msk.bf16.vlgmr.msra.gmra.mrb[16].mxu0 %vm552_vm6, %v1013_v18 }
 0x4c5   : > { %1853 = vmatpush3.bf16.xpose.msra.mxu0 %v1137_v19  ;;  %1854 = vmatprep.mubr.msk.bf16.mxu0 %vm2340_vm5, %v2339_v57 }
 0x4c6   : > { %1864 = vmatprep.subr.bf16.mxu0 %v2339_v57 }
 0x4cc   : > { %1855 = vmatmul.mubr.msk.bf16.vlgmr.msra.gmra.mrb[20].mxu0 %vm552_vm6, %v1130_v21 }
 0x4cd   : > { %1865 = vmatpush3.bf16.xpose.msra.mxu0 %v1254_v22  ;;  %1866 = vmatprep.mubr.msk.bf16.mxu0 %vm2340_vm5, %v2339_v57 }
 0x4ce   : > { %1876 = vmatprep.subr.bf16.mxu0 %v2339_v57 }
 0x4d4   : > { %1867 = vmatmul.mubr.msk.bf16.vlgmr.msra.gmra.mrb[24].mxu0 %vm552_vm6, %v1247_v24 }
 0x4d5   : > { %1877 = vmatpush3.bf16.xpose.msra.mxu0 %v1371_v25  ;;  %1878 = vmatprep.mubr.msk.bf16.mxu0 %vm2340_vm5, %v2339_v57 }
 0x4d6   : > { %1888 = vmatprep.subr.bf16.mxu0 %v2339_v57 }
 0x4dc   : > { %1879 = vmatmul.mubr.msk.bf16.vlgmr.msra.gmra.mrb[28].mxu0 %vm552_vm6, %v1364_v26 }
 0x4dd   : > { %1896 = vmatprep.mubr.msk.bf16.mxu0 %vm2340_vm5, %v2339_v57 }
 0x57f   : > { %v593_v27 = vpop.f32.mrb[4].mxu1  ;;  %v704_v28 = vpop.f32.mrb[4].mxu0 }
 0x580   : > { %v599_v29 = vmul.f32 0.35355338, %v593_v27  ;;  %v710_v30 = vmul.f32 0.35355338, %v704_v28  ;;  %v1796_v31 = vpop.f32.mrb[5].mxu1  ;;  %v1808_v32 = vpop.f32.mrb[5].mxu0 }
 0x581   : > { %v596_v33 = vpop.f32.mrb[6].mxu1  ;;  %v707_v34 = vpop.f32.mrb[6].mxu0 }
 0x582   : > { %v1797_v35 = vpop.f32.mrb[7].mxu1  ;;  %v1809_v36 = vpop.f32.mrb[7].mxu0  ;;  %v711_v37 = vsel %vm552_vm6, %v710_v30, -inf  ;;  %v600_v38 = vsel %vm552_vm6, %v599_v29, -inf }
 0x583   : > { %712 = vmax.xlane.f32.xlu1 %v711_v37  ;;  %601 = vmax.xlane.f32.xlu0 %v600_v38 }
 0x587   : > { %v822_v39 = vpop.f32.mrb[8].mxu0 }
 0x588   : > { %v828_v40 = vmul.f32 0.35355338, %v822_v39  ;;  %v1820_v41 = vpop.f32.mrb[9].mxu0 }
 0x589   : > { %v825_v42 = vpop.f32.mrb[10].mxu0 }
 0x58a   : > { %v1821_v43 = vpop.f32.mrb[11].mxu0  ;;  %v829_v44 = vsel %vm552_vm6, %v828_v40, -inf }
 0x58b   : > { %830 = vmax.xlane.f32.xlu0 %v829_v44 }
 0x58f   : > { %v939_v45 = vpop.f32.mrb[12].mxu0 }
 0x590   : > { %v945_v46 = vmul.f32 0.35355338, %v939_v45  ;;  %v1832_v47 = vpop.f32.mrb[13].mxu0 }
 0x591   : > { %v942_v48 = vpop.f32.mrb[14].mxu0 }
 0x592   : > { %v1833_v49 = vpop.f32.mrb[15].mxu0  ;;  %v946_v50 = vsel %vm552_vm6, %v945_v46, -inf }
 0x593   : > { %947 = vmax.xlane.f32.xlu0 %v946_v50 }
 0x597   : > { %v1056_v51 = vpop.f32.mrb[16].mxu0 }
 0x598   : > { %v1062_v52 = vmul.f32 0.35355338, %v1056_v51  ;;  %v1844_v53 = vpop.f32.mrb[17].mxu0 }
 0x599   : > { %v1059_v54 = vpop.f32.mrb[18].mxu0 }
 0x59a   : > { %v1845_v55 = vpop.f32.mrb[19].mxu0  ;;  %v1063_v56 = vsel %vm552_vm6, %v1062_v52, -inf }
 0x59b   : > { %1064 = vmax.xlane.f32.xlu1 %v1063_v56 }
 0x59f   : > { %v1173_v58 = vpop.f32.mrb[20].mxu0 }
 0x5a0   : > { %v1179_v59 = vmul.f32 0.35355338, %v1173_v58  ;;  %v1856_v60 = vpop.f32.mrb[21].mxu0 }
 0x5a1   : > { %v1176_v61 = vpop.f32.mrb[22].mxu0 }
 0x5a2   : > { %v1857_v62 = vpop.f32.mrb[23].mxu0  ;;  %v1180_v63 = vsel %vm552_vm6, %v1179_v59, -inf }
 0x5a3   : > { %1181 = vmax.xlane.f32.xlu0 %v1180_v63 }
 0x5a7   : > { %v1290_v1 = vpop.f32.mrb[24].mxu0 }
 0x5a8   : > { %v1296_v2 = vmul.f32 0.35355338, %v1290_v1  ;;  %v1868_v3 = vpop.f32.mrb[25].mxu0 }
 0x5a9   : > { %v1293_v4 = vpop.f32.mrb[26].mxu0 }
 0x5aa   : > { %v1869_v5 = vpop.f32.mrb[27].mxu0  ;;  %v1297_v7 = vsel %vm552_vm6, %v1296_v2, -inf }
 0x5ab   : > { %1298 = vmax.xlane.f32.xlu1 %v1297_v7 }
 0x5af   : > { %v1407_v8 = vpop.f32.mrb[28].mxu0 }
 0x5b0   : > { %v1413_v9 = vmul.f32 0.35355338, %v1407_v8  ;;  %v1880_v10 = vpop.f32.mrb[29].mxu0 }
 0x5b1   : > { %v1410_v11 = vpop.f32.mrb[30].mxu0 }
 0x5b2   : > { %v1881_v12 = vpop.f32.mrb[31].mxu0  ;;  %v1414_v13 = vsel %vm552_vm6, %v1413_v9, -inf }
 0x5b3   : > { %1415 = vmax.xlane.f32.xlu0 %v1414_v13 }
 0x5bc   : > { %841 = vrot.lane.b32.xlu1 %v2682_v6, %s2345_s11 }
 0x5c9   : > { %724 = vrot.lane.b32.xlu0 %v2682_v6, %s2343_s10 }
 0x610   : > { %v713_v14 = vpop.xlane.xlu1 %712  ;;  %v602_v15 = vpop.xlane.xlu0 %601 }
 0x611   : > { %v714_v16 = vsub.f32 %v710_v30, %v713_v14  ;;  %v603_v17 = vsub.f32 %v599_v29, %v602_v15 }
 0x613   : > { %v715_v18 = vmul.f32 1.442695, %v714_v16  ;;  %v604_v19 = vmul.f32 1.442695, %v603_v17 }
 0x615   : > { %2045 = vpow2.f32 %v715_v18 }
 0x616   : > { %2047 = vpow2.f32 %v604_v19 }
 0x618   : > { %v831_v20 = vpop.xlane.xlu0 %830 }
 0x619   : > { %v832_v21 = vsub.f32 %v828_v40, %v831_v20 }
 0x61b   : > { %v833_v22 = vmul.f32 1.442695, %v832_v21 }
 0x61d   : > { %2049 = vpow2.f32 %v833_v22 }
 0x61f   : > { %v2735_v23 = vpop.eup %2045 }
 0x620   : > { %v2048_v24 = vpop.eup %2047  ;;  %v948_v25 = vpop.xlane.xlu0 %947  ;;  %v717_v26 = vsel %vm552_vm6, %v2735_v23, 0.0 }
 0x621   : > { %v949_v27 = vsub.f32 %v945_v46, %v948_v25  ;;  %718 = vadd.xlane.f32.xlu0 %v717_v26  ;;  %v606_v28 = vsel %vm552_vm6, %v2048_v24, 0.0 }
 0x622   : > { %607 = vadd.xlane.f32.xlu1 %v606_v28 }
 0x623   : > { %v950_v29 = vmul.f32 1.442695, %v949_v27 }
 0x625   : > { %2051 = vpow2.f32 %v950_v29 }
 0x627   : > { %v2740_v30 = vpop.eup %2049 }
 0x628   : > { %v835_v31 = vsel %vm552_vm6, %v2740_v30, 0.0  ;;  %v1065_v34 = vpop.xlane.xlu1 %1064 }
 0x629   : > { %836 = vadd.xlane.f32.xlu1 %v835_v31  ;;  %v1066_v35 = vsub.f32 %v1062_v52, %v1065_v34 }
 0x62b   : > { %v1067_v37 = vmul.f32 1.442695, %v1066_v35 }
 0x62d   : > { %2053 = vpow2.f32 %v1067_v37 }
 0x62f   : > { %v2744_v32 = vpop.eup %2051 }
 0x630   : > { %v952_v33 = vsel %vm552_vm6, %v2744_v32, 0.0  ;;  %v1182_v36 = vpop.xlane.xlu0 %1181 }
 0x631   : > { %953 = vadd.xlane.f32.xlu0 %v952_v33  ;;  %v1183_v38 = vsub.f32 %v1179_v59, %v1182_v36 }
 0x633   : > { %v1184_v42 = vmul.f32 1.442695, %v1183_v38 }
 0x635   : > { %2055 = vpow2.f32 %v1184_v42 }
 0x637   : > { %v2752_v46 = vpop.eup %2053 }
 0x638   : > { %v1299_v39 = vpop.xlane.xlu1 %1298  ;;  %v1069_v47 = vsel %vm552_vm6, %v2752_v46, 0.0 }
 0x639   : > { %v1300_v41 = vsub.f32 %v1296_v2, %v1299_v39 }
 0x63a   : > { %958 = vrot.lane.b32.xlu1 %v2682_v6, %s2347_s16 }
 0x63b   : > { %v1301_v44 = vmul.f32 1.442695, %v1300_v41 }
 0x63c   : > { %v842_v54 = vpop.permute.xlu1 %841 }
 0x63d   : > { %2057 = vpow2.f32 %v1301_v44  ;;  %v847_v5 = vsel %vm615_vm7, %v842_v54, 0 }
 0x63f   : > { %v2756_v48 = vpop.eup %2055 }
 0x640   : > { %v1416_v40 = vpop.xlane.xlu0 %1415  ;;  %v1186_v50 = vsel %vm552_vm6, %v2756_v48, 0.0 }
 0x641   : > { %v1417_v43 = vsub.f32 %v1413_v9, %v1416_v40 }
 0x643   : > { %v1418_v45 = vmul.f32 1.442695, %v1417_v43 }
 0x644   : > { %v725_v55 = vpop.permute.xlu0 %724 }
 0x645   : > { %2059 = vpow2.f32 %v1418_v45  ;;  %v730_v1 = vsel %vm615_vm7, %v725_v55, 0 }
 0x647   : > { %1075 = vrot.lane.b32.xlu0 %v2682_v6, %s2337_s28  ;;  %v2758_v49 = vpop.eup %2057  ;;  %s2904_s28 = sshll.u32 %s2621_s15, 3 }
 0x648   : > { %v1303_v52 = vsel %vm552_vm6, %v2758_v49, 0.0 }
 0x64f   : > { %v2762_v51 = vpop.eup %2059 }
 0x650   : > { %v1420_v53 = vsel %vm552_vm6, %v2762_v51, 0.0 }
 0x65e   : > { %1070 = vadd.xlane.f32.xlu1 %v1069_v47 }
 0x662   : > { %1187 = vadd.xlane.f32.xlu1 %v1186_v50 }
 0x666   : > { %1304 = vadd.xlane.f32.xlu0 %v1303_v52  ;;  %1421 = vadd.xlane.f32.xlu1 %v1420_v53 }
 0x677   : > { %1192 = vrot.lane.b32.xlu1 %v2682_v6, %s2350_s12 }
 0x67c   : > { %1309 = vrot.lane.b32.xlu0 %v2682_v6, %s2352_s20 }
 0x680   : > { %1426 = vrot.lane.b32.xlu0 %v2682_v6, %s2354_s30  ;;  %s1752_s30 = sshll.u32 %s2412_s27, 7  ;;  %s1568_s27 = scalar_lea.sflag [#allocation5], %s2621_s15 }
 0x6ae   : > { %v719_v58 = vpop.xlane.xlu0 %718 }
 0x6af   : > { %v608_v56 = vpop.xlane.xlu1 %607 }
 0x6b0   : > { %2061 = vrcp.f32 %v608_v56 }
 0x6b1   : > { %2063 = vrcp.f32 %v719_v58 }
 0x6b6   : > { %v837_v59 = vpop.xlane.xlu1 %836 }
 0x6b7   : > { %2065 = vrcp.f32 %v837_v59  ;;  %v2033_v59 = vld [vmem:[#allocation11] sm:$0xff]  }
 0x6b8   : > { %1889 = vmatpush3.bf16.msra.mxu0 %v2033_v59 }
 0x6b9   : > { %1890 = vmatprep.subr.bf16.mxu0 %v2339_v57 }
 0x6ba   : > { %v2062_v60 = vpop.eup %2061  ;;  %v959_v8 = vpop.permute.xlu1 %958 }
 0x6bb   : > { %v610_v61 = vmul.f32 %v2062_v60, %v2048_v24  ;;  %v2064_v63 = vpop.eup %2063  ;;  %v964_v11 = vsel %vm615_vm7, %v959_v8, 0  ;;  %v2034_v60 = vld [vmem:[#allocation11 + $0x8] sm:$0xff]  }
 0x6bc   : > { %v721_v6 = vmul.f32 %v2064_v63, %v2735_v23  ;;  %1891 = vmatpush3.bf16.msra.mxu0 %v2034_v60 }
 0x6bd   : > { %v611_v62 = vpack.c.bf16 %v610_v61, %v610_v61  ;;  %1892 = vmatprep.subr.bf16.mxu0 %v2339_v57 }
 0x6be   : > { %v954_v2 = vpop.xlane.xlu0 %953  ;;  %v722_v3 = vpack.c.bf16 %v721_v6, %v721_v6  ;;  %v2035_v6 = vld [vmem:[#allocation11 + $0x10] sm:$0xff]  }
 0x6bf   : > { %1801 = vmatmul.mubr.msk.bf16.vlgmr.msra.gmra.mrb[8].mxu1 %vm552_vm6, %v611_v62  ;;  %2067 = vrcp.f32 %v954_v2  ;;  %v2036_v2 = vld [vmem:[#allocation11 + $0x18] sm:$0xff]  }
 0x6c0   : > { %1811 = vmatpush3.bf16.msra.mxu1 %v730_v1  ;;  %1812 = vmatprep.mubr.msk.bf16.mxu1 %vm2340_vm5, %v2339_v57 }
 0x6c1   : > { %1822 = vmatprep.subr.bf16.mxu1 %v2339_v57  ;;  %v2066_v4 = vpop.eup %2065  ;;  %1893 = vmatpush3.bf16.msra.mxu0 %v2035_v6 }
 0x6c2   : > { %v839_v7 = vmul.f32 %v2066_v4, %v2740_v30  ;;  %v1076_v13 = vpop.permute.xlu0 %1075  ;;  %1894 = vmatprep.subr.bf16.mxu0 %v2339_v57 }
 0x6c3   : > { %v1081_v15 = vsel %vm615_vm7, %v1076_v13, 0 }
 0x6c4   : > { %v840_v9 = vpack.c.bf16 %v839_v7, %v839_v7 }
 0x6c5   : > { %1895 = vmatpush3.bf16.msra.mxu0 %v2036_v2 }
 0x6c7   : > { %1813 = vmatmul.mubr.msk.bf16.vlgmr.msra.gmra.mrb[12].mxu1 %vm552_vm6, %v722_v3 }
 0x6c8   : > { %1823 = vmatpush3.bf16.msra.mxu1 %v847_v5  ;;  %1824 = vmatprep.mubr.msk.bf16.mxu1 %vm2340_vm5, %v2339_v57 }
 0x6c9   : > { %1834 = vmatprep.subr.bf16.mxu1 %v2339_v57  ;;  %v2068_v10 = vpop.eup %2067 }
 0x6ca   : > { %v956_v12 = vmul.f32 %v2068_v10, %v2744_v32 }
 0x6cc   : > { %v957_v14 = vpack.c.bf16 %v956_v12, %v956_v12 }
 0x6cf   : > { %1825 = vmatmul.mubr.msk.bf16.vlgmr.msra.gmra.mrb[16].mxu1 %vm552_vm6, %v840_v9 }
 0x6d0   : > { %1835 = vmatpush3.bf16.msra.mxu1 %v964_v11  ;;  %1836 = vmatprep.mubr.msk.bf16.mxu1 %vm2340_vm5, %v2339_v57 }
 0x6d1   : > { %1846 = vmatprep.subr.bf16.mxu1 %v2339_v57 }
 0x6d7   : > { %1837 = vmatmul.mubr.msk.bf16.vlgmr.msra.gmra.mrb[20].mxu1 %vm552_vm6, %v957_v14 }
 0x6d8   : > { %1847 = vmatpush3.bf16.msra.mxu1 %v1081_v15  ;;  %1848 = vmatprep.mubr.msk.bf16.mxu1 %vm2340_vm5, %v2339_v57 }
 0x6d9   : > { %1858 = vmatprep.subr.bf16.mxu1 %v2339_v57 }
 0x6eb   : > { %v1071_v16 = vpop.xlane.xlu1 %1070 }
 0x6ec   : > { %2069 = vrcp.f32 %v1071_v16 }
 0x6ef   : > { %v1188_v17 = vpop.xlane.xlu1 %1187 }
 0x6f0   : > { %2071 = vrcp.f32 %v1188_v17 }
 0x6f3   : > { %v1422_v18 = vpop.xlane.xlu1 %1421  ;;  %v1305_v19 = vpop.xlane.xlu0 %1304 }
 0x6f4   : > { %2073 = vrcp.f32 %v1305_v19 }
 0x6f5   : > { %2075 = vrcp.f32 %v1422_v18 }
 0x6f6   : > { %v2070_v20 = vpop.eup %2069 }
 0x6f7   : > { %v1073_v21 = vmul.f32 %v2070_v20, %v2752_v46  ;;  %v1193_v22 = vpop.permute.xlu1 %1192  ;;  %v1310_v27 = vpop.permute.xlu0 %1309  ;;  %v1745_v20 = vld [vmem:[#allocation12] ss:$0 sm:$0xff] }
 0x6f8   : > { %v1198_v25 = vsel %vm615_vm7, %v1193_v22, 0  ;;  %v1315_v30 = vsel %vm615_vm7, %v1310_v27, 0 }
 0x6f9   : > { %v1074_v23 = vpack.c.bf16 %v1073_v21, %v1073_v21 }
 0x6fa   : > { %v2072_v24 = vpop.eup %2071 }
 0x6fb   : > { %1849 = vmatmul.mubr.msk.bf16.vlgmr.msra.gmra.mrb[24].mxu1 %vm552_vm6, %v1074_v23  ;;  %v1190_v26 = vmul.f32 %v2072_v24, %v2756_v48  ;;  %v1427_v32 = vpop.permute.xlu0 %1426 }
 0x6fc   : > { %1859 = vmatpush3.bf16.msra.mxu1 %v1198_v25  ;;  %1860 = vmatprep.mubr.msk.bf16.mxu1 %vm2340_vm5, %v2339_v57  ;;  %v1432_v35 = vsel %vm615_vm7, %v1427_v32, 0 }
 0x6fd   : > { %1870 = vmatprep.subr.bf16.mxu1 %v2339_v57  ;;  %v1191_v28 = vpack.c.bf16 %v1190_v26, %v1190_v26 }
 0x6fe   : > { %v2074_v29 = vpop.eup %2073 }
 0x6ff   : > { %v1307_v31 = vmul.f32 %v2074_v29, %v2758_v49  ;;  %v2076_v34 = vpop.eup %2075 }
 0x700   : > { %v1424_v36 = vmul.f32 %v2076_v34, %v2762_v51 }
 0x701   : > { %v1308_v33 = vpack.c.bf16 %v1307_v31, %v1307_v31 }
 0x702   : > { %v1425_v37 = vpack.c.bf16 %v1424_v36, %v1424_v36 }
 0x703   : > { %1861 = vmatmul.mubr.msk.bf16.vlgmr.msra.gmra.mrb[28].mxu1 %vm552_vm6, %v1191_v28 }
 0x704   : > { %1871 = vmatpush3.bf16.msra.mxu1 %v1315_v30  ;;  %1872 = vmatprep.mubr.msk.bf16.mxu1 %vm2340_vm5, %v2339_v57 }
 0x705   : > { %1882 = vmatprep.subr.bf16.mxu1 %v2339_v57 }
 0x70b   : > { %1873 = vmatmul.mubr.msk.bf16.vlgmr.msra.gmra.mrb[32].mxu1 %vm552_vm6, %v1308_v33 }
 0x70c   : > { %1883 = vmatpush3.bf16.msra.mxu1 %v1432_v35  ;;  %1884 = vmatprep.mubr.msk.bf16.mxu1 %vm2340_vm5, %v2339_v57 }
 0x713   : > { %1885 = vmatmul.mubr.msk.bf16.vlgmr.msra.gmra.mrb[36].mxu1 %vm552_vm6, %v1425_v37 }
 0x792   : > { %v653_v38 = vpop.f32.mrb[8].mxu1 }
 0x793   : > { %659 = vst.msk [vmem:[#allocation2] sm:$0xff] %vm552_vm6, %v653_v38  ;;  %v1802_v39 = vpop.f32.mrb[9].mxu1 }
 0x794   : > { %v656_v40 = vpop.f32.mrb[10].mxu1 }
 0x795   : > { %v1803_v41 = vpop.f32.mrb[11].mxu1 }
 0x79a   : > { %v766_v42 = vpop.f32.mrb[12].mxu1 }
 0x79b   : > { %773 = vrot.lane.b32.xlu1 %v766_v42, %s2353_s8  ;;  %v1814_v43 = vpop.f32.mrb[13].mxu1 }
 0x79c   : > { %v769_v44 = vpop.f32.mrb[14].mxu1 }
 0x79d   : > { %v1815_v45 = vpop.f32.mrb[15].mxu1 }
 0x7a2   : > { %v883_v46 = vpop.f32.mrb[16].mxu1 }
 0x7a3   : > { %890 = vrot.lane.b32.xlu0 %v883_v46, %s2351_s19  ;;  %v1826_v47 = vpop.f32.mrb[17].mxu1 }
 0x7a4   : > { %v886_v48 = vpop.f32.mrb[18].mxu1 }
 0x7a5   : > { %v1827_v49 = vpop.f32.mrb[19].mxu1 }
 0x7aa   : > { %v1000_v50 = vpop.f32.mrb[20].mxu1 }
 0x7ab   : > { %1007 = vrot.lane.b32.xlu1 %v1000_v50, %s2349_s17  ;;  %v1838_v51 = vpop.f32.mrb[21].mxu1 }
 0x7ac   : > { %v1003_v52 = vpop.f32.mrb[22].mxu1 }
 0x7ad   : > { %v1839_v53 = vpop.f32.mrb[23].mxu1 }
 0x7ce   : > { %v1117_v54 = vpop.f32.mrb[24].mxu1 }
 0x7cf   : > { %1124 = vrot.lane.b32.xlu0 %v1117_v54, %s2348_s29  ;;  %v1850_v55 = vpop.f32.mrb[25].mxu1  ;;  %s2355_s29 = smov [#allocation14]  }
 0x7d0   : > { %v1120_v56 = vpop.f32.mrb[26].mxu1  ;;  %s2251_s17 = sshll.u32 %s2355_s29, 4  ;;  %s2252_s17 = int_to_ptr.vmem [resolvable:$false] %s2251_s17 }
 0x7d1   : > { %v1851_v58 = vpop.f32.mrb[27].mxu1  ;;  %s2253_s12 = scalar_lea.vmem %s2252_s17, 256 }
 0x7d6   : > { %v1234_v61 = vpop.f32.mrb[28].mxu1 }
 0x7d7   : > { %1241 = vrot.lane.b32.xlu1 %v1234_v61, %s2346_s25  ;;  %v1862_v62 = vpop.f32.mrb[29].mxu1  ;;  %s2834_s25 = scalar_lea.hbm %s2884_s6, %s1752_s30 }
 0x7d8   : > { %v1237_v63 = vpop.f32.mrb[30].mxu1 }
 0x7d9   : > { %v1863_v1 = vpop.f32.mrb[31].mxu1 }
 0x7de   : > { %v1351_v3 = vpop.f32.mrb[32].mxu1 }
 0x7df   : > { %1358 = vrot.lane.b32.xlu0 %v1351_v3, %s2344_s9  ;;  %v1874_v4 = vpop.f32.mrb[33].mxu1 }
 0x7e0   : > { %v1354_v5 = vpop.f32.mrb[34].mxu1 }
 0x7e1   : > { %v1875_v7 = vpop.f32.mrb[35].mxu1 }
 0x7e6   : > { %v1468_v8 = vpop.f32.mrb[36].mxu1 }
 0x7e7   : > { %1475 = vrot.lane.b32.xlu1 %v1468_v8, %s2341_s14  ;;  %v1886_v9 = vpop.f32.mrb[37].mxu1  ;;  %s333_s14 = scalar_lea.vmem [#allocation14], %s2904_s28 }
 0x7e8   : > { %v1471_v10 = vpop.f32.mrb[38].mxu1  ;;  %s1581_s10 = sshll.u32 %s333_s14, 4  ;;  %s2836_s10 = int_to_ptr.vmem [resolvable:$true] %s1581_s10 }
 0x7e9   : > { %v1887_v11 = vpop.f32.mrb[39].mxu1  ;;  %s2247_s16 = scalar_lea.vmem %s2836_s10, 128  ;;  %p2254_p13 = scmp.lt.s32.totalorder %s2836_s10, %s2252_s17 }
 0x7ea   : > { %p2248_p7 = scmp.ne.s32.totalorder %s2836_s10, %s2247_s16  ;;  %p2255_p0 = scmp.lt.s32.totalorder %s2253_s12, %s2247_s16 }
 0x7ec   : > { %p2249_p4 = pnand %p2248_p7, %p2905_p10  ;;  %p2256_p2 = por %p2255_p0, %p2254_p13 }
 0x7ee   : > { %p2250_p1 = pneg %p2249_p4 }
 0x7f0   : > { %p2257_p3 = pnand %p2256_p2, %p2250_p1 }
 0x80d   : > { %v774_v12 = vpop.permute.xlu1 %773 }
 0x80e   : > { %777 = vst.msk [vmem:[#allocation2] sm:$0xff] %vm776_vm8, %v774_v12 }
 0x815   : > { %v891_v13 = vpop.permute.xlu0 %890 }
 0x816   : > { %894 = vst.msk [vmem:[#allocation2] sm:$0xff] %vm893_vm9, %v891_v13 }
 0x81d   : > { %v1008_v57 = vpop.permute.xlu1 %1007 }
 0x81e   : > { %1011 = vst.msk [vmem:[#allocation2] sm:$0xff] %vm1010_vm10, %v1008_v57 }
 0x841   : > { %v1125_v14 = vpop.permute.xlu0 %1124 }
 0x842   : > { %1128 = vst.msk [vmem:[#allocation2] sm:$0xff] %vm1127_vm11, %v1125_v14 }
 0x849   : > { %v1242_v15 = vpop.permute.xlu1 %1241 }
 0x84a   : > { %1245 = vst.msk [vmem:[#allocation2] sm:$0xff] %vm1244_vm12, %v1242_v15 }
 0x851   : > { %v1359_v16 = vpop.permute.xlu0 %1358 }
 0x852   : > { %1362 = vst.msk [vmem:[#allocation2] sm:$0xff] %vm1361_vm13, %v1359_v16 }
 0x859   : > { %v1476_v17 = vpop.permute.xlu1 %1475 }
 0x85a   : > { %1479 = vst.msk [vmem:[#allocation2] sm:$0xff] %vm1478_vm14, %v1476_v17 }
 0x861   : > { %v1480_v18 = vld [vmem:[#allocation2] sm:$0xff] }
 0x862   : > { %v1481_v19 = vpack.c.bf16 %v1480_v18, %v1480_v18 }
 0x864   : > { %1897 = vmatmul.mubr.msk.bf16.vlgmr.msra.gmra.mrb[32].mxu0 %vm1521_vm15, %v1481_v19 }
 0x937   : > { %v1559_v21 = vpop.f32.mrb[32].mxu0 }
 0x938   : > { %v1560_v22 = vadd.f32 %v1745_v20, %v1559_v21  ;;  %v1898_v23 = vpop.f32.mrb[33].mxu0 }
 0x939   : > { %v1562_v24 = vpop.f32.mrb[34].mxu0 }
 0x93a   : > { %v1565_v25 = vadd.f32 %v1560_v22, %v2643_v0  ;;  %v1899_v26 = vpop.f32.mrb[35].mxu0 }
 0x93c   : > { %1566 = vst.msk [vmem:[%s333_s14] sm:$0xff] %vm1521_vm15, %v1565_v25 }
 0x93d   : > { %2260 = shalt.err (!%p2257_p3)
}
 0x93e   : > { %s2261_s15 = scalar_lea.hbm %s2834_s25, 128  ;;  %s2265_s8 = scalar_lea.hbm %s2884_s6, 256 }
 0x93f   : > { %p2262_p6 = scmp.ne.s32.totalorder %s2834_s25, %s2261_s15  ;;  %p2266_p8 = scmp.lt.u32.totalorder %s2834_s25, %s2884_s6 }
 0x940   : > { %p2267_p5 = scmp.lt.u32.totalorder %s2265_s8, %s2261_s15  ;;  %p2269_p7 = scmp.lt.u32.totalorder %s2261_s15, %s2834_s25 }
 0x941   : > { %p2263_p11 = pnand %p2262_p6, %p2905_p10 }
 0x942   : > { %p2268_p9 = por %p2267_p5, %p2266_p8 }
 0x943   : > { %p2264_p12 = pneg %p2263_p11 }
 0x944   : > { %p2270_p4 = por %p2269_p7, %p2268_p9 }
 0x946   : > { %p2271_p1 = pnand %p2270_p4, %p2264_p12 }
 0x948   : > { %2274 = shalt.err (!%p2271_p1)
}
 0x949   : > { %1924 = dma.vmem_to_hbm [thread:$0]  (%p2905_p10), %s2836_s10, 128, %s2834_s25, %s1568_s27  }
 0x94a PF: > { %s1593_s14 = sand.u32 1, %s2313_s21   ;;  %p2906_p13 = scmp.ne.s32.totalorder %s2895_s18, 0 }
 0x94b   : > { %p2907_p0 = scmp.ge.s32.totalorder %s2325_s24, 2  ;;  %s1594_s9 = scalar_lea.sflag [#allocation5], %s1593_s14 }
 0x94d   : > { %p1947_p2 = pnand %p2907_p0, %p2906_p13 }
 0x94f   : > { %2308 = dma.done.wait (!%p1947_p2), %s1594_s9, 128  }
 0x950   : > { %2310 = vsyncadd (!%p1947_p2), %s1594_s9, 4294967168  ;;  %p22_p3 = scmp.ge.s32.totalorder %s2551_s7, 4   ;;  %s2908_s21 = smov %s2317_s22 }
 0x951   : > { %s2909_s22 = smov %s2321_s23  ;;  %s2910_s23 = smov %s2563_s13 }
 0x952   : > { %s2911_s24 = smov %s2551_s7  ;;  %24 = sbr.rel (!%p22_p3) target bundleno = 8 (0x8), region = 109 }
 0x959   :  { %1599 = vsyncpa [#allocation4], 1 }
 0x95a   :  { %1601 = vsyncpa [#allocation4 + $0x1], 1 }
 0x95b   :  { %1602 = vsyncpa [#allocation7], 1 }
 0x95c   :  { %1603 = vsyncpa [#allocation10], 1 }
 0x95d   :  { %1604 = vsyncpa [#allocation13], 1 }
 0x95e   :  { %1605 = vsyncpa [#allocation5], 1 }
 0x95f   :  { %1607 = vsyncpa [#allocation5 + $0x1], 1 }

</bundles_post_ra>
